<compile_context>
chip_gen: v6e
topology: v6e:2x2x1
jax: 0.10.0
libtpu: 0.0.40
codegen_flags: <defaults>
</compile_context>

<pallas_src>
import functools

import jax
import jax.numpy as jnp
from jax.experimental import pallas as pl
from jax.experimental.pallas import tpu as pltpu

LEAKY_SLOPE = 0.2
BN_EPS = 1e-5

# Static per-layer configuration (kernel geometry / activation / BN flags).
LAYER_CFG = {
    "c0_0": dict(kh=4, kw=4, stride=2, pad=1, cout=32,  act=True,  bn=False),
    "c0_1": dict(kh=4, kw=4, stride=2, pad=1, cout=32,  act=True,  bn=False),
    "c1":   dict(kh=4, kw=4, stride=2, pad=1, cout=128, act=True,  bn=True),
    "c2":   dict(kh=4, kw=4, stride=2, pad=1, cout=256, act=True,  bn=True),
    "c3":   dict(kh=4, kw=4, stride=2, pad=1, cout=512, act=True,  bn=True),
    "c4":   dict(kh=3, kw=3, stride=1, pad=1, cout=1,   act=False, bn=False),
}


def _round_up(x, m):
    return (x + m - 1) // m * m


# ---------------------------------------------------------------------------
# Fused conv (+ bias + BatchNorm + LeakyReLU) Pallas kernel
# ---------------------------------------------------------------------------
def _fused_conv_kernel(*refs, m_valid, tm, act, use_bn):
    """Grid = (Np//TN [parallel], Mp//TM [arbitrary]).

    The output BlockSpec is the full (Mp, TN) column slab (index depends only
    on the column tile), so it stays resident in VMEM across the row sweep.
    Each row step computes a (TM, TN) matmul tile; for BN layers the last row
    step reduces batch statistics over the resident slab and applies the
    affine + activation in place before the single HBM writeback.
    """
    if use_bn:
        x_ref, w_ref, b_ref, g_ref, bt_ref, o_ref = refs
    else:
        x_ref, w_ref, b_ref, o_ref = refs

    i = pl.program_id(1)
    row0 = pl.multiple_of(i * tm, tm)

    # bf16 x bf16 -> f32 on the MXU, fused bias add.
    y = jnp.dot(x_ref[...], w_ref[...], preferred_element_type=jnp.float32)
    y = y + b_ref[...]

    if not use_bn:
        if act:
            y = jnp.maximum(y, LEAKY_SLOPE * y)      # LeakyReLU(0.2)
        o_ref[pl.ds(row0, tm), :] = y
        return

    # BN path: stash raw conv output into the resident column slab.
    o_ref[pl.ds(row0, tm), :] = y

    @pl.when(i == pl.num_programs(1) - 1)
    def _():
        y_all = o_ref[...]                           # (Mp, TN) f32, in VMEM
        rows = jax.lax.broadcasted_iota(jnp.int32, y_all.shape, 0)
        valid = rows < m_valid                       # mask padded rows
        inv_m = jnp.float32(1.0 / m_valid)
        # Two-pass (mean, then centered sum of squares): no catastrophic
        # cancellation, matches PyTorch training-mode biased variance.
        mean = jnp.sum(jnp.where(valid, y_all, 0.0), axis=0, keepdims=True) * inv_m
        diff = jnp.where(valid, y_all - mean, 0.0)
        var = jnp.sum(diff * diff, axis=0, keepdims=True) * inv_m
        scale = g_ref[...] * jax.lax.rsqrt(var + BN_EPS)
        shift = bt_ref[...] - mean * scale
        h = y_all * scale + shift
        if act:
            h = jnp.maximum(h, LEAKY_SLOPE * h)
        o_ref[...] = h


# ---------------------------------------------------------------------------
# JAX glue: im2col, per-layer driver
# ---------------------------------------------------------------------------
def _im2col(x, kh, kw, stride, pad):
    # x: (N, H, W, C) -> patches: (N*Ho*Wo, kh*kw*C)  [index order: kh, kw, ci]
    # TODO(synk): patch gather could be moved inside the matmul kernel
    # (kh*kw shifted dots) to avoid materializing the im2col slab in HBM.
    N, H, W, C = x.shape
    xp = jnp.pad(x, ((0, 0), (pad, pad), (pad, pad), (0, 0)))
    Ho = (H + 2 * pad - kh) // stride + 1
    Wo = (W + 2 * pad - kw) // stride + 1
    cols = [xp[:, i:i + stride * Ho:stride, j:j + stride * Wo:stride, :]
            for i in range(kh) for j in range(kw)]
    patches = jnp.concatenate(cols, axis=-1)         # (N, Ho, Wo, kh*kw*C)
    return patches.reshape(N * Ho * Wo, kh * kw * C), Ho, Wo


def conv_layer(x, p, cfg):
    """x: (N,H,W,Cin) NHWC; p: prepared params {w:(Kp,Np) bf16, b/g/bt:(1,Np) f32}."""
    N = x.shape[0]
    patches, Ho, Wo = _im2col(x, cfg["kh"], cfg["kw"], cfg["stride"], cfg["pad"])
    M, K = patches.shape
    Kp, Np = p["w"].shape

    # Row tiling: full M when small (single MXU pass), else 256-row tiles.
    TM = _round_up(M, 8) if M <= 512 else 256
    Mp = _round_up(M, TM)
    # 256-lane output tiles when Cout allows it (fills v6e/v7x MXU, and gives
    # c3 two parallel grid steps for the second TensorCore on v7x).
    TN = 256 if Np % 256 == 0 else 128

    patches = jnp.pad(patches, ((0, Mp - M), (0, Kp - K))).astype(jnp.bfloat16)

    use_bn = cfg["bn"]
    col_spec = pl.BlockSpec((1, TN), lambda j, i: (0, j))
    in_specs = [pl.BlockSpec((TM, Kp), lambda j, i: (i, 0)),   # patches row tile
                pl.BlockSpec((Kp, TN), lambda j, i: (0, j)),   # weight (resident over i)
                col_spec]                                      # bias
    operands = [patches, p["w"], p["b"]]
    if use_bn:
        in_specs += [col_spec, col_spec]
        operands += [p["g"], p["bt"]]

    y = pl.pallas_call(
        functools.partial(_fused_conv_kernel, m_valid=M, tm=TM,
                          act=cfg["act"], use_bn=use_bn),
        out_shape=jax.ShapeDtypeStruct((Mp, Np), jnp.float32),
        grid_spec=pltpu.PrefetchScalarGridSpec(
            num_scalar_prefetch=0,
            grid=(Np // TN, Mp // TM),
            in_specs=in_specs,
            out_specs=pl.BlockSpec((Mp, TN), lambda j, i: (0, j))),
        compiler_params=pltpu.CompilerParams(
            dimension_semantics=("parallel", "arbitrary")),
    )(*operands)

    return y[:M, :cfg["cout"]].reshape(N, Ho, Wo, cfg["cout"])


# ---------------------------------------------------------------------------
# Parameters: deterministic init (matching weights_init statistics) in PyTorch
# layout, then one-time preparation into padded bf16 matmul slabs.
# ---------------------------------------------------------------------------
def init_params(key, in_ch, out_ch):
    keys = iter(jax.random.split(key, 16))

    def conv(co, ci, kh, kw):
        w = 0.02 * jax.random.normal(next(keys), (co, ci, kh, kw), jnp.float32)
        bound = 1.0 / float(ci * kh * kw) ** 0.5
        b = jax.random.uniform(next(keys), (co,), jnp.float32, -bound, bound)
        return {"w": w, "b": b}

    def bn(c):
        return {"g": 1.0 + 0.02 * jax.random.normal(next(keys), (c,), jnp.float32),
                "bt": jnp.zeros((c,), jnp.float32)}

    return {
        "c0_0": conv(32, in_ch, 4, 4),
        "c0_1": conv(32, out_ch, 4, 4),
        "c1": {**conv(128, 64, 4, 4), **bn(128)},
        "c2": {**conv(256, 128, 4, 4), **bn(256)},
        "c3": {**conv(512, 256, 4, 4), **bn(512)},
        "c4": conv(1, 512, 3, 3),
    }


def prepare_params(raw):
    """One-time weight re-layout + padding (hoisted out of the forward)."""
    prep = {}
    for name, cfg in LAYER_CFG.items():
        w = raw[name]["w"]                                  # (co, ci, kh, kw)
        co, ci, kh, kw = w.shape
        K = kh * kw * ci
        Kp, Np = _round_up(K, 128), _round_up(co, 128)
        wmat = jnp.transpose(w, (2, 3, 1, 0)).reshape(K, co)   # (kh,kw,ci) x co
        wmat = jnp.pad(wmat, ((0, Kp - K), (0, Np - co))).astype(jnp.bfloat16)
        entry = {
            "w": wmat,
            "b": jnp.pad(raw[name]["b"].reshape(1, co), ((0, 0), (0, Np - co))),
        }
        if cfg["bn"]:
            entry["g"] = jnp.pad(raw[name]["g"].reshape(1, co), ((0, 0), (0, Np - co)))
            entry["bt"] = jnp.pad(raw[name]["bt"].reshape(1, co), ((0, 0), (0, Np - co)))
        prep[name] = entry
    return prep


# ---------------------------------------------------------------------------
# Discriminator forward (matches _Discriminator.forward), jitted.
# ---------------------------------------------------------------------------
@functools.partial(jax.jit, static_argnums=(2,))
def discriminator_forward(x_nchw, params, in_ch):
    x = jnp.transpose(x_nchw, (0, 2, 3, 1)).astype(jnp.float32)   # NCHW -> NHWC
    h0 = conv_layer(x[..., :in_ch], params["c0_0"], LAYER_CFG["c0_0"])
    h1 = conv_layer(x[..., in_ch:], params["c0_1"], LAYER_CFG["c0_1"])
    h = jnp.concatenate([h0, h1], axis=-1)                        # cat on channels
    for name in ("c1", "c2", "c3", "c4"):
        h = conv_layer(h, params[name], LAYER_CFG[name])
    return jnp.transpose(h, (0, 3, 1, 2))                         # NHWC -> NCHW


if __name__ == "__main__":
    key = jax.random.PRNGKey(0)
    in_ch, out_ch = 3, 3
    N, H, W = 2, 32, 32

    k_x, k_p = jax.random.split(key)
    x = jax.random.normal(k_x, (N, in_ch + out_ch, H, W), jnp.float32)
    params = prepare_params(init_params(k_p, in_ch, out_ch))

    out = discriminator_forward(x, params, in_ch)
    out = jax.block_until_ready(out)

    assert out.shape == (N, 1, H // 16, W // 16), out.shape
    assert bool(jnp.all(jnp.isfinite(out)))
    print("KERNEL_OK")
</pallas_src>

<mosaic_0001>
module attributes {stable_mosaic.version = 11 : i64} {
  func.func @_fused_conv_kernel(%arg0: i32, %arg1: i32, %arg2: memref<512x128xbf16, #tpu.memory_space<vmem>>, %arg3: memref<128x128xbf16, #tpu.memory_space<vmem>>, %arg4: memref<1x128xf32, #tpu.memory_space<vmem>>, %arg5: memref<512x128xf32, #tpu.memory_space<vmem>>) attributes {dimension_semantics = [#tpu.dimension_semantics<parallel>, #tpu.dimension_semantics<arbitrary>], iteration_bounds = array<i64: 1, 1>, scalar_prefetch = 0 : i64, scratch_operands = 0 : i64, tpu.core_type = #tpu.core_type<tc>, window_params = [{transform_indices = @transform_0, window_bounds = array<i64: 512, 128>}, {transform_indices = @transform_1, window_bounds = array<i64: 128, 128>}, {transform_indices = @transform_2, window_bounds = array<i64: 1, 128>}, {transform_indices = @transform_3, window_bounds = array<i64: 512, 128>}]} {
    %c512_i32 = arith.constant 512 : i32
    %0 = arith.muli %arg1, %c512_i32 : i32
    %1 = tpu.assume_multiple %0, 512 : i32
    %c0 = arith.constant 0 : index
    %c0_0 = arith.constant 0 : index
    %2 = vector.load %arg2[%c0, %c0_0] : memref<512x128xbf16, #tpu.memory_space<vmem>>, vector<512x128xbf16>
    %c0_1 = arith.constant 0 : index
    %c0_2 = arith.constant 0 : index
    %3 = vector.load %arg3[%c0_1, %c0_2] : memref<128x128xbf16, #tpu.memory_space<vmem>>, vector<128x128xbf16>
    %cst = arith.constant dense<0.000000e+00> : vector<512x128xf32>
    %4 = tpu.matmul %2, %3, %cst {dimension_numbers = #tpu.dot_dimension_numbers<[1], [0], [0], [1], [0, 0, 1, 1], [], []>} : vector<512x128xbf16>, vector<128x128xbf16>, vector<512x128xf32> -> vector<512x128xf32>
    %c0_3 = arith.constant 0 : index
    %c0_4 = arith.constant 0 : index
    %5 = vector.load %arg4[%c0_3, %c0_4] : memref<1x128xf32, #tpu.memory_space<vmem>>, vector<1x128xf32>
    %6 = vector.broadcast %5 : vector<1x128xf32> to vector<512x128xf32>
    %7 = arith.addf %4, %6 : vector<512x128xf32>
    %cst_5 = arith.constant 2.000000e-01 : f32
    %8 = vector.broadcast %cst_5 : f32 to vector<512x128xf32>
    %9 = arith.mulf %8, %7 : vector<512x128xf32>
    %10 = arith.maximumf %7, %9 : vector<512x128xf32>
    %11 = arith.index_cast %1 : i32 to index
    %c0_6 = arith.constant 0 : index
    %12 = vector.load %arg5[%11, %c0_6] : memref<512x128xf32, #tpu.memory_space<vmem>>, vector<512x128xf32>
    tpu.vector_store %arg5[%11, %c0_6], %10 {strides = array<i32>} : memref<512x128xf32, #tpu.memory_space<vmem>>, vector<512x128xf32>,
    return
  }
  func.func @transform_0(%arg0: i32, %arg1: i32) -> (i32, i32) {
    %c0_i32 = arith.constant 0 : i32
    %c0_i32_0 = arith.constant 0 : i32
    return %arg1, %c0_i32 : i32, i32
  }
  func.func @transform_1(%arg0: i32, %arg1: i32) -> (i32, i32) {
    %c0_i32 = arith.constant 0 : i32
    %c0_i32_0 = arith.constant 0 : i32
    return %c0_i32, %arg0 : i32, i32
  }
  func.func @transform_2(%arg0: i32, %arg1: i32) -> (i32, i32) {
    %c0_i32 = arith.constant 0 : i32
    %c0_i32_0 = arith.constant 0 : i32
    return %c0_i32, %arg0 : i32, i32
  }
  func.func @transform_3(%arg0: i32, %arg1: i32) -> (i32, i32) {
    %c0_i32 = arith.constant 0 : i32
    %c0_i32_0 = arith.constant 0 : i32
    return %c0_i32, %arg0 : i32, i32
  }
}

module attributes {stable_mosaic.version = 11 : i64} {
  func.func @_fused_conv_kernel(%arg0: i32, %arg1: i32, %arg2: memref<128x1024xbf16, #tpu.memory_space<vmem>>, %arg3: memref<1024x128xbf16, #tpu.memory_space<vmem>>, %arg4: memref<1x128xf32, #tpu.memory_space<vmem>>, %arg5: memref<1x128xf32, #tpu.memory_space<vmem>>, %arg6: memref<1x128xf32, #tpu.memory_space<vmem>>, %arg7: memref<128x128xf32, #tpu.memory_space<vmem>>) attributes {dimension_semantics = [#tpu.dimension_semantics<parallel>, #tpu.dimension_semantics<arbitrary>], iteration_bounds = array<i64: 1, 1>, scalar_prefetch = 0 : i64, scratch_operands = 0 : i64, tpu.core_type = #tpu.core_type<tc>, window_params = [{transform_indices = @transform_0, window_bounds = array<i64: 128, 1024>}, {transform_indices = @transform_1, window_bounds = array<i64: 1024, 128>}, {transform_indices = @transform_2, window_bounds = array<i64: 1, 128>}, {transform_indices = @transform_3, window_bounds = array<i64: 1, 128>}, {transform_indices = @transform_4, window_bounds = array<i64: 1, 128>}, {transform_indices = @transform_5, window_bounds = array<i64: 128, 128>}]} {
    %c128_i32 = arith.constant 128 : i32
    %0 = arith.muli %arg1, %c128_i32 : i32
    %1 = tpu.assume_multiple %0, 128 : i32
    %c0 = arith.constant 0 : index
    %c0_0 = arith.constant 0 : index
    %2 = vector.load %arg2[%c0, %c0_0] : memref<128x1024xbf16, #tpu.memory_space<vmem>>, vector<128x1024xbf16>
    %c0_1 = arith.constant 0 : index
    %c0_2 = arith.constant 0 : index
    %3 = vector.load %arg3[%c0_1, %c0_2] : memref<1024x128xbf16, #tpu.memory_space<vmem>>, vector<1024x128xbf16>
    %cst = arith.constant dense<0.000000e+00> : vector<128x128xf32>
    %4 = tpu.matmul %2, %3, %cst {dimension_numbers = #tpu.dot_dimension_numbers<[1], [0], [0], [1], [0, 0, 1, 1], [], []>} : vector<128x1024xbf16>, vector<1024x128xbf16>, vector<128x128xf32> -> vector<128x128xf32>
    %c0_3 = arith.constant 0 : index
    %c0_4 = arith.constant 0 : index
    %5 = vector.load %arg4[%c0_3, %c0_4] : memref<1x128xf32, #tpu.memory_space<vmem>>, vector<1x128xf32>
    %6 = vector.broadcast %5 : vector<1x128xf32> to vector<128x128xf32>
    %7 = arith.addf %4, %6 : vector<128x128xf32>
    %8 = arith.index_cast %1 : i32 to index
    %c0_5 = arith.constant 0 : index
    %9 = vector.load %arg7[%8, %c0_5] : memref<128x128xf32, #tpu.memory_space<vmem>>, vector<128x128xf32>
    tpu.vector_store %arg7[%8, %c0_5], %7 {strides = array<i32>} : memref<128x128xf32, #tpu.memory_space<vmem>>, vector<128x128xf32>,
    %c0_i32 = arith.constant 0 : i32
    %10 = arith.cmpi eq, %arg1, %c0_i32 : i32
    %11 = arith.extui %10 : i1 to i32
    %c0_i32_6 = arith.constant 0 : i32
    %12 = arith.cmpi ne, %11, %c0_i32_6 : i32
    scf.if %12 {
      %c0_7 = arith.constant 0 : index
      %c0_8 = arith.constant 0 : index
      %13 = vector.load %arg7[%c0_7, %c0_8] : memref<128x128xf32, #tpu.memory_space<vmem>>, vector<128x128xf32>
      %14 = tpu.iota {dimensions = array<i32: 0>} : vector<128x128xi32>
      %c128_i32_9 = arith.constant 128 : i32
      %15 = vector.broadcast %c128_i32_9 : i32 to vector<128x128xi32>
      %16 = arith.cmpi slt, %14, %15 : vector<128x128xi32>
      %cst_10 = arith.constant 0.000000e+00 : f32
      %17 = vector.broadcast %cst_10 : f32 to vector<128x128xf32>
      %18 = arith.select %16, %13, %17 : vector<128x128xi1>, vector<128x128xf32>
      %cst_11 = arith.constant dense<0.000000e+00> : vector<128xf32>
      %19 = vector.multi_reduction <add>, %18, %cst_11 [0] : vector<128x128xf32> to vector<128xf32>
      %20 = vector.shape_cast %19 : vector<128xf32> to vector<1x128xf32>
      %cst_12 = arith.constant 7.812500e-03 : f32
      %21 = vector.broadcast %cst_12 : f32 to vector<1x128xf32>
      %22 = arith.mulf %20, %21 : vector<1x128xf32>
      %23 = vector.broadcast %22 : vector<1x128xf32> to vector<128x128xf32>
      %24 = arith.subf %13, %23 : vector<128x128xf32>
      %cst_13 = arith.constant 0.000000e+00 : f32
      %25 = vector.broadcast %cst_13 : f32 to vector<128x128xf32>
      %26 = arith.select %16, %24, %25 : vector<128x128xi1>, vector<128x128xf32>
      %27 = arith.mulf %26, %26 : vector<128x128xf32>
      %cst_14 = arith.constant dense<0.000000e+00> : vector<128xf32>
      %28 = vector.multi_reduction <add>, %27, %cst_14 [0] : vector<128x128xf32> to vector<128xf32>
      %29 = vector.shape_cast %28 : vector<128xf32> to vector<1x128xf32>
      %cst_15 = arith.constant 7.812500e-03 : f32
      %30 = vector.broadcast %cst_15 : f32 to vector<1x128xf32>
      %31 = arith.mulf %29, %30 : vector<1x128xf32>
      %c0_16 = arith.constant 0 : index
      %c0_17 = arith.constant 0 : index
      %32 = vector.load %arg5[%c0_16, %c0_17] : memref<1x128xf32, #tpu.memory_space<vmem>>, vector<1x128xf32>
      %cst_18 = arith.constant 9.99999974E-6 : f32
      %33 = vector.broadcast %cst_18 : f32 to vector<1x128xf32>
      %34 = arith.addf %31, %33 : vector<1x128xf32>
      %35 = math.rsqrt %34 : vector<1x128xf32>
      %36 = arith.mulf %32, %35 : vector<1x128xf32>
      %c0_19 = arith.constant 0 : index
      %c0_20 = arith.constant 0 : index
      %37 = vector.load %arg6[%c0_19, %c0_20] : memref<1x128xf32, #tpu.memory_space<vmem>>, vector<1x128xf32>
      %38 = arith.mulf %22, %36 : vector<1x128xf32>
      %39 = arith.subf %37, %38 : vector<1x128xf32>
      %40 = vector.broadcast %36 : vector<1x128xf32> to vector<128x128xf32>
      %41 = arith.mulf %13, %40 : vector<128x128xf32>
      %42 = vector.broadcast %39 : vector<1x128xf32> to vector<128x128xf32>
      %43 = arith.addf %41, %42 : vector<128x128xf32>
      %cst_21 = arith.constant 2.000000e-01 : f32
      %44 = vector.broadcast %cst_21 : f32 to vector<128x128xf32>
      %45 = arith.mulf %44, %43 : vector<128x128xf32>
      %46 = arith.maximumf %43, %45 : vector<128x128xf32>
      %c0_22 = arith.constant 0 : index
      %c0_23 = arith.constant 0 : index
      %47 = vector.load %arg7[%c0_22, %c0_23] : memref<128x128xf32, #tpu.memory_space<vmem>>, vector<128x128xf32>
      tpu.vector_store %arg7[%c0_22, %c0_23], %46 {strides = array<i32>} : memref<128x128xf32, #tpu.memory_space<vmem>>, vector<128x128xf32>,
    } else {
    }
    return
  }
  func.func @transform_0(%arg0: i32, %arg1: i32) -> (i32, i32) {
    %c0_i32 = arith.constant 0 : i32
    %c0_i32_0 = arith.constant 0 : i32
    return %arg1, %c0_i32 : i32, i32
  }
  func.func @transform_1(%arg0: i32, %arg1: i32) -> (i32, i32) {
    %c0_i32 = arith.constant 0 : i32
    %c0_i32_0 = arith.constant 0 : i32
    return %c0_i32, %arg0 : i32, i32
  }
  func.func @transform_2(%arg0: i32, %arg1: i32) -> (i32, i32) {
    %c0_i32 = arith.constant 0 : i32
    %c0_i32_0 = arith.constant 0 : i32
    return %c0_i32, %arg0 : i32, i32
  }
  func.func @transform_3(%arg0: i32, %arg1: i32) -> (i32, i32) {
    %c0_i32 = arith.constant 0 : i32
    %c0_i32_0 = arith.constant 0 : i32
    return %c0_i32, %arg0 : i32, i32
  }
  func.func @transform_4(%arg0: i32, %arg1: i32) -> (i32, i32) {
    %c0_i32 = arith.constant 0 : i32
    %c0_i32_0 = arith.constant 0 : i32
    return %c0_i32, %arg0 : i32, i32
  }
  func.func @transform_5(%arg0: i32, %arg1: i32) -> (i32, i32) {
    %c0_i32 = arith.constant 0 : i32
    %c0_i32_0 = arith.constant 0 : i32
    return %c0_i32, %arg0 : i32, i32
  }
}

module attributes {stable_mosaic.version = 11 : i64} {
  func.func @_fused_conv_kernel(%arg0: i32, %arg1: i32, %arg2: memref<32x2048xbf16, #tpu.memory_space<vmem>>, %arg3: memref<2048x256xbf16, #tpu.memory_space<vmem>>, %arg4: memref<1x256xf32, #tpu.memory_space<vmem>>, %arg5: memref<1x256xf32, #tpu.memory_space<vmem>>, %arg6: memref<1x256xf32, #tpu.memory_space<vmem>>, %arg7: memref<32x256xf32, #tpu.memory_space<vmem>>) attributes {dimension_semantics = [#tpu.dimension_semantics<parallel>, #tpu.dimension_semantics<arbitrary>], iteration_bounds = array<i64: 1, 1>, scalar_prefetch = 0 : i64, scratch_operands = 0 : i64, tpu.core_type = #tpu.core_type<tc>, window_params = [{transform_indices = @transform_0, window_bounds = array<i64: 32, 2048>}, {transform_indices = @transform_1, window_bounds = array<i64: 2048, 256>}, {transform_indices = @transform_2, window_bounds = array<i64: 1, 256>}, {transform_indices = @transform_3, window_bounds = array<i64: 1, 256>}, {transform_indices = @transform_4, window_bounds = array<i64: 1, 256>}, {transform_indices = @transform_5, window_bounds = array<i64: 32, 256>}]} {
    %c32_i32 = arith.constant 32 : i32
    %0 = arith.muli %arg1, %c32_i32 : i32
    %1 = tpu.assume_multiple %0, 32 : i32
    %c0 = arith.constant 0 : index
    %c0_0 = arith.constant 0 : index
    %2 = vector.load %arg2[%c0, %c0_0] : memref<32x2048xbf16, #tpu.memory_space<vmem>>, vector<32x2048xbf16>
    %c0_1 = arith.constant 0 : index
    %c0_2 = arith.constant 0 : index
    %3 = vector.load %arg3[%c0_1, %c0_2] : memref<2048x256xbf16, #tpu.memory_space<vmem>>, vector<2048x256xbf16>
    %cst = arith.constant dense<0.000000e+00> : vector<32x256xf32>
    %4 = tpu.matmul %2, %3, %cst {dimension_numbers = #tpu.dot_dimension_numbers<[1], [0], [0], [1], [0, 0, 1, 1], [], []>} : vector<32x2048xbf16>, vector<2048x256xbf16>, vector<32x256xf32> -> vector<32x256xf32>
    %c0_3 = arith.constant 0 : index
    %c0_4 = arith.constant 0 : index
    %5 = vector.load %arg4[%c0_3, %c0_4] : memref<1x256xf32, #tpu.memory_space<vmem>>, vector<1x256xf32>
    %6 = vector.broadcast %5 : vector<1x256xf32> to vector<32x256xf32>
    %7 = arith.addf %4, %6 : vector<32x256xf32>
    %8 = arith.index_cast %1 : i32 to index
    %c0_5 = arith.constant 0 : index
    %9 = vector.load %arg7[%8, %c0_5] : memref<32x256xf32, #tpu.memory_space<vmem>>, vector<32x256xf32>
    tpu.vector_store %arg7[%8, %c0_5], %7 {strides = array<i32>} : memref<32x256xf32, #tpu.memory_space<vmem>>, vector<32x256xf32>,
    %c0_i32 = arith.constant 0 : i32
    %10 = arith.cmpi eq, %arg1, %c0_i32 : i32
    %11 = arith.extui %10 : i1 to i32
    %c0_i32_6 = arith.constant 0 : i32
    %12 = arith.cmpi ne, %11, %c0_i32_6 : i32
    scf.if %12 {
      %c0_7 = arith.constant 0 : index
      %c0_8 = arith.constant 0 : index
      %13 = vector.load %arg7[%c0_7, %c0_8] : memref<32x256xf32, #tpu.memory_space<vmem>>, vector<32x256xf32>
      %14 = tpu.iota {dimensions = array<i32: 0>} : vector<32x256xi32>
      %c32_i32_9 = arith.constant 32 : i32
      %15 = vector.broadcast %c32_i32_9 : i32 to vector<32x256xi32>
      %16 = arith.cmpi slt, %14, %15 : vector<32x256xi32>
      %cst_10 = arith.constant 0.000000e+00 : f32
      %17 = vector.broadcast %cst_10 : f32 to vector<32x256xf32>
      %18 = arith.select %16, %13, %17 : vector<32x256xi1>, vector<32x256xf32>
      %cst_11 = arith.constant dense<0.000000e+00> : vector<256xf32>
      %19 = vector.multi_reduction <add>, %18, %cst_11 [0] : vector<32x256xf32> to vector<256xf32>
      %20 = vector.shape_cast %19 : vector<256xf32> to vector<1x256xf32>
      %cst_12 = arith.constant 3.125000e-02 : f32
      %21 = vector.broadcast %cst_12 : f32 to vector<1x256xf32>
      %22 = arith.mulf %20, %21 : vector<1x256xf32>
      %23 = vector.broadcast %22 : vector<1x256xf32> to vector<32x256xf32>
      %24 = arith.subf %13, %23 : vector<32x256xf32>
      %cst_13 = arith.constant 0.000000e+00 : f32
      %25 = vector.broadcast %cst_13 : f32 to vector<32x256xf32>
      %26 = arith.select %16, %24, %25 : vector<32x256xi1>, vector<32x256xf32>
      %27 = arith.mulf %26, %26 : vector<32x256xf32>
      %cst_14 = arith.constant dense<0.000000e+00> : vector<256xf32>
      %28 = vector.multi_reduction <add>, %27, %cst_14 [0] : vector<32x256xf32> to vector<256xf32>
      %29 = vector.shape_cast %28 : vector<256xf32> to vector<1x256xf32>
      %cst_15 = arith.constant 3.125000e-02 : f32
      %30 = vector.broadcast %cst_15 : f32 to vector<1x256xf32>
      %31 = arith.mulf %29, %30 : vector<1x256xf32>
      %c0_16 = arith.constant 0 : index
      %c0_17 = arith.constant 0 : index
      %32 = vector.load %arg5[%c0_16, %c0_17] : memref<1x256xf32, #tpu.memory_space<vmem>>, vector<1x256xf32>
      %cst_18 = arith.constant 9.99999974E-6 : f32
      %33 = vector.broadcast %cst_18 : f32 to vector<1x256xf32>
      %34 = arith.addf %31, %33 : vector<1x256xf32>
      %35 = math.rsqrt %34 : vector<1x256xf32>
      %36 = arith.mulf %32, %35 : vector<1x256xf32>
      %c0_19 = arith.constant 0 : index
      %c0_20 = arith.constant 0 : index
      %37 = vector.load %arg6[%c0_19, %c0_20] : memref<1x256xf32, #tpu.memory_space<vmem>>, vector<1x256xf32>
      %38 = arith.mulf %22, %36 : vector<1x256xf32>
      %39 = arith.subf %37, %38 : vector<1x256xf32>
      %40 = vector.broadcast %36 : vector<1x256xf32> to vector<32x256xf32>
      %41 = arith.mulf %13, %40 : vector<32x256xf32>
      %42 = vector.broadcast %39 : vector<1x256xf32> to vector<32x256xf32>
      %43 = arith.addf %41, %42 : vector<32x256xf32>
      %cst_21 = arith.constant 2.000000e-01 : f32
      %44 = vector.broadcast %cst_21 : f32 to vector<32x256xf32>
      %45 = arith.mulf %44, %43 : vector<32x256xf32>
      %46 = arith.maximumf %43, %45 : vector<32x256xf32>
      %c0_22 = arith.constant 0 : index
      %c0_23 = arith.constant 0 : index
      %47 = vector.load %arg7[%c0_22, %c0_23] : memref<32x256xf32, #tpu.memory_space<vmem>>, vector<32x256xf32>
      tpu.vector_store %arg7[%c0_22, %c0_23], %46 {strides = array<i32>} : memref<32x256xf32, #tpu.memory_space<vmem>>, vector<32x256xf32>,
    } else {
    }
    return
  }
  func.func @transform_0(%arg0: i32, %arg1: i32) -> (i32, i32) {
    %c0_i32 = arith.constant 0 : i32
    %c0_i32_0 = arith.constant 0 : i32
    return %arg1, %c0_i32 : i32, i32
  }
  func.func @transform_1(%arg0: i32, %arg1: i32) -> (i32, i32) {
    %c0_i32 = arith.constant 0 : i32
    %c0_i32_0 = arith.constant 0 : i32
    return %c0_i32, %arg0 : i32, i32
  }
  func.func @transform_2(%arg0: i32, %arg1: i32) -> (i32, i32) {
    %c0_i32 = arith.constant 0 : i32
    %c0_i32_0 = arith.constant 0 : i32
    return %c0_i32, %arg0 : i32, i32
  }
  func.func @transform_3(%arg0: i32, %arg1: i32) -> (i32, i32) {
    %c0_i32 = arith.constant 0 : i32
    %c0_i32_0 = arith.constant 0 : i32
    return %c0_i32, %arg0 : i32, i32
  }
  func.func @transform_4(%arg0: i32, %arg1: i32) -> (i32, i32) {
    %c0_i32 = arith.constant 0 : i32
    %c0_i32_0 = arith.constant 0 : i32
    return %c0_i32, %arg0 : i32, i32
  }
  func.func @transform_5(%arg0: i32, %arg1: i32) -> (i32, i32) {
    %c0_i32 = arith.constant 0 : i32
    %c0_i32_0 = arith.constant 0 : i32
    return %c0_i32, %arg0 : i32, i32
  }
}

module attributes {stable_mosaic.version = 11 : i64} {
  func.func @_fused_conv_kernel(%arg0: i32, %arg1: i32, %arg2: memref<8x4096xbf16, #tpu.memory_space<vmem>>, %arg3: memref<4096x256xbf16, #tpu.memory_space<vmem>>, %arg4: memref<1x256xf32, #tpu.memory_space<vmem>>, %arg5: memref<1x256xf32, #tpu.memory_space<vmem>>, %arg6: memref<1x256xf32, #tpu.memory_space<vmem>>, %arg7: memref<8x256xf32, #tpu.memory_space<vmem>>) attributes {dimension_semantics = [#tpu.dimension_semantics<parallel>, #tpu.dimension_semantics<arbitrary>], iteration_bounds = array<i64: 2, 1>, scalar_prefetch = 0 : i64, scratch_operands = 0 : i64, tpu.core_type = #tpu.core_type<tc>, window_params = [{transform_indices = @transform_0, window_bounds = array<i64: 8, 4096>}, {transform_indices = @transform_1, window_bounds = array<i64: 4096, 256>}, {transform_indices = @transform_2, window_bounds = array<i64: 1, 256>}, {transform_indices = @transform_3, window_bounds = array<i64: 1, 256>}, {transform_indices = @transform_4, window_bounds = array<i64: 1, 256>}, {transform_indices = @transform_5, window_bounds = array<i64: 8, 256>}]} {
    %c8_i32 = arith.constant 8 : i32
    %0 = arith.muli %arg1, %c8_i32 : i32
    %1 = tpu.assume_multiple %0, 8 : i32
    %c0 = arith.constant 0 : index
    %c0_0 = arith.constant 0 : index
    %2 = vector.load %arg2[%c0, %c0_0] : memref<8x4096xbf16, #tpu.memory_space<vmem>>, vector<8x4096xbf16>
    %c0_1 = arith.constant 0 : index
    %c0_2 = arith.constant 0 : index
    %3 = vector.load %arg3[%c0_1, %c0_2] : memref<4096x256xbf16, #tpu.memory_space<vmem>>, vector<4096x256xbf16>
    %cst = arith.constant dense<0.000000e+00> : vector<8x256xf32>
    %4 = tpu.matmul %2, %3, %cst {dimension_numbers = #tpu.dot_dimension_numbers<[1], [0], [0], [1], [0, 0, 1, 1], [], []>} : vector<8x4096xbf16>, vector<4096x256xbf16>, vector<8x256xf32> -> vector<8x256xf32>
    %c0_3 = arith.constant 0 : index
    %c0_4 = arith.constant 0 : index
    %5 = vector.load %arg4[%c0_3, %c0_4] : memref<1x256xf32, #tpu.memory_space<vmem>>, vector<1x256xf32>
    %6 = vector.broadcast %5 : vector<1x256xf32> to vector<8x256xf32>
    %7 = arith.addf %4, %6 : vector<8x256xf32>
    %8 = arith.index_cast %1 : i32 to index
    %c0_5 = arith.constant 0 : index
    %9 = vector.load %arg7[%8, %c0_5] : memref<8x256xf32, #tpu.memory_space<vmem>>, vector<8x256xf32>
    tpu.vector_store %arg7[%8, %c0_5], %7 {strides = array<i32>} : memref<8x256xf32, #tpu.memory_space<vmem>>, vector<8x256xf32>,
    %c0_i32 = arith.constant 0 : i32
    %10 = arith.cmpi eq, %arg1, %c0_i32 : i32
    %11 = arith.extui %10 : i1 to i32
    %c0_i32_6 = arith.constant 0 : i32
    %12 = arith.cmpi ne, %11, %c0_i32_6 : i32
    scf.if %12 {
      %c0_7 = arith.constant 0 : index
      %c0_8 = arith.constant 0 : index
      %13 = vector.load %arg7[%c0_7, %c0_8] : memref<8x256xf32, #tpu.memory_space<vmem>>, vector<8x256xf32>
      %14 = tpu.iota {dimensions = array<i32: 0>} : vector<8x256xi32>
      %c8_i32_9 = arith.constant 8 : i32
      %15 = vector.broadcast %c8_i32_9 : i32 to vector<8x256xi32>
      %16 = arith.cmpi slt, %14, %15 : vector<8x256xi32>
      %cst_10 = arith.constant 0.000000e+00 : f32
      %17 = vector.broadcast %cst_10 : f32 to vector<8x256xf32>
      %18 = arith.select %16, %13, %17 : vector<8x256xi1>, vector<8x256xf32>
      %cst_11 = arith.constant dense<0.000000e+00> : vector<256xf32>
      %19 = vector.multi_reduction <add>, %18, %cst_11 [0] : vector<8x256xf32> to vector<256xf32>
      %20 = vector.shape_cast %19 : vector<256xf32> to vector<1x256xf32>
      %cst_12 = arith.constant 1.250000e-01 : f32
      %21 = vector.broadcast %cst_12 : f32 to vector<1x256xf32>
      %22 = arith.mulf %20, %21 : vector<1x256xf32>
      %23 = vector.broadcast %22 : vector<1x256xf32> to vector<8x256xf32>
      %24 = arith.subf %13, %23 : vector<8x256xf32>
      %cst_13 = arith.constant 0.000000e+00 : f32
      %25 = vector.broadcast %cst_13 : f32 to vector<8x256xf32>
      %26 = arith.select %16, %24, %25 : vector<8x256xi1>, vector<8x256xf32>
      %27 = arith.mulf %26, %26 : vector<8x256xf32>
      %cst_14 = arith.constant dense<0.000000e+00> : vector<256xf32>
      %28 = vector.multi_reduction <add>, %27, %cst_14 [0] : vector<8x256xf32> to vector<256xf32>
      %29 = vector.shape_cast %28 : vector<256xf32> to vector<1x256xf32>
      %cst_15 = arith.constant 1.250000e-01 : f32
      %30 = vector.broadcast %cst_15 : f32 to vector<1x256xf32>
      %31 = arith.mulf %29, %30 : vector<1x256xf32>
      %c0_16 = arith.constant 0 : index
      %c0_17 = arith.constant 0 : index
      %32 = vector.load %arg5[%c0_16, %c0_17] : memref<1x256xf32, #tpu.memory_space<vmem>>, vector<1x256xf32>
      %cst_18 = arith.constant 9.99999974E-6 : f32
      %33 = vector.broadcast %cst_18 : f32 to vector<1x256xf32>
      %34 = arith.addf %31, %33 : vector<1x256xf32>
      %35 = math.rsqrt %34 : vector<1x256xf32>
      %36 = arith.mulf %32, %35 : vector<1x256xf32>
      %c0_19 = arith.constant 0 : index
      %c0_20 = arith.constant 0 : index
      %37 = vector.load %arg6[%c0_19, %c0_20] : memref<1x256xf32, #tpu.memory_space<vmem>>, vector<1x256xf32>
      %38 = arith.mulf %22, %36 : vector<1x256xf32>
      %39 = arith.subf %37, %38 : vector<1x256xf32>
      %40 = vector.broadcast %36 : vector<1x256xf32> to vector<8x256xf32>
      %41 = arith.mulf %13, %40 : vector<8x256xf32>
      %42 = vector.broadcast %39 : vector<1x256xf32> to vector<8x256xf32>
      %43 = arith.addf %41, %42 : vector<8x256xf32>
      %cst_21 = arith.constant 2.000000e-01 : f32
      %44 = vector.broadcast %cst_21 : f32 to vector<8x256xf32>
      %45 = arith.mulf %44, %43 : vector<8x256xf32>
      %46 = arith.maximumf %43, %45 : vector<8x256xf32>
      %c0_22 = arith.constant 0 : index
      %c0_23 = arith.constant 0 : index
      %47 = vector.load %arg7[%c0_22, %c0_23] : memref<8x256xf32, #tpu.memory_space<vmem>>, vector<8x256xf32>
      tpu.vector_store %arg7[%c0_22, %c0_23], %46 {strides = array<i32>} : memref<8x256xf32, #tpu.memory_space<vmem>>, vector<8x256xf32>,
    } else {
    }
    return
  }
  func.func @transform_0(%arg0: i32, %arg1: i32) -> (i32, i32) {
    %c0_i32 = arith.constant 0 : i32
    %c0_i32_0 = arith.constant 0 : i32
    return %arg1, %c0_i32 : i32, i32
  }
  func.func @transform_1(%arg0: i32, %arg1: i32) -> (i32, i32) {
    %c0_i32 = arith.constant 0 : i32
    %c0_i32_0 = arith.constant 0 : i32
    return %c0_i32, %arg0 : i32, i32
  }
  func.func @transform_2(%arg0: i32, %arg1: i32) -> (i32, i32) {
    %c0_i32 = arith.constant 0 : i32
    %c0_i32_0 = arith.constant 0 : i32
    return %c0_i32, %arg0 : i32, i32
  }
  func.func @transform_3(%arg0: i32, %arg1: i32) -> (i32, i32) {
    %c0_i32 = arith.constant 0 : i32
    %c0_i32_0 = arith.constant 0 : i32
    return %c0_i32, %arg0 : i32, i32
  }
  func.func @transform_4(%arg0: i32, %arg1: i32) -> (i32, i32) {
    %c0_i32 = arith.constant 0 : i32
    %c0_i32_0 = arith.constant 0 : i32
    return %c0_i32, %arg0 : i32, i32
  }
  func.func @transform_5(%arg0: i32, %arg1: i32) -> (i32, i32) {
    %c0_i32 = arith.constant 0 : i32
    %c0_i32_0 = arith.constant 0 : i32
    return %c0_i32, %arg0 : i32, i32
  }
}

module attributes {stable_mosaic.version = 11 : i64} {
  func.func @_fused_conv_kernel(%arg0: i32, %arg1: i32, %arg2: memref<8x4608xbf16, #tpu.memory_space<vmem>>, %arg3: memref<4608x128xbf16, #tpu.memory_space<vmem>>, %arg4: memref<1x128xf32, #tpu.memory_space<vmem>>, %arg5: memref<8x128xf32, #tpu.memory_space<vmem>>) attributes {dimension_semantics = [#tpu.dimension_semantics<parallel>, #tpu.dimension_semantics<arbitrary>], iteration_bounds = array<i64: 1, 1>, scalar_prefetch = 0 : i64, scratch_operands = 0 : i64, tpu.core_type = #tpu.core_type<tc>, window_params = [{transform_indices = @transform_0, window_bounds = array<i64: 8, 4608>}, {transform_indices = @transform_1, window_bounds = array<i64: 4608, 128>}, {transform_indices = @transform_2, window_bounds = array<i64: 1, 128>}, {transform_indices = @transform_3, window_bounds = array<i64: 8, 128>}]} {
    %c8_i32 = arith.constant 8 : i32
    %0 = arith.muli %arg1, %c8_i32 : i32
    %1 = tpu.assume_multiple %0, 8 : i32
    %c0 = arith.constant 0 : index
    %c0_0 = arith.constant 0 : index
    %2 = vector.load %arg2[%c0, %c0_0] : memref<8x4608xbf16, #tpu.memory_space<vmem>>, vector<8x4608xbf16>
    %c0_1 = arith.constant 0 : index
    %c0_2 = arith.constant 0 : index
    %3 = vector.load %arg3[%c0_1, %c0_2] : memref<4608x128xbf16, #tpu.memory_space<vmem>>, vector<4608x128xbf16>
    %cst = arith.constant dense<0.000000e+00> : vector<8x128xf32>
    %4 = tpu.matmul %2, %3, %cst {dimension_numbers = #tpu.dot_dimension_numbers<[1], [0], [0], [1], [0, 0, 1, 1], [], []>} : vector<8x4608xbf16>, vector<4608x128xbf16>, vector<8x128xf32> -> vector<8x128xf32>
    %c0_3 = arith.constant 0 : index
    %c0_4 = arith.constant 0 : index
    %5 = vector.load %arg4[%c0_3, %c0_4] : memref<1x128xf32, #tpu.memory_space<vmem>>, vector<1x128xf32>
    %6 = vector.broadcast %5 : vector<1x128xf32> to vector<8x128xf32>
    %7 = arith.addf %4, %6 : vector<8x128xf32>
    %8 = arith.index_cast %1 : i32 to index
    %c0_5 = arith.constant 0 : index
    %9 = vector.load %arg5[%8, %c0_5] : memref<8x128xf32, #tpu.memory_space<vmem>>, vector<8x128xf32>
    tpu.vector_store %arg5[%8, %c0_5], %7 {strides = array<i32>} : memref<8x128xf32, #tpu.memory_space<vmem>>, vector<8x128xf32>,
    return
  }
  func.func @transform_0(%arg0: i32, %arg1: i32) -> (i32, i32) {
    %c0_i32 = arith.constant 0 : i32
    %c0_i32_0 = arith.constant 0 : i32
    return %arg1, %c0_i32 : i32, i32
  }
  func.func @transform_1(%arg0: i32, %arg1: i32) -> (i32, i32) {
    %c0_i32 = arith.constant 0 : i32
    %c0_i32_0 = arith.constant 0 : i32
    return %c0_i32, %arg0 : i32, i32
  }
  func.func @transform_2(%arg0: i32, %arg1: i32) -> (i32, i32) {
    %c0_i32 = arith.constant 0 : i32
    %c0_i32_0 = arith.constant 0 : i32
    return %c0_i32, %arg0 : i32, i32
  }
  func.func @transform_3(%arg0: i32, %arg1: i32) -> (i32, i32) {
    %c0_i32 = arith.constant 0 : i32
    %c0_i32_0 = arith.constant 0 : i32
    return %c0_i32, %arg0 : i32, i32
  }
}

</mosaic_0001>

<bundles_post_ra>
// kernel: discriminator_forward.7
= control target key start
LH: loop header
LB: loop body
LE: loop exit
PB: predicated region body
PF: predicated region fallthrough
CT: control target
= control target key end

     0   :  { %s1447_s1 = inlined_call_operand.vmem [shape: bf16[128,128], index: 1, kind: input, shape index: {}]   ;;  %s1448_s0 = inlined_call_operand.vmem [shape: bf16[512,128], index: 0, kind: input, shape index: {}]   ;;  %s1449_s2 = inlined_call_operand.vmem [shape: f32[1,128], index: 2, kind: input, shape index: {}]   ;;  %s1450_s3 = inlined_call_operand.vmem [shape: f32[512,128], index: 3, kind: output, shape index: {}]  }
   0x1   :  { %v1006_v0 = vld [vmem:[%s1447_s1 + $0x38] sm:$0xff]   ;;  %v1007_v1 = vld [vmem:[%s1447_s1 + $0x30] sm:$0xff]   ;;  %v1008_v2 = vld [vmem:[%s1447_s1 + $0x28] sm:$0xff]  }
   0x2   :  { %910 = vmatprep.subr.bf16.mxu0 %v1006_v0  ;;  %990 = vmatprep.subr.bf16.mxu1 %v1006_v0  ;;  %v1009_v3 = vld [vmem:[%s1447_s1 + $0x20] sm:$0xff]   ;;  %v1010_v6 = vld [vmem:[%s1447_s1 + $0x18] sm:$0xff]   ;;  %v1011_v7 = vld [vmem:[%s1447_s1 + $0x10] sm:$0xff]  }
   0x3   :  { %911 = vmatpush3.bf16.msra.mxu0 %v1006_v0  ;;  %998 = vmatpush3.bf16.msra.mxu1 %v1006_v0  ;;  %v1014_v4 = vld [vmem:[%s1448_s0] sm:$0xff]   ;;  %v1012_v8 = vld [vmem:[%s1447_s1 + $0x8] sm:$0xff]   ;;  %v1018_v12 = vld [vmem:[%s1448_s0 + $0x10] sm:$0xff]  }
   0x4   :  { %912 = vmatprep.subr.bf16.mxu0 %v1007_v1  ;;  %991 = vmatprep.subr.bf16.mxu1 %v1007_v1  ;;  %v1015_v5 = vld [vmem:[%s1448_s0 + $0x80] sm:$0xff]   ;;  %v1016_v10 = vld [vmem:[%s1448_s0 + $0x8] sm:$0xff]   ;;  %v1019_v13 = vld [vmem:[%s1448_s0 + $0x90] sm:$0xff]  }
   0x5   :  { %926 = vmatprep.mubr.bf16.mxu0 %v1014_v4  ;;  %958 = vmatprep.mubr.bf16.mxu1 %v1015_v5  ;;  %v1013_v9 = vld [vmem:[%s1447_s1] sm:$0xff]   ;;  %v1017_v11 = vld [vmem:[%s1448_s0 + $0x88] sm:$0xff]   ;;  %v1020_v14 = vld [vmem:[%s1448_s0 + $0x18] sm:$0xff]  }
   0x6   :  { %v1021_v15 = vld [vmem:[%s1448_s0 + $0x98] sm:$0xff]   ;;  %v1022_v16 = vld [vmem:[%s1448_s0 + $0x20] sm:$0xff]   ;;  %v1024_v18 = vld [vmem:[%s1448_s0 + $0x28] sm:$0xff]  }
   0x7   :  { %913 = vmatpush3.bf16.msra.mxu0 %v1007_v1  ;;  %999 = vmatpush3.bf16.msra.mxu1 %v1007_v1  ;;  %v1023_v17 = vld [vmem:[%s1448_s0 + $0xa0] sm:$0xff]   ;;  %v1025_v19 = vld [vmem:[%s1448_s0 + $0xa8] sm:$0xff]   ;;  %v1026_v20 = vld [vmem:[%s1448_s0 + $0x30] sm:$0xff]  }
   0x8   :  { %914 = vmatprep.subr.bf16.mxu0 %v1008_v2  ;;  %992 = vmatprep.subr.bf16.mxu1 %v1008_v2  ;;  %v1027_v21 = vld [vmem:[%s1448_s0 + $0xb0] sm:$0xff]   ;;  %v1028_v22 = vld [vmem:[%s1448_s0 + $0x38] sm:$0xff]   ;;  %v1030_v24 = vld [vmem:[%s1448_s0 + $0x40] sm:$0xff]  }
   0x9   :  { %v1029_v23 = vld [vmem:[%s1448_s0 + $0xb8] sm:$0xff]   ;;  %v1031_v25 = vld [vmem:[%s1448_s0 + $0xc0] sm:$0xff]   ;;  %v1032_v26 = vld [vmem:[%s1448_s0 + $0x48] sm:$0xff]  }
   0xa   :  { %v1033_v27 = vld [vmem:[%s1448_s0 + $0xc8] sm:$0xff]   ;;  %v1034_v28 = vld [vmem:[%s1448_s0 + $0x50] sm:$0xff]   ;;  %v1036_v30 = vld [vmem:[%s1448_s0 + $0x58] sm:$0xff]  }
   0xb   :  { %915 = vmatpush3.bf16.msra.mxu0 %v1008_v2  ;;  %1000 = vmatpush3.bf16.msra.mxu1 %v1008_v2  ;;  %v1035_v29 = vld [vmem:[%s1448_s0 + $0xd0] sm:$0xff]   ;;  %v1037_v31 = vld [vmem:[%s1448_s0 + $0xd8] sm:$0xff]   ;;  %v1038_v32 = vld [vmem:[%s1448_s0 + $0x60] sm:$0xff]  }
   0xc   :  { %916 = vmatprep.subr.bf16.mxu0 %v1009_v3  ;;  %993 = vmatprep.subr.bf16.mxu1 %v1009_v3  ;;  %v1039_v33 = vld [vmem:[%s1448_s0 + $0xe0] sm:$0xff]   ;;  %v1040_v34 = vld [vmem:[%s1448_s0 + $0x68] sm:$0xff]   ;;  %v1042_v36 = vld [vmem:[%s1448_s0 + $0x70] sm:$0xff]  }
   0xd   :  { %v1041_v35 = vld [vmem:[%s1448_s0 + $0xe8] sm:$0xff]   ;;  %v1043_v37 = vld [vmem:[%s1448_s0 + $0xf0] sm:$0xff]   ;;  %v1044_v38 = vld [vmem:[%s1448_s0 + $0x78] sm:$0xff]  }
   0xe   :  { %v1045_v39 = vld [vmem:[%s1448_s0 + $0xf8] sm:$0xff]   ;;  %v1189_v40 = vld [vmem:[%s1449_s2] ss:$0 sm:$0xff] }
   0xf   :  { %917 = vmatpush3.bf16.msra.mxu0 %v1009_v3  ;;  %1001 = vmatpush3.bf16.msra.mxu1 %v1009_v3 }
  0x10   :  { %918 = vmatprep.subr.bf16.mxu0 %v1010_v6  ;;  %994 = vmatprep.subr.bf16.mxu1 %v1010_v6 }
  0x13   :  { %919 = vmatpush3.bf16.msra.mxu0 %v1010_v6  ;;  %1002 = vmatpush3.bf16.msra.mxu1 %v1010_v6 }
  0x14   :  { %920 = vmatprep.subr.bf16.mxu0 %v1011_v7  ;;  %995 = vmatprep.subr.bf16.mxu1 %v1011_v7 }
  0x17   :  { %921 = vmatpush3.bf16.msra.mxu0 %v1011_v7  ;;  %1003 = vmatpush3.bf16.msra.mxu1 %v1011_v7 }
  0x18   :  { %922 = vmatprep.subr.bf16.mxu0 %v1012_v8  ;;  %996 = vmatprep.subr.bf16.mxu1 %v1012_v8 }
  0x1b   :  { %923 = vmatpush3.bf16.msra.mxu0 %v1012_v8  ;;  %1004 = vmatpush3.bf16.msra.mxu1 %v1012_v8 }
  0x1c   :  { %924 = vmatprep.subr.bf16.mxu0 %v1013_v9  ;;  %997 = vmatprep.subr.bf16.mxu1 %v1013_v9 }
  0x1f   :  { %925 = vmatpush3.bf16.msra.mxu0 %v1013_v9  ;;  %1005 = vmatpush3.bf16.msra.mxu1 %v1013_v9 }
  0x22   :  { %927 = vmatmul.mubr.bf16.vlgmr.msra.gmra.mxu0 %v1016_v10  ;;  %959 = vmatmul.mubr.bf16.vlgmr.msra.gmra.mxu1 %v1017_v11 }
  0x23   :  { %930 = vmatprep.mubr.bf16.mxu0 %v1018_v12  ;;  %962 = vmatprep.mubr.bf16.mxu1 %v1019_v13 }
  0x2a   :  { %931 = vmatmul.mubr.bf16.gmra.mxu0 %v1020_v14  ;;  %963 = vmatmul.mubr.bf16.gmra.mxu1 %v1021_v15 }
  0x2b   :  { %934 = vmatprep.mubr.bf16.mxu0 %v1022_v16  ;;  %966 = vmatprep.mubr.bf16.mxu1 %v1023_v17 }
  0x32   :  { %935 = vmatmul.mubr.bf16.gmra.mxu0 %v1024_v18  ;;  %967 = vmatmul.mubr.bf16.gmra.mxu1 %v1025_v19 }
  0x33   :  { %938 = vmatprep.mubr.bf16.mxu0 %v1026_v20  ;;  %970 = vmatprep.mubr.bf16.mxu1 %v1027_v21 }
  0x3a   :  { %939 = vmatmul.mubr.bf16.gmra.mxu0 %v1028_v22  ;;  %971 = vmatmul.mubr.bf16.gmra.mxu1 %v1029_v23 }
  0x3b   :  { %942 = vmatprep.mubr.bf16.mxu0 %v1030_v24  ;;  %974 = vmatprep.mubr.bf16.mxu1 %v1031_v25 }
  0x42   :  { %943 = vmatmul.mubr.bf16.gmra.mxu0 %v1032_v26  ;;  %975 = vmatmul.mubr.bf16.gmra.mxu1 %v1033_v27 }
  0x43   :  { %946 = vmatprep.mubr.bf16.mxu0 %v1034_v28  ;;  %978 = vmatprep.mubr.bf16.mxu1 %v1035_v29 }
  0x4a   :  { %947 = vmatmul.mubr.bf16.gmra.mxu0 %v1036_v30  ;;  %979 = vmatmul.mubr.bf16.gmra.mxu1 %v1037_v31 }
  0x4b   :  { %950 = vmatprep.mubr.bf16.mxu0 %v1038_v32  ;;  %982 = vmatprep.mubr.bf16.mxu1 %v1039_v33 }
  0x52   :  { %951 = vmatmul.mubr.bf16.gmra.mxu0 %v1040_v34  ;;  %983 = vmatmul.mubr.bf16.gmra.mxu1 %v1041_v35 }
  0x53   :  { %954 = vmatprep.mubr.bf16.mxu0 %v1042_v36  ;;  %986 = vmatprep.mubr.bf16.mxu1 %v1043_v37 }
  0x5a   :  { %955 = vmatmul.mubr.bf16.gmra.mxu0 %v1044_v38  ;;  %987 = vmatmul.mubr.bf16.gmra.mxu1 %v1045_v39 }
  0xe2   :  { %v928_v41 = vpop.f32.mrf.mxu0  ;;  %v960_v42 = vpop.f32.mrf.mxu1 }
  0xe3   :  { %v386_v43 = vadd.f32 %v928_v41, %v1189_v40  ;;  %v514_v44 = vadd.f32 %v960_v42, %v1189_v40 }
  0xe4   :  { %v377_v45 = vpop.f32.mrf.mxu0  ;;  %v505_v46 = vpop.f32.mrf.mxu1 }
  0xe5   :  { %v634_v47 = vmul.f32 0.2, %v386_v43  ;;  %v666_v48 = vmul.f32 0.2, %v514_v44  ;;  %v378_v49 = vadd.f32 %v1189_v40, %v377_v45  ;;  %v506_v50 = vadd.f32 %v1189_v40, %v505_v46 }
  0xe6   :  { %v929_v51 = vpop.f32.mrf.mxu0  ;;  %v961_v52 = vpop.f32.mrf.mxu1 }
  0xe7   :  { %v698_v53 = vmax.f32 %v386_v43, %v634_v47  ;;  %v730_v54 = vmax.f32 %v514_v44, %v666_v48  ;;  %v632_v55 = vmul.f32 0.2, %v378_v49  ;;  %v664_v56 = vmul.f32 0.2, %v506_v50 }
  0xe8   :  { %v389_v57 = vadd.f32 %v929_v51, %v1189_v40  ;;  %v517_v58 = vadd.f32 %v961_v52, %v1189_v40  ;;  %v380_v59 = vpop.f32.mrf.mxu0  ;;  %v508_v60 = vpop.f32.mrf.mxu1 }
  0xe9   :  { %763 = vst [vmem:[%s1450_s3 + $0x10] sm:$0xff] %v698_v53  ;;  %795 = vst [vmem:[%s1450_s3 + $0x110] sm:$0xff] %v730_v54  ;;  %v696_v61 = vmax.f32 %v378_v49, %v632_v55  ;;  %v728_v62 = vmax.f32 %v506_v50, %v664_v56  ;;  %v381_v63 = vadd.f32 %v1189_v40, %v380_v59 }
  0xea   :  { %v509_v0 = vadd.f32 %v1189_v40, %v508_v60  ;;  %v635_v1 = vmul.f32 0.2, %v389_v57  ;;  %v667_v2 = vmul.f32 0.2, %v517_v58  ;;  %v932_v3 = vpop.f32.mrf.mxu0  ;;  %v964_v4 = vpop.f32.mrf.mxu1 }
  0xeb   :  { %761 = vst [vmem:[%s1450_s3] sm:$0xff] %v696_v61  ;;  %793 = vst [vmem:[%s1450_s3 + $0x100] sm:$0xff] %v728_v62  ;;  %v633_v5 = vmul.f32 0.2, %v381_v63  ;;  %v402_v7 = vadd.f32 %v932_v3, %v1189_v40  ;;  %v530_v8 = vadd.f32 %v964_v4, %v1189_v40 }
  0xec   :  { %v665_v6 = vmul.f32 0.2, %v509_v0  ;;  %v699_v9 = vmax.f32 %v389_v57, %v635_v1  ;;  %v731_v10 = vmax.f32 %v517_v58, %v667_v2  ;;  %v393_v11 = vpop.f32.mrf.mxu0  ;;  %v521_v12 = vpop.f32.mrf.mxu1 }
  0xed   :  { %v697_v13 = vmax.f32 %v381_v63, %v633_v5  ;;  %v638_v15 = vmul.f32 0.2, %v402_v7  ;;  %v670_v16 = vmul.f32 0.2, %v530_v8  ;;  %v394_v17 = vadd.f32 %v1189_v40, %v393_v11 }
  0xee   :  { %v729_v14 = vmax.f32 %v509_v0, %v665_v6  ;;  %764 = vst [vmem:[%s1450_s3 + $0x18] sm:$0xff] %v699_v9  ;;  %796 = vst [vmem:[%s1450_s3 + $0x118] sm:$0xff] %v731_v10  ;;  %v522_v18 = vadd.f32 %v1189_v40, %v521_v12  ;;  %v933_v19 = vpop.f32.mrf.mxu0  ;;  %v965_v20 = vpop.f32.mrf.mxu1 }
  0xef   :  { %762 = vst [vmem:[%s1450_s3 + $0x8] sm:$0xff] %v697_v13  ;;  %v702_v21 = vmax.f32 %v402_v7, %v638_v15  ;;  %v734_v22 = vmax.f32 %v530_v8, %v670_v16  ;;  %v405_v23 = vadd.f32 %v933_v19, %v1189_v40  ;;  %v533_v24 = vadd.f32 %v965_v20, %v1189_v40 }
  0xf0   :  { %794 = vst [vmem:[%s1450_s3 + $0x108] sm:$0xff] %v729_v14  ;;  %v636_v25 = vmul.f32 0.2, %v394_v17  ;;  %v668_v26 = vmul.f32 0.2, %v522_v18  ;;  %v396_v27 = vpop.f32.mrf.mxu0  ;;  %v524_v28 = vpop.f32.mrf.mxu1 }
  0xf1   :  { %767 = vst [vmem:[%s1450_s3 + $0x30] sm:$0xff] %v702_v21  ;;  %799 = vst [vmem:[%s1450_s3 + $0x130] sm:$0xff] %v734_v22  ;;  %v639_v29 = vmul.f32 0.2, %v405_v23  ;;  %v671_v30 = vmul.f32 0.2, %v533_v24  ;;  %v397_v31 = vadd.f32 %v1189_v40, %v396_v27  ;;  %v525_v32 = vadd.f32 %v1189_v40, %v524_v28 }
  0xf2   :  { %v700_v33 = vmax.f32 %v394_v17, %v636_v25  ;;  %v732_v34 = vmax.f32 %v522_v18, %v668_v26  ;;  %v936_v35 = vpop.f32.mrf.mxu0  ;;  %v968_v36 = vpop.f32.mrf.mxu1 }
  0xf3   :  { %v703_v37 = vmax.f32 %v405_v23, %v639_v29  ;;  %v735_v38 = vmax.f32 %v533_v24, %v671_v30  ;;  %v637_v39 = vmul.f32 0.2, %v397_v31  ;;  %v669_v41 = vmul.f32 0.2, %v525_v32 }
  0xf4   :  { %765 = vst [vmem:[%s1450_s3 + $0x20] sm:$0xff] %v700_v33  ;;  %797 = vst [vmem:[%s1450_s3 + $0x120] sm:$0xff] %v732_v34  ;;  %v418_v42 = vadd.f32 %v936_v35, %v1189_v40  ;;  %v546_v43 = vadd.f32 %v968_v36, %v1189_v40  ;;  %v409_v44 = vpop.f32.mrf.mxu0  ;;  %v537_v45 = vpop.f32.mrf.mxu1 }
  0xf5   :  { %768 = vst [vmem:[%s1450_s3 + $0x38] sm:$0xff] %v703_v37  ;;  %800 = vst [vmem:[%s1450_s3 + $0x138] sm:$0xff] %v735_v38  ;;  %v701_v46 = vmax.f32 %v397_v31, %v637_v39  ;;  %v733_v47 = vmax.f32 %v525_v32, %v669_v41  ;;  %v410_v48 = vadd.f32 %v1189_v40, %v409_v44 }
  0xf6   :  { %v538_v49 = vadd.f32 %v1189_v40, %v537_v45  ;;  %v642_v50 = vmul.f32 0.2, %v418_v42  ;;  %v674_v51 = vmul.f32 0.2, %v546_v43  ;;  %v937_v52 = vpop.f32.mrf.mxu0  ;;  %v969_v53 = vpop.f32.mrf.mxu1 }
  0xf7   :  { %766 = vst [vmem:[%s1450_s3 + $0x28] sm:$0xff] %v701_v46  ;;  %798 = vst [vmem:[%s1450_s3 + $0x128] sm:$0xff] %v733_v47  ;;  %v640_v54 = vmul.f32 0.2, %v410_v48  ;;  %v421_v56 = vadd.f32 %v937_v52, %v1189_v40  ;;  %v549_v57 = vadd.f32 %v969_v53, %v1189_v40 }
  0xf8   :  { %v672_v55 = vmul.f32 0.2, %v538_v49  ;;  %v706_v58 = vmax.f32 %v418_v42, %v642_v50  ;;  %v738_v59 = vmax.f32 %v546_v43, %v674_v51  ;;  %v412_v60 = vpop.f32.mrf.mxu0  ;;  %v540_v61 = vpop.f32.mrf.mxu1 }
  0xf9   :  { %v704_v62 = vmax.f32 %v410_v48, %v640_v54  ;;  %v643_v0 = vmul.f32 0.2, %v421_v56  ;;  %v675_v1 = vmul.f32 0.2, %v549_v57  ;;  %v413_v2 = vadd.f32 %v1189_v40, %v412_v60 }
  0xfa   :  { %v736_v63 = vmax.f32 %v538_v49, %v672_v55  ;;  %771 = vst [vmem:[%s1450_s3 + $0x50] sm:$0xff] %v706_v58  ;;  %803 = vst [vmem:[%s1450_s3 + $0x150] sm:$0xff] %v738_v59  ;;  %v541_v3 = vadd.f32 %v1189_v40, %v540_v61  ;;  %v940_v4 = vpop.f32.mrf.mxu0  ;;  %v972_v5 = vpop.f32.mrf.mxu1 }
  0xfb   :  { %769 = vst [vmem:[%s1450_s3 + $0x40] sm:$0xff] %v704_v62  ;;  %v707_v6 = vmax.f32 %v421_v56, %v643_v0  ;;  %v739_v7 = vmax.f32 %v549_v57, %v675_v1  ;;  %v434_v8 = vadd.f32 %v940_v4, %v1189_v40  ;;  %v562_v9 = vadd.f32 %v972_v5, %v1189_v40 }
  0xfc   :  { %801 = vst [vmem:[%s1450_s3 + $0x140] sm:$0xff] %v736_v63  ;;  %v641_v10 = vmul.f32 0.2, %v413_v2  ;;  %v673_v11 = vmul.f32 0.2, %v541_v3  ;;  %v425_v12 = vpop.f32.mrf.mxu0  ;;  %v553_v13 = vpop.f32.mrf.mxu1 }
  0xfd   :  { %772 = vst [vmem:[%s1450_s3 + $0x58] sm:$0xff] %v707_v6  ;;  %804 = vst [vmem:[%s1450_s3 + $0x158] sm:$0xff] %v739_v7  ;;  %v646_v14 = vmul.f32 0.2, %v434_v8  ;;  %v678_v15 = vmul.f32 0.2, %v562_v9  ;;  %v426_v16 = vadd.f32 %v1189_v40, %v425_v12  ;;  %v554_v17 = vadd.f32 %v1189_v40, %v553_v13 }
  0xfe   :  { %v705_v18 = vmax.f32 %v413_v2, %v641_v10  ;;  %v737_v19 = vmax.f32 %v541_v3, %v673_v11  ;;  %v941_v20 = vpop.f32.mrf.mxu0  ;;  %v973_v21 = vpop.f32.mrf.mxu1 }
  0xff   :  { %v710_v22 = vmax.f32 %v434_v8, %v646_v14  ;;  %v742_v23 = vmax.f32 %v562_v9, %v678_v15  ;;  %v644_v24 = vmul.f32 0.2, %v426_v16  ;;  %v676_v25 = vmul.f32 0.2, %v554_v17 }
 0x100   :  { %770 = vst [vmem:[%s1450_s3 + $0x48] sm:$0xff] %v705_v18  ;;  %802 = vst [vmem:[%s1450_s3 + $0x148] sm:$0xff] %v737_v19  ;;  %v437_v26 = vadd.f32 %v941_v20, %v1189_v40  ;;  %v565_v27 = vadd.f32 %v973_v21, %v1189_v40  ;;  %v428_v28 = vpop.f32.mrf.mxu0  ;;  %v556_v29 = vpop.f32.mrf.mxu1 }
 0x101   :  { %775 = vst [vmem:[%s1450_s3 + $0x70] sm:$0xff] %v710_v22  ;;  %807 = vst [vmem:[%s1450_s3 + $0x170] sm:$0xff] %v742_v23  ;;  %v708_v30 = vmax.f32 %v426_v16, %v644_v24  ;;  %v740_v31 = vmax.f32 %v554_v17, %v676_v25  ;;  %v429_v32 = vadd.f32 %v1189_v40, %v428_v28 }
 0x102   :  { %v557_v33 = vadd.f32 %v1189_v40, %v556_v29  ;;  %v647_v34 = vmul.f32 0.2, %v437_v26  ;;  %v679_v35 = vmul.f32 0.2, %v565_v27  ;;  %v944_v36 = vpop.f32.mrf.mxu0  ;;  %v976_v37 = vpop.f32.mrf.mxu1 }
 0x103   :  { %773 = vst [vmem:[%s1450_s3 + $0x60] sm:$0xff] %v708_v30  ;;  %805 = vst [vmem:[%s1450_s3 + $0x160] sm:$0xff] %v740_v31  ;;  %v645_v38 = vmul.f32 0.2, %v429_v32  ;;  %v450_v41 = vadd.f32 %v944_v36, %v1189_v40  ;;  %v578_v42 = vadd.f32 %v976_v37, %v1189_v40 }
 0x104   :  { %v677_v39 = vmul.f32 0.2, %v557_v33  ;;  %v711_v43 = vmax.f32 %v437_v26, %v647_v34  ;;  %v743_v44 = vmax.f32 %v565_v27, %v679_v35  ;;  %v441_v45 = vpop.f32.mrf.mxu0  ;;  %v569_v46 = vpop.f32.mrf.mxu1 }
 0x105   :  { %v709_v47 = vmax.f32 %v429_v32, %v645_v38  ;;  %v650_v49 = vmul.f32 0.2, %v450_v41  ;;  %v682_v50 = vmul.f32 0.2, %v578_v42  ;;  %v442_v51 = vadd.f32 %v1189_v40, %v441_v45 }
 0x106   :  { %v741_v48 = vmax.f32 %v557_v33, %v677_v39  ;;  %776 = vst [vmem:[%s1450_s3 + $0x78] sm:$0xff] %v711_v43  ;;  %808 = vst [vmem:[%s1450_s3 + $0x178] sm:$0xff] %v743_v44  ;;  %v570_v52 = vadd.f32 %v1189_v40, %v569_v46  ;;  %v945_v53 = vpop.f32.mrf.mxu0  ;;  %v977_v54 = vpop.f32.mrf.mxu1 }
 0x107   :  { %774 = vst [vmem:[%s1450_s3 + $0x68] sm:$0xff] %v709_v47  ;;  %v714_v55 = vmax.f32 %v450_v41, %v650_v49  ;;  %v746_v56 = vmax.f32 %v578_v42, %v682_v50  ;;  %v453_v57 = vadd.f32 %v945_v53, %v1189_v40  ;;  %v581_v58 = vadd.f32 %v977_v54, %v1189_v40 }
 0x108   :  { %806 = vst [vmem:[%s1450_s3 + $0x168] sm:$0xff] %v741_v48  ;;  %v648_v59 = vmul.f32 0.2, %v442_v51  ;;  %v680_v60 = vmul.f32 0.2, %v570_v52  ;;  %v444_v61 = vpop.f32.mrf.mxu0  ;;  %v572_v62 = vpop.f32.mrf.mxu1 }
 0x109   :  { %779 = vst [vmem:[%s1450_s3 + $0x90] sm:$0xff] %v714_v55  ;;  %811 = vst [vmem:[%s1450_s3 + $0x190] sm:$0xff] %v746_v56  ;;  %v651_v63 = vmul.f32 0.2, %v453_v57  ;;  %v683_v0 = vmul.f32 0.2, %v581_v58  ;;  %v445_v1 = vadd.f32 %v1189_v40, %v444_v61  ;;  %v573_v2 = vadd.f32 %v1189_v40, %v572_v62 }
 0x10a   :  { %v712_v3 = vmax.f32 %v442_v51, %v648_v59  ;;  %v744_v4 = vmax.f32 %v570_v52, %v680_v60  ;;  %v948_v5 = vpop.f32.mrf.mxu0  ;;  %v980_v6 = vpop.f32.mrf.mxu1 }
 0x10b   :  { %v715_v7 = vmax.f32 %v453_v57, %v651_v63  ;;  %v747_v8 = vmax.f32 %v581_v58, %v683_v0  ;;  %v649_v9 = vmul.f32 0.2, %v445_v1  ;;  %v681_v10 = vmul.f32 0.2, %v573_v2 }
 0x10c   :  { %777 = vst [vmem:[%s1450_s3 + $0x80] sm:$0xff] %v712_v3  ;;  %809 = vst [vmem:[%s1450_s3 + $0x180] sm:$0xff] %v744_v4  ;;  %v466_v11 = vadd.f32 %v948_v5, %v1189_v40  ;;  %v594_v12 = vadd.f32 %v980_v6, %v1189_v40  ;;  %v457_v13 = vpop.f32.mrf.mxu0  ;;  %v585_v14 = vpop.f32.mrf.mxu1 }
 0x10d   :  { %780 = vst [vmem:[%s1450_s3 + $0x98] sm:$0xff] %v715_v7  ;;  %812 = vst [vmem:[%s1450_s3 + $0x198] sm:$0xff] %v747_v8  ;;  %v713_v15 = vmax.f32 %v445_v1, %v649_v9  ;;  %v745_v16 = vmax.f32 %v573_v2, %v681_v10  ;;  %v458_v17 = vadd.f32 %v1189_v40, %v457_v13 }
 0x10e   :  { %v586_v18 = vadd.f32 %v1189_v40, %v585_v14  ;;  %v654_v19 = vmul.f32 0.2, %v466_v11  ;;  %v686_v20 = vmul.f32 0.2, %v594_v12  ;;  %v949_v21 = vpop.f32.mrf.mxu0  ;;  %v981_v22 = vpop.f32.mrf.mxu1 }
 0x10f   :  { %778 = vst [vmem:[%s1450_s3 + $0x88] sm:$0xff] %v713_v15  ;;  %810 = vst [vmem:[%s1450_s3 + $0x188] sm:$0xff] %v745_v16  ;;  %v652_v23 = vmul.f32 0.2, %v458_v17  ;;  %v469_v25 = vadd.f32 %v949_v21, %v1189_v40  ;;  %v597_v26 = vadd.f32 %v981_v22, %v1189_v40 }
 0x110   :  { %v684_v24 = vmul.f32 0.2, %v586_v18  ;;  %v718_v27 = vmax.f32 %v466_v11, %v654_v19  ;;  %v750_v28 = vmax.f32 %v594_v12, %v686_v20  ;;  %v460_v29 = vpop.f32.mrf.mxu0  ;;  %v588_v30 = vpop.f32.mrf.mxu1 }
 0x111   :  { %v716_v31 = vmax.f32 %v458_v17, %v652_v23  ;;  %v655_v33 = vmul.f32 0.2, %v469_v25  ;;  %v687_v34 = vmul.f32 0.2, %v597_v26  ;;  %v461_v35 = vadd.f32 %v1189_v40, %v460_v29 }
 0x112   :  { %v748_v32 = vmax.f32 %v586_v18, %v684_v24  ;;  %783 = vst [vmem:[%s1450_s3 + $0xb0] sm:$0xff] %v718_v27  ;;  %815 = vst [vmem:[%s1450_s3 + $0x1b0] sm:$0xff] %v750_v28  ;;  %v589_v36 = vadd.f32 %v1189_v40, %v588_v30  ;;  %v952_v37 = vpop.f32.mrf.mxu0  ;;  %v984_v38 = vpop.f32.mrf.mxu1 }
 0x113   :  { %781 = vst [vmem:[%s1450_s3 + $0xa0] sm:$0xff] %v716_v31  ;;  %v719_v39 = vmax.f32 %v469_v25, %v655_v33  ;;  %v751_v41 = vmax.f32 %v597_v26, %v687_v34  ;;  %v482_v42 = vadd.f32 %v952_v37, %v1189_v40  ;;  %v610_v43 = vadd.f32 %v984_v38, %v1189_v40 }
 0x114   :  { %813 = vst [vmem:[%s1450_s3 + $0x1a0] sm:$0xff] %v748_v32  ;;  %v653_v44 = vmul.f32 0.2, %v461_v35  ;;  %v685_v45 = vmul.f32 0.2, %v589_v36  ;;  %v473_v46 = vpop.f32.mrf.mxu0  ;;  %v601_v47 = vpop.f32.mrf.mxu1 }
 0x115   :  { %784 = vst [vmem:[%s1450_s3 + $0xb8] sm:$0xff] %v719_v39  ;;  %816 = vst [vmem:[%s1450_s3 + $0x1b8] sm:$0xff] %v751_v41  ;;  %v658_v48 = vmul.f32 0.2, %v482_v42  ;;  %v690_v49 = vmul.f32 0.2, %v610_v43  ;;  %v474_v50 = vadd.f32 %v1189_v40, %v473_v46  ;;  %v602_v51 = vadd.f32 %v1189_v40, %v601_v47 }
 0x116   :  { %v717_v52 = vmax.f32 %v461_v35, %v653_v44  ;;  %v749_v53 = vmax.f32 %v589_v36, %v685_v45  ;;  %v953_v54 = vpop.f32.mrf.mxu0  ;;  %v985_v55 = vpop.f32.mrf.mxu1 }
 0x117   :  { %v722_v56 = vmax.f32 %v482_v42, %v658_v48  ;;  %v754_v57 = vmax.f32 %v610_v43, %v690_v49  ;;  %v656_v58 = vmul.f32 0.2, %v474_v50  ;;  %v688_v59 = vmul.f32 0.2, %v602_v51 }
 0x118   :  { %782 = vst [vmem:[%s1450_s3 + $0xa8] sm:$0xff] %v717_v52  ;;  %814 = vst [vmem:[%s1450_s3 + $0x1a8] sm:$0xff] %v749_v53  ;;  %v485_v60 = vadd.f32 %v953_v54, %v1189_v40  ;;  %v613_v61 = vadd.f32 %v985_v55, %v1189_v40  ;;  %v476_v62 = vpop.f32.mrf.mxu0  ;;  %v604_v63 = vpop.f32.mrf.mxu1 }
 0x119   :  { %787 = vst [vmem:[%s1450_s3 + $0xd0] sm:$0xff] %v722_v56  ;;  %819 = vst [vmem:[%s1450_s3 + $0x1d0] sm:$0xff] %v754_v57  ;;  %v720_v0 = vmax.f32 %v474_v50, %v656_v58  ;;  %v752_v1 = vmax.f32 %v602_v51, %v688_v59  ;;  %v477_v2 = vadd.f32 %v1189_v40, %v476_v62 }
 0x11a   :  { %v605_v3 = vadd.f32 %v1189_v40, %v604_v63  ;;  %v659_v4 = vmul.f32 0.2, %v485_v60  ;;  %v691_v5 = vmul.f32 0.2, %v613_v61  ;;  %v956_v6 = vpop.f32.mrf.mxu0  ;;  %v988_v7 = vpop.f32.mrf.mxu1 }
 0x11b   :  { %785 = vst [vmem:[%s1450_s3 + $0xc0] sm:$0xff] %v720_v0  ;;  %817 = vst [vmem:[%s1450_s3 + $0x1c0] sm:$0xff] %v752_v1  ;;  %v657_v8 = vmul.f32 0.2, %v477_v2  ;;  %v498_v10 = vadd.f32 %v956_v6, %v1189_v40  ;;  %v626_v11 = vadd.f32 %v988_v7, %v1189_v40 }
 0x11c   :  { %v689_v9 = vmul.f32 0.2, %v605_v3  ;;  %v723_v12 = vmax.f32 %v485_v60, %v659_v4  ;;  %v755_v13 = vmax.f32 %v613_v61, %v691_v5  ;;  %v489_v14 = vpop.f32.mrf.mxu0  ;;  %v617_v15 = vpop.f32.mrf.mxu1 }
 0x11d   :  { %v721_v16 = vmax.f32 %v477_v2, %v657_v8  ;;  %v662_v18 = vmul.f32 0.2, %v498_v10  ;;  %v694_v19 = vmul.f32 0.2, %v626_v11  ;;  %v490_v20 = vadd.f32 %v1189_v40, %v489_v14 }
 0x11e   :  { %v753_v17 = vmax.f32 %v605_v3, %v689_v9  ;;  %788 = vst [vmem:[%s1450_s3 + $0xd8] sm:$0xff] %v723_v12  ;;  %820 = vst [vmem:[%s1450_s3 + $0x1d8] sm:$0xff] %v755_v13  ;;  %v618_v21 = vadd.f32 %v1189_v40, %v617_v15  ;;  %v957_v22 = vpop.f32.mrf.mxu0  ;;  %v989_v23 = vpop.f32.mrf.mxu1 }
 0x11f   :  { %786 = vst [vmem:[%s1450_s3 + $0xc8] sm:$0xff] %v721_v16  ;;  %v726_v24 = vmax.f32 %v498_v10, %v662_v18  ;;  %v758_v25 = vmax.f32 %v626_v11, %v694_v19  ;;  %v501_v26 = vadd.f32 %v957_v22, %v1189_v40  ;;  %v629_v27 = vadd.f32 %v989_v23, %v1189_v40 }
 0x120   :  { %818 = vst [vmem:[%s1450_s3 + $0x1c8] sm:$0xff] %v753_v17  ;;  %v660_v28 = vmul.f32 0.2, %v490_v20  ;;  %v692_v29 = vmul.f32 0.2, %v618_v21  ;;  %v492_v30 = vpop.f32.mrf.mxu0  ;;  %v620_v31 = vpop.f32.mrf.mxu1 }
 0x121   :  { %791 = vst [vmem:[%s1450_s3 + $0xf0] sm:$0xff] %v726_v24  ;;  %823 = vst [vmem:[%s1450_s3 + $0x1f0] sm:$0xff] %v758_v25  ;;  %v663_v32 = vmul.f32 0.2, %v501_v26  ;;  %v695_v33 = vmul.f32 0.2, %v629_v27  ;;  %v493_v34 = vadd.f32 %v1189_v40, %v492_v30  ;;  %v621_v35 = vadd.f32 %v1189_v40, %v620_v31 }
 0x122   :  { %v724_v36 = vmax.f32 %v490_v20, %v660_v28  ;;  %v756_v37 = vmax.f32 %v618_v21, %v692_v29 }
 0x123   :  { %v727_v38 = vmax.f32 %v501_v26, %v663_v32  ;;  %v759_v39 = vmax.f32 %v629_v27, %v695_v33  ;;  %v661_v41 = vmul.f32 0.2, %v493_v34  ;;  %v693_v42 = vmul.f32 0.2, %v621_v35 }
 0x124   :  { %789 = vst [vmem:[%s1450_s3 + $0xe0] sm:$0xff] %v724_v36  ;;  %821 = vst [vmem:[%s1450_s3 + $0x1e0] sm:$0xff] %v756_v37 }
 0x125   :  { %792 = vst [vmem:[%s1450_s3 + $0xf8] sm:$0xff] %v727_v38  ;;  %824 = vst [vmem:[%s1450_s3 + $0x1f8] sm:$0xff] %v759_v39  ;;  %v725_v40 = vmax.f32 %v493_v34, %v661_v41  ;;  %v757_v43 = vmax.f32 %v621_v35, %v693_v42 }
 0x127   :  { %790 = vst [vmem:[%s1450_s3 + $0xe8] sm:$0xff] %v725_v40  ;;  %822 = vst [vmem:[%s1450_s3 + $0x1e8] sm:$0xff] %v757_v43 }

// kernel: discriminator_forward.8
= control target key start
LH: loop header
LB: loop body
LE: loop exit
PB: predicated region body
PF: predicated region fallthrough
CT: control target
= control target key end

     0   :  { %s2690_s1 = inlined_call_operand.vmem [shape: bf16[1024,128], index: 1, kind: input, shape index: {}]   ;;  %s2691_s0 = inlined_call_operand.vmem [shape: bf16[128,1024], index: 0, kind: input, shape index: {}]   ;;  %s2692_s2 = inlined_call_operand.vmem [shape: f32[1,128], index: 2, kind: input, shape index: {}]   ;;  %s2693_s3 = inlined_call_operand.vmem [shape: f32[1,128], index: 3, kind: input, shape index: {}]   ;;  %s2694_s4 = inlined_call_operand.vmem [shape: f32[1,128], index: 4, kind: input, shape index: {}]   ;;  %s2695_s5 = inlined_call_operand.vmem [shape: f32[128,128], index: 5, kind: output, shape index: {}]  }
   0x1   :  { %v1979_v0 = vld [vmem:[%s2690_s1 + $0x78] sm:$0xff]   ;;  %v1983_v4 = vld [vmem:[%s2690_s1 + $0x70] sm:$0xff]   ;;  %v1987_v8 = vld [vmem:[%s2690_s1 + $0x68] sm:$0xff]  }
   0x2   :  { %v1980_v1 = vld [vmem:[%s2690_s1 + $0xf8] sm:$0xff]   ;;  %1723 = vmatprep.subr.bf16.mxu0 %v1979_v0  ;;  %v1984_v5 = vld [vmem:[%s2690_s1 + $0xf0] sm:$0xff]   ;;  %v1988_v9 = vld [vmem:[%s2690_s1 + $0xe8] sm:$0xff]  }
   0x3   :  { %v1981_v2 = vld [vmem:[%s2690_s1 + $0x38] sm:$0xff]   ;;  %1787 = vmatprep.subr.bf16.mxu1 %v1980_v1  ;;  %v1985_v6 = vld [vmem:[%s2690_s1 + $0x30] sm:$0xff]   ;;  %v1989_v10 = vld [vmem:[%s2690_s1 + $0x28] sm:$0xff]  }
   0x4   :  { %v1982_v3 = vld [vmem:[%s2690_s1 + $0xb8] sm:$0xff]   ;;  %1724 = vmatpush3.bf16.msra.mxu0 %v1981_v2  ;;  %v1986_v7 = vld [vmem:[%s2690_s1 + $0xb0] sm:$0xff]   ;;  %v1990_v11 = vld [vmem:[%s2690_s1 + $0xa8] sm:$0xff]  }
   0x5   :  { %1788 = vmatpush3.bf16.msra.mxu1 %v1982_v3  ;;  %1725 = vmatprep.subr.bf16.mxu0 %v1983_v4  ;;  %v1991_v12 = vld [vmem:[%s2690_s1 + $0x60] sm:$0xff]   ;;  %v1995_v16 = vld [vmem:[%s2690_s1 + $0x58] sm:$0xff]   ;;  %v1999_v20 = vld [vmem:[%s2690_s1 + $0x50] sm:$0xff]  }
   0x6   :  { %1789 = vmatprep.subr.bf16.mxu1 %v1984_v5  ;;  %v1992_v13 = vld [vmem:[%s2690_s1 + $0xe0] sm:$0xff]   ;;  %v1996_v17 = vld [vmem:[%s2690_s1 + $0xd8] sm:$0xff]   ;;  %v2000_v21 = vld [vmem:[%s2690_s1 + $0xd0] sm:$0xff]  }
   0x7   :  { %v1993_v14 = vld [vmem:[%s2690_s1 + $0x20] sm:$0xff]   ;;  %v1997_v18 = vld [vmem:[%s2690_s1 + $0x18] sm:$0xff]   ;;  %v2001_v22 = vld [vmem:[%s2690_s1 + $0x10] sm:$0xff]  }
   0x8   :  { %1726 = vmatpush3.bf16.msra.mxu0 %v1985_v6  ;;  %v1994_v15 = vld [vmem:[%s2690_s1 + $0xa0] sm:$0xff]   ;;  %v1998_v19 = vld [vmem:[%s2690_s1 + $0x98] sm:$0xff]   ;;  %v2002_v23 = vld [vmem:[%s2690_s1 + $0x90] sm:$0xff]  }
   0x9   :  { %1790 = vmatpush3.bf16.msra.mxu1 %v1986_v7  ;;  %1727 = vmatprep.subr.bf16.mxu0 %v1987_v8  ;;  %v2003_v24 = vld [vmem:[%s2690_s1 + $0x48] sm:$0xff]   ;;  %v2007_v28 = vld [vmem:[%s2690_s1 + $0x40] sm:$0xff]   ;;  %v2011_v40 = vld [vmem:[%s2690_s1 + $0x178] sm:$0xff]  }
   0xa   :  { %1791 = vmatprep.subr.bf16.mxu1 %v1988_v9  ;;  %v2004_v25 = vld [vmem:[%s2690_s1 + $0xc8] sm:$0xff]   ;;  %v2008_v29 = vld [vmem:[%s2690_s1 + $0xc0] sm:$0xff]   ;;  %v2012_v41 = vld [vmem:[%s2690_s1 + $0x138] sm:$0xff]  }
   0xb   :  { %v2005_v26 = vld [vmem:[%s2690_s1 + $0x8] sm:$0xff]   ;;  %v2009_v30 = vld [vmem:[%s2690_s1] sm:$0xff]   ;;  %v2013_v42 = vld [vmem:[%s2690_s1 + $0x1f8] sm:$0xff]  }
   0xc   :  { %1728 = vmatpush3.bf16.msra.mxu0 %v1989_v10  ;;  %v2006_v27 = vld [vmem:[%s2690_s1 + $0x88] sm:$0xff]   ;;  %v2010_v31 = vld [vmem:[%s2690_s1 + $0x80] sm:$0xff]   ;;  %v2014_v43 = vld [vmem:[%s2690_s1 + $0x1b8] sm:$0xff]  }
   0xd   :  { %1792 = vmatpush3.bf16.msra.mxu1 %v1990_v11  ;;  %1729 = vmatprep.subr.bf16.mxu0 %v1991_v12  ;;  %v22_v32 = vld [vmem:[%s2691_s0] sm:$0xff]  ;;  %v23_v34 = vld [vmem:[%s2691_s0 + $0x8] sm:$0xff]  ;;  %v2015_v50 = vld [vmem:[%s2690_s1 + $0x170] sm:$0xff]  }
   0xe   :  { %1793 = vmatprep.subr.bf16.mxu1 %v1992_v13  ;;  %v26_v33 = vld [vmem:[%s2691_s0 + $0x20] sm:$0xff]  ;;  %v27_v37 = vld [vmem:[%s2691_s0 + $0x28] sm:$0xff]  ;;  %v2016_v52 = vld [vmem:[%s2690_s1 + $0x130] sm:$0xff]  }
   0xf   :  { %v1595_v35 = vcombine.low %v22_v32, %v26_v33  ;;  %v1596_v36 = vcombine.high %v22_v32, %v26_v33  ;;  %v1597_v38 = vcombine.low %v23_v34, %v27_v37  ;;  %v1598_v39 = vcombine.high %v23_v34, %v27_v37  ;;  %v30_v44 = vld [vmem:[%s2691_s0 + $0x40] sm:$0xff]  ;;  %v31_v47 = vld [vmem:[%s2691_s0 + $0x48] sm:$0xff]  ;;  %v2017_v54 = vld [vmem:[%s2690_s1 + $0x1f0] sm:$0xff]  }
  0x10   :  { %1730 = vmatpush3.bf16.msra.mxu0 %v1993_v14  ;;  %v34_v45 = vld [vmem:[%s2691_s0 + $0x60] sm:$0xff]  ;;  %v35_v48 = vld [vmem:[%s2691_s0 + $0x68] sm:$0xff]  ;;  %v2018_v55 = vld [vmem:[%s2690_s1 + $0x1b0] sm:$0xff]  }
  0x11   :  { %1794 = vmatpush3.bf16.msra.mxu1 %v1994_v15  ;;  %1731 = vmatprep.subr.bf16.mxu0 %v1995_v16  ;;  %v1604_v46 = vcombine.high %v30_v44, %v34_v45  ;;  %v1606_v49 = vcombine.high %v31_v47, %v35_v48  ;;  %v1603_v51 = vcombine.low %v30_v44, %v34_v45  ;;  %v38_v56 = vld [vmem:[%s2691_s0 + $0x80] sm:$0xff]  ;;  %v39_v58 = vld [vmem:[%s2691_s0 + $0x88] sm:$0xff]  ;;  %v2033_v32 = vld [vmem:[%s2690_s1 + $0x1d0] sm:$0xff]  }
  0x12   :  { %1795 = vmatprep.subr.bf16.mxu1 %v1996_v17  ;;  %957 = vmatprep.mubr.bf16.mxu0 %v1596_v36  ;;  %v1605_v53 = vcombine.low %v31_v47, %v35_v48  ;;  %v42_v57 = vld [vmem:[%s2691_s0 + $0xa0] sm:$0xff]  ;;  %v43_v59 = vld [vmem:[%s2691_s0 + $0xa8] sm:$0xff]  ;;  %v2034_v33 = vld [vmem:[%s2690_s1 + $0x190] sm:$0xff]  }
  0x13   :  { %1054 = vmatprep.mubr.bf16.mxu1 %v1598_v39  ;;  %v1612_v60 = vcombine.high %v38_v56, %v42_v57  ;;  %v1614_v61 = vcombine.high %v39_v58, %v43_v59  ;;  %v2019_v62 = vld [vmem:[%s2690_s1 + $0x168] sm:$0xff]   ;;  %v1611_v2 = vcombine.low %v38_v56, %v42_v57  ;;  %v46_v3 = vld [vmem:[%s2691_s0 + $0xc0] sm:$0xff]  ;;  %v1613_v6 = vcombine.low %v39_v58, %v43_v59 }
  0x14   :  { %1732 = vmatpush3.bf16.msra.mxu0 %v1997_v18  ;;  %v2020_v63 = vld [vmem:[%s2690_s1 + $0x128] sm:$0xff]   ;;  %v50_v4 = vld [vmem:[%s2691_s0 + $0xe0] sm:$0xff]  ;;  %v2027_v18 = vld [vmem:[%s2690_s1 + $0x158] sm:$0xff]  }
  0x15   :  { %1796 = vmatpush3.bf16.msra.mxu1 %v1998_v19  ;;  %1733 = vmatprep.subr.bf16.mxu0 %v1999_v20  ;;  %v2021_v0 = vld [vmem:[%s2690_s1 + $0x1e8] sm:$0xff]   ;;  %v1620_v7 = vcombine.high %v46_v3, %v50_v4  ;;  %v2023_v10 = vld [vmem:[%s2690_s1 + $0x160] sm:$0xff]   ;;  %v1619_v19 = vcombine.low %v46_v3, %v50_v4  ;;  %v2028_v20 = vld [vmem:[%s2690_s1 + $0x118] sm:$0xff]  }
  0x16   :  { %1797 = vmatprep.subr.bf16.mxu1 %v2000_v21  ;;  %v2022_v1 = vld [vmem:[%s2690_s1 + $0x1a8] sm:$0xff]   ;;  %v2024_v11 = vld [vmem:[%s2690_s1 + $0x120] sm:$0xff]  }
  0x17   :  { %v47_v5 = vld [vmem:[%s2691_s0 + $0xc8] sm:$0xff]  ;;  %v2025_v12 = vld [vmem:[%s2690_s1 + $0x1e0] sm:$0xff]  }
  0x18   :  { %1734 = vmatpush3.bf16.msra.mxu0 %v2001_v22  ;;  %v51_v8 = vld [vmem:[%s2691_s0 + $0xe8] sm:$0xff]  ;;  %v2026_v13 = vld [vmem:[%s2690_s1 + $0x1a0] sm:$0xff]  }
  0x19   :  { %1798 = vmatpush3.bf16.msra.mxu1 %v2002_v23  ;;  %1735 = vmatprep.subr.bf16.mxu0 %v2003_v24  ;;  %v1622_v9 = vcombine.high %v47_v5, %v51_v8  ;;  %v54_v14 = vld [vmem:[%s2691_s0 + $0x100] sm:$0xff]  ;;  %v55_v16 = vld [vmem:[%s2691_s0 + $0x108] sm:$0xff]  ;;  %v1621_v21 = vcombine.low %v47_v5, %v51_v8  ;;  %v2029_v23 = vld [vmem:[%s2690_s1 + $0x1d8] sm:$0xff]  }
  0x1a   :  { %1799 = vmatprep.subr.bf16.mxu1 %v2004_v25  ;;  %v58_v15 = vld [vmem:[%s2691_s0 + $0x120] sm:$0xff]  ;;  %v59_v17 = vld [vmem:[%s2691_s0 + $0x128] sm:$0xff]  ;;  %v2030_v25 = vld [vmem:[%s2690_s1 + $0x198] sm:$0xff]  }
  0x1b   :  { %v1628_v22 = vcombine.high %v54_v14, %v58_v15  ;;  %v1630_v24 = vcombine.high %v55_v16, %v59_v17  ;;  %v1627_v34 = vcombine.low %v54_v14, %v58_v15  ;;  %v2036_v39 = vld [vmem:[%s2690_s1 + $0x108] sm:$0xff]   ;;  %v2040_v48 = vld [vmem:[%s2690_s1 + $0x100] sm:$0xff]   ;;  %v33_v8 = vld [vmem:[%s2691_s0 + $0x58] sm:$0xff] }
  0x1c   :  { %1736 = vmatpush3.bf16.msra.mxu0 %v2005_v26  ;;  %v62_v26 = vld [vmem:[%s2691_s0 + $0x140] sm:$0xff]  ;;  %v71_v44 = vld [vmem:[%s2691_s0 + $0x188] sm:$0xff]  ;;  %v40_v14 = vld [vmem:[%s2691_s0 + $0x90] sm:$0xff] }
  0x1d   :  { %1800 = vmatpush3.bf16.msra.mxu1 %v2006_v27  ;;  %1737 = vmatprep.subr.bf16.mxu0 %v2007_v28  ;;  %v66_v27 = vld [vmem:[%s2691_s0 + $0x160] sm:$0xff]  ;;  %v2031_v28 = vld [vmem:[%s2690_s1 + $0x150] sm:$0xff]   ;;  %v75_v45 = vld [vmem:[%s2691_s0 + $0x1a8] sm:$0xff] }
  0x1e   :  { %1801 = vmatprep.subr.bf16.mxu1 %v2008_v29  ;;  %v63_v29 = vld [vmem:[%s2691_s0 + $0x148] sm:$0xff]  ;;  %v1636_v36 = vcombine.high %v62_v26, %v66_v27  ;;  %v1635_v47 = vcombine.low %v62_v26, %v66_v27  ;;  %v1645_v59 = vcombine.low %v71_v44, %v75_v45  ;;  %v44_v15 = vld [vmem:[%s2691_s0 + $0xb0] sm:$0xff] }
  0x1f   :  { %v79_v56 = vld [vmem:[%s2691_s0 + $0x1c8] sm:$0xff]  ;;  %v1615_v26 = vcombine.low %v40_v14, %v44_v15 }
  0x20   :  { %1738 = vmatpush3.bf16.msra.mxu0 %v2009_v30  ;;  %v67_v30 = vld [vmem:[%s2691_s0 + $0x168] sm:$0xff] }
  0x21   :  { %1802 = vmatpush3.bf16.msra.mxu1 %v2010_v31  ;;  %1851 = vmatprep.subr.bf16.mxu0 %v2011_v40  ;;  %v2032_v31 = vld [vmem:[%s2690_s1 + $0x110] sm:$0xff]   ;;  %v1638_v37 = vcombine.high %v63_v29, %v67_v30  ;;  %v2037_v40 = vld [vmem:[%s2690_s1 + $0x1c8] sm:$0xff]  }
  0x22   :  { %1915 = vmatprep.subr.bf16.mxu1 %v2013_v42  ;;  %v74_v42 = vld [vmem:[%s2691_s0 + $0x1a0] sm:$0xff]  ;;  %v83_v57 = vld [vmem:[%s2691_s0 + $0x1e8] sm:$0xff] }
  0x23   :  { %958 = vmatmul.mubr.bf16.vlgmr.msra.gmra.mxu0 %v1595_v35  ;;  %v1629_v35 = vcombine.low %v55_v16, %v59_v17  ;;  %v1653_v3 = vcombine.low %v79_v56, %v83_v57  ;;  %v41_v16 = vld [vmem:[%s2691_s0 + $0x98] sm:$0xff] }
  0x24   :  { %1055 = vmatmul.mubr.bf16.vlgmr.msra.gmra.mxu1 %v1597_v38  ;;  %1852 = vmatpush3.bf16.msra.mxu0 %v2012_v41  ;;  %v2035_v38 = vld [vmem:[%s2690_s1 + $0x148] sm:$0xff]   ;;  %v70_v41 = vld [vmem:[%s2691_s0 + $0x180] sm:$0xff]  ;;  %v45_v17 = vld [vmem:[%s2691_s0 + $0xb8] sm:$0xff] }
  0x25   :  { %1916 = vmatpush3.bf16.msra.mxu1 %v2014_v43  ;;  %965 = vmatprep.mubr.bf16.mxu0 %v1604_v46  ;;  %v2038_v43 = vld [vmem:[%s2690_s1 + $0x188] sm:$0xff]   ;;  %v2039_v46 = vld [vmem:[%s2690_s1 + $0x140] sm:$0xff]   ;;  %v1643_v58 = vcombine.low %v70_v41, %v74_v42  ;;  %v1617_v27 = vcombine.low %v41_v16, %v45_v17 }
  0x26   :  { %1062 = vmatprep.mubr.bf16.mxu1 %v1606_v49  ;;  %1853 = vmatprep.subr.bf16.mxu0 %v2015_v50  ;;  %v1637_v49 = vcombine.low %v63_v29, %v67_v30  ;;  %v1644_v50 = vcombine.high %v70_v41, %v74_v42  ;;  %v56_v30 = vld [vmem:[%s2691_s0 + $0x110] sm:$0xff]  ;;  %v69_v41 = vld [vmem:[%s2691_s0 + $0x178] sm:$0xff] }
  0x27   :  { %1917 = vmatprep.subr.bf16.mxu1 %v2017_v54  ;;  %v78_v54 = vld [vmem:[%s2691_s0 + $0x1c0] sm:$0xff] }
  0x28   :  { %1854 = vmatpush3.bf16.msra.mxu0 %v2016_v52  ;;  %v1646_v52 = vcombine.high %v71_v44, %v75_v45 }
  0x29   :  { %1918 = vmatpush3.bf16.msra.mxu1 %v2018_v55  ;;  %1855 = vmatprep.subr.bf16.mxu0 %v2019_v62  ;;  %v82_v55 = vld [vmem:[%s2691_s0 + $0x1e0] sm:$0xff]  ;;  %v24_v62 = vld [vmem:[%s2691_s0 + $0x10] sm:$0xff] }
  0x2a   :  { %1919 = vmatprep.subr.bf16.mxu1 %v2021_v0  ;;  %v25_v0 = vld [vmem:[%s2691_s0 + $0x18] sm:$0xff] }
  0x2b   :  { %966 = vmatmul.mubr.bf16.gmra.mxu0 %v1603_v51  ;;  %v2041_v51 = vld [vmem:[%s2690_s1 + $0x1c0] sm:$0xff]  }
  0x2c   :  { %1063 = vmatmul.mubr.bf16.gmra.mxu1 %v1605_v53  ;;  %973 = vmatprep.mubr.bf16.mxu0 %v1612_v60  ;;  %v2042_v53 = vld [vmem:[%s2690_s1 + $0x180] sm:$0xff]   ;;  %v1652_v60 = vcombine.high %v78_v54, %v82_v55 }
  0x2d   :  { %1070 = vmatprep.mubr.bf16.mxu1 %v1614_v61  ;;  %1856 = vmatpush3.bf16.msra.mxu0 %v2020_v63  ;;  %v1654_v61 = vcombine.high %v79_v56, %v83_v57  ;;  %v28_v63 = vld [vmem:[%s2691_s0 + $0x30] sm:$0xff]  ;;  %v81_v56 = vld [vmem:[%s2691_s0 + $0x1d8] sm:$0xff] }
  0x2e   :  { %1920 = vmatpush3.bf16.msra.mxu1 %v2022_v1  ;;  %1857 = vmatprep.subr.bf16.mxu0 %v2023_v10  ;;  %v29_v1 = vld [vmem:[%s2691_s0 + $0x38] sm:$0xff]  ;;  %v1600_v4 = vcombine.high %v24_v62, %v28_v63  ;;  %v1599_v10 = vcombine.low %v24_v62, %v28_v63 }
  0x2f   :  { %1921 = vmatprep.subr.bf16.mxu1 %v2025_v12  ;;  %v1602_v5 = vcombine.high %v25_v0, %v29_v1  ;;  %v85_v57 = vld [vmem:[%s2691_s0 + $0x1f8] sm:$0xff] }
  0x30   :  { %v1657_v63 = vcombine.low %v81_v56, %v85_v57 }
  0x31   :  { %1858 = vmatpush3.bf16.msra.mxu0 %v2024_v11  ;;  %v1601_v11 = vcombine.low %v25_v0, %v29_v1 }
  0x32   :  { %1922 = vmatpush3.bf16.msra.mxu1 %v2026_v13  ;;  %1859 = vmatprep.subr.bf16.mxu0 %v2027_v18 }
  0x33   :  { %974 = vmatmul.mubr.bf16.gmra.mxu0 %v1611_v2  ;;  %1923 = vmatprep.subr.bf16.mxu1 %v2029_v23  ;;  %v1651_v2 = vcombine.low %v78_v54, %v82_v55  ;;  %v52_v23 = vld [vmem:[%s2691_s0 + $0xf0] sm:$0xff] }
  0x34   :  { %1071 = vmatmul.mubr.bf16.gmra.mxu1 %v1613_v6  ;;  %981 = vmatprep.mubr.bf16.mxu0 %v1620_v7  ;;  %v32_v6 = vld [vmem:[%s2691_s0 + $0x50] sm:$0xff] }
  0x35   :  { %1078 = vmatprep.mubr.bf16.mxu1 %v1622_v9  ;;  %1860 = vmatpush3.bf16.msra.mxu0 %v2028_v20  ;;  %v36_v7 = vld [vmem:[%s2691_s0 + $0x70] sm:$0xff]  ;;  %v37_v9 = vld [vmem:[%s2691_s0 + $0x78] sm:$0xff]  ;;  %v1616_v20 = vcombine.high %v40_v14, %v44_v15 }
  0x36   :  { %1924 = vmatpush3.bf16.msra.mxu1 %v2030_v25  ;;  %1861 = vmatprep.subr.bf16.mxu0 %v2031_v28  ;;  %v1608_v12 = vcombine.high %v32_v6, %v36_v7  ;;  %v1610_v13 = vcombine.high %v33_v8, %v37_v9  ;;  %v1607_v18 = vcombine.low %v32_v6, %v36_v7  ;;  %v53_v25 = vld [vmem:[%s2691_s0 + $0xf8] sm:$0xff]  ;;  %v80_v54 = vld [vmem:[%s2691_s0 + $0x1d0] sm:$0xff] }
  0x37   :  { %1925 = vmatprep.subr.bf16.mxu1 %v2033_v32  ;;  %v57_v32 = vld [vmem:[%s2691_s0 + $0x118] sm:$0xff]  ;;  %v84_v55 = vld [vmem:[%s2691_s0 + $0x1f0] sm:$0xff] }
  0x38   :  { %v1655_v62 = vcombine.low %v80_v54, %v84_v55 }
  0x39   :  { %1862 = vmatpush3.bf16.msra.mxu0 %v2032_v31  ;;  %v60_v31 = vld [vmem:[%s2691_s0 + $0x130] sm:$0xff] }
  0x3a   :  { %1926 = vmatpush3.bf16.msra.mxu1 %v2034_v33  ;;  %1863 = vmatprep.subr.bf16.mxu0 %v2035_v38  ;;  %v61_v33 = vld [vmem:[%s2691_s0 + $0x138] sm:$0xff]  ;;  %v64_v38 = vld [vmem:[%s2691_s0 + $0x150] sm:$0xff]  ;;  %v1631_v42 = vcombine.low %v56_v30, %v60_v31 }
  0x3b   :  { %982 = vmatmul.mubr.bf16.gmra.mxu0 %v1619_v19  ;;  %1927 = vmatprep.subr.bf16.mxu1 %v2037_v40  ;;  %v1609_v19 = vcombine.low %v33_v8, %v37_v9  ;;  %v65_v40 = vld [vmem:[%s2691_s0 + $0x158] sm:$0xff] }
  0x3c   :  { %1079 = vmatmul.mubr.bf16.gmra.mxu1 %v1621_v21  ;;  %989 = vmatprep.mubr.bf16.mxu0 %v1628_v22  ;;  %v1618_v21 = vcombine.high %v41_v16, %v45_v17  ;;  %v48_v22 = vld [vmem:[%s2691_s0 + $0xd0] sm:$0xff]  ;;  %v1642_v45 = vcombine.high %v65_v40, %v69_v41 }
  0x3d   :  { %1086 = vmatprep.mubr.bf16.mxu1 %v1630_v24  ;;  %1864 = vmatpush3.bf16.msra.mxu0 %v2036_v39  ;;  %v49_v24 = vld [vmem:[%s2691_s0 + $0xd8] sm:$0xff]  ;;  %v1624_v28 = vcombine.high %v48_v22, %v52_v23  ;;  %v68_v39 = vld [vmem:[%s2691_s0 + $0x170] sm:$0xff] }
  0x3e   :  { %1928 = vmatpush3.bf16.msra.mxu1 %v2038_v43  ;;  %1865 = vmatprep.subr.bf16.mxu0 %v2039_v46  ;;  %v1626_v29 = vcombine.high %v49_v24, %v53_v25  ;;  %v1633_v43 = vcombine.low %v57_v32, %v61_v33  ;;  %v1640_v44 = vcombine.high %v64_v38, %v68_v39  ;;  %v72_v46 = vld [vmem:[%s2691_s0 + $0x190] sm:$0xff] }
  0x3f   :  { %1929 = vmatprep.subr.bf16.mxu1 %v2041_v51  ;;  %v1641_v51 = vcombine.low %v65_v40, %v69_v41 }
  0x41   :  { %1866 = vmatpush3.bf16.msra.mxu0 %v2040_v48  ;;  %v73_v48 = vld [vmem:[%s2691_s0 + $0x198] sm:$0xff] }
  0x42   :  { %1930 = vmatpush3.bf16.msra.mxu1 %v2042_v53 }
  0x43   :  { %990 = vmatmul.mubr.bf16.gmra.mxu0 %v1627_v34  ;;  %v1623_v34 = vcombine.low %v48_v22, %v52_v23 }
  0x44   :  { %1087 = vmatmul.mubr.bf16.gmra.mxu1 %v1629_v35  ;;  %997 = vmatprep.mubr.bf16.mxu0 %v1636_v36  ;;  %v1625_v35 = vcombine.low %v49_v24, %v53_v25  ;;  %v1632_v36 = vcombine.high %v56_v30, %v60_v31 }
  0x45   :  { %1094 = vmatprep.mubr.bf16.mxu1 %v1638_v37  ;;  %v1634_v37 = vcombine.high %v57_v32, %v61_v33 }
  0x4b   :  { %998 = vmatmul.mubr.bf16.gmra.mxu0 %v1635_v47  ;;  %v76_v47 = vld [vmem:[%s2691_s0 + $0x1b0] sm:$0xff] }
  0x4c   :  { %1095 = vmatmul.mubr.bf16.gmra.mxu1 %v1637_v49  ;;  %1005 = vmatprep.mubr.bf16.mxu0 %v1644_v50  ;;  %v77_v49 = vld [vmem:[%s2691_s0 + $0x1b8] sm:$0xff]  ;;  %v1639_v50 = vcombine.low %v64_v38, %v68_v39 }
  0x4d   :  { %1102 = vmatprep.mubr.bf16.mxu1 %v1646_v52  ;;  %v1648_v52 = vcombine.high %v72_v46, %v76_v47  ;;  %v1650_v53 = vcombine.high %v73_v48, %v77_v49 }
  0x53   :  { %1006 = vmatmul.mubr.bf16.gmra.mxu0 %v1643_v58  ;;  %v1647_v58 = vcombine.low %v72_v46, %v76_v47 }
  0x54   :  { %1103 = vmatmul.mubr.bf16.gmra.mxu1 %v1645_v59  ;;  %1013 = vmatprep.mubr.bf16.mxu0 %v1652_v60  ;;  %v1649_v59 = vcombine.low %v73_v48, %v77_v49  ;;  %v1656_v60 = vcombine.high %v80_v54, %v84_v55 }
  0x55   :  { %1110 = vmatprep.mubr.bf16.mxu1 %v1654_v61  ;;  %v1658_v61 = vcombine.high %v81_v56, %v85_v57 }
  0x5b   :  { %1014 = vmatmul.mubr.bf16.gmra.mxu0 %v1651_v2  ;;  %v2462_v2 = vld [vmem:[%s2692_s2] ss:$0 sm:$0xff] }
  0x5c   :  { %1111 = vmatmul.mubr.bf16.gmra.mxu1 %v1653_v3  ;;  %1151 = vmatprep.mubr.bf16.mxu0 %v1600_v4 }
  0x5d   :  { %1248 = vmatprep.mubr.bf16.mxu1 %v1602_v5 }
  0x63   :  { %1152 = vmatmul.mubr.bf16.vlgmr.msra.gmra.mxu0 %v1599_v10 }
  0x64   :  { %1249 = vmatmul.mubr.bf16.vlgmr.msra.gmra.mxu1 %v1601_v11  ;;  %1159 = vmatprep.mubr.bf16.mxu0 %v1608_v12 }
  0x65   :  { %1256 = vmatprep.mubr.bf16.mxu1 %v1610_v13 }
  0x6b   :  { %1160 = vmatmul.mubr.bf16.gmra.mxu0 %v1607_v18 }
  0x6c   :  { %1257 = vmatmul.mubr.bf16.gmra.mxu1 %v1609_v19  ;;  %1167 = vmatprep.mubr.bf16.mxu0 %v1616_v20 }
  0x6d   :  { %1264 = vmatprep.mubr.bf16.mxu1 %v1618_v21 }
  0x73   :  { %1168 = vmatmul.mubr.bf16.gmra.mxu0 %v1615_v26 }
  0x74   :  { %1265 = vmatmul.mubr.bf16.gmra.mxu1 %v1617_v27  ;;  %1175 = vmatprep.mubr.bf16.mxu0 %v1624_v28 }
  0x75   :  { %1272 = vmatprep.mubr.bf16.mxu1 %v1626_v29 }
  0x7b   :  { %1176 = vmatmul.mubr.bf16.gmra.mxu0 %v1623_v34 }
  0x7c   :  { %1273 = vmatmul.mubr.bf16.gmra.mxu1 %v1625_v35  ;;  %1183 = vmatprep.mubr.bf16.mxu0 %v1632_v36 }
  0x7d   :  { %1280 = vmatprep.mubr.bf16.mxu1 %v1634_v37 }
  0x83   :  { %1184 = vmatmul.mubr.bf16.gmra.mxu0 %v1631_v42 }
  0x84   :  { %1281 = vmatmul.mubr.bf16.gmra.mxu1 %v1633_v43  ;;  %1191 = vmatprep.mubr.bf16.mxu0 %v1640_v44 }
  0x85   :  { %1288 = vmatprep.mubr.bf16.mxu1 %v1642_v45 }
  0x8b   :  { %1192 = vmatmul.mubr.bf16.gmra.mxu0 %v1639_v50 }
  0x8c   :  { %1289 = vmatmul.mubr.bf16.gmra.mxu1 %v1641_v51  ;;  %1199 = vmatprep.mubr.bf16.mxu0 %v1648_v52 }
  0x8d   :  { %1296 = vmatprep.mubr.bf16.mxu1 %v1650_v53 }
  0x93   :  { %1200 = vmatmul.mubr.bf16.gmra.mxu0 %v1647_v58 }
  0x94   :  { %1297 = vmatmul.mubr.bf16.gmra.mxu1 %v1649_v59  ;;  %1207 = vmatprep.mubr.bf16.mxu0 %v1656_v60 }
  0x95   :  { %1304 = vmatprep.mubr.bf16.mxu1 %v1658_v61 }
  0x9b   :  { %1208 = vmatmul.mubr.bf16.gmra.mxu0 %v1655_v62 }
  0x9c   :  { %1305 = vmatmul.mubr.bf16.gmra.mxu1 %v1657_v63 }
  0xe3   :  { %v1739_v0 = vpop.f32.mrf.mxu0 }
  0xe4   :  { %v1803_v1 = vpop.f32.mrf.mxu1 }
  0xe5   :  { %v1740_v3 = vpop.f32.mrf.mxu0 }
  0xe6   :  { %v1741_v4 = vadd.f32 %v1740_v3, %v1739_v0  ;;  %v1804_v5 = vpop.f32.mrf.mxu1 }
  0xe7   :  { %v1805_v6 = vadd.f32 %v1804_v5, %v1803_v1  ;;  %v1742_v7 = vpop.f32.mrf.mxu0 }
  0xe8   :  { %v960_v8 = vadd.f32 %v1741_v4, %v2462_v2  ;;  %v1806_v9 = vpop.f32.mrf.mxu1 }
  0xe9   :  { %v1743_v10 = vpop.f32.mrf.mxu0 }
  0xea   :  { %v2465_v11 = vadd.f32 %v1805_v6, %v960_v8  ;;  %v1744_v12 = vadd.f32 %v1743_v10, %v1742_v7  ;;  %v1807_v13 = vpop.f32.mrf.mxu1 }
  0xeb   :  { %v1808_v14 = vadd.f32 %v1807_v13, %v1806_v9  ;;  %v1745_v15 = vpop.f32.mrf.mxu0 }
  0xec   :  { %v963_v16 = vadd.f32 %v1744_v12, %v2462_v2  ;;  %v1809_v17 = vpop.f32.mrf.mxu1 }
  0xed   :  { %v1746_v18 = vpop.f32.mrf.mxu0 }
  0xee   :  { %v2468_v19 = vadd.f32 %v1808_v14, %v963_v16  ;;  %v1747_v20 = vadd.f32 %v1746_v18, %v1745_v15  ;;  %v1810_v21 = vpop.f32.mrf.mxu1 }
  0xef   :  { %v1811_v22 = vadd.f32 %v1810_v21, %v1809_v17  ;;  %v1748_v23 = vpop.f32.mrf.mxu0 }
  0xf0   :  { %v968_v24 = vadd.f32 %v1747_v20, %v2462_v2  ;;  %v1812_v25 = vpop.f32.mrf.mxu1 }
  0xf1   :  { %v1749_v26 = vpop.f32.mrf.mxu0 }
  0xf2   :  { %v2471_v27 = vadd.f32 %v1811_v22, %v968_v24  ;;  %v1750_v28 = vadd.f32 %v1749_v26, %v1748_v23  ;;  %v1813_v29 = vpop.f32.mrf.mxu1 }
  0xf3   :  { %v1814_v30 = vadd.f32 %v1813_v29, %v1812_v25  ;;  %v1751_v31 = vpop.f32.mrf.mxu0 }
  0xf4   :  { %v971_v32 = vadd.f32 %v1750_v28, %v2462_v2  ;;  %v1815_v33 = vpop.f32.mrf.mxu1 }
  0xf5   :  { %v1752_v34 = vpop.f32.mrf.mxu0 }
  0xf6   :  { %v2474_v35 = vadd.f32 %v1814_v30, %v971_v32  ;;  %v1753_v36 = vadd.f32 %v1752_v34, %v1751_v31  ;;  %v1816_v37 = vpop.f32.mrf.mxu1 }
  0xf7   :  { %v1817_v38 = vadd.f32 %v1816_v37, %v1815_v33  ;;  %v1754_v39 = vpop.f32.mrf.mxu0 }
  0xf8   :  { %v976_v40 = vadd.f32 %v1753_v36, %v2462_v2  ;;  %v1818_v41 = vpop.f32.mrf.mxu1 }
  0xf9   :  { %v1755_v42 = vpop.f32.mrf.mxu0 }
  0xfa   :  { %v2477_v43 = vadd.f32 %v1817_v38, %v976_v40  ;;  %v1756_v44 = vadd.f32 %v1755_v42, %v1754_v39  ;;  %v1819_v45 = vpop.f32.mrf.mxu1 }
  0xfb   :  { %v1820_v46 = vadd.f32 %v1819_v45, %v1818_v41  ;;  %v1757_v47 = vpop.f32.mrf.mxu0 }
  0xfc   :  { %v979_v48 = vadd.f32 %v1756_v44, %v2462_v2  ;;  %v1821_v49 = vpop.f32.mrf.mxu1 }
  0xfd   :  { %v1758_v50 = vpop.f32.mrf.mxu0 }
  0xfe   :  { %v2480_v51 = vadd.f32 %v1820_v46, %v979_v48  ;;  %v1759_v52 = vadd.f32 %v1758_v50, %v1757_v47  ;;  %v1822_v53 = vpop.f32.mrf.mxu1 }
  0xff   :  { %v1823_v54 = vadd.f32 %v1822_v53, %v1821_v49  ;;  %v1760_v55 = vpop.f32.mrf.mxu0 }
 0x100   :  { %v984_v56 = vadd.f32 %v1759_v52, %v2462_v2  ;;  %v1824_v57 = vpop.f32.mrf.mxu1 }
 0x101   :  { %v1761_v58 = vpop.f32.mrf.mxu0 }
 0x102   :  { %v2483_v59 = vadd.f32 %v1823_v54, %v984_v56  ;;  %v1762_v60 = vadd.f32 %v1761_v58, %v1760_v55  ;;  %v1825_v61 = vpop.f32.mrf.mxu1 }
 0x103   :  { %v1826_v62 = vadd.f32 %v1825_v61, %v1824_v57  ;;  %v1763_v63 = vpop.f32.mrf.mxu0 }
 0x104   :  { %v987_v0 = vadd.f32 %v1762_v60, %v2462_v2  ;;  %v1827_v1 = vpop.f32.mrf.mxu1 }
 0x105   :  { %v1764_v3 = vpop.f32.mrf.mxu0 }
 0x106   :  { %v2486_v4 = vadd.f32 %v1826_v62, %v987_v0  ;;  %v1765_v5 = vadd.f32 %v1764_v3, %v1763_v63  ;;  %v1828_v6 = vpop.f32.mrf.mxu1 }
 0x107   :  { %v1829_v7 = vadd.f32 %v1828_v6, %v1827_v1  ;;  %v1766_v8 = vpop.f32.mrf.mxu0 }
 0x108   :  { %v992_v9 = vadd.f32 %v1765_v5, %v2462_v2  ;;  %v1830_v10 = vpop.f32.mrf.mxu1 }
 0x109   :  { %v1767_v12 = vpop.f32.mrf.mxu0 }
 0x10a   :  { %v2489_v13 = vadd.f32 %v1829_v7, %v992_v9  ;;  %v1768_v14 = vadd.f32 %v1767_v12, %v1766_v8  ;;  %v1831_v15 = vpop.f32.mrf.mxu1 }
 0x10b   :  { %v1832_v16 = vadd.f32 %v1831_v15, %v1830_v10  ;;  %v1769_v17 = vpop.f32.mrf.mxu0 }
 0x10c   :  { %v995_v18 = vadd.f32 %v1768_v14, %v2462_v2  ;;  %v1833_v20 = vpop.f32.mrf.mxu1 }
 0x10d   :  { %v1770_v21 = vpop.f32.mrf.mxu0 }
 0x10e   :  { %v2492_v22 = vadd.f32 %v1832_v16, %v995_v18  ;;  %v1771_v23 = vadd.f32 %v1770_v21, %v1769_v17  ;;  %v1834_v24 = vpop.f32.mrf.mxu1 }
 0x10f   :  { %v1835_v25 = vadd.f32 %v1834_v24, %v1833_v20  ;;  %v1772_v26 = vpop.f32.mrf.mxu0 }
 0x110   :  { %v1000_v28 = vadd.f32 %v1771_v23, %v2462_v2  ;;  %v1836_v29 = vpop.f32.mrf.mxu1 }
 0x111   :  { %v1773_v30 = vpop.f32.mrf.mxu0 }
 0x112   :  { %v2495_v31 = vadd.f32 %v1835_v25, %v1000_v28  ;;  %v1774_v32 = vadd.f32 %v1773_v30, %v1772_v26  ;;  %v1837_v33 = vpop.f32.mrf.mxu1 }
 0x113   :  { %v1838_v34 = vadd.f32 %v1837_v33, %v1836_v29  ;;  %v1775_v36 = vpop.f32.mrf.mxu0 }
 0x114   :  { %v1003_v37 = vadd.f32 %v1774_v32, %v2462_v2  ;;  %v1839_v38 = vpop.f32.mrf.mxu1 }
 0x115   :  { %v1776_v39 = vpop.f32.mrf.mxu0 }
 0x116   :  { %v2498_v40 = vadd.f32 %v1838_v34, %v1003_v37  ;;  %v1777_v41 = vadd.f32 %v1776_v39, %v1775_v36  ;;  %v1840_v42 = vpop.f32.mrf.mxu1 }
 0x117   :  { %v1841_v44 = vadd.f32 %v1840_v42, %v1839_v38  ;;  %v1778_v45 = vpop.f32.mrf.mxu0 }
 0x118   :  { %v1008_v46 = vadd.f32 %v1777_v41, %v2462_v2  ;;  %v1842_v47 = vpop.f32.mrf.mxu1 }
 0x119   :  { %v1779_v48 = vpop.f32.mrf.mxu0 }
 0x11a   :  { %v2501_v49 = vadd.f32 %v1841_v44, %v1008_v46  ;;  %v1780_v50 = vadd.f32 %v1779_v48, %v1778_v45  ;;  %v1843_v52 = vpop.f32.mrf.mxu1 }
 0x11b   :  { %v1844_v53 = vadd.f32 %v1843_v52, %v1842_v47  ;;  %v1781_v54 = vpop.f32.mrf.mxu0 }
 0x11c   :  { %v1011_v55 = vadd.f32 %v1780_v50, %v2462_v2  ;;  %v1845_v56 = vpop.f32.mrf.mxu1 }
 0x11d   :  { %v1782_v57 = vpop.f32.mrf.mxu0 }
 0x11e   :  { %v2504_v58 = vadd.f32 %v1844_v53, %v1011_v55  ;;  %v1783_v60 = vadd.f32 %v1782_v57, %v1781_v54  ;;  %v1846_v61 = vpop.f32.mrf.mxu1 }
 0x11f   :  { %v2506_v62 = vpop.f32.mrf.mxu0  ;;  %v1847_v0 = vadd.f32 %v1846_v61, %v1845_v56 }
 0x120   :  { %v1016_v63 = vadd.f32 %v1783_v60, %v2462_v2  ;;  %v2509_v1 = vpop.f32.mrf.mxu1 }
 0x121   :  { %v2511_v3 = vpop.f32.mrf.mxu0 }
 0x122   :  { %v2513_v5 = vadd.f32 %v1847_v0, %v1016_v63  ;;  %v2515_v6 = vpop.f32.mrf.mxu1 }
 0x123   :  { %v1867_v7 = vpop.f32.mrf.mxu0 }
 0x124   :  { %v1931_v8 = vpop.f32.mrf.mxu1 }
 0x125   :  { %v1868_v9 = vpop.f32.mrf.mxu0 }
 0x126   :  { %v1932_v10 = vpop.f32.mrf.mxu1  ;;  %v1869_v46 = vadd.f32 %v1868_v9, %v1867_v7 }
 0x127   :  { %v1870_v12 = vpop.f32.mrf.mxu0 }
 0x128   :  { %v1934_v14 = vpop.f32.mrf.mxu1  ;;  %v1154_v56 = vadd.f32 %v1869_v46, %v2465_v11 }
 0x129   :  { %v1871_v15 = vpop.f32.mrf.mxu0 }
 0x12a   :  { %v1935_v16 = vpop.f32.mrf.mxu1  ;;  %v1872_v42 = vadd.f32 %v1871_v15, %v1870_v12  ;;  %v1933_v12 = vadd.f32 %v1932_v10, %v1931_v8 }
 0x12b   :  { %v1873_v17 = vpop.f32.mrf.mxu0  ;;  %v1936_v57 = vadd.f32 %v1935_v16, %v1934_v14 }
 0x12c   :  { %v1937_v18 = vpop.f32.mrf.mxu1  ;;  %v1157_v52 = vadd.f32 %v1872_v42, %v2468_v19  ;;  %v2523_v42 = vadd.f32 %v1933_v12, %v1154_v56 }
 0x12d   :  { %v1874_v20 = vpop.f32.mrf.mxu0 }
 0x12e   :  { %v1938_v21 = vpop.f32.mrf.mxu1  ;;  %v1875_v47 = vadd.f32 %v1874_v20, %v1873_v17  ;;  %v2520_v15 = vadd.f32 %v1936_v57, %v1157_v52 }
 0x12f   :  { %v1876_v23 = vpop.f32.mrf.mxu0  ;;  %v1939_v7 = vadd.f32 %v1938_v21, %v1937_v18 }
 0x130   :  { %v1940_v24 = vpop.f32.mrf.mxu1  ;;  %v1162_v60 = vadd.f32 %v1875_v47, %v2471_v27  ;;  %v1399_v8 = vadd.f32 %v2520_v15, %v2523_v42 }
 0x131   :  { %v1877_v25 = vpop.f32.mrf.mxu0 }
 0x132   :  { %v1941_v26 = vpop.f32.mrf.mxu1  ;;  %v1878_v54 = vadd.f32 %v1877_v25, %v1876_v23  ;;  %v2525_v23 = vadd.f32 %v1939_v7, %v1162_v60 }
 0x133   :  { %v1879_v28 = vpop.f32.mrf.mxu0  ;;  %v1942_v14 = vadd.f32 %v1941_v26, %v1940_v24 }
 0x134   :  { %v1943_v29 = vpop.f32.mrf.mxu1  ;;  %v1165_v17 = vadd.f32 %v1878_v54, %v2474_v35 }
 0x135   :  { %v1880_v30 = vpop.f32.mrf.mxu0 }
 0x136   :  { %v1944_v32 = vpop.f32.mrf.mxu1  ;;  %v1881_v63 = vadd.f32 %v1880_v30, %v1879_v28  ;;  %v2530_v18 = vadd.f32 %v1942_v14, %v1165_v17 }
 0x137   :  { %v1882_v33 = vpop.f32.mrf.mxu0  ;;  %v1945_v21 = vadd.f32 %v1944_v32, %v1943_v29 }
 0x138   :  { %v1946_v34 = vpop.f32.mrf.mxu1  ;;  %v1170_v27 = vadd.f32 %v1881_v63, %v2477_v43 }
 0x139   :  { %v1883_v36 = vpop.f32.mrf.mxu0 }
 0x13a   :  { %v1947_v37 = vpop.f32.mrf.mxu1  ;;  %v1884_v20 = vadd.f32 %v1883_v36, %v1882_v33  ;;  %v1400_v33 = vadd.f32 %v1399_v8, %v2525_v23  ;;  %v2534_v46 = vadd.f32 %v1945_v21, %v1170_v27 }
 0x13b   :  { %v1885_v38 = vpop.f32.mrf.mxu0  ;;  %v1948_v24 = vadd.f32 %v1947_v37, %v1946_v34 }
 0x13c   :  { %v1949_v39 = vpop.f32.mrf.mxu1  ;;  %v1173_v35 = vadd.f32 %v1884_v20, %v2480_v51  ;;  %v1401_v51 = vadd.f32 %v1400_v33, %v2530_v18 }
 0x13d   :  { %v1886_v41 = vpop.f32.mrf.mxu0 }
 0x13e   :  { %v1950_v44 = vpop.f32.mrf.mxu1  ;;  %v1887_v16 = vadd.f32 %v1886_v41, %v1885_v38  ;;  %v2537_v47 = vadd.f32 %v1948_v24, %v1173_v35 }
 0x13f   :  { %v1888_v45 = vpop.f32.mrf.mxu0  ;;  %v1951_v52 = vadd.f32 %v1950_v44, %v1949_v39 }
 0x140   :  { %v1952_v48 = vpop.f32.mrf.mxu1  ;;  %v1178_v43 = vadd.f32 %v1887_v16, %v2483_v59  ;;  %v1402_v59 = vadd.f32 %v1401_v51, %v2534_v46 }
 0x141   :  { %v1889_v50 = vpop.f32.mrf.mxu0 }
 0x142   :  { %v1953_v53 = vpop.f32.mrf.mxu1  ;;  %v1890_v28 = vadd.f32 %v1889_v50, %v1888_v45  ;;  %v2541_v54 = vadd.f32 %v1951_v52, %v1178_v43 }
 0x143   :  { %v1891_v55 = vpop.f32.mrf.mxu0  ;;  %v1954_v56 = vadd.f32 %v1953_v53, %v1952_v48 }
 0x144   :  { %v1955_v61 = vpop.f32.mrf.mxu1  ;;  %v1181_v29 = vadd.f32 %v1890_v28, %v2486_v4  ;;  %v1403_v4 = vadd.f32 %v1402_v59, %v2537_v47 }
 0x145   :  { %v1892_v0 = vpop.f32.mrf.mxu0 }
 0x146   :  { %v1956_v9 = vpop.f32.mrf.mxu1  ;;  %v1893_v26 = vadd.f32 %v1892_v0, %v1891_v55  ;;  %v2545_v60 = vadd.f32 %v1954_v56, %v1181_v29  ;;  %v1850_v29 = vadd.f32 %v2515_v6, %v2509_v1 }
 0x147   :  { %v1894_v19 = vpop.f32.mrf.mxu0  ;;  %v1957_v39 = vadd.f32 %v1956_v9, %v1955_v61 }
 0x148   :  { %v1958_v11 = vpop.f32.mrf.mxu1  ;;  %v1186_v34 = vadd.f32 %v1893_v26, %v2489_v13  ;;  %v1404_v13 = vadd.f32 %v1403_v4, %v2541_v54 }
 0x149   :  { %v1895_v25 = vpop.f32.mrf.mxu0 }
 0x14a   :  { %v1959_v10 = vpop.f32.mrf.mxu1  ;;  %v1896_v45 = vadd.f32 %v1895_v25, %v1894_v19  ;;  %v2549_v7 = vadd.f32 %v1957_v39, %v1186_v34  ;;  %v1405_v61 = vadd.f32 %v1404_v13, %v2545_v60  ;;  %v1786_v25 = vadd.f32 %v2511_v3, %v2506_v62 }
 0x14b   :  { %v1897_v30 = vpop.f32.mrf.mxu0  ;;  %v1960_v53 = vadd.f32 %v1959_v10, %v1958_v11 }
 0x14c   :  { %v1961_v36 = vpop.f32.mrf.mxu1  ;;  %v1189_v63 = vadd.f32 %v1896_v45, %v2492_v22  ;;  %v1406_v21 = vadd.f32 %v1405_v61, %v2549_v7  ;;  %v1019_v62 = vadd.f32 %v1786_v25, %v2462_v2 }
 0x14d   :  { %v1898_v38 = vpop.f32.mrf.mxu0 }
 0x14e   :  { %v1962_v41 = vpop.f32.mrf.mxu1  ;;  %v1899_v55 = vadd.f32 %v1898_v38, %v1897_v30  ;;  %v2554_v9 = vadd.f32 %v1960_v53, %v1189_v63  ;;  %v1116_v34 = vadd.f32 %v1850_v29, %v1019_v62 }
 0x14f   :  { %v1900_v32 = vpop.f32.mrf.mxu0  ;;  %v1963_v27 = vadd.f32 %v1962_v41, %v1961_v36 }
 0x150   :  { %v1964_v50 = vpop.f32.mrf.mxu1  ;;  %v1194_v17 = vadd.f32 %v1899_v55, %v2495_v31  ;;  %v1407_v43 = vadd.f32 %v1406_v21, %v2554_v9 }
 0x151   :  { %v1901_v37 = vpop.f32.mrf.mxu0 }
 0x152   :  { %v1965_v57 = vpop.f32.mrf.mxu1  ;;  %v1902_v0 = vadd.f32 %v1901_v37, %v1900_v32  ;;  %v2560_v11 = vadd.f32 %v1963_v27, %v1194_v17 }
 0x153   :  { %v1903_v44 = vpop.f32.mrf.mxu0  ;;  %v1966_v31 = vadd.f32 %v1965_v57, %v1964_v50 }
 0x154   :  { %v1967_v12 = vpop.f32.mrf.mxu1  ;;  %v1197_v22 = vadd.f32 %v1902_v0, %v2498_v40 }
 0x155   :  { %v1904_v48 = vpop.f32.mrf.mxu0 }
 0x156   :  { %v1905_v20 = vadd.f32 %v1904_v48, %v1903_v44  ;;  %v1968_v19 = vpop.f32.mrf.mxu1  ;;  %v2563_v33 = vadd.f32 %v1966_v31, %v1197_v22 }
 0x157   :  { %v1906_v14 = vpop.f32.mrf.mxu0  ;;  %v1969_v36 = vadd.f32 %v1968_v19, %v1967_v12 }
 0x158   :  { %v1970_v16 = vpop.f32.mrf.mxu1  ;;  %v1202_v10 = vadd.f32 %v1905_v20, %v2501_v49  ;;  %v1408_v49 = vadd.f32 %v1407_v43, %v2560_v11 }
 0x159   :  { %v1907_v8 = vpop.f32.mrf.mxu0 }
 0x15a   :  { %v1908_v35 = vadd.f32 %v1907_v8, %v1906_v14  ;;  %v1971_v28 = vpop.f32.mrf.mxu1  ;;  %v2568_v26 = vadd.f32 %v1969_v36, %v1202_v10  ;;  %v1409_v2 = vadd.f32 %v1408_v49, %v2563_v33 }
 0x15b   :  { %v1909_v30 = vpop.f32.mrf.mxu0  ;;  %v1972_v38 = vadd.f32 %v1971_v28, %v1970_v16 }
 0x15c   :  { %v1205_v40 = vadd.f32 %v1908_v35, %v2504_v58  ;;  %v1973_v24 = vpop.f32.mrf.mxu1  ;;  %v1410_v57 = vadd.f32 %v1409_v2, %v2568_v26 }
 0x15d   :  { %v1910_v3 = vpop.f32.mrf.mxu0 }
 0x15e   :  { %v1911_v41 = vadd.f32 %v1910_v3, %v1909_v30  ;;  %v1974_v52 = vpop.f32.mrf.mxu1  ;;  %v2573_v51 = vadd.f32 %v1972_v38, %v1205_v40 }
 0x15f   :  { %v1912_v32 = vpop.f32.mrf.mxu0  ;;  %v1975_v45 = vadd.f32 %v1974_v52, %v1973_v24 }
 0x160   :  { %v1210_v58 = vadd.f32 %v1911_v41, %v2513_v5  ;;  %v1976_v50 = vpop.f32.mrf.mxu1  ;;  %v1411_v1 = vadd.f32 %v1410_v57, %v2573_v51 }
 0x161   :  { %v1913_v56 = vpop.f32.mrf.mxu0 }
 0x162   :  { %v2577_v37 = vadd.f32 %v1975_v45, %v1210_v58  ;;  %v1914_v59 = vadd.f32 %v1913_v56, %v1912_v32  ;;  %v1977_v55 = vpop.f32.mrf.mxu1 }
 0x163   :  { %v1978_v44 = vadd.f32 %v1977_v55, %v1976_v50 }
 0x164   :  { %v1213_v39 = vadd.f32 %v1914_v59, %v1116_v34  ;;  %v1412_v5 = vadd.f32 %v1411_v1, %v2577_v37 }
 0x166   :  { %v2581_v6 = vadd.f32 %v1978_v44, %v1213_v39 }
 0x168   :  { %v1413_v4 = vadd.f32 %v1412_v5, %v2581_v6 }
 0x16a   :  { %v1414_v63 = vrot.slane %v1413_v4, 4 }
 0x16c   :  { %v1415_v0 = vadd.f32 %v1414_v63, %v1413_v4 }
 0x16e   :  { %v1416_v12 = vrot.slane %v1415_v0, 2 }
 0x170   :  { %v1417_v48 = vadd.f32 %v1416_v12, %v1415_v0 }
 0x172   :  { %v1418_v13 = vrot.slane %v1417_v48, 1 }
 0x174   :  { %v1419_v53 = vadd.f32 %v1418_v13, %v1417_v48 }
 0x176   :  { %v2585_v17 = vmul.f32 0.0078125, %v1419_v53 }
 0x178   :  { %v1421_v20 = vsub.f32 %v2523_v42, %v2585_v17  ;;  %v1422_v19 = vsub.f32 %v2520_v15, %v2585_v17  ;;  %v1423_v14 = vsub.f32 %v2525_v23, %v2585_v17  ;;  %v1424_v22 = vsub.f32 %v2530_v18, %v2585_v17 }
 0x179   :  { %v1425_v16 = vsub.f32 %v2534_v46, %v2585_v17  ;;  %v1426_v21 = vsub.f32 %v2537_v47, %v2585_v17  ;;  %v1427_v35 = vsub.f32 %v2541_v54, %v2585_v17  ;;  %v1428_v36 = vsub.f32 %v2545_v60, %v2585_v17 }
 0x17a   :  { %v1453_v61 = vmul.f32 %v1421_v20, %v1421_v20  ;;  %v1454_v27 = vmul.f32 %v1422_v19, %v1422_v19  ;;  %v1455_v25 = vmul.f32 %v1423_v14, %v1423_v14  ;;  %v1456_v31 = vmul.f32 %v1424_v22, %v1424_v22 }
 0x17b   :  { %v1457_v28 = vmul.f32 %v1425_v16, %v1425_v16  ;;  %v1458_v40 = vmul.f32 %v1426_v21, %v1426_v21  ;;  %v1429_v43 = vsub.f32 %v2549_v7, %v2585_v17  ;;  %v1459_v62 = vmul.f32 %v1427_v35, %v1427_v35 }
 0x17c   :  { %v1469_v8 = vadd.f32 %v1454_v27, %v1453_v61  ;;  %v1430_v38 = vsub.f32 %v2554_v9, %v2585_v17  ;;  %v1460_v41 = vmul.f32 %v1428_v36, %v1428_v36  ;;  %v1431_v49 = vsub.f32 %v2560_v11, %v2585_v17 }
 0x17d   :  { %v1461_v29 = vmul.f32 %v1429_v43, %v1429_v43  ;;  %v1432_v58 = vsub.f32 %v2563_v33, %v2585_v17  ;;  %v1433_v2 = vsub.f32 %v2568_v26, %v2585_v17  ;;  %v1434_v59 = vsub.f32 %v2573_v51, %v2585_v17 }
 0x17e   :  { %v1470_v10 = vadd.f32 %v1469_v8, %v1455_v25  ;;  %v1462_v45 = vmul.f32 %v1430_v38, %v1430_v38  ;;  %v1463_v56 = vmul.f32 %v1431_v49, %v1431_v49  ;;  %v1435_v39 = vsub.f32 %v2577_v37, %v2585_v17 }
 0x17f   :  { %v1464_v55 = vmul.f32 %v1432_v58, %v1432_v58  ;;  %v1465_v44 = vmul.f32 %v1433_v2, %v1433_v2  ;;  %v1436_v5 = vsub.f32 %v2581_v6, %v2585_v17  ;;  %v1466_v4 = vmul.f32 %v1434_v59, %v1434_v59 }
 0x180   :  { %v1471_v30 = vadd.f32 %v1470_v10, %v1456_v31  ;;  %v1467_v0 = vmul.f32 %v1435_v39, %v1435_v39  ;;  %v1499_v8 = vlaneseq  ;;  %v1491_v31 = vld [vmem:[%s2693_s3] sm:$0x1] }
 0x181   :  { %v1468_v48 = vmul.f32 %v1436_v5, %v1436_v5 }
 0x182   :  { %v1472_v24 = vadd.f32 %v1471_v30, %v1457_v28  ;;  %v1500_v21 = vshrl.u32 %v1499_v8, 7  ;;  %v1495_v30 = vld [vmem:[%s2694_s4] sm:$0x1] }
 0x184   :  { %v1473_v3 = vadd.f32 %v1472_v24, %v1458_v40  ;;  %v1501_v10 = vsub.s32 0, %v1500_v21 }
 0x186   :  { %v1474_v52 = vadd.f32 %v1473_v3, %v1459_v62 }
 0x188   :  { %v1475_v32 = vadd.f32 %v1474_v52, %v1460_v41 }
 0x18a   :  { %v1476_v50 = vadd.f32 %v1475_v32, %v1461_v29 }
 0x18c   :  { %v1477_v34 = vadd.f32 %v1476_v50, %v1462_v45 }
 0x18e   :  { %v1478_v57 = vadd.f32 %v1477_v34, %v1463_v56 }
 0x190   :  { %v1479_v1 = vadd.f32 %v1478_v57, %v1464_v55 }
 0x192   :  { %v1480_v63 = vadd.f32 %v1479_v1, %v1465_v44 }
 0x194   :  { %v1481_v12 = vadd.f32 %v1480_v63, %v1466_v4 }
 0x196   :  { %v1482_v13 = vadd.f32 %v1481_v12, %v1467_v0 }
 0x198   :  { %v1483_v53 = vadd.f32 %v1482_v13, %v1468_v48 }
 0x19a   :  { %v1484_v20 = vrot.slane %v1483_v53, 4 }
 0x19c   :  { %v1485_v19 = vadd.f32 %v1484_v20, %v1483_v53 }
 0x19e   :  { %v1486_v14 = vrot.slane %v1485_v19, 2 }
 0x1a0   :  { %v1487_v61 = vadd.f32 %v1486_v14, %v1485_v19 }
 0x1a2   :  { %v1488_v27 = vrot.slane %v1487_v61, 1 }
 0x1a4   :  { %v1489_v22 = vadd.f32 %v1488_v27, %v1487_v61 }
 0x1a6   :  { %v1490_v16 = vmul.f32 0.0078125, %v1489_v22 }
 0x1a8   :  { %v1492_v25 = vadd.f32 1e-05, %v1490_v16 }
 0x1aa   :  { %2043 = vrsqrt.f32 %v1492_v25 }
 0x1b7   :  { %v2044_v35 = vpop.eup %2043 }
 0x1b8   :  { %v1494_v28 = vmul.f32 %v2044_v35, %v1491_v31 }
 0x1ba   :  { %v1496_v36 = vmul.f32 %v1494_v28, %v2585_v17  ;;  %v1502_v40 = vrot.slane %v1494_v28, %v1501_v10 }
 0x1bc   :  { %v1497_v24 = vsub.f32 %v1495_v30, %v1496_v36  ;;  %v1504_v43 = vmul.f32 %v1502_v40, %v2523_v42  ;;  %v1505_v62 = vmul.f32 %v1502_v40, %v2520_v15  ;;  %v1506_v3 = vmul.f32 %v1502_v40, %v2525_v23 }
 0x1bd   :  { %v1507_v38 = vmul.f32 %v1502_v40, %v2530_v18  ;;  %v1508_v41 = vmul.f32 %v1502_v40, %v2534_v46  ;;  %v1509_v52 = vmul.f32 %v1502_v40, %v2537_v47  ;;  %v1510_v49 = vmul.f32 %v1502_v40, %v2541_v54 }
 0x1be   :  { %v1511_v29 = vmul.f32 %v1502_v40, %v2545_v60  ;;  %v1512_v17 = vmul.f32 %v1502_v40, %v2549_v7  ;;  %v1513_v32 = vmul.f32 %v1502_v40, %v2554_v9  ;;  %v1524_v58 = vrot.slane %v1497_v24, %v1501_v10 }
 0x1bf   :  { %v1514_v42 = vmul.f32 %v1502_v40, %v2560_v11  ;;  %v1515_v15 = vmul.f32 %v1502_v40, %v2563_v33  ;;  %v1516_v23 = vmul.f32 %v1502_v40, %v2568_v26  ;;  %v1517_v18 = vmul.f32 %v1502_v40, %v2573_v51 }
 0x1c0   :  { %v1518_v46 = vmul.f32 %v1502_v40, %v2577_v37  ;;  %v1526_v47 = vadd.f32 %v1524_v58, %v1504_v43  ;;  %v1527_v45 = vadd.f32 %v1524_v58, %v1505_v62  ;;  %v1528_v54 = vadd.f32 %v1524_v58, %v1506_v3 }
 0x1c1   :  { %v1519_v60 = vmul.f32 %v1502_v40, %v2581_v6  ;;  %v1529_v50 = vadd.f32 %v1524_v58, %v1507_v38  ;;  %v1530_v7 = vadd.f32 %v1524_v58, %v1508_v41  ;;  %v1531_v2 = vadd.f32 %v1524_v58, %v1509_v52 }
 0x1c2   :  { %v1532_v9 = vadd.f32 %v1524_v58, %v1510_v49  ;;  %v1533_v56 = vadd.f32 %v1524_v58, %v1511_v29  ;;  %v1534_v34 = vadd.f32 %v1524_v58, %v1512_v17  ;;  %v1535_v11 = vadd.f32 %v1524_v58, %v1513_v32 }
 0x1c3   :  { %v1536_v59 = vadd.f32 %v1524_v58, %v1514_v42  ;;  %v1537_v33 = vadd.f32 %v1524_v58, %v1515_v15  ;;  %v1538_v55 = vadd.f32 %v1524_v58, %v1516_v23  ;;  %v1539_v26 = vadd.f32 %v1524_v58, %v1517_v18 }
 0x1c4   :  { %v1540_v57 = vadd.f32 %v1524_v58, %v1518_v46  ;;  %v1542_v51 = vmul.f32 0.2, %v1526_v47  ;;  %v1543_v39 = vmul.f32 0.2, %v1527_v45  ;;  %v1544_v37 = vmul.f32 0.2, %v1528_v54 }
 0x1c5   :  { %v1541_v44 = vadd.f32 %v1524_v58, %v1519_v60  ;;  %v1545_v1 = vmul.f32 0.2, %v1529_v50  ;;  %v1546_v5 = vmul.f32 0.2, %v1530_v7  ;;  %v1547_v4 = vmul.f32 0.2, %v1531_v2 }
 0x1c6   :  { %v1548_v6 = vmul.f32 0.2, %v1532_v9  ;;  %v1549_v63 = vmul.f32 0.2, %v1533_v56  ;;  %v1550_v0 = vmul.f32 0.2, %v1534_v34  ;;  %v1558_v12 = vmax.f32 %v1526_v47, %v1542_v51 }
 0x1c7   :  { %v1551_v48 = vmul.f32 0.2, %v1535_v11  ;;  %v1552_v13 = vmul.f32 0.2, %v1536_v59  ;;  %v1553_v53 = vmul.f32 0.2, %v1537_v33  ;;  %v1559_v20 = vmax.f32 %v1527_v45, %v1543_v39 }
 0x1c8   :  { %v1554_v19 = vmul.f32 0.2, %v1538_v55  ;;  %v1555_v14 = vmul.f32 0.2, %v1539_v26  ;;  %v1556_v61 = vmul.f32 0.2, %v1540_v57  ;;  %v1560_v27 = vmax.f32 %v1528_v54, %v1544_v37  ;;  %1574 = vst [vmem:[%s2695_s5] sm:$0xff] %v1558_v12 }
 0x1c9   :  { %v1557_v22 = vmul.f32 0.2, %v1541_v44  ;;  %v1561_v16 = vmax.f32 %v1529_v50, %v1545_v1  ;;  %v1562_v25 = vmax.f32 %v1530_v7, %v1546_v5  ;;  %v1563_v8 = vmax.f32 %v1531_v2, %v1547_v4  ;;  %1575 = vst [vmem:[%s2695_s5 + $0x8] sm:$0xff] %v1559_v20 }
 0x1ca   :  { %v1564_v21 = vmax.f32 %v1532_v9, %v1548_v6  ;;  %v1565_v31 = vmax.f32 %v1533_v56, %v1549_v63  ;;  %v1566_v10 = vmax.f32 %v1534_v34, %v1550_v0  ;;  %v1567_v35 = vmax.f32 %v1535_v11, %v1551_v48  ;;  %1576 = vst [vmem:[%s2695_s5 + $0x10] sm:$0xff] %v1560_v27 }
 0x1cb   :  { %v1568_v28 = vmax.f32 %v1536_v59, %v1552_v13  ;;  %v1569_v30 = vmax.f32 %v1537_v33, %v1553_v53  ;;  %v1570_v36 = vmax.f32 %v1538_v55, %v1554_v19  ;;  %v1571_v40 = vmax.f32 %v1539_v26, %v1555_v14  ;;  %1577 = vst [vmem:[%s2695_s5 + $0x18] sm:$0xff] %v1561_v16 }
 0x1cc   :  { %1578 = vst [vmem:[%s2695_s5 + $0x20] sm:$0xff] %v1562_v25  ;;  %1579 = vst [vmem:[%s2695_s5 + $0x28] sm:$0xff] %v1563_v8  ;;  %v1572_v24 = vmax.f32 %v1540_v57, %v1556_v61  ;;  %v1573_v43 = vmax.f32 %v1541_v44, %v1557_v22 }
 0x1cd   :  { %1580 = vst [vmem:[%s2695_s5 + $0x30] sm:$0xff] %v1564_v21  ;;  %1581 = vst [vmem:[%s2695_s5 + $0x38] sm:$0xff] %v1565_v31 }
 0x1ce   :  { %1582 = vst [vmem:[%s2695_s5 + $0x40] sm:$0xff] %v1566_v10  ;;  %1583 = vst [vmem:[%s2695_s5 + $0x48] sm:$0xff] %v1567_v35 }
 0x1cf   :  { %1584 = vst [vmem:[%s2695_s5 + $0x50] sm:$0xff] %v1568_v28  ;;  %1585 = vst [vmem:[%s2695_s5 + $0x58] sm:$0xff] %v1569_v30 }
 0x1d0   :  { %1586 = vst [vmem:[%s2695_s5 + $0x60] sm:$0xff] %v1570_v36  ;;  %1587 = vst [vmem:[%s2695_s5 + $0x68] sm:$0xff] %v1571_v40 }
 0x1d1   :  { %1588 = vst [vmem:[%s2695_s5 + $0x70] sm:$0xff] %v1572_v24  ;;  %1589 = vst [vmem:[%s2695_s5 + $0x78] sm:$0xff] %v1573_v43 }

// kernel: discriminator_forward.9
= control target key start
LH: loop header
LB: loop body
LE: loop exit
PB: predicated region body
PF: predicated region fallthrough
CT: control target
= control target key end

     0   :  { %s4134_s1 = inlined_call_operand.vmem [shape: bf16[2048,256], index: 1, kind: input, shape index: {}]   ;;  %s4135_s0 = inlined_call_operand.vmem [shape: bf16[32,2048], index: 0, kind: input, shape index: {}]   ;;  %s4136_s2 = inlined_call_operand.vmem [shape: f32[1,256], index: 2, kind: input, shape index: {}]   ;;  %s4137_s3 = inlined_call_operand.vmem [shape: f32[1,256], index: 3, kind: input, shape index: {}]   ;;  %s4138_s4 = inlined_call_operand.vmem [shape: f32[1,256], index: 4, kind: input, shape index: {}]   ;;  %s4139_s5 = inlined_call_operand.vmem [shape: f32[32,256], index: 5, kind: output, shape index: {}]  }
   0x1   :  { %v2694_v0 = vld [vmem:[%s4134_s1 + $0x74] ss:$8 sps:$4 sm:$0xff]   ;;  %v2698_v2 = vld [vmem:[%s4134_s1 + $0x70] ss:$8 sps:$4 sm:$0xff]   ;;  %v2700_v4 = vld [vmem:[%s4134_s1 + $0x64] ss:$8 sps:$4 sm:$0xff]  }
   0x2   :  { %v2696_v1 = vld [vmem:[%s4134_s1 + $0x174] ss:$8 sps:$4 sm:$0xff]   ;;  %1761 = vmatprep.subr.bf16.mxu0 %v2694_v0  ;;  %v2699_v3 = vld [vmem:[%s4134_s1 + $0x170] ss:$8 sps:$4 sm:$0xff]   ;;  %v2702_v5 = vld [vmem:[%s4134_s1 + $0x164] ss:$8 sps:$4 sm:$0xff]  }
   0x3   :  { %1814 = vmatprep.subr.bf16.mxu1 %v2696_v1  ;;  %1762 = vmatpush1.bf16.msra.mxu0 %v2698_v2  ;;  %v2704_v6 = vld [vmem:[%s4134_s1 + $0x60] ss:$8 sps:$4 sm:$0xff]   ;;  %v2706_v8 = vld [vmem:[%s4134_s1 + $0x54] ss:$8 sps:$4 sm:$0xff]   ;;  %v2710_v10 = vld [vmem:[%s4134_s1 + $0x50] ss:$8 sps:$4 sm:$0xff]  }
   0x4   :  { %1815 = vmatpush1.bf16.msra.mxu1 %v2699_v3  ;;  %1763 = vmatprep.subr.bf16.mxu0 %v2700_v4  ;;  %v2705_v7 = vld [vmem:[%s4134_s1 + $0x160] ss:$8 sps:$4 sm:$0xff]   ;;  %v2708_v9 = vld [vmem:[%s4134_s1 + $0x154] ss:$8 sps:$4 sm:$0xff]   ;;  %v2711_v11 = vld [vmem:[%s4134_s1 + $0x150] ss:$8 sps:$4 sm:$0xff]  }
   0x5   :  { %1816 = vmatprep.subr.bf16.mxu1 %v2702_v5  ;;  %v2712_v12 = vld [vmem:[%s4134_s1 + $0x44] ss:$8 sps:$4 sm:$0xff]   ;;  %v2716_v14 = vld [vmem:[%s4134_s1 + $0x40] ss:$8 sps:$4 sm:$0xff]   ;;  %v2718_v16 = vld [vmem:[%s4134_s1 + $0x34] ss:$8 sps:$4 sm:$0xff]  }
   0x6   :  { %v2714_v13 = vld [vmem:[%s4134_s1 + $0x144] ss:$8 sps:$4 sm:$0xff]   ;;  %v2717_v15 = vld [vmem:[%s4134_s1 + $0x140] ss:$8 sps:$4 sm:$0xff]   ;;  %v2720_v17 = vld [vmem:[%s4134_s1 + $0x134] ss:$8 sps:$4 sm:$0xff]  }
   0x7   :  { %1764 = vmatpush1.bf16.msra.mxu0 %v2704_v6  ;;  %v2722_v18 = vld [vmem:[%s4134_s1 + $0x30] ss:$8 sps:$4 sm:$0xff]   ;;  %v2724_v20 = vld [vmem:[%s4134_s1 + $0x24] ss:$8 sps:$4 sm:$0xff]   ;;  %v2728_v22 = vld [vmem:[%s4134_s1 + $0x20] ss:$8 sps:$4 sm:$0xff]  }
   0x8   :  { %1817 = vmatpush1.bf16.msra.mxu1 %v2705_v7  ;;  %1765 = vmatprep.subr.bf16.mxu0 %v2706_v8  ;;  %v2723_v19 = vld [vmem:[%s4134_s1 + $0x130] ss:$8 sps:$4 sm:$0xff]   ;;  %v2726_v21 = vld [vmem:[%s4134_s1 + $0x124] ss:$8 sps:$4 sm:$0xff]   ;;  %v2729_v23 = vld [vmem:[%s4134_s1 + $0x120] ss:$8 sps:$4 sm:$0xff]  }
   0x9   :  { %1818 = vmatprep.subr.bf16.mxu1 %v2708_v9  ;;  %v2730_v24 = vld [vmem:[%s4134_s1 + $0x14] ss:$8 sps:$4 sm:$0xff]   ;;  %v2734_v26 = vld [vmem:[%s4134_s1 + $0x10] ss:$8 sps:$4 sm:$0xff]   ;;  %v2736_v28 = vld [vmem:[%s4134_s1 + $0x4] ss:$8 sps:$4 sm:$0xff]  }
   0xa   :  { %v2732_v25 = vld [vmem:[%s4134_s1 + $0x114] ss:$8 sps:$4 sm:$0xff]   ;;  %v2735_v27 = vld [vmem:[%s4134_s1 + $0x110] ss:$8 sps:$4 sm:$0xff]   ;;  %v2738_v29 = vld [vmem:[%s4134_s1 + $0x104] ss:$8 sps:$4 sm:$0xff]  }
   0xb   :  { %1766 = vmatpush1.bf16.msra.mxu0 %v2710_v10  ;;  %v2740_v30 = vld [vmem:[%s4134_s1] ss:$8 sps:$4 sm:$0xff]   ;;  %v2742_v32 = vld [vmem:[%s4134_s1 + $0xf4] ss:$8 sps:$4 sm:$0xff]   ;;  %v2746_v34 = vld [vmem:[%s4134_s1 + $0xf0] ss:$8 sps:$4 sm:$0xff]  }
   0xc   :  { %1819 = vmatpush1.bf16.msra.mxu1 %v2711_v11  ;;  %1767 = vmatprep.subr.bf16.mxu0 %v2712_v12  ;;  %v2741_v31 = vld [vmem:[%s4134_s1 + $0x100] ss:$8 sps:$4 sm:$0xff]   ;;  %v2744_v33 = vld [vmem:[%s4134_s1 + $0x1f4] ss:$8 sps:$4 sm:$0xff]   ;;  %v2747_v35 = vld [vmem:[%s4134_s1 + $0x1f0] ss:$8 sps:$4 sm:$0xff]  }
   0xd   :  { %1820 = vmatprep.subr.bf16.mxu1 %v2714_v13  ;;  %v2748_v36 = vld [vmem:[%s4134_s1 + $0xe4] ss:$8 sps:$4 sm:$0xff]   ;;  %v2752_v38 = vld [vmem:[%s4134_s1 + $0xe0] ss:$8 sps:$4 sm:$0xff]   ;;  %v2754_v40 = vld [vmem:[%s4134_s1 + $0xd4] ss:$8 sps:$4 sm:$0xff]  }
   0xe   :  { %v2750_v37 = vld [vmem:[%s4134_s1 + $0x1e4] ss:$8 sps:$4 sm:$0xff]   ;;  %v2753_v39 = vld [vmem:[%s4134_s1 + $0x1e0] ss:$8 sps:$4 sm:$0xff]   ;;  %v2756_v41 = vld [vmem:[%s4134_s1 + $0x1d4] ss:$8 sps:$4 sm:$0xff]  }
   0xf   :  { %1768 = vmatpush1.bf16.msra.mxu0 %v2716_v14  ;;  %v2758_v42 = vld [vmem:[%s4134_s1 + $0xd0] ss:$8 sps:$4 sm:$0xff]   ;;  %v2760_v44 = vld [vmem:[%s4134_s1 + $0xc4] ss:$8 sps:$4 sm:$0xff]   ;;  %v2764_v46 = vld [vmem:[%s4134_s1 + $0xc0] ss:$8 sps:$4 sm:$0xff]  }
  0x10   :  { %1821 = vmatpush1.bf16.msra.mxu1 %v2717_v15  ;;  %1769 = vmatprep.subr.bf16.mxu0 %v2718_v16  ;;  %v2759_v43 = vld [vmem:[%s4134_s1 + $0x1d0] ss:$8 sps:$4 sm:$0xff]   ;;  %v2762_v45 = vld [vmem:[%s4134_s1 + $0x1c4] ss:$8 sps:$4 sm:$0xff]   ;;  %v2765_v47 = vld [vmem:[%s4134_s1 + $0x1c0] ss:$8 sps:$4 sm:$0xff]  }
  0x11   :  { %1822 = vmatprep.subr.bf16.mxu1 %v2720_v17  ;;  %v21_v48 = vld [vmem:[%s4135_s0] sm:$0xff]  ;;  %v22_v50 = vld [vmem:[%s4135_s0 + $0x8] sm:$0xff]  ;;  %v2766_v52 = vld [vmem:[%s4134_s1 + $0xb4] ss:$8 sps:$4 sm:$0xff]  }
  0x12   :  { %v29_v49 = vld [vmem:[%s4135_s0 + $0x40] sm:$0xff]  ;;  %v30_v51 = vld [vmem:[%s4135_s0 + $0x48] sm:$0xff]  ;;  %v2768_v54 = vld [vmem:[%s4134_s1 + $0x1b4] ss:$8 sps:$4 sm:$0xff]  }
  0x13   :  { %1770 = vmatpush1.bf16.msra.mxu0 %v2722_v18  ;;  %v2406_v53 = vcombine.high %v21_v48, %v29_v49  ;;  %v2408_v55 = vcombine.high %v22_v50, %v30_v51  ;;  %v2770_v56 = vld [vmem:[%s4134_s1 + $0xb0] ss:$8 sps:$4 sm:$0xff]   ;;  %v2772_v58 = vld [vmem:[%s4134_s1 + $0xa4] ss:$8 sps:$4 sm:$0xff]   ;;  %v2776_v60 = vld [vmem:[%s4134_s1 + $0xa0] ss:$8 sps:$4 sm:$0xff]   ;;  %v2405_v8 = vcombine.low %v21_v48, %v29_v49  ;;  %v2407_v9 = vcombine.low %v22_v50, %v30_v51 }
  0x14   :  { %1823 = vmatpush1.bf16.msra.mxu1 %v2723_v19  ;;  %1771 = vmatprep.subr.bf16.mxu0 %v2724_v20  ;;  %v2771_v57 = vld [vmem:[%s4134_s1 + $0x1b0] ss:$8 sps:$4 sm:$0xff]   ;;  %v2774_v59 = vld [vmem:[%s4134_s1 + $0x1a4] ss:$8 sps:$4 sm:$0xff]   ;;  %v2777_v61 = vld [vmem:[%s4134_s1 + $0x1a0] ss:$8 sps:$4 sm:$0xff]  }
  0x15   :  { %1824 = vmatprep.subr.bf16.mxu1 %v2726_v21  ;;  %1793 = vmatprep.mubr.bf16.mxu0 %v2406_v53  ;;  %v2778_v62 = vld [vmem:[%s4134_s1 + $0x94] ss:$8 sps:$4 sm:$0xff]   ;;  %v2782_v0 = vld [vmem:[%s4134_s1 + $0x90] ss:$8 sps:$4 sm:$0xff]   ;;  %v2784_v2 = vld [vmem:[%s4134_s1 + $0x84] ss:$8 sps:$4 sm:$0xff]  }
  0x16   :  { %1846 = vmatprep.mubr.bf16.mxu1 %v2408_v55  ;;  %v2780_v63 = vld [vmem:[%s4134_s1 + $0x194] ss:$8 sps:$4 sm:$0xff]   ;;  %v2783_v1 = vld [vmem:[%s4134_s1 + $0x190] ss:$8 sps:$4 sm:$0xff]   ;;  %v2786_v3 = vld [vmem:[%s4134_s1 + $0x184] ss:$8 sps:$4 sm:$0xff]  }
  0x17   :  { %1772 = vmatpush1.bf16.msra.mxu0 %v2728_v22  ;;  %v2788_v4 = vld [vmem:[%s4134_s1 + $0x80] ss:$8 sps:$4 sm:$0xff]   ;;  %v2792_v6 = vld [vmem:[%s4134_s1 + $0x274] ss:$8 sps:$4 sm:$0xff]   ;;  %v2790_v10 = vld [vmem:[%s4134_s1 + $0x270] ss:$8 sps:$4 sm:$0xff]  }
  0x18   :  { %1825 = vmatpush1.bf16.msra.mxu1 %v2729_v23  ;;  %1773 = vmatprep.subr.bf16.mxu0 %v2730_v24  ;;  %v2789_v5 = vld [vmem:[%s4134_s1 + $0x180] ss:$8 sps:$4 sm:$0xff]   ;;  %v2795_v7 = vld [vmem:[%s4134_s1 + $0x374] ss:$8 sps:$4 sm:$0xff]   ;;  %v2793_v11 = vld [vmem:[%s4134_s1 + $0x370] ss:$8 sps:$4 sm:$0xff]  }
  0x19   :  { %1826 = vmatprep.subr.bf16.mxu1 %v2732_v25  ;;  %v2798_v12 = vld [vmem:[%s4134_s1 + $0x264] ss:$8 sps:$4 sm:$0xff]   ;;  %v2796_v14 = vld [vmem:[%s4134_s1 + $0x260] ss:$8 sps:$4 sm:$0xff]   ;;  %v2804_v16 = vld [vmem:[%s4134_s1 + $0x254] ss:$8 sps:$4 sm:$0xff]  }
  0x1a   :  { %v2801_v13 = vld [vmem:[%s4134_s1 + $0x364] ss:$8 sps:$4 sm:$0xff]   ;;  %v2799_v15 = vld [vmem:[%s4134_s1 + $0x360] ss:$8 sps:$4 sm:$0xff]   ;;  %v2807_v17 = vld [vmem:[%s4134_s1 + $0x354] ss:$8 sps:$4 sm:$0xff]  }
  0x1b   :  { %1774 = vmatpush1.bf16.msra.mxu0 %v2734_v26  ;;  %v2802_v18 = vld [vmem:[%s4134_s1 + $0x250] ss:$8 sps:$4 sm:$0xff]   ;;  %v2810_v20 = vld [vmem:[%s4134_s1 + $0x244] ss:$8 sps:$4 sm:$0xff]   ;;  %v2808_v22 = vld [vmem:[%s4134_s1 + $0x240] ss:$8 sps:$4 sm:$0xff]  }
  0x1c   :  { %1827 = vmatpush1.bf16.msra.mxu1 %v2735_v27  ;;  %1775 = vmatprep.subr.bf16.mxu0 %v2736_v28  ;;  %v2805_v19 = vld [vmem:[%s4134_s1 + $0x350] ss:$8 sps:$4 sm:$0xff]   ;;  %v2813_v21 = vld [vmem:[%s4134_s1 + $0x344] ss:$8 sps:$4 sm:$0xff]   ;;  %v2811_v23 = vld [vmem:[%s4134_s1 + $0x340] ss:$8 sps:$4 sm:$0xff]  }
  0x1d   :  { %1828 = vmatprep.subr.bf16.mxu1 %v2738_v29  ;;  %v2816_v24 = vld [vmem:[%s4134_s1 + $0x234] ss:$8 sps:$4 sm:$0xff]   ;;  %v2814_v26 = vld [vmem:[%s4134_s1 + $0x230] ss:$8 sps:$4 sm:$0xff]   ;;  %v37_v28 = vld [vmem:[%s4135_s0 + $0x80] sm:$0xff] }
  0x1e   :  { %v2819_v25 = vld [vmem:[%s4134_s1 + $0x334] ss:$8 sps:$4 sm:$0xff]   ;;  %v2817_v27 = vld [vmem:[%s4134_s1 + $0x330] ss:$8 sps:$4 sm:$0xff]   ;;  %v45_v29 = vld [vmem:[%s4135_s0 + $0xc0] sm:$0xff] }
  0x1f   :  { %1776 = vmatpush1.bf16.msra.mxu0 %v2740_v30  ;;  %v38_v30 = vld [vmem:[%s4135_s0 + $0x88] sm:$0xff]  ;;  %v3432_v48 = vld [vmem:[%s4135_s0 + $0x18] sm:$0xff] }
  0x20   :  { %1829 = vmatpush1.bf16.msra.mxu1 %v2741_v31  ;;  %1777 = vmatprep.subr.bf16.mxu0 %v2742_v32  ;;  %v46_v31 = vld [vmem:[%s4135_s0 + $0xc8] sm:$0xff]  ;;  %v3439_v50 = vld [vmem:[%s4135_s0 + $0x58] sm:$0xff] }
  0x21   :  { %1830 = vmatprep.subr.bf16.mxu1 %v2744_v33  ;;  %v2822_v32 = vld [vmem:[%s4134_s1 + $0x224] ss:$8 sps:$4 sm:$0xff]   ;;  %v2422_v33 = vcombine.high %v37_v28, %v45_v29  ;;  %v2412_v51 = vcombine.high %v3432_v48, %v3439_v50  ;;  %v2835_v53 = vld [vmem:[%s4134_s1 + $0x300] ss:$8 sps:$4 sm:$0xff]   ;;  %v2843_v55 = vld [vmem:[%s4134_s1 + $0x3f4] ss:$8 sps:$4 sm:$0xff]  }
  0x23   :  { %1778 = vmatpush2.bf16.msra.mxu0 %v2746_v34  ;;  %v2421_v34 = vcombine.low %v37_v28, %v45_v29  ;;  %v2411_v29 = vcombine.low %v3432_v48, %v3439_v50  ;;  %v2906_v48 = vld [vmem:[%s4134_s1 + $0x444] ss:$8 sps:$4 sm:$0xff]  }
  0x24   :  { %1831 = vmatpush2.bf16.msra.mxu1 %v2747_v35  ;;  %1779 = vmatprep.subr.bf16.mxu0 %v2748_v36  ;;  %v2424_v35 = vcombine.high %v38_v30, %v46_v31  ;;  %v2825_v36 = vld [vmem:[%s4134_s1 + $0x324] ss:$8 sps:$4 sm:$0xff]  }
  0x25   :  { %1832 = vmatprep.subr.bf16.mxu1 %v2750_v37  ;;  %v2423_v37 = vcombine.low %v38_v30, %v46_v31  ;;  %v40_v30 = vld [vmem:[%s4135_s0 + $0x98] sm:$0xff] }
  0x26   :  { %v48_v31 = vld [vmem:[%s4135_s0 + $0xd8] sm:$0xff] }
  0x27   :  { %1780 = vmatpush2.bf16.msra.mxu0 %v2752_v38  ;;  %v2820_v38 = vld [vmem:[%s4134_s1 + $0x220] ss:$8 sps:$4 sm:$0xff]  }
  0x28   :  { %1833 = vmatpush2.bf16.msra.mxu1 %v2753_v39  ;;  %1781 = vmatprep.subr.bf16.mxu0 %v2754_v40  ;;  %v2823_v39 = vld [vmem:[%s4134_s1 + $0x320] ss:$8 sps:$4 sm:$0xff]   ;;  %v2828_v40 = vld [vmem:[%s4134_s1 + $0x214] ss:$8 sps:$4 sm:$0xff]  }
  0x29   :  { %1834 = vmatprep.subr.bf16.mxu1 %v2756_v41  ;;  %v2831_v41 = vld [vmem:[%s4134_s1 + $0x314] ss:$8 sps:$4 sm:$0xff]  }
  0x2b   :  { %1782 = vmatpush2.bf16.msra.mxu0 %v2758_v42  ;;  %v2826_v42 = vld [vmem:[%s4134_s1 + $0x210] ss:$8 sps:$4 sm:$0xff]  }
  0x2c   :  { %1835 = vmatpush2.bf16.msra.mxu1 %v2759_v43  ;;  %1783 = vmatprep.subr.bf16.mxu0 %v2760_v44  ;;  %v2829_v43 = vld [vmem:[%s4134_s1 + $0x310] ss:$8 sps:$4 sm:$0xff]   ;;  %v2834_v44 = vld [vmem:[%s4134_s1 + $0x204] ss:$8 sps:$4 sm:$0xff]  }
  0x2d   :  { %1836 = vmatprep.subr.bf16.mxu1 %v2762_v45  ;;  %v2837_v45 = vld [vmem:[%s4134_s1 + $0x304] ss:$8 sps:$4 sm:$0xff]  }
  0x2f   :  { %1784 = vmatpush2.bf16.msra.mxu0 %v2764_v46  ;;  %v3422_v46 = vld [vmem:[%s4135_s0 + $0x10] sm:$0xff] }
  0x30   :  { %1837 = vmatpush2.bf16.msra.mxu1 %v2765_v47  ;;  %1785 = vmatprep.subr.bf16.mxu0 %v2766_v52  ;;  %v3427_v47 = vld [vmem:[%s4135_s0 + $0x50] sm:$0xff]  ;;  %v2832_v52 = vld [vmem:[%s4134_s1 + $0x200] ss:$8 sps:$4 sm:$0xff]  }
  0x31   :  { %1838 = vmatprep.subr.bf16.mxu1 %v2768_v54  ;;  %v2410_v49 = vcombine.high %v3422_v46, %v3427_v47  ;;  %v2840_v54 = vld [vmem:[%s4134_s1 + $0x2f4] ss:$8 sps:$4 sm:$0xff]   ;;  %v2409_v28 = vcombine.low %v3422_v46, %v3427_v47  ;;  %v3610_v46 = vld [vmem:[%s4135_s0 + $0x28] sm:$0xff] }
  0x32   :  { %v3615_v47 = vld [vmem:[%s4135_s0 + $0x68] sm:$0xff] }
  0x33   :  { %1786 = vmatpush2.bf16.msra.mxu0 %v2770_v56  ;;  %v2838_v56 = vld [vmem:[%s4134_s1 + $0x2f0] ss:$8 sps:$4 sm:$0xff]  }
  0x34   :  { %1839 = vmatpush2.bf16.msra.mxu1 %v2771_v57  ;;  %1787 = vmatprep.subr.bf16.mxu0 %v2772_v58  ;;  %v2841_v57 = vld [vmem:[%s4134_s1 + $0x3f0] ss:$8 sps:$4 sm:$0xff]   ;;  %v2846_v58 = vld [vmem:[%s4134_s1 + $0x2e4] ss:$8 sps:$4 sm:$0xff]  }
  0x35   :  { %1840 = vmatprep.subr.bf16.mxu1 %v2774_v59  ;;  %v2849_v59 = vld [vmem:[%s4134_s1 + $0x3e4] ss:$8 sps:$4 sm:$0xff]  }
  0x37   :  { %1788 = vmatpush2.bf16.msra.mxu0 %v2776_v60  ;;  %v2844_v60 = vld [vmem:[%s4134_s1 + $0x2e0] ss:$8 sps:$4 sm:$0xff]  }
  0x38   :  { %1841 = vmatpush2.bf16.msra.mxu1 %v2777_v61  ;;  %1789 = vmatprep.subr.bf16.mxu0 %v2778_v62  ;;  %v2847_v61 = vld [vmem:[%s4134_s1 + $0x3e0] ss:$8 sps:$4 sm:$0xff]   ;;  %v2852_v62 = vld [vmem:[%s4134_s1 + $0x2d4] ss:$8 sps:$4 sm:$0xff]  }
  0x39   :  { %1842 = vmatprep.subr.bf16.mxu1 %v2780_v63  ;;  %v2855_v63 = vld [vmem:[%s4134_s1 + $0x3d4] ss:$8 sps:$4 sm:$0xff]  }
  0x3b   :  { %1790 = vmatpush2.bf16.msra.mxu0 %v2782_v0  ;;  %v2850_v0 = vld [vmem:[%s4134_s1 + $0x2d0] ss:$8 sps:$4 sm:$0xff]  }
  0x3c   :  { %1843 = vmatpush2.bf16.msra.mxu1 %v2783_v1  ;;  %1791 = vmatprep.subr.bf16.mxu0 %v2784_v2  ;;  %v2853_v1 = vld [vmem:[%s4134_s1 + $0x3d0] ss:$8 sps:$4 sm:$0xff]   ;;  %v2858_v2 = vld [vmem:[%s4134_s1 + $0x2c4] ss:$8 sps:$4 sm:$0xff]  }
  0x3d   :  { %1844 = vmatprep.subr.bf16.mxu1 %v2786_v3  ;;  %v2861_v3 = vld [vmem:[%s4134_s1 + $0x3c4] ss:$8 sps:$4 sm:$0xff]  }
  0x3f   :  { %1792 = vmatpush2.bf16.msra.mxu0 %v2788_v4  ;;  %v2856_v4 = vld [vmem:[%s4134_s1 + $0x2c0] ss:$8 sps:$4 sm:$0xff]  }
  0x40   :  { %1845 = vmatpush2.bf16.msra.mxu1 %v2789_v5  ;;  %1867 = vmatprep.subr.bf16.mxu0 %v2792_v6  ;;  %v2859_v5 = vld [vmem:[%s4134_s1 + $0x3c0] ss:$8 sps:$4 sm:$0xff]   ;;  %v2864_v6 = vld [vmem:[%s4134_s1 + $0x2b4] ss:$8 sps:$4 sm:$0xff]  }
  0x41   :  { %1920 = vmatprep.subr.bf16.mxu1 %v2795_v7  ;;  %v2867_v7 = vld [vmem:[%s4134_s1 + $0x3b4] ss:$8 sps:$4 sm:$0xff]  }
  0x42   :  { %1794 = vmatmul.mubr.bf16.vlgmr.msra.gmra.mxu0 %v2405_v8  ;;  %v2862_v8 = vld [vmem:[%s4134_s1 + $0x2b0] ss:$8 sps:$4 sm:$0xff]  }
  0x43   :  { %1847 = vmatmul.mubr.bf16.vlgmr.msra.gmra.mxu1 %v2407_v9  ;;  %1868 = vmatpush1.bf16.msra.mxu0 %v2790_v10  ;;  %v2865_v9 = vld [vmem:[%s4134_s1 + $0x3b0] ss:$8 sps:$4 sm:$0xff]   ;;  %v2870_v10 = vld [vmem:[%s4134_s1 + $0x2a4] ss:$8 sps:$4 sm:$0xff]  }
  0x44   :  { %1921 = vmatpush1.bf16.msra.mxu1 %v2793_v11  ;;  %1869 = vmatprep.subr.bf16.mxu0 %v2798_v12  ;;  %v2873_v11 = vld [vmem:[%s4134_s1 + $0x3a4] ss:$8 sps:$4 sm:$0xff]   ;;  %v2868_v12 = vld [vmem:[%s4134_s1 + $0x2a0] ss:$8 sps:$4 sm:$0xff]  }
  0x45   :  { %1922 = vmatprep.subr.bf16.mxu1 %v2801_v13  ;;  %1803 = vmatprep.mubr.bf16.mxu0 %v2422_v33  ;;  %v2871_v13 = vld [vmem:[%s4134_s1 + $0x3a0] ss:$8 sps:$4 sm:$0xff]   ;;  %v2897_v33 = vld [vmem:[%s4134_s1 + $0x564] ss:$8 sps:$4 sm:$0xff]  }
  0x46   :  { %1856 = vmatprep.mubr.bf16.mxu1 %v2424_v35  ;;  %v2428_v35 = vcombine.high %v40_v30, %v48_v31 }
  0x47   :  { %1870 = vmatpush1.bf16.msra.mxu0 %v2796_v14  ;;  %v2876_v14 = vld [vmem:[%s4134_s1 + $0x294] ss:$8 sps:$4 sm:$0xff]  }
  0x48   :  { %1923 = vmatpush1.bf16.msra.mxu1 %v2799_v15  ;;  %1871 = vmatprep.subr.bf16.mxu0 %v2804_v16  ;;  %v2879_v15 = vld [vmem:[%s4134_s1 + $0x394] ss:$8 sps:$4 sm:$0xff]   ;;  %v2874_v16 = vld [vmem:[%s4134_s1 + $0x290] ss:$8 sps:$4 sm:$0xff]  }
  0x49   :  { %1924 = vmatprep.subr.bf16.mxu1 %v2807_v17  ;;  %v2877_v17 = vld [vmem:[%s4134_s1 + $0x390] ss:$8 sps:$4 sm:$0xff]  }
  0x4a   :  { %1804 = vmatmul.mubr.bf16.gmra.mxu0 %v2421_v34 }
  0x4b   :  { %1872 = vmatpush1.bf16.msra.mxu0 %v2802_v18  ;;  %1857 = vmatmul.mubr.bf16.gmra.mxu1 %v2423_v37  ;;  %v2882_v18 = vld [vmem:[%s4134_s1 + $0x284] ss:$8 sps:$4 sm:$0xff]   ;;  %v2895_v37 = vld [vmem:[%s4134_s1 + $0x560] ss:$8 sps:$4 sm:$0xff]  }
  0x4c   :  { %1925 = vmatpush1.bf16.msra.mxu1 %v2805_v19  ;;  %1873 = vmatprep.subr.bf16.mxu0 %v2810_v20  ;;  %v2885_v19 = vld [vmem:[%s4134_s1 + $0x384] ss:$8 sps:$4 sm:$0xff]   ;;  %v2880_v20 = vld [vmem:[%s4134_s1 + $0x280] ss:$8 sps:$4 sm:$0xff]  }
  0x4d   :  { %1926 = vmatprep.subr.bf16.mxu1 %v2813_v21  ;;  %1899 = vmatprep.mubr.bf16.mxu0 %v2410_v49  ;;  %v2883_v21 = vld [vmem:[%s4134_s1 + $0x380] ss:$8 sps:$4 sm:$0xff]   ;;  %v2909_v49 = vld [vmem:[%s4134_s1 + $0x544] ss:$8 sps:$4 sm:$0xff]  }
  0x4e   :  { %1952 = vmatprep.mubr.bf16.mxu1 %v2412_v51  ;;  %v2416_v51 = vcombine.high %v3610_v46, %v3615_v47 }
  0x4f   :  { %1874 = vmatpush1.bf16.msra.mxu0 %v2808_v22  ;;  %v2888_v22 = vld [vmem:[%s4134_s1 + $0x474] ss:$8 sps:$4 sm:$0xff]  }
  0x50   :  { %1927 = vmatpush1.bf16.msra.mxu1 %v2811_v23  ;;  %1875 = vmatprep.subr.bf16.mxu0 %v2816_v24  ;;  %v2891_v23 = vld [vmem:[%s4134_s1 + $0x574] ss:$8 sps:$4 sm:$0xff]   ;;  %v2886_v24 = vld [vmem:[%s4134_s1 + $0x470] ss:$8 sps:$4 sm:$0xff]  }
  0x51   :  { %1928 = vmatprep.subr.bf16.mxu1 %v2819_v25  ;;  %v2889_v25 = vld [vmem:[%s4134_s1 + $0x570] ss:$8 sps:$4 sm:$0xff]  }
  0x53   :  { %1876 = vmatpush1.bf16.msra.mxu0 %v2814_v26  ;;  %v39_v26 = vld [vmem:[%s4135_s0 + $0x90] sm:$0xff] }
  0x54   :  { %1929 = vmatpush1.bf16.msra.mxu1 %v2817_v27  ;;  %1877 = vmatprep.subr.bf16.mxu0 %v2822_v32  ;;  %v47_v27 = vld [vmem:[%s4135_s0 + $0xd0] sm:$0xff]  ;;  %v2894_v32 = vld [vmem:[%s4134_s1 + $0x464] ss:$8 sps:$4 sm:$0xff]  }
  0x55   :  { %1930 = vmatprep.subr.bf16.mxu1 %v2825_v36  ;;  %v2426_v34 = vcombine.high %v39_v26, %v47_v27  ;;  %v2892_v36 = vld [vmem:[%s4134_s1 + $0x460] ss:$8 sps:$4 sm:$0xff]  }
  0x57   :  { %1878 = vmatpush1.bf16.msra.mxu0 %v2820_v38  ;;  %v2900_v38 = vld [vmem:[%s4134_s1 + $0x454] ss:$8 sps:$4 sm:$0xff]  }
  0x58   :  { %1931 = vmatpush1.bf16.msra.mxu1 %v2823_v39  ;;  %1879 = vmatprep.subr.bf16.mxu0 %v2828_v40  ;;  %v2903_v39 = vld [vmem:[%s4134_s1 + $0x554] ss:$8 sps:$4 sm:$0xff]   ;;  %v2898_v40 = vld [vmem:[%s4134_s1 + $0x450] ss:$8 sps:$4 sm:$0xff]  }
  0x59   :  { %1932 = vmatprep.subr.bf16.mxu1 %v2831_v41  ;;  %v2901_v41 = vld [vmem:[%s4134_s1 + $0x550] ss:$8 sps:$4 sm:$0xff]  }
  0x5b   :  { %1880 = vmatpush1.bf16.msra.mxu0 %v2826_v42  ;;  %v3600_v42 = vld [vmem:[%s4135_s0 + $0x20] sm:$0xff] }
  0x5c   :  { %1933 = vmatpush1.bf16.msra.mxu1 %v2829_v43  ;;  %1881 = vmatprep.subr.bf16.mxu0 %v2834_v44  ;;  %v3605_v43 = vld [vmem:[%s4135_s0 + $0x60] sm:$0xff]  ;;  %v2425_v44 = vcombine.low %v39_v26, %v47_v27 }
  0x5d   :  { %1934 = vmatprep.subr.bf16.mxu1 %v2837_v45  ;;  %v2427_v45 = vcombine.low %v40_v30, %v48_v31  ;;  %v2414_v50 = vcombine.high %v3600_v42, %v3605_v43  ;;  %v2966_v26 = vld [vmem:[%s4134_s1 + $0x4a4] ss:$8 sps:$4 sm:$0xff]   ;;  %v2972_v30 = vld [vmem:[%s4134_s1 + $0x494] ss:$8 sps:$4 sm:$0xff]  }
  0x5e   :  { %v2969_v27 = vld [vmem:[%s4134_s1 + $0x5a4] ss:$8 sps:$4 sm:$0xff]   ;;  %v2975_v31 = vld [vmem:[%s4134_s1 + $0x594] ss:$8 sps:$4 sm:$0xff]  }
  0x5f   :  { %1882 = vmatpush1.bf16.msra.mxu0 %v2832_v52  ;;  %v2904_v52 = vld [vmem:[%s4134_s1 + $0x440] ss:$8 sps:$4 sm:$0xff]  }
  0x60   :  { %1935 = vmatpush1.bf16.msra.mxu1 %v2835_v53  ;;  %1883 = vmatprep.subr.bf16.mxu0 %v2840_v54  ;;  %v2907_v53 = vld [vmem:[%s4134_s1 + $0x540] ss:$8 sps:$4 sm:$0xff]   ;;  %v2912_v54 = vld [vmem:[%s4134_s1 + $0x434] ss:$8 sps:$4 sm:$0xff]  }
  0x61   :  { %1936 = vmatprep.subr.bf16.mxu1 %v2843_v55  ;;  %v2915_v55 = vld [vmem:[%s4134_s1 + $0x534] ss:$8 sps:$4 sm:$0xff]  }
  0x63   :  { %1884 = vmatpush2.bf16.msra.mxu0 %v2838_v56  ;;  %v2910_v56 = vld [vmem:[%s4134_s1 + $0x430] ss:$8 sps:$4 sm:$0xff]  }
  0x64   :  { %1937 = vmatpush2.bf16.msra.mxu1 %v2841_v57  ;;  %1885 = vmatprep.subr.bf16.mxu0 %v2846_v58  ;;  %v2913_v57 = vld [vmem:[%s4134_s1 + $0x530] ss:$8 sps:$4 sm:$0xff]   ;;  %v2918_v58 = vld [vmem:[%s4134_s1 + $0x424] ss:$8 sps:$4 sm:$0xff]  }
  0x65   :  { %1938 = vmatprep.subr.bf16.mxu1 %v2849_v59  ;;  %v2921_v59 = vld [vmem:[%s4134_s1 + $0x524] ss:$8 sps:$4 sm:$0xff]  }
  0x67   :  { %1886 = vmatpush2.bf16.msra.mxu0 %v2844_v60  ;;  %v2916_v60 = vld [vmem:[%s4134_s1 + $0x420] ss:$8 sps:$4 sm:$0xff]  }
  0x68   :  { %1939 = vmatpush2.bf16.msra.mxu1 %v2847_v61  ;;  %1887 = vmatprep.subr.bf16.mxu0 %v2852_v62  ;;  %v2919_v61 = vld [vmem:[%s4134_s1 + $0x520] ss:$8 sps:$4 sm:$0xff]   ;;  %v2924_v62 = vld [vmem:[%s4134_s1 + $0x414] ss:$8 sps:$4 sm:$0xff]  }
  0x69   :  { %1940 = vmatprep.subr.bf16.mxu1 %v2855_v63  ;;  %v2927_v63 = vld [vmem:[%s4134_s1 + $0x514] ss:$8 sps:$4 sm:$0xff]  }
  0x6b   :  { %1888 = vmatpush2.bf16.msra.mxu0 %v2850_v0  ;;  %v2922_v0 = vld [vmem:[%s4134_s1 + $0x410] ss:$8 sps:$4 sm:$0xff]  }
  0x6c   :  { %1941 = vmatpush2.bf16.msra.mxu1 %v2853_v1  ;;  %1889 = vmatprep.subr.bf16.mxu0 %v2858_v2  ;;  %v2925_v1 = vld [vmem:[%s4134_s1 + $0x510] ss:$8 sps:$4 sm:$0xff]   ;;  %v2930_v2 = vld [vmem:[%s4134_s1 + $0x404] ss:$8 sps:$4 sm:$0xff]  }
  0x6d   :  { %1942 = vmatprep.subr.bf16.mxu1 %v2861_v3  ;;  %v2933_v3 = vld [vmem:[%s4134_s1 + $0x504] ss:$8 sps:$4 sm:$0xff]  }
  0x6f   :  { %1890 = vmatpush2.bf16.msra.mxu0 %v2856_v4  ;;  %v2928_v4 = vld [vmem:[%s4134_s1 + $0x400] ss:$8 sps:$4 sm:$0xff]  }
  0x70   :  { %1943 = vmatpush2.bf16.msra.mxu1 %v2859_v5  ;;  %1891 = vmatprep.subr.bf16.mxu0 %v2864_v6  ;;  %v2931_v5 = vld [vmem:[%s4134_s1 + $0x500] ss:$8 sps:$4 sm:$0xff]   ;;  %v2936_v6 = vld [vmem:[%s4134_s1 + $0x4f4] ss:$8 sps:$4 sm:$0xff]  }
  0x71   :  { %1944 = vmatprep.subr.bf16.mxu1 %v2867_v7  ;;  %v2939_v7 = vld [vmem:[%s4134_s1 + $0x5f4] ss:$8 sps:$4 sm:$0xff]  }
  0x73   :  { %1892 = vmatpush2.bf16.msra.mxu0 %v2862_v8  ;;  %v2934_v8 = vld [vmem:[%s4134_s1 + $0x4f0] ss:$8 sps:$4 sm:$0xff]  }
  0x74   :  { %1945 = vmatpush2.bf16.msra.mxu1 %v2865_v9  ;;  %1893 = vmatprep.subr.bf16.mxu0 %v2870_v10  ;;  %v2937_v9 = vld [vmem:[%s4134_s1 + $0x5f0] ss:$8 sps:$4 sm:$0xff]   ;;  %v2942_v10 = vld [vmem:[%s4134_s1 + $0x4e4] ss:$8 sps:$4 sm:$0xff]  }
  0x75   :  { %1946 = vmatprep.subr.bf16.mxu1 %v2873_v11  ;;  %v2945_v11 = vld [vmem:[%s4134_s1 + $0x5e4] ss:$8 sps:$4 sm:$0xff]  }
  0x77   :  { %1894 = vmatpush2.bf16.msra.mxu0 %v2868_v12  ;;  %v2940_v12 = vld [vmem:[%s4134_s1 + $0x4e0] ss:$8 sps:$4 sm:$0xff]  }
  0x78   :  { %1947 = vmatpush2.bf16.msra.mxu1 %v2871_v13  ;;  %1895 = vmatprep.subr.bf16.mxu0 %v2876_v14  ;;  %v2943_v13 = vld [vmem:[%s4134_s1 + $0x5e0] ss:$8 sps:$4 sm:$0xff]   ;;  %v2948_v14 = vld [vmem:[%s4134_s1 + $0x4d4] ss:$8 sps:$4 sm:$0xff]  }
  0x79   :  { %1948 = vmatprep.subr.bf16.mxu1 %v2879_v15  ;;  %v2951_v15 = vld [vmem:[%s4134_s1 + $0x5d4] ss:$8 sps:$4 sm:$0xff]  }
  0x7b   :  { %1896 = vmatpush2.bf16.msra.mxu0 %v2874_v16  ;;  %v2946_v16 = vld [vmem:[%s4134_s1 + $0x4d0] ss:$8 sps:$4 sm:$0xff]  }
  0x7c   :  { %1949 = vmatpush2.bf16.msra.mxu1 %v2877_v17  ;;  %1897 = vmatprep.subr.bf16.mxu0 %v2882_v18  ;;  %v2949_v17 = vld [vmem:[%s4134_s1 + $0x5d0] ss:$8 sps:$4 sm:$0xff]   ;;  %v2954_v18 = vld [vmem:[%s4134_s1 + $0x4c4] ss:$8 sps:$4 sm:$0xff]  }
  0x7d   :  { %1950 = vmatprep.subr.bf16.mxu1 %v2885_v19  ;;  %v2957_v19 = vld [vmem:[%s4134_s1 + $0x5c4] ss:$8 sps:$4 sm:$0xff]  }
  0x7f   :  { %1898 = vmatpush2.bf16.msra.mxu0 %v2880_v20  ;;  %v2952_v20 = vld [vmem:[%s4134_s1 + $0x4c0] ss:$8 sps:$4 sm:$0xff]  }
  0x80   :  { %1951 = vmatpush2.bf16.msra.mxu1 %v2883_v21  ;;  %1973 = vmatprep.subr.bf16.mxu0 %v2888_v22  ;;  %v2955_v21 = vld [vmem:[%s4134_s1 + $0x5c0] ss:$8 sps:$4 sm:$0xff]   ;;  %v2960_v22 = vld [vmem:[%s4134_s1 + $0x4b4] ss:$8 sps:$4 sm:$0xff]  }
  0x81   :  { %2026 = vmatprep.subr.bf16.mxu1 %v2891_v23  ;;  %v2963_v23 = vld [vmem:[%s4134_s1 + $0x5b4] ss:$8 sps:$4 sm:$0xff]  }
  0x82   :  { %1900 = vmatmul.mubr.bf16.vlgmr.msra.gmra.mxu0 %v2409_v28  ;;  %v2964_v28 = vld [vmem:[%s4134_s1 + $0x4a0] ss:$8 sps:$4 sm:$0xff]  }
  0x83   :  { %1953 = vmatmul.mubr.bf16.vlgmr.msra.gmra.mxu1 %v2411_v29  ;;  %1974 = vmatpush1.bf16.msra.mxu0 %v2886_v24  ;;  %v2958_v24 = vld [vmem:[%s4134_s1 + $0x4b0] ss:$8 sps:$4 sm:$0xff]   ;;  %v2967_v29 = vld [vmem:[%s4134_s1 + $0x5a0] ss:$8 sps:$4 sm:$0xff]  }
  0x84   :  { %2027 = vmatpush1.bf16.msra.mxu1 %v2889_v25  ;;  %1975 = vmatprep.subr.bf16.mxu0 %v2894_v32  ;;  %v2961_v25 = vld [vmem:[%s4134_s1 + $0x5b0] ss:$8 sps:$4 sm:$0xff]  }
  0x85   :  { %2028 = vmatprep.subr.bf16.mxu1 %v2897_v33  ;;  %1909 = vmatprep.mubr.bf16.mxu0 %v2426_v34  ;;  %v2970_v32 = vld [vmem:[%s4134_s1 + $0x490] ss:$8 sps:$4 sm:$0xff]   ;;  %v2978_v34 = vld [vmem:[%s4134_s1 + $0x484] ss:$8 sps:$4 sm:$0xff]  }
  0x86   :  { %1962 = vmatprep.mubr.bf16.mxu1 %v2428_v35  ;;  %v2973_v33 = vld [vmem:[%s4134_s1 + $0x590] ss:$8 sps:$4 sm:$0xff]   ;;  %v2981_v35 = vld [vmem:[%s4134_s1 + $0x584] ss:$8 sps:$4 sm:$0xff]  }
  0x87   :  { %1976 = vmatpush1.bf16.msra.mxu0 %v2892_v36  ;;  %v2976_v36 = vld [vmem:[%s4134_s1 + $0x480] ss:$8 sps:$4 sm:$0xff]  }
  0x88   :  { %2029 = vmatpush1.bf16.msra.mxu1 %v2895_v37  ;;  %1977 = vmatprep.subr.bf16.mxu0 %v2900_v38  ;;  %v2979_v37 = vld [vmem:[%s4134_s1 + $0x580] ss:$8 sps:$4 sm:$0xff]   ;;  %v2984_v38 = vld [vmem:[%s4134_s1 + $0x674] ss:$8 sps:$4 sm:$0xff]  }
  0x89   :  { %2030 = vmatprep.subr.bf16.mxu1 %v2903_v39  ;;  %v2987_v39 = vld [vmem:[%s4134_s1 + $0x774] ss:$8 sps:$4 sm:$0xff]  }
  0x8a   :  { %1910 = vmatmul.mubr.bf16.gmra.mxu0 %v2425_v44  ;;  %v2415_v44 = vcombine.low %v3610_v46, %v3615_v47  ;;  %v2990_v46 = vld [vmem:[%s4134_s1 + $0x664] ss:$8 sps:$4 sm:$0xff]  }
  0x8b   :  { %1963 = vmatmul.mubr.bf16.gmra.mxu1 %v2427_v45  ;;  %1978 = vmatpush1.bf16.msra.mxu0 %v2898_v40  ;;  %v41_v40 = vld [vmem:[%s4135_s0 + $0xa0] sm:$0xff] }
  0x8c   :  { %2031 = vmatpush1.bf16.msra.mxu1 %v2901_v41  ;;  %1979 = vmatprep.subr.bf16.mxu0 %v2906_v48  ;;  %v2413_v41 = vcombine.low %v3600_v42, %v3605_v43  ;;  %v49_v45 = vld [vmem:[%s4135_s0 + $0xe0] sm:$0xff]  ;;  %v42_v48 = vld [vmem:[%s4135_s0 + $0xa8] sm:$0xff]  ;;  %v2982_v42 = vld [vmem:[%s4134_s1 + $0x670] ss:$8 sps:$4 sm:$0xff]  }
  0x8d   :  { %2032 = vmatprep.subr.bf16.mxu1 %v2909_v49  ;;  %2005 = vmatprep.mubr.bf16.mxu0 %v2414_v50  ;;  %v50_v49 = vld [vmem:[%s4135_s0 + $0xe8] sm:$0xff]  ;;  %v2985_v43 = vld [vmem:[%s4134_s1 + $0x770] ss:$8 sps:$4 sm:$0xff]   ;;  %v2430_v50 = vcombine.high %v41_v40, %v49_v45 }
  0x8e   :  { %2058 = vmatprep.mubr.bf16.mxu1 %v2416_v51  ;;  %v2993_v47 = vld [vmem:[%s4134_s1 + $0x764] ss:$8 sps:$4 sm:$0xff]   ;;  %v2432_v51 = vcombine.high %v42_v48, %v50_v49 }
  0x8f   :  { %1980 = vmatpush1.bf16.msra.mxu0 %v2904_v52  ;;  %v2988_v52 = vld [vmem:[%s4134_s1 + $0x660] ss:$8 sps:$4 sm:$0xff]  }
  0x90   :  { %2033 = vmatpush1.bf16.msra.mxu1 %v2907_v53  ;;  %1981 = vmatprep.subr.bf16.mxu0 %v2912_v54  ;;  %v2991_v53 = vld [vmem:[%s4134_s1 + $0x760] ss:$8 sps:$4 sm:$0xff]   ;;  %v2996_v54 = vld [vmem:[%s4134_s1 + $0x654] ss:$8 sps:$4 sm:$0xff]  }
  0x91   :  { %2034 = vmatprep.subr.bf16.mxu1 %v2915_v55  ;;  %v2999_v55 = vld [vmem:[%s4134_s1 + $0x754] ss:$8 sps:$4 sm:$0xff]  }
  0x93   :  { %1982 = vmatpush1.bf16.msra.mxu0 %v2910_v56  ;;  %v3826_v56 = vld [vmem:[%s4135_s0 + $0x30] sm:$0xff] }
  0x94   :  { %2035 = vmatpush1.bf16.msra.mxu1 %v2913_v57  ;;  %1983 = vmatprep.subr.bf16.mxu0 %v2918_v58  ;;  %v2429_v57 = vcombine.low %v41_v40, %v49_v45  ;;  %v2431_v58 = vcombine.low %v42_v48, %v50_v49  ;;  %v3054_v40 = vld [vmem:[%s4134_s1 + $0x6b0] ss:$8 sps:$4 sm:$0xff]   ;;  %v3065_v45 = vld [vmem:[%s4134_s1 + $0x7a4] ss:$8 sps:$4 sm:$0xff]   ;;  %v3060_v48 = vld [vmem:[%s4134_s1 + $0x6a0] ss:$8 sps:$4 sm:$0xff]  }
  0x95   :  { %2036 = vmatprep.subr.bf16.mxu1 %v2921_v59  ;;  %v3831_v59 = vld [vmem:[%s4135_s0 + $0x70] sm:$0xff]  ;;  %v3063_v49 = vld [vmem:[%s4134_s1 + $0x7a0] ss:$8 sps:$4 sm:$0xff]  }
  0x97   :  { %1984 = vmatpush1.bf16.msra.mxu0 %v2916_v60  ;;  %v3836_v60 = vld [vmem:[%s4135_s0 + $0x38] sm:$0xff] }
  0x98   :  { %2037 = vmatpush1.bf16.msra.mxu1 %v2919_v61  ;;  %1985 = vmatprep.subr.bf16.mxu0 %v2924_v62  ;;  %v3841_v61 = vld [vmem:[%s4135_s0 + $0x78] sm:$0xff] }
  0x99   :  { %2038 = vmatprep.subr.bf16.mxu1 %v2927_v63  ;;  %v2994_v62 = vld [vmem:[%s4134_s1 + $0x650] ss:$8 sps:$4 sm:$0xff]  }
  0x9a   :  { %v2997_v63 = vld [vmem:[%s4134_s1 + $0x750] ss:$8 sps:$4 sm:$0xff]  }
  0x9b   :  { %1986 = vmatpush1.bf16.msra.mxu0 %v2922_v0  ;;  %v3002_v0 = vld [vmem:[%s4134_s1 + $0x644] ss:$8 sps:$4 sm:$0xff]  }
  0x9c   :  { %2039 = vmatpush1.bf16.msra.mxu1 %v2925_v1  ;;  %1987 = vmatprep.subr.bf16.mxu0 %v2930_v2  ;;  %v3005_v1 = vld [vmem:[%s4134_s1 + $0x744] ss:$8 sps:$4 sm:$0xff]   ;;  %v2418_v2 = vcombine.high %v3826_v56, %v3831_v59 }
  0x9d   :  { %2040 = vmatprep.subr.bf16.mxu1 %v2933_v3  ;;  %v2420_v3 = vcombine.high %v3836_v60, %v3841_v61 }
  0x9f   :  { %1988 = vmatpush1.bf16.msra.mxu0 %v2928_v4  ;;  %v3000_v4 = vld [vmem:[%s4134_s1 + $0x640] ss:$8 sps:$4 sm:$0xff]  }
  0xa0   :  { %2041 = vmatpush1.bf16.msra.mxu1 %v2931_v5  ;;  %1989 = vmatprep.subr.bf16.mxu0 %v2936_v6  ;;  %v3003_v5 = vld [vmem:[%s4134_s1 + $0x740] ss:$8 sps:$4 sm:$0xff]   ;;  %v3008_v6 = vld [vmem:[%s4134_s1 + $0x634] ss:$8 sps:$4 sm:$0xff]  }
  0xa1   :  { %2042 = vmatprep.subr.bf16.mxu1 %v2939_v7  ;;  %v3011_v7 = vld [vmem:[%s4134_s1 + $0x734] ss:$8 sps:$4 sm:$0xff]  }
  0xa3   :  { %1990 = vmatpush2.bf16.msra.mxu0 %v2934_v8  ;;  %v3006_v8 = vld [vmem:[%s4134_s1 + $0x630] ss:$8 sps:$4 sm:$0xff]  }
  0xa4   :  { %2043 = vmatpush2.bf16.msra.mxu1 %v2937_v9  ;;  %1991 = vmatprep.subr.bf16.mxu0 %v2942_v10  ;;  %v3009_v9 = vld [vmem:[%s4134_s1 + $0x730] ss:$8 sps:$4 sm:$0xff]   ;;  %v3014_v10 = vld [vmem:[%s4134_s1 + $0x624] ss:$8 sps:$4 sm:$0xff]  }
  0xa5   :  { %2044 = vmatprep.subr.bf16.mxu1 %v2945_v11  ;;  %v3017_v11 = vld [vmem:[%s4134_s1 + $0x724] ss:$8 sps:$4 sm:$0xff]  }
  0xa7   :  { %1992 = vmatpush2.bf16.msra.mxu0 %v2940_v12  ;;  %v3012_v12 = vld [vmem:[%s4134_s1 + $0x620] ss:$8 sps:$4 sm:$0xff]  }
  0xa8   :  { %2045 = vmatpush2.bf16.msra.mxu1 %v2943_v13  ;;  %1993 = vmatprep.subr.bf16.mxu0 %v2948_v14  ;;  %v3015_v13 = vld [vmem:[%s4134_s1 + $0x720] ss:$8 sps:$4 sm:$0xff]   ;;  %v3020_v14 = vld [vmem:[%s4134_s1 + $0x614] ss:$8 sps:$4 sm:$0xff]  }
  0xa9   :  { %2046 = vmatprep.subr.bf16.mxu1 %v2951_v15  ;;  %v3023_v15 = vld [vmem:[%s4134_s1 + $0x714] ss:$8 sps:$4 sm:$0xff]  }
  0xab   :  { %1994 = vmatpush2.bf16.msra.mxu0 %v2946_v16  ;;  %v3018_v16 = vld [vmem:[%s4134_s1 + $0x610] ss:$8 sps:$4 sm:$0xff]  }
  0xac   :  { %2047 = vmatpush2.bf16.msra.mxu1 %v2949_v17  ;;  %1995 = vmatprep.subr.bf16.mxu0 %v2954_v18  ;;  %v3021_v17 = vld [vmem:[%s4134_s1 + $0x710] ss:$8 sps:$4 sm:$0xff]   ;;  %v3026_v18 = vld [vmem:[%s4134_s1 + $0x604] ss:$8 sps:$4 sm:$0xff]  }
  0xad   :  { %2048 = vmatprep.subr.bf16.mxu1 %v2957_v19  ;;  %v3029_v19 = vld [vmem:[%s4134_s1 + $0x704] ss:$8 sps:$4 sm:$0xff]  }
  0xaf   :  { %1996 = vmatpush2.bf16.msra.mxu0 %v2952_v20  ;;  %v3024_v20 = vld [vmem:[%s4134_s1 + $0x600] ss:$8 sps:$4 sm:$0xff]  }
  0xb0   :  { %2049 = vmatpush2.bf16.msra.mxu1 %v2955_v21  ;;  %1997 = vmatprep.subr.bf16.mxu0 %v2960_v22  ;;  %v3027_v21 = vld [vmem:[%s4134_s1 + $0x700] ss:$8 sps:$4 sm:$0xff]   ;;  %v3032_v22 = vld [vmem:[%s4134_s1 + $0x6f4] ss:$8 sps:$4 sm:$0xff]  }
  0xb1   :  { %2050 = vmatprep.subr.bf16.mxu1 %v2963_v23  ;;  %v3035_v23 = vld [vmem:[%s4134_s1 + $0x7f4] ss:$8 sps:$4 sm:$0xff]  }
  0xb3   :  { %1998 = vmatpush2.bf16.msra.mxu0 %v2958_v24  ;;  %v3030_v24 = vld [vmem:[%s4134_s1 + $0x6f0] ss:$8 sps:$4 sm:$0xff]  }
  0xb4   :  { %2051 = vmatpush2.bf16.msra.mxu1 %v2961_v25  ;;  %1999 = vmatprep.subr.bf16.mxu0 %v2966_v26  ;;  %v3033_v25 = vld [vmem:[%s4134_s1 + $0x7f0] ss:$8 sps:$4 sm:$0xff]   ;;  %v3038_v26 = vld [vmem:[%s4134_s1 + $0x6e4] ss:$8 sps:$4 sm:$0xff]  }
  0xb5   :  { %2052 = vmatprep.subr.bf16.mxu1 %v2969_v27  ;;  %v3041_v27 = vld [vmem:[%s4134_s1 + $0x7e4] ss:$8 sps:$4 sm:$0xff]  }
  0xb7   :  { %2000 = vmatpush2.bf16.msra.mxu0 %v2964_v28  ;;  %v3036_v28 = vld [vmem:[%s4134_s1 + $0x6e0] ss:$8 sps:$4 sm:$0xff]  }
  0xb8   :  { %2053 = vmatpush2.bf16.msra.mxu1 %v2967_v29  ;;  %2001 = vmatprep.subr.bf16.mxu0 %v2972_v30  ;;  %v3039_v29 = vld [vmem:[%s4134_s1 + $0x7e0] ss:$8 sps:$4 sm:$0xff]   ;;  %v3044_v30 = vld [vmem:[%s4134_s1 + $0x6d4] ss:$8 sps:$4 sm:$0xff]  }
  0xb9   :  { %2054 = vmatprep.subr.bf16.mxu1 %v2975_v31  ;;  %v3047_v31 = vld [vmem:[%s4134_s1 + $0x7d4] ss:$8 sps:$4 sm:$0xff]  }
  0xbb   :  { %2002 = vmatpush2.bf16.msra.mxu0 %v2970_v32  ;;  %v3042_v32 = vld [vmem:[%s4134_s1 + $0x6d0] ss:$8 sps:$4 sm:$0xff]  }
  0xbc   :  { %2055 = vmatpush2.bf16.msra.mxu1 %v2973_v33  ;;  %2003 = vmatprep.subr.bf16.mxu0 %v2978_v34  ;;  %v3045_v33 = vld [vmem:[%s4134_s1 + $0x7d0] ss:$8 sps:$4 sm:$0xff]   ;;  %v3050_v34 = vld [vmem:[%s4134_s1 + $0x6c4] ss:$8 sps:$4 sm:$0xff]  }
  0xbd   :  { %2056 = vmatprep.subr.bf16.mxu1 %v2981_v35  ;;  %v3053_v35 = vld [vmem:[%s4134_s1 + $0x7c4] ss:$8 sps:$4 sm:$0xff]  }
  0xbf   :  { %2004 = vmatpush2.bf16.msra.mxu0 %v2976_v36  ;;  %v3048_v36 = vld [vmem:[%s4134_s1 + $0x6c0] ss:$8 sps:$4 sm:$0xff]  }
  0xc0   :  { %2057 = vmatpush2.bf16.msra.mxu1 %v2979_v37  ;;  %2079 = vmatprep.subr.bf16.mxu0 %v2984_v38  ;;  %v3051_v37 = vld [vmem:[%s4134_s1 + $0x7c0] ss:$8 sps:$4 sm:$0xff]   ;;  %v3056_v38 = vld [vmem:[%s4134_s1 + $0x6b4] ss:$8 sps:$4 sm:$0xff]  }
  0xc1   :  { %2132 = vmatprep.subr.bf16.mxu1 %v2987_v39  ;;  %v3059_v39 = vld [vmem:[%s4134_s1 + $0x7b4] ss:$8 sps:$4 sm:$0xff]  }
  0xc2   :  { %2006 = vmatmul.mubr.bf16.vlgmr.msra.gmra.mxu0 %v2413_v41  ;;  %v3057_v41 = vld [vmem:[%s4134_s1 + $0x7b0] ss:$8 sps:$4 sm:$0xff]  }
  0xc3   :  { %2059 = vmatmul.mubr.bf16.vlgmr.msra.gmra.mxu1 %v2415_v44  ;;  %2080 = vmatpush1.bf16.msra.mxu0 %v2982_v42  ;;  %v3062_v44 = vld [vmem:[%s4134_s1 + $0x6a4] ss:$8 sps:$4 sm:$0xff]   ;;  %v3068_v42 = vld [vmem:[%s4134_s1 + $0x694] ss:$8 sps:$4 sm:$0xff]  }
  0xc4   :  { %2133 = vmatpush1.bf16.msra.mxu1 %v2985_v43  ;;  %2081 = vmatprep.subr.bf16.mxu0 %v2990_v46  ;;  %v3071_v43 = vld [vmem:[%s4134_s1 + $0x794] ss:$8 sps:$4 sm:$0xff]   ;;  %v3066_v46 = vld [vmem:[%s4134_s1 + $0x690] ss:$8 sps:$4 sm:$0xff]  }
  0xc5   :  { %2134 = vmatprep.subr.bf16.mxu1 %v2993_v47  ;;  %2015 = vmatprep.mubr.bf16.mxu0 %v2430_v50  ;;  %v3069_v47 = vld [vmem:[%s4134_s1 + $0x790] ss:$8 sps:$4 sm:$0xff]   ;;  %v3074_v50 = vld [vmem:[%s4134_s1 + $0x684] ss:$8 sps:$4 sm:$0xff]  }
  0xc6   :  { %2068 = vmatprep.mubr.bf16.mxu1 %v2432_v51  ;;  %v3077_v51 = vld [vmem:[%s4134_s1 + $0x784] ss:$8 sps:$4 sm:$0xff]  }
  0xc7   :  { %2082 = vmatpush1.bf16.msra.mxu0 %v2988_v52  ;;  %v3072_v52 = vld [vmem:[%s4134_s1 + $0x680] ss:$8 sps:$4 sm:$0xff]  }
  0xc8   :  { %2135 = vmatpush1.bf16.msra.mxu1 %v2991_v53  ;;  %2083 = vmatprep.subr.bf16.mxu0 %v2996_v54  ;;  %v3075_v53 = vld [vmem:[%s4134_s1 + $0x780] ss:$8 sps:$4 sm:$0xff]   ;;  %v43_v54 = vld [vmem:[%s4135_s0 + $0xb0] sm:$0xff] }
  0xc9   :  { %2136 = vmatprep.subr.bf16.mxu1 %v2999_v55  ;;  %v51_v55 = vld [vmem:[%s4135_s0 + $0xf0] sm:$0xff] }
  0xca   :  { %2016 = vmatmul.mubr.bf16.gmra.mxu0 %v2429_v57  ;;  %v44_v57 = vld [vmem:[%s4135_s0 + $0xb8] sm:$0xff] }
  0xcb   :  { %2069 = vmatmul.mubr.bf16.gmra.mxu1 %v2431_v58  ;;  %2084 = vmatpush1.bf16.msra.mxu0 %v2994_v62  ;;  %v52_v58 = vld [vmem:[%s4135_s0 + $0xf8] sm:$0xff]  ;;  %v2417_v62 = vcombine.low %v3826_v56, %v3831_v59 }
  0xcc   :  { %2137 = vmatpush1.bf16.msra.mxu1 %v2997_v63  ;;  %2085 = vmatprep.subr.bf16.mxu0 %v3002_v0  ;;  %v2419_v63 = vcombine.low %v3836_v60, %v3841_v61  ;;  %v2434_v0 = vcombine.high %v43_v54, %v51_v55 }
  0xcd   :  { %2138 = vmatprep.subr.bf16.mxu1 %v3005_v1  ;;  %2111 = vmatprep.mubr.bf16.mxu0 %v2418_v2  ;;  %v2436_v1 = vcombine.high %v44_v57, %v52_v58  ;;  %v2433_v2 = vcombine.low %v43_v54, %v51_v55 }
  0xce   :  { %2164 = vmatprep.mubr.bf16.mxu1 %v2420_v3  ;;  %v2435_v3 = vcombine.low %v44_v57, %v52_v58 }
  0xcf   :  { %2086 = vmatpush1.bf16.msra.mxu0 %v3000_v4 }
  0xd0   :  { %2139 = vmatpush1.bf16.msra.mxu1 %v3003_v5  ;;  %2087 = vmatprep.subr.bf16.mxu0 %v3008_v6 }
  0xd1   :  { %2140 = vmatprep.subr.bf16.mxu1 %v3011_v7 }
  0xd3   :  { %2088 = vmatpush1.bf16.msra.mxu0 %v3006_v8 }
  0xd4   :  { %2141 = vmatpush1.bf16.msra.mxu1 %v3009_v9  ;;  %2089 = vmatprep.subr.bf16.mxu0 %v3014_v10 }
  0xd5   :  { %2142 = vmatprep.subr.bf16.mxu1 %v3017_v11 }
  0xd7   :  { %2090 = vmatpush1.bf16.msra.mxu0 %v3012_v12 }
  0xd8   :  { %2143 = vmatpush1.bf16.msra.mxu1 %v3015_v13  ;;  %2091 = vmatprep.subr.bf16.mxu0 %v3020_v14 }
  0xd9   :  { %2144 = vmatprep.subr.bf16.mxu1 %v3023_v15 }
  0xdb   :  { %2092 = vmatpush1.bf16.msra.mxu0 %v3018_v16 }
  0xdc   :  { %2145 = vmatpush1.bf16.msra.mxu1 %v3021_v17  ;;  %2093 = vmatprep.subr.bf16.mxu0 %v3026_v18 }
  0xdd   :  { %2146 = vmatprep.subr.bf16.mxu1 %v3029_v19 }
  0xdf   :  { %2094 = vmatpush1.bf16.msra.mxu0 %v3024_v20 }
  0xe0   :  { %2147 = vmatpush1.bf16.msra.mxu1 %v3027_v21  ;;  %2095 = vmatprep.subr.bf16.mxu0 %v3032_v22 }
  0xe1   :  { %2148 = vmatprep.subr.bf16.mxu1 %v3035_v23 }
  0xe3   :  { %2096 = vmatpush2.bf16.msra.mxu0 %v3030_v24 }
  0xe4   :  { %2149 = vmatpush2.bf16.msra.mxu1 %v3033_v25  ;;  %2097 = vmatprep.subr.bf16.mxu0 %v3038_v26 }
  0xe5   :  { %2150 = vmatprep.subr.bf16.mxu1 %v3041_v27 }
  0xe7   :  { %2098 = vmatpush2.bf16.msra.mxu0 %v3036_v28 }
  0xe8   :  { %2151 = vmatpush2.bf16.msra.mxu1 %v3039_v29  ;;  %2099 = vmatprep.subr.bf16.mxu0 %v3044_v30 }
  0xe9   :  { %2152 = vmatprep.subr.bf16.mxu1 %v3047_v31 }
  0xeb   :  { %2100 = vmatpush2.bf16.msra.mxu0 %v3042_v32 }
  0xec   :  { %2153 = vmatpush2.bf16.msra.mxu1 %v3045_v33  ;;  %2101 = vmatprep.subr.bf16.mxu0 %v3050_v34  ;;  %v311_v34 = vlaneseq }
  0xed   :  { %2154 = vmatprep.subr.bf16.mxu1 %v3053_v35 }
  0xef   :  { %2102 = vmatpush2.bf16.msra.mxu0 %v3048_v36 }
  0xf0   :  { %2155 = vmatpush2.bf16.msra.mxu1 %v3051_v37  ;;  %2103 = vmatprep.subr.bf16.mxu0 %v3056_v38  ;;  %v4039_v37 = vshrl.u32 %v311_v34, 7 }
  0xf1   :  { %2156 = vmatprep.subr.bf16.mxu1 %v3059_v39 }
  0xf2   :  { %4147 = vst [vmem:[#allocation4_spill] sm:$0xff] %v4039_v37 }
  0xf3   :  { %2104 = vmatpush2.bf16.msra.mxu0 %v3054_v40  ;;  %v4042_v40 = vsub.s32 0, %v4039_v37 }
  0xf4   :  { %2157 = vmatpush2.bf16.msra.mxu1 %v3057_v41  ;;  %2105 = vmatprep.subr.bf16.mxu0 %v3062_v44  ;;  %v309_v41 = vld [vmem:[%s4136_s2] sm:$0x3] }
  0xf5   :  { %2158 = vmatprep.subr.bf16.mxu1 %v3065_v45  ;;  %4148 = vst [vmem:[#allocation5_spill] sm:$0xff] %v4042_v40  ;;  %v4048_v45 = vsub.s32 1, %v4039_v37 }
  0xf7   :  { %2106 = vmatpush2.bf16.msra.mxu0 %v3060_v48  ;;  %4149 = vst [vmem:[#allocation6_spill] sm:$0xff] %v4048_v45 }
  0xf8   :  { %2159 = vmatpush2.bf16.msra.mxu1 %v3063_v49  ;;  %2107 = vmatprep.subr.bf16.mxu0 %v3068_v42  ;;  %v314_v49 = vrot.slane %v309_v41, %v4042_v40 }
  0xf9   :  { %2160 = vmatprep.subr.bf16.mxu1 %v3071_v43 }
  0xfb   :  { %2108 = vmatpush2.bf16.msra.mxu0 %v3066_v46  ;;  %v318_v46 = vrot.slane %v309_v41, %v4048_v45 }
  0xfc   :  { %2161 = vmatpush2.bf16.msra.mxu1 %v3069_v47  ;;  %2109 = vmatprep.subr.bf16.mxu0 %v3074_v50 }
  0xfd   :  { %2162 = vmatprep.subr.bf16.mxu1 %v3077_v51 }
  0xff   :  { %2110 = vmatpush2.bf16.msra.mxu0 %v3072_v52 }
 0x100   :  { %2163 = vmatpush2.bf16.msra.mxu1 %v3075_v53 }
 0x102   :  { %2112 = vmatmul.mubr.bf16.vlgmr.msra.gmra.mxu0 %v2417_v62  ;;  %v1795_v4 = vpop.f32.mrf.mxu0 }
 0x103   :  { %2165 = vmatmul.mubr.bf16.vlgmr.msra.gmra.mxu1 %v2419_v63  ;;  %2121 = vmatprep.mubr.bf16.mxu0 %v2434_v0  ;;  %v1848_v5 = vpop.f32.mrf.mxu1  ;;  %v1796_v50 = vadd.f32 %v1795_v4, %v314_v49 }
 0x104   :  { %2174 = vmatprep.mubr.bf16.mxu1 %v2436_v1  ;;  %v1797_v6 = vpop.f32.mrf.mxu0 }
 0x105   :  { %v1850_v7 = vpop.f32.mrf.mxu1  ;;  %v1798_v54 = vadd.f32 %v1797_v6, %v318_v46  ;;  %v1849_v58 = vadd.f32 %v1848_v5, %v1796_v50 }
 0x106   :  { %v1799_v56 = vpop.f32.mrf.mxu0 }
 0x107   :  { %v1852_v59 = vpop.f32.mrf.mxu1  ;;  %v1800_v47 = vadd.f32 %v1799_v56, %v314_v49  ;;  %v1851_v34 = vadd.f32 %v1850_v7, %v1798_v54 }
 0x108   :  { %v1801_v8 = vpop.f32.mrf.mxu0 }
 0x109   :  { %v1854_v61 = vpop.f32.mrf.mxu1  ;;  %v1802_v51 = vadd.f32 %v1801_v8, %v318_v46  ;;  %v1853_v55 = vadd.f32 %v1852_v59, %v1800_v47 }
 0x10a   :  { %2122 = vmatmul.mubr.bf16.gmra.mxu0 %v2433_v2  ;;  %v1805_v60 = vpop.f32.mrf.mxu0 }
 0x10b   :  { %2175 = vmatmul.mubr.bf16.gmra.mxu1 %v2435_v3  ;;  %v1858_v10 = vpop.f32.mrf.mxu1  ;;  %v1806_v57 = vadd.f32 %v1805_v60, %v314_v49  ;;  %v1855_v62 = vadd.f32 %v1854_v61, %v1802_v51 }
 0x10c   :  { %v1807_v9 = vpop.f32.mrf.mxu0 }
 0x10d   :  { %v1860_v12 = vpop.f32.mrf.mxu1  ;;  %v1808_v63 = vadd.f32 %v1807_v9, %v318_v46  ;;  %v1859_v40 = vadd.f32 %v1858_v10, %v1806_v57 }
 0x10e   :  { %v1809_v11 = vpop.f32.mrf.mxu0 }
 0x10f   :  { %v1862_v14 = vpop.f32.mrf.mxu1  ;;  %v1810_v1 = vadd.f32 %v1809_v11, %v314_v49  ;;  %v1861_v56 = vadd.f32 %v1860_v12, %v1808_v63 }
 0x110   :  { %v1811_v13 = vpop.f32.mrf.mxu0 }
 0x111   :  { %v4025_v16 = vpop.f32.mrf.mxu1  ;;  %v1812_v41 = vadd.f32 %v1811_v13, %v318_v46 }
 0x113   :  { %v1865_v11 = vadd.f32 %v4025_v16, %v1812_v41 }
 0x142   :  { %v1901_v15 = vpop.f32.mrf.mxu0 }
 0x143   :  { %v1954_v17 = vpop.f32.mrf.mxu1  ;;  %v1902_v37 = vadd.f32 %v1901_v15, %v1849_v58 }
 0x144   :  { %v1903_v18 = vpop.f32.mrf.mxu0 }
 0x145   :  { %v4027_v19 = vpop.f32.mrf.mxu1  ;;  %v1904_v4 = vadd.f32 %v1903_v18, %v1851_v34  ;;  %v1955_v60 = vadd.f32 %v1954_v17, %v1902_v37 }
 0x146   :  { %v1905_v20 = vpop.f32.mrf.mxu0 }
 0x147   :  { %v1958_v21 = vpop.f32.mrf.mxu1  ;;  %v1906_v0 = vadd.f32 %v1905_v20, %v1853_v55  ;;  %v1957_v10 = vadd.f32 %v4027_v19, %v1904_v4 }
 0x148   :  { %v1907_v22 = vpop.f32.mrf.mxu0 }
 0x149   :  { %v1960_v23 = vpop.f32.mrf.mxu1  ;;  %v1959_v8 = vadd.f32 %v1958_v21, %v1906_v0 }
 0x14a   :  { %v1911_v24 = vpop.f32.mrf.mxu0 }
 0x14b   :  { %v1964_v25 = vpop.f32.mrf.mxu1  ;;  %v1912_v45 = vadd.f32 %v1911_v24, %v1859_v40 }
 0x14c   :  { %v1913_v26 = vpop.f32.mrf.mxu0 }
 0x14d   :  { %v4029_v27 = vpop.f32.mrf.mxu1  ;;  %v1914_v61 = vadd.f32 %v1913_v26, %v1861_v56  ;;  %v1965_v15 = vadd.f32 %v1964_v25, %v1912_v45 }
 0x14e   :  { %v1915_v28 = vpop.f32.mrf.mxu0 }
 0x14f   :  { %v4031_v29 = vpop.f32.mrf.mxu1 }
 0x150   :  { %v1917_v30 = vpop.f32.mrf.mxu0 }
 0x151   :  { %v4033_v31 = vpop.f32.mrf.mxu1  ;;  %v1918_v18 = vadd.f32 %v1917_v30, %v1865_v11 }
 0x152   :  { %4145 = vst [vmem:[#allocation2_spill] sm:$0xff] %v4033_v31  ;;  %v1863_v31 = vadd.f32 %v1862_v14, %v1810_v1  ;;  %v1967_v14 = vadd.f32 %v4029_v27, %v1914_v61 }
 0x154   :  { %v1916_v20 = vadd.f32 %v1915_v28, %v1863_v31 }
 0x156   :  { %v1969_v26 = vadd.f32 %v4031_v29, %v1916_v20 }
 0x159   :  { %v4150_v25 = vld [vmem:[#allocation2_spill] sm:$0xff] }
 0x182   :  { %v2007_v32 = vpop.f32.mrf.mxu0 }
 0x183   :  { %v4035_v33 = vpop.f32.mrf.mxu1  ;;  %v2008_v13 = vadd.f32 %v2007_v32, %v1955_v60  ;;  %v1971_v32 = vadd.f32 %v4150_v25, %v1918_v18 }
 0x184   :  { %v2009_v35 = vpop.f32.mrf.mxu0 }
 0x185   :  { %v4037_v36 = vpop.f32.mrf.mxu1  ;;  %v2010_v24 = vadd.f32 %v2009_v35, %v1957_v10  ;;  %v2061_v28 = vadd.f32 %v4035_v33, %v2008_v13 }
 0x186   :  { %4146 = vst [vmem:[#allocation3_spill] sm:$0xff] %v4037_v36  ;;  %v2011_v38 = vpop.f32.mrf.mxu0  ;;  %v1908_v36 = vadd.f32 %v1907_v22, %v1855_v62 }
 0x187   :  { %v2064_v39 = vpop.f32.mrf.mxu1  ;;  %v2012_v9 = vadd.f32 %v2011_v38, %v1959_v8 }
 0x188   :  { %v2013_v44 = vpop.f32.mrf.mxu0  ;;  %v1961_v5 = vadd.f32 %v1960_v23, %v1908_v36 }
 0x189   :  { %v2066_v48 = vpop.f32.mrf.mxu1  ;;  %v2065_v17 = vadd.f32 %v2064_v39, %v2012_v9 }
 0x18a   :  { %v2017_v42 = vpop.f32.mrf.mxu0  ;;  %v2014_v12 = vadd.f32 %v2013_v44, %v1961_v5 }
 0x18b   :  { %v2070_v43 = vpop.f32.mrf.mxu1  ;;  %v2018_v23 = vadd.f32 %v2017_v42, %v1965_v15 }
 0x18c   :  { %v2019_v52 = vpop.f32.mrf.mxu0  ;;  %v2067_v31 = vadd.f32 %v2066_v48, %v2014_v12 }
 0x18d   :  { %v2072_v53 = vpop.f32.mrf.mxu1  ;;  %v2020_v37 = vadd.f32 %v2019_v52, %v1967_v14  ;;  %v4151_v44 = vld [vmem:[#allocation3_spill] sm:$0xff]  ;;  %v2071_v27 = vadd.f32 %v2070_v43, %v2018_v23 }
 0x18e   :  { %v2021_v2 = vpop.f32.mrf.mxu0  ;;  %v2063_v45 = vadd.f32 %v4151_v44, %v2010_v24 }
 0x18f   :  { %v2074_v3 = vpop.f32.mrf.mxu1  ;;  %v2022_v38 = vadd.f32 %v2021_v2, %v1969_v26  ;;  %v2073_v47 = vadd.f32 %v2072_v53, %v2020_v37 }
 0x190   :  { %v2023_v6 = vpop.f32.mrf.mxu0 }
 0x191   :  { %v2076_v59 = vpop.f32.mrf.mxu1  ;;  %v2024_v42 = vadd.f32 %v2023_v6, %v1971_v32  ;;  %v2075_v48 = vadd.f32 %v2074_v3, %v2022_v38 }
 0x193   :  { %v2077_v62 = vadd.f32 %v2076_v59, %v2024_v42 }
 0x1c2   :  { %v2113_v49 = vpop.f32.mrf.mxu0 }
 0x1c3   :  { %v2166_v7 = vpop.f32.mrf.mxu1  ;;  %v2114_v35 = vadd.f32 %v2113_v49, %v2061_v28 }
 0x1c4   :  { %v2115_v21 = vpop.f32.mrf.mxu0 }
 0x1c5   :  { %v2168_v22 = vpop.f32.mrf.mxu1  ;;  %v2116_v50 = vadd.f32 %v2115_v21, %v2063_v45  ;;  %v4061_v55 = vadd.f32 %v2166_v7, %v2114_v35 }
 0x1c6   :  { %v2117_v36 = vpop.f32.mrf.mxu0 }
 0x1c7   :  { %v2170_v16 = vpop.f32.mrf.mxu1  ;;  %v2118_v19 = vadd.f32 %v2117_v36, %v2065_v17  ;;  %v4067_v1 = vadd.f32 %v2168_v22, %v2116_v50 }
 0x1c8   :  { %v2119_v30 = vpop.f32.mrf.mxu0 }
 0x1c9   :  { %v2172_v40 = vpop.f32.mrf.mxu1  ;;  %v2120_v39 = vadd.f32 %v2119_v30, %v2067_v31  ;;  %v4059_v51 = vadd.f32 %v2170_v16, %v2118_v19 }
 0x1ca   :  { %v2123_v46 = vpop.f32.mrf.mxu0 }
 0x1cb   :  { %v2176_v29 = vpop.f32.mrf.mxu1  ;;  %v2124_v33 = vadd.f32 %v2123_v46, %v2071_v27  ;;  %v4063_v57 = vadd.f32 %v2172_v40, %v2120_v39  ;;  %v2227_v53 = vadd.f32 %v4059_v51, %v4061_v55 }
 0x1cc   :  { %v2125_v52 = vpop.f32.mrf.mxu0 }
 0x1cd   :  { %v2178_v54 = vpop.f32.mrf.mxu1  ;;  %v4065_v58 = vadd.f32 %v2176_v29, %v2124_v33  ;;  %v2126_v43 = vadd.f32 %v2125_v52, %v2073_v47  ;;  %v2236_v8 = vadd.f32 %v4063_v57, %v4067_v1 }
 0x1ce   :  { %v2127_v63 = vpop.f32.mrf.mxu0 }
 0x1cf   :  { %v2180_v0 = vpop.f32.mrf.mxu1  ;;  %v4071_v2 = vadd.f32 %v2178_v54, %v2126_v43  ;;  %v2128_v3 = vadd.f32 %v2127_v63, %v2075_v48  ;;  %v2228_v41 = vadd.f32 %v2227_v53, %v4065_v58 }
 0x1d0   :  { %v2129_v34 = vpop.f32.mrf.mxu0 }
 0x1d1   :  { %v4074_v56 = vadd.f32 %v2180_v0, %v2128_v3  ;;  %v2130_v4 = vadd.f32 %v2129_v34, %v2077_v62  ;;  %v2182_v6 = vpop.f32.mrf.mxu1  ;;  %v2237_v5 = vadd.f32 %v2236_v8, %v4071_v2 }
 0x1d3   :  { %v2229_v59 = vadd.f32 %v2228_v41, %v4074_v56  ;;  %v4079_v60 = vadd.f32 %v2182_v6, %v2130_v4  ;;  %v3082_v6 = vmov 1966171168  }
 0x1d5   :  { %v2230_v61 = vrot.slane %v2229_v59, 4  ;;  %v2238_v9 = vadd.f32 %v2237_v5, %v4079_v60 }
 0x1d7   :  { %v2231_v11 = vadd.f32 %v2230_v61, %v2229_v59  ;;  %v2239_v20 = vrot.slane %v2238_v9, 4  ;;  %v2300_v59 = vunpack.c.l.s4 %v3082_v6 }
 0x1d9   :  { %v2232_v49 = vrot.slane %v2231_v11, 2  ;;  %v2240_v7 = vadd.f32 %v2239_v20, %v2238_v9  ;;  %v2301_v5 = vunpack.c.0.s8 %v2300_v59  ;;  %v4152_v9 = vld [vmem:[#allocation4_spill] sm:$0xff] }
 0x1db   :  { %v2233_v10 = vadd.f32 %v2232_v49, %v2231_v11  ;;  %v2241_v15 = vrot.slane %v2240_v7, 2  ;;  %v2304_v11 = vsub.s32 %v2301_v5, %v4152_v9 }
 0x1dd   :  { %v2234_v13 = vrot.slane %v2233_v10, 1  ;;  %v2242_v12 = vadd.f32 %v2241_v15, %v2240_v7 }
 0x1df   :  { %v2235_v18 = vadd.f32 %v2234_v13, %v2233_v10  ;;  %v2243_v21 = vrot.slane %v2242_v12, 1  ;;  %v2291_v10 = vld [vmem:[%s4137_s3] sm:$0x3] }
 0x1e1   :  { %v2245_v22 = vmul.f32 0.03125, %v2235_v18  ;;  %v2244_v14 = vadd.f32 %v2243_v21, %v2242_v12  ;;  %v4153_v12 = vld [vmem:[#allocation5_spill] sm:$0xff]  ;;  %v4154_v21 = vld [vmem:[#allocation6_spill] sm:$0xff] }
 0x1e3   :  { %v2247_v24 = vsub.f32 %v4061_v55, %v2245_v22  ;;  %v2249_v17 = vsub.f32 %v4059_v51, %v2245_v22  ;;  %v2251_v23 = vsub.f32 %v4065_v58, %v2245_v22  ;;  %v2246_v26 = vmul.f32 0.03125, %v2244_v14 }
 0x1e4   :  { %v2253_v36 = vsub.f32 %v4074_v56, %v2245_v22 }
 0x1e5   :  { %v2263_v16 = vmul.f32 %v2247_v24, %v2247_v24  ;;  %v2265_v28 = vmul.f32 %v2249_v17, %v2249_v17  ;;  %v2248_v31 = vsub.f32 %v4067_v1, %v2246_v26  ;;  %v2250_v37 = vsub.f32 %v4063_v57, %v2246_v26 }
 0x1e6   :  { %v2252_v19 = vsub.f32 %v4071_v2, %v2246_v26  ;;  %v2267_v25 = vmul.f32 %v2251_v23, %v2251_v23  ;;  %v2254_v38 = vsub.f32 %v4079_v60, %v2246_v26  ;;  %v2269_v44 = vmul.f32 %v2253_v36, %v2253_v36 }
 0x1e7   :  { %v2271_v32 = vadd.f32 %v2265_v28, %v2263_v16  ;;  %v2264_v30 = vmul.f32 %v2248_v31, %v2248_v31  ;;  %v2266_v40 = vmul.f32 %v2250_v37, %v2250_v37  ;;  %v2315_v16 = vld [vmem:[%s4138_s4] sm:$0x3] }
 0x1e8   :  { %v2268_v27 = vmul.f32 %v2252_v19, %v2252_v19  ;;  %v2270_v42 = vmul.f32 %v2254_v38, %v2254_v38 }
 0x1e9   :  { %v2272_v45 = vadd.f32 %v2271_v32, %v2267_v25  ;;  %v2280_v35 = vadd.f32 %v2266_v40, %v2264_v30 }
 0x1eb   :  { %v2273_v39 = vadd.f32 %v2272_v45, %v2269_v44  ;;  %v2281_v46 = vadd.f32 %v2280_v35, %v2268_v27 }
 0x1ed   :  { %v2274_v29 = vrot.slane %v2273_v39, 4  ;;  %v2282_v47 = vadd.f32 %v2281_v46, %v2270_v42 }
 0x1ef   :  { %v2275_v50 = vadd.f32 %v2274_v29, %v2273_v39  ;;  %v2283_v33 = vrot.slane %v2282_v47, 4 }
 0x1f1   :  { %v2276_v48 = vrot.slane %v2275_v50, 2  ;;  %v2284_v52 = vadd.f32 %v2283_v33, %v2282_v47 }
 0x1f3   :  { %v2277_v54 = vadd.f32 %v2276_v48, %v2275_v50  ;;  %v2285_v43 = vrot.slane %v2284_v52, 2 }
 0x1f5   :  { %v2278_v62 = vrot.slane %v2277_v54, 1  ;;  %v2286_v63 = vadd.f32 %v2285_v43, %v2284_v52 }
 0x1f7   :  { %v2279_v0 = vadd.f32 %v2278_v62, %v2277_v54  ;;  %v2287_v53 = vrot.slane %v2286_v63, 1 }
 0x1f9   :  { %v2289_v3 = vmul.f32 0.03125, %v2279_v0  ;;  %v2288_v34 = vadd.f32 %v2287_v53, %v2286_v63 }
 0x1fb   :  { %v2292_v41 = vadd.f32 1e-05, %v2289_v3  ;;  %v2290_v4 = vmul.f32 0.03125, %v2288_v34 }
 0x1fd   :  { %v2293_v8 = vadd.f32 1e-05, %v2290_v4  ;;  %3078 = vrsqrt.f32 %v2292_v41 }
 0x1ff   :  { %3080 = vrsqrt.f32 %v2293_v8 }
 0x20a   :  { %v3079_v61 = vpop.eup %3078 }
 0x20c   :  { %v3081_v20 = vpop.eup %3080 }
 0x20d   :  { %v2298_v49 = vcombine.low %v3079_v61, %v3081_v20 }
 0x20f   :  { %v2305_v7 = vrot.slane %v2298_v49, %v2304_v11 }
 0x211   :  { %v2312_v15 = vrot.slane %v2305_v7, %v2304_v11 }
 0x213   :  { %v2314_v13 = vmul.f32 %v2312_v15, %v2291_v10 }
 0x215   :  { %v2320_v18 = vrot.slane %v2314_v13, %v4153_v12  ;;  %v2324_v14 = vrot.slane %v2314_v13, %v4154_v21 }
 0x217   :  { %v2327_v24 = vmul.f32 %v2320_v18, %v2245_v22  ;;  %v2328_v17 = vmul.f32 %v2324_v14, %v2246_v26  ;;  %v2348_v37 = vmul.f32 %v2320_v18, %v4061_v55  ;;  %v2349_v19 = vmul.f32 %v2324_v14, %v4067_v1 }
 0x218   :  { %v2350_v25 = vmul.f32 %v2320_v18, %v4059_v51  ;;  %v2351_v32 = vmul.f32 %v2324_v14, %v4063_v57  ;;  %v2352_v26 = vmul.f32 %v2320_v18, %v4065_v58  ;;  %v2353_v30 = vmul.f32 %v2324_v14, %v4071_v2 }
 0x219   :  { %v2331_v23 = vcombine.low %v2327_v24, %v2328_v17  ;;  %v2354_v40 = vmul.f32 %v2320_v18, %v4074_v56  ;;  %v2355_v44 = vmul.f32 %v2324_v14, %v4079_v60 }
 0x21b   :  { %v2338_v36 = vrot.slane %v2331_v23, %v2304_v11 }
 0x21d   :  { %v2345_v28 = vrot.slane %v2338_v36, %v2304_v11 }
 0x21f   :  { %v2347_v31 = vsub.f32 %v2315_v16, %v2345_v28 }
 0x221   :  { %v2360_v38 = vrot.slane %v2347_v31, %v4153_v12  ;;  %v2364_v22 = vrot.slane %v2347_v31, %v4154_v21 }
 0x223   :  { %v2367_v45 = vadd.f32 %v2360_v38, %v2348_v37  ;;  %v2368_v55 = vadd.f32 %v2364_v22, %v2349_v19  ;;  %v2369_v27 = vadd.f32 %v2360_v38, %v2350_v25  ;;  %v2370_v1 = vadd.f32 %v2364_v22, %v2351_v32 }
 0x224   :  { %v2371_v35 = vadd.f32 %v2360_v38, %v2352_v26  ;;  %v2372_v51 = vadd.f32 %v2364_v22, %v2353_v30  ;;  %v2373_v39 = vadd.f32 %v2360_v38, %v2354_v40  ;;  %v2374_v57 = vadd.f32 %v2364_v22, %v2355_v44 }
 0x225   :  { %v2375_v42 = vmul.f32 0.2, %v2367_v45  ;;  %v2376_v46 = vmul.f32 0.2, %v2368_v55  ;;  %v2377_v29 = vmul.f32 0.2, %v2369_v27 }
 0x226   :  { %v2378_v47 = vmul.f32 0.2, %v2370_v1  ;;  %v2379_v50 = vmul.f32 0.2, %v2371_v35  ;;  %v2380_v58 = vmul.f32 0.2, %v2372_v51 }
 0x227   :  { %v2381_v33 = vmul.f32 0.2, %v2373_v39  ;;  %v2382_v2 = vmul.f32 0.2, %v2374_v57  ;;  %v2383_v48 = vmax.f32 %v2367_v45, %v2375_v42  ;;  %v2384_v56 = vmax.f32 %v2368_v55, %v2376_v46 }
 0x228   :  { %v2385_v52 = vmax.f32 %v2369_v27, %v2377_v29  ;;  %v2386_v60 = vmax.f32 %v2370_v1, %v2378_v47  ;;  %v2387_v54 = vmax.f32 %v2371_v35, %v2379_v50  ;;  %v2388_v43 = vmax.f32 %v2372_v51, %v2380_v58 }
 0x229   :  { %v2389_v62 = vmax.f32 %v2373_v39, %v2381_v33  ;;  %v2390_v63 = vmax.f32 %v2374_v57, %v2382_v2  ;;  %2391 = vst [vmem:[%s4139_s5] sm:$0xff] %v2383_v48  ;;  %2392 = vst [vmem:[%s4139_s5 + $0x8] sm:$0xff] %v2384_v56 }
 0x22a   :  { %2393 = vst [vmem:[%s4139_s5 + $0x10] sm:$0xff] %v2385_v52  ;;  %2394 = vst [vmem:[%s4139_s5 + $0x18] sm:$0xff] %v2386_v60 }
 0x22b   :  { %2395 = vst [vmem:[%s4139_s5 + $0x20] sm:$0xff] %v2387_v54  ;;  %2396 = vst [vmem:[%s4139_s5 + $0x28] sm:$0xff] %v2388_v43 }
 0x22c   :  { %2397 = vst [vmem:[%s4139_s5 + $0x30] sm:$0xff] %v2389_v62  ;;  %2398 = vst [vmem:[%s4139_s5 + $0x38] sm:$0xff] %v2390_v63 }

// kernel: discriminator_forward.10
= control target key start
LH: loop header
LB: loop body
LE: loop exit
PB: predicated region body
PF: predicated region fallthrough
CT: control target
= control target key end

     0   :  { %s10085_s18 = smov 0   ;;  %s10087_s19 = smov 0   ;;  %s11904_s0 = inlined_call_operand.vmem [shape: bf16[8,4096], index: 0, kind: input, shape index: {}]   ;;  %s11905_s1 = inlined_call_operand.vmem [shape: bf16[4096,512], index: 1, kind: input, shape index: {}]   ;;  %s11906_s2 = inlined_call_operand.vmem [shape: f32[1,512], index: 2, kind: input, shape index: {}]   ;;  %s11907_s3 = inlined_call_operand.vmem [shape: f32[1,512], index: 3, kind: input, shape index: {}]   ;;  %s11908_s4 = inlined_call_operand.vmem [shape: f32[1,512], index: 4, kind: input, shape index: {}]   ;;  %s11909_s5 = inlined_call_operand.vmem [shape: f32[8,512], index: 5, kind: output, shape index: {}]  }
   0x1   :  { %s10089_s20 = smov 0   ;;  %s10091_s21 = smov 0  }
   0x2   :  { %s10093_s22 = smov 0  }
   0x3 LB: > { %s27_s23 = sadd.s32 1, %s10048_s21  ;;  %p67_p1 = scmp.ne.s32.totalorder %s10040_s19, %s10036_s18  ;;  %s10052_s22 = sphi %s10093_s22, %s15_s22   ;;  %s10048_s21 = sphi %s10091_s21, %s11913_s21   ;;  %s10044_s20 = sphi %s10089_s20, %s11912_s20   ;;  %s10040_s19 = sphi %s10087_s19, %s11911_s19   ;;  %s10036_s18 = sphi %s10085_s18, %s11910_s18  }
   0x4   : > { %p29_p0 = scmp.ge.s32.totalorder %s27_s23, 2  ;;  %p68_p2 = scmp.eq.s32.totalorder %s10052_s22, 0 }
   0x5   : > { %s60_s25 = sadd.s32 1, %s10040_s19  ;;  %p8611_p5 = scmp.ge.s32.totalorder %s10052_s22, 2 }
   0x6   : > { %s11915_s23 = smov (%p29_p0, %s27_s23), 0  ;;  %p69_p3 = por %p68_p2, %p67_p1 }
   0x7   : > { %s57_s24 = ssub.s32 %s10048_s21, %s11915_s23  ;;  %205 = sbr.rel (%p8611_p5) target bundleno = 272 (0x110), region = 20 }
   0x8   : > { %p58_p4 = scmp.eq.s32.totalorder %s57_s24, 0 }
   0xa   : > { %s10120_s26 = scalar_select %p58_p4, %s10040_s19, %s60_s25  }
   0xc   : > { %208 = sbr.rel (!%p69_p3) target bundleno = 272 (0x110), region = 24  ;;  %s210_s27 = sand.u32 (%p69_p3), 1, %s10040_s19  }
   0xd   : > { %s9168_s28 = sshll.u32 (%p69_p3), %s10048_s21, 3  ;;  %s8612_s29 = sshll.u32 (%p69_p3), %s210_s27, 12 }
   0xe   : > { %s10128_s7 = scalar_lea.vmem (%p69_p3), %s11905_s1, %s9168_s28  ;;  %s10133_s8 = scalar_lea.vmem (%p69_p3), [#allocation2], %s8612_s29 }
   0xf   : > { %v1269_v0 = vld [vmem:[%s10128_s7] sm:$0xff] (%p69_p3)  ;;  %v1271_v1 = vld [vmem:[%s10128_s7 + $0x10] sm:$0xff] (%p69_p3) }
  0x10   : > { %v1273_v2 = vld [vmem:[%s10128_s7 + $0x20] sm:$0xff] (%p69_p3)  ;;  %1270 = vst [vmem:[%s10133_s8] sm:$0xff] (%p69_p3), %v1269_v0  ;;  %1272 = vst [vmem:[%s10133_s8 + $0x8] sm:$0xff] (%p69_p3), %v1271_v1  ;;  %v1275_v3 = vld [vmem:[%s10128_s7 + $0x30] sm:$0xff] (%p69_p3) }
  0x11   : > { %1274 = vst [vmem:[%s10133_s8 + $0x10] sm:$0xff] %v1273_v2  ;;  %v1277_v4 = vld [vmem:[%s10128_s7 + $0x40] sm:$0xff]  ;;  %v1279_v5 = vld [vmem:[%s10128_s7 + $0x50] sm:$0xff]  ;;  %1276 = vst [vmem:[%s10133_s8 + $0x18] sm:$0xff] %v1275_v3 }
  0x12   : > { %1278 = vst [vmem:[%s10133_s8 + $0x20] sm:$0xff] %v1277_v4  ;;  %1280 = vst [vmem:[%s10133_s8 + $0x28] sm:$0xff] %v1279_v5  ;;  %v1281_v6 = vld [vmem:[%s10128_s7 + $0x60] sm:$0xff]  ;;  %v1283_v7 = vld [vmem:[%s10128_s7 + $0x70] sm:$0xff] }
  0x13   : > { %v1285_v8 = vld [vmem:[%s10128_s7 + $0x80] sm:$0xff]  ;;  %1282 = vst [vmem:[%s10133_s8 + $0x30] sm:$0xff] %v1281_v6  ;;  %1284 = vst [vmem:[%s10133_s8 + $0x38] sm:$0xff] %v1283_v7  ;;  %v1287_v9 = vld [vmem:[%s10128_s7 + $0x90] sm:$0xff] }
  0x14   : > { %1286 = vst [vmem:[%s10133_s8 + $0x40] sm:$0xff] %v1285_v8  ;;  %v1289_v10 = vld [vmem:[%s10128_s7 + $0xa0] sm:$0xff]  ;;  %v1291_v11 = vld [vmem:[%s10128_s7 + $0xb0] sm:$0xff]  ;;  %1288 = vst [vmem:[%s10133_s8 + $0x48] sm:$0xff] %v1287_v9 }
  0x15   : > { %1290 = vst [vmem:[%s10133_s8 + $0x50] sm:$0xff] %v1289_v10  ;;  %1292 = vst [vmem:[%s10133_s8 + $0x58] sm:$0xff] %v1291_v11  ;;  %v1293_v12 = vld [vmem:[%s10128_s7 + $0xc0] sm:$0xff]  ;;  %v1295_v13 = vld [vmem:[%s10128_s7 + $0xd0] sm:$0xff] }
  0x16   : > { %v1297_v14 = vld [vmem:[%s10128_s7 + $0xe0] sm:$0xff]  ;;  %1294 = vst [vmem:[%s10133_s8 + $0x60] sm:$0xff] %v1293_v12  ;;  %1296 = vst [vmem:[%s10133_s8 + $0x68] sm:$0xff] %v1295_v13  ;;  %v1299_v15 = vld [vmem:[%s10128_s7 + $0xf0] sm:$0xff] }
  0x17   : > { %1298 = vst [vmem:[%s10133_s8 + $0x70] sm:$0xff] %v1297_v14  ;;  %v1301_v16 = vld [vmem:[%s10128_s7 + $0x100] sm:$0xff]  ;;  %v1303_v17 = vld [vmem:[%s10128_s7 + $0x110] sm:$0xff]  ;;  %1300 = vst [vmem:[%s10133_s8 + $0x78] sm:$0xff] %v1299_v15 }
  0x18   : > { %1302 = vst [vmem:[%s10133_s8 + $0x80] sm:$0xff] %v1301_v16  ;;  %1304 = vst [vmem:[%s10133_s8 + $0x88] sm:$0xff] %v1303_v17  ;;  %v1305_v18 = vld [vmem:[%s10128_s7 + $0x120] sm:$0xff]  ;;  %v1307_v19 = vld [vmem:[%s10128_s7 + $0x130] sm:$0xff] }
  0x19   : > { %v1309_v20 = vld [vmem:[%s10128_s7 + $0x140] sm:$0xff]  ;;  %1306 = vst [vmem:[%s10133_s8 + $0x90] sm:$0xff] %v1305_v18  ;;  %1308 = vst [vmem:[%s10133_s8 + $0x98] sm:$0xff] %v1307_v19  ;;  %v1311_v21 = vld [vmem:[%s10128_s7 + $0x150] sm:$0xff] }
  0x1a   : > { %1310 = vst [vmem:[%s10133_s8 + $0xa0] sm:$0xff] %v1309_v20  ;;  %v1313_v22 = vld [vmem:[%s10128_s7 + $0x160] sm:$0xff]  ;;  %v1315_v23 = vld [vmem:[%s10128_s7 + $0x170] sm:$0xff]  ;;  %1312 = vst [vmem:[%s10133_s8 + $0xa8] sm:$0xff] %v1311_v21 }
  0x1b   : > { %1314 = vst [vmem:[%s10133_s8 + $0xb0] sm:$0xff] %v1313_v22  ;;  %1316 = vst [vmem:[%s10133_s8 + $0xb8] sm:$0xff] %v1315_v23  ;;  %v1317_v24 = vld [vmem:[%s10128_s7 + $0x180] sm:$0xff]  ;;  %v1319_v25 = vld [vmem:[%s10128_s7 + $0x190] sm:$0xff] }
  0x1c   : > { %v1321_v26 = vld [vmem:[%s10128_s7 + $0x1a0] sm:$0xff]  ;;  %1318 = vst [vmem:[%s10133_s8 + $0xc0] sm:$0xff] %v1317_v24  ;;  %1320 = vst [vmem:[%s10133_s8 + $0xc8] sm:$0xff] %v1319_v25  ;;  %v1323_v27 = vld [vmem:[%s10128_s7 + $0x1b0] sm:$0xff] }
  0x1d   : > { %1322 = vst [vmem:[%s10133_s8 + $0xd0] sm:$0xff] %v1321_v26  ;;  %v1325_v28 = vld [vmem:[%s10128_s7 + $0x1c0] sm:$0xff]  ;;  %v1327_v29 = vld [vmem:[%s10128_s7 + $0x1d0] sm:$0xff]  ;;  %1324 = vst [vmem:[%s10133_s8 + $0xd8] sm:$0xff] %v1323_v27 }
  0x1e   : > { %1326 = vst [vmem:[%s10133_s8 + $0xe0] sm:$0xff] %v1325_v28  ;;  %1328 = vst [vmem:[%s10133_s8 + $0xe8] sm:$0xff] %v1327_v29  ;;  %v1329_v30 = vld [vmem:[%s10128_s7 + $0x1e0] sm:$0xff]  ;;  %v1331_v31 = vld [vmem:[%s10128_s7 + $0x1f0] sm:$0xff] }
  0x1f   : > { %v1333_v32 = vld [vmem:[%s10128_s7 + $0x200] sm:$0xff]  ;;  %1330 = vst [vmem:[%s10133_s8 + $0xf0] sm:$0xff] %v1329_v30  ;;  %1332 = vst [vmem:[%s10133_s8 + $0xf8] sm:$0xff] %v1331_v31  ;;  %v1335_v33 = vld [vmem:[%s10128_s7 + $0x210] sm:$0xff] }
  0x20   : > { %1334 = vst [vmem:[%s10133_s8 + $0x100] sm:$0xff] %v1333_v32  ;;  %v1337_v34 = vld [vmem:[%s10128_s7 + $0x220] sm:$0xff]  ;;  %v1339_v35 = vld [vmem:[%s10128_s7 + $0x230] sm:$0xff]  ;;  %1336 = vst [vmem:[%s10133_s8 + $0x108] sm:$0xff] %v1335_v33 }
  0x21   : > { %1338 = vst [vmem:[%s10133_s8 + $0x110] sm:$0xff] %v1337_v34  ;;  %1340 = vst [vmem:[%s10133_s8 + $0x118] sm:$0xff] %v1339_v35  ;;  %v1341_v36 = vld [vmem:[%s10128_s7 + $0x240] sm:$0xff]  ;;  %v1343_v37 = vld [vmem:[%s10128_s7 + $0x250] sm:$0xff] }
  0x22   : > { %v1345_v38 = vld [vmem:[%s10128_s7 + $0x260] sm:$0xff]  ;;  %1342 = vst [vmem:[%s10133_s8 + $0x120] sm:$0xff] %v1341_v36  ;;  %1344 = vst [vmem:[%s10133_s8 + $0x128] sm:$0xff] %v1343_v37  ;;  %v1347_v39 = vld [vmem:[%s10128_s7 + $0x270] sm:$0xff] }
  0x23   : > { %1346 = vst [vmem:[%s10133_s8 + $0x130] sm:$0xff] %v1345_v38  ;;  %v1349_v40 = vld [vmem:[%s10128_s7 + $0x280] sm:$0xff]  ;;  %v1351_v41 = vld [vmem:[%s10128_s7 + $0x290] sm:$0xff]  ;;  %1348 = vst [vmem:[%s10133_s8 + $0x138] sm:$0xff] %v1347_v39 }
  0x24   : > { %1350 = vst [vmem:[%s10133_s8 + $0x140] sm:$0xff] %v1349_v40  ;;  %1352 = vst [vmem:[%s10133_s8 + $0x148] sm:$0xff] %v1351_v41  ;;  %v1353_v42 = vld [vmem:[%s10128_s7 + $0x2a0] sm:$0xff]  ;;  %v1355_v43 = vld [vmem:[%s10128_s7 + $0x2b0] sm:$0xff] }
  0x25   : > { %v1357_v44 = vld [vmem:[%s10128_s7 + $0x2c0] sm:$0xff]  ;;  %1354 = vst [vmem:[%s10133_s8 + $0x150] sm:$0xff] %v1353_v42  ;;  %1356 = vst [vmem:[%s10133_s8 + $0x158] sm:$0xff] %v1355_v43  ;;  %v1359_v45 = vld [vmem:[%s10128_s7 + $0x2d0] sm:$0xff] }
  0x26   : > { %1358 = vst [vmem:[%s10133_s8 + $0x160] sm:$0xff] %v1357_v44  ;;  %v1361_v46 = vld [vmem:[%s10128_s7 + $0x2e0] sm:$0xff]  ;;  %v1363_v47 = vld [vmem:[%s10128_s7 + $0x2f0] sm:$0xff]  ;;  %1360 = vst [vmem:[%s10133_s8 + $0x168] sm:$0xff] %v1359_v45 }
  0x27   : > { %1362 = vst [vmem:[%s10133_s8 + $0x170] sm:$0xff] %v1361_v46  ;;  %1364 = vst [vmem:[%s10133_s8 + $0x178] sm:$0xff] %v1363_v47  ;;  %v1365_v48 = vld [vmem:[%s10128_s7 + $0x300] sm:$0xff]  ;;  %v1367_v49 = vld [vmem:[%s10128_s7 + $0x310] sm:$0xff] }
  0x28   : > { %v1369_v50 = vld [vmem:[%s10128_s7 + $0x320] sm:$0xff]  ;;  %1366 = vst [vmem:[%s10133_s8 + $0x180] sm:$0xff] %v1365_v48  ;;  %1368 = vst [vmem:[%s10133_s8 + $0x188] sm:$0xff] %v1367_v49  ;;  %v1371_v51 = vld [vmem:[%s10128_s7 + $0x330] sm:$0xff] }
  0x29   : > { %1370 = vst [vmem:[%s10133_s8 + $0x190] sm:$0xff] %v1369_v50  ;;  %v1373_v52 = vld [vmem:[%s10128_s7 + $0x340] sm:$0xff]  ;;  %v1375_v53 = vld [vmem:[%s10128_s7 + $0x350] sm:$0xff]  ;;  %1372 = vst [vmem:[%s10133_s8 + $0x198] sm:$0xff] %v1371_v51 }
  0x2a   : > { %1374 = vst [vmem:[%s10133_s8 + $0x1a0] sm:$0xff] %v1373_v52  ;;  %1376 = vst [vmem:[%s10133_s8 + $0x1a8] sm:$0xff] %v1375_v53  ;;  %v1377_v54 = vld [vmem:[%s10128_s7 + $0x360] sm:$0xff]  ;;  %v1379_v55 = vld [vmem:[%s10128_s7 + $0x370] sm:$0xff] }
  0x2b   : > { %v1381_v56 = vld [vmem:[%s10128_s7 + $0x380] sm:$0xff]  ;;  %1378 = vst [vmem:[%s10133_s8 + $0x1b0] sm:$0xff] %v1377_v54  ;;  %1380 = vst [vmem:[%s10133_s8 + $0x1b8] sm:$0xff] %v1379_v55  ;;  %v1383_v57 = vld [vmem:[%s10128_s7 + $0x390] sm:$0xff] }
  0x2c   : > { %1382 = vst [vmem:[%s10133_s8 + $0x1c0] sm:$0xff] %v1381_v56  ;;  %v1385_v58 = vld [vmem:[%s10128_s7 + $0x3a0] sm:$0xff]  ;;  %v1387_v59 = vld [vmem:[%s10128_s7 + $0x3b0] sm:$0xff]  ;;  %1384 = vst [vmem:[%s10133_s8 + $0x1c8] sm:$0xff] %v1383_v57 }
  0x2d   : > { %1386 = vst [vmem:[%s10133_s8 + $0x1d0] sm:$0xff] %v1385_v58  ;;  %1388 = vst [vmem:[%s10133_s8 + $0x1d8] sm:$0xff] %v1387_v59  ;;  %v1389_v60 = vld [vmem:[%s10128_s7 + $0x3c0] sm:$0xff]  ;;  %v1391_v61 = vld [vmem:[%s10128_s7 + $0x3d0] sm:$0xff] }
  0x2e   : > { %v1393_v62 = vld [vmem:[%s10128_s7 + $0x3e0] sm:$0xff]  ;;  %1390 = vst [vmem:[%s10133_s8 + $0x1e0] sm:$0xff] %v1389_v60  ;;  %1392 = vst [vmem:[%s10133_s8 + $0x1e8] sm:$0xff] %v1391_v61  ;;  %v1395_v63 = vld [vmem:[%s10128_s7 + $0x3f0] sm:$0xff] }
  0x2f   : > { %1394 = vst [vmem:[%s10133_s8 + $0x1f0] sm:$0xff] %v1393_v62  ;;  %v1397_v0 = vld [vmem:[%s10128_s7 + $0x400] sm:$0xff]  ;;  %v1399_v1 = vld [vmem:[%s10128_s7 + $0x410] sm:$0xff]  ;;  %1396 = vst [vmem:[%s10133_s8 + $0x1f8] sm:$0xff] %v1395_v63 }
  0x30   : > { %1398 = vst [vmem:[%s10133_s8 + $0x200] sm:$0xff] %v1397_v0  ;;  %1400 = vst [vmem:[%s10133_s8 + $0x208] sm:$0xff] %v1399_v1  ;;  %v1401_v2 = vld [vmem:[%s10128_s7 + $0x420] sm:$0xff]  ;;  %v1403_v3 = vld [vmem:[%s10128_s7 + $0x430] sm:$0xff] }
  0x31   : > { %v1405_v4 = vld [vmem:[%s10128_s7 + $0x440] sm:$0xff]  ;;  %1402 = vst [vmem:[%s10133_s8 + $0x210] sm:$0xff] %v1401_v2  ;;  %1404 = vst [vmem:[%s10133_s8 + $0x218] sm:$0xff] %v1403_v3  ;;  %v1407_v5 = vld [vmem:[%s10128_s7 + $0x450] sm:$0xff] }
  0x32   : > { %1406 = vst [vmem:[%s10133_s8 + $0x220] sm:$0xff] %v1405_v4  ;;  %v1409_v6 = vld [vmem:[%s10128_s7 + $0x460] sm:$0xff]  ;;  %v1411_v7 = vld [vmem:[%s10128_s7 + $0x470] sm:$0xff]  ;;  %1408 = vst [vmem:[%s10133_s8 + $0x228] sm:$0xff] %v1407_v5 }
  0x33   : > { %1410 = vst [vmem:[%s10133_s8 + $0x230] sm:$0xff] %v1409_v6  ;;  %1412 = vst [vmem:[%s10133_s8 + $0x238] sm:$0xff] %v1411_v7  ;;  %v1413_v8 = vld [vmem:[%s10128_s7 + $0x480] sm:$0xff]  ;;  %v1415_v9 = vld [vmem:[%s10128_s7 + $0x490] sm:$0xff] }
  0x34   : > { %v1417_v10 = vld [vmem:[%s10128_s7 + $0x4a0] sm:$0xff]  ;;  %1414 = vst [vmem:[%s10133_s8 + $0x240] sm:$0xff] %v1413_v8  ;;  %1416 = vst [vmem:[%s10133_s8 + $0x248] sm:$0xff] %v1415_v9  ;;  %v1419_v11 = vld [vmem:[%s10128_s7 + $0x4b0] sm:$0xff] }
  0x35   : > { %1418 = vst [vmem:[%s10133_s8 + $0x250] sm:$0xff] %v1417_v10  ;;  %v1421_v12 = vld [vmem:[%s10128_s7 + $0x4c0] sm:$0xff]  ;;  %v1423_v13 = vld [vmem:[%s10128_s7 + $0x4d0] sm:$0xff]  ;;  %1420 = vst [vmem:[%s10133_s8 + $0x258] sm:$0xff] %v1419_v11 }
  0x36   : > { %1422 = vst [vmem:[%s10133_s8 + $0x260] sm:$0xff] %v1421_v12  ;;  %1424 = vst [vmem:[%s10133_s8 + $0x268] sm:$0xff] %v1423_v13  ;;  %v1425_v14 = vld [vmem:[%s10128_s7 + $0x4e0] sm:$0xff]  ;;  %v1427_v15 = vld [vmem:[%s10128_s7 + $0x4f0] sm:$0xff] }
  0x37   : > { %v1429_v16 = vld [vmem:[%s10128_s7 + $0x500] sm:$0xff]  ;;  %1426 = vst [vmem:[%s10133_s8 + $0x270] sm:$0xff] %v1425_v14  ;;  %1428 = vst [vmem:[%s10133_s8 + $0x278] sm:$0xff] %v1427_v15  ;;  %v1431_v17 = vld [vmem:[%s10128_s7 + $0x510] sm:$0xff] }
  0x38   : > { %1430 = vst [vmem:[%s10133_s8 + $0x280] sm:$0xff] %v1429_v16  ;;  %v1433_v18 = vld [vmem:[%s10128_s7 + $0x520] sm:$0xff]  ;;  %v1435_v19 = vld [vmem:[%s10128_s7 + $0x530] sm:$0xff]  ;;  %1432 = vst [vmem:[%s10133_s8 + $0x288] sm:$0xff] %v1431_v17 }
  0x39   : > { %1434 = vst [vmem:[%s10133_s8 + $0x290] sm:$0xff] %v1433_v18  ;;  %1436 = vst [vmem:[%s10133_s8 + $0x298] sm:$0xff] %v1435_v19  ;;  %v1437_v20 = vld [vmem:[%s10128_s7 + $0x540] sm:$0xff]  ;;  %v1439_v21 = vld [vmem:[%s10128_s7 + $0x550] sm:$0xff] }
  0x3a   : > { %v1441_v22 = vld [vmem:[%s10128_s7 + $0x560] sm:$0xff]  ;;  %1438 = vst [vmem:[%s10133_s8 + $0x2a0] sm:$0xff] %v1437_v20  ;;  %1440 = vst [vmem:[%s10133_s8 + $0x2a8] sm:$0xff] %v1439_v21  ;;  %v1443_v23 = vld [vmem:[%s10128_s7 + $0x570] sm:$0xff] }
  0x3b   : > { %1442 = vst [vmem:[%s10133_s8 + $0x2b0] sm:$0xff] %v1441_v22  ;;  %v1445_v24 = vld [vmem:[%s10128_s7 + $0x580] sm:$0xff]  ;;  %v1447_v25 = vld [vmem:[%s10128_s7 + $0x590] sm:$0xff]  ;;  %1444 = vst [vmem:[%s10133_s8 + $0x2b8] sm:$0xff] %v1443_v23 }
  0x3c   : > { %1446 = vst [vmem:[%s10133_s8 + $0x2c0] sm:$0xff] %v1445_v24  ;;  %1448 = vst [vmem:[%s10133_s8 + $0x2c8] sm:$0xff] %v1447_v25  ;;  %v1449_v26 = vld [vmem:[%s10128_s7 + $0x5a0] sm:$0xff]  ;;  %v1451_v27 = vld [vmem:[%s10128_s7 + $0x5b0] sm:$0xff] }
  0x3d   : > { %v1453_v28 = vld [vmem:[%s10128_s7 + $0x5c0] sm:$0xff]  ;;  %1450 = vst [vmem:[%s10133_s8 + $0x2d0] sm:$0xff] %v1449_v26  ;;  %1452 = vst [vmem:[%s10133_s8 + $0x2d8] sm:$0xff] %v1451_v27  ;;  %v1455_v29 = vld [vmem:[%s10128_s7 + $0x5d0] sm:$0xff] }
  0x3e   : > { %1454 = vst [vmem:[%s10133_s8 + $0x2e0] sm:$0xff] %v1453_v28  ;;  %v1457_v30 = vld [vmem:[%s10128_s7 + $0x5e0] sm:$0xff]  ;;  %v1459_v31 = vld [vmem:[%s10128_s7 + $0x5f0] sm:$0xff]  ;;  %1456 = vst [vmem:[%s10133_s8 + $0x2e8] sm:$0xff] %v1455_v29 }
  0x3f   : > { %1458 = vst [vmem:[%s10133_s8 + $0x2f0] sm:$0xff] %v1457_v30  ;;  %1460 = vst [vmem:[%s10133_s8 + $0x2f8] sm:$0xff] %v1459_v31  ;;  %v1461_v32 = vld [vmem:[%s10128_s7 + $0x600] sm:$0xff]  ;;  %v1463_v33 = vld [vmem:[%s10128_s7 + $0x610] sm:$0xff] }
  0x40   : > { %v1465_v34 = vld [vmem:[%s10128_s7 + $0x620] sm:$0xff]  ;;  %1462 = vst [vmem:[%s10133_s8 + $0x300] sm:$0xff] %v1461_v32  ;;  %1464 = vst [vmem:[%s10133_s8 + $0x308] sm:$0xff] %v1463_v33  ;;  %v1467_v35 = vld [vmem:[%s10128_s7 + $0x630] sm:$0xff] }
  0x41   : > { %1466 = vst [vmem:[%s10133_s8 + $0x310] sm:$0xff] %v1465_v34  ;;  %v1469_v36 = vld [vmem:[%s10128_s7 + $0x640] sm:$0xff]  ;;  %v1471_v37 = vld [vmem:[%s10128_s7 + $0x650] sm:$0xff]  ;;  %1468 = vst [vmem:[%s10133_s8 + $0x318] sm:$0xff] %v1467_v35 }
  0x42   : > { %1470 = vst [vmem:[%s10133_s8 + $0x320] sm:$0xff] %v1469_v36  ;;  %1472 = vst [vmem:[%s10133_s8 + $0x328] sm:$0xff] %v1471_v37  ;;  %v1473_v38 = vld [vmem:[%s10128_s7 + $0x660] sm:$0xff]  ;;  %v1475_v39 = vld [vmem:[%s10128_s7 + $0x670] sm:$0xff] }
  0x43   : > { %v1477_v40 = vld [vmem:[%s10128_s7 + $0x680] sm:$0xff]  ;;  %1474 = vst [vmem:[%s10133_s8 + $0x330] sm:$0xff] %v1473_v38  ;;  %1476 = vst [vmem:[%s10133_s8 + $0x338] sm:$0xff] %v1475_v39  ;;  %v1479_v41 = vld [vmem:[%s10128_s7 + $0x690] sm:$0xff] }
  0x44   : > { %1478 = vst [vmem:[%s10133_s8 + $0x340] sm:$0xff] %v1477_v40  ;;  %v1481_v42 = vld [vmem:[%s10128_s7 + $0x6a0] sm:$0xff]  ;;  %v1483_v43 = vld [vmem:[%s10128_s7 + $0x6b0] sm:$0xff]  ;;  %1480 = vst [vmem:[%s10133_s8 + $0x348] sm:$0xff] %v1479_v41 }
  0x45   : > { %1482 = vst [vmem:[%s10133_s8 + $0x350] sm:$0xff] %v1481_v42  ;;  %1484 = vst [vmem:[%s10133_s8 + $0x358] sm:$0xff] %v1483_v43  ;;  %v1485_v44 = vld [vmem:[%s10128_s7 + $0x6c0] sm:$0xff]  ;;  %v1487_v45 = vld [vmem:[%s10128_s7 + $0x6d0] sm:$0xff] }
  0x46   : > { %v1489_v46 = vld [vmem:[%s10128_s7 + $0x6e0] sm:$0xff]  ;;  %1486 = vst [vmem:[%s10133_s8 + $0x360] sm:$0xff] %v1485_v44  ;;  %1488 = vst [vmem:[%s10133_s8 + $0x368] sm:$0xff] %v1487_v45  ;;  %v1491_v47 = vld [vmem:[%s10128_s7 + $0x6f0] sm:$0xff] }
  0x47   : > { %1490 = vst [vmem:[%s10133_s8 + $0x370] sm:$0xff] %v1489_v46  ;;  %v1493_v48 = vld [vmem:[%s10128_s7 + $0x700] sm:$0xff]  ;;  %v1495_v49 = vld [vmem:[%s10128_s7 + $0x710] sm:$0xff]  ;;  %1492 = vst [vmem:[%s10133_s8 + $0x378] sm:$0xff] %v1491_v47 }
  0x48   : > { %1494 = vst [vmem:[%s10133_s8 + $0x380] sm:$0xff] %v1493_v48  ;;  %1496 = vst [vmem:[%s10133_s8 + $0x388] sm:$0xff] %v1495_v49  ;;  %v1497_v50 = vld [vmem:[%s10128_s7 + $0x720] sm:$0xff]  ;;  %v1499_v51 = vld [vmem:[%s10128_s7 + $0x730] sm:$0xff] }
  0x49   : > { %v1501_v52 = vld [vmem:[%s10128_s7 + $0x740] sm:$0xff]  ;;  %1498 = vst [vmem:[%s10133_s8 + $0x390] sm:$0xff] %v1497_v50  ;;  %1500 = vst [vmem:[%s10133_s8 + $0x398] sm:$0xff] %v1499_v51  ;;  %v1503_v53 = vld [vmem:[%s10128_s7 + $0x750] sm:$0xff] }
  0x4a   : > { %1502 = vst [vmem:[%s10133_s8 + $0x3a0] sm:$0xff] %v1501_v52  ;;  %v1505_v54 = vld [vmem:[%s10128_s7 + $0x760] sm:$0xff]  ;;  %v1507_v55 = vld [vmem:[%s10128_s7 + $0x770] sm:$0xff]  ;;  %1504 = vst [vmem:[%s10133_s8 + $0x3a8] sm:$0xff] %v1503_v53 }
  0x4b   : > { %1506 = vst [vmem:[%s10133_s8 + $0x3b0] sm:$0xff] %v1505_v54  ;;  %1508 = vst [vmem:[%s10133_s8 + $0x3b8] sm:$0xff] %v1507_v55  ;;  %v1509_v56 = vld [vmem:[%s10128_s7 + $0x780] sm:$0xff]  ;;  %v1511_v57 = vld [vmem:[%s10128_s7 + $0x790] sm:$0xff] }
  0x4c   : > { %v1513_v58 = vld [vmem:[%s10128_s7 + $0x7a0] sm:$0xff]  ;;  %1510 = vst [vmem:[%s10133_s8 + $0x3c0] sm:$0xff] %v1509_v56  ;;  %1512 = vst [vmem:[%s10133_s8 + $0x3c8] sm:$0xff] %v1511_v57  ;;  %v1515_v59 = vld [vmem:[%s10128_s7 + $0x7b0] sm:$0xff] }
  0x4d   : > { %1514 = vst [vmem:[%s10133_s8 + $0x3d0] sm:$0xff] %v1513_v58  ;;  %v1517_v60 = vld [vmem:[%s10128_s7 + $0x7c0] sm:$0xff]  ;;  %v1519_v61 = vld [vmem:[%s10128_s7 + $0x7d0] sm:$0xff]  ;;  %1516 = vst [vmem:[%s10133_s8 + $0x3d8] sm:$0xff] %v1515_v59 }
  0x4e   : > { %1518 = vst [vmem:[%s10133_s8 + $0x3e0] sm:$0xff] %v1517_v60  ;;  %1520 = vst [vmem:[%s10133_s8 + $0x3e8] sm:$0xff] %v1519_v61  ;;  %v1521_v62 = vld [vmem:[%s10128_s7 + $0x7e0] sm:$0xff]  ;;  %v1523_v63 = vld [vmem:[%s10128_s7 + $0x7f0] sm:$0xff] }
  0x4f   : > { %v1525_v0 = vld [vmem:[%s10128_s7 + $0x800] sm:$0xff]  ;;  %1522 = vst [vmem:[%s10133_s8 + $0x3f0] sm:$0xff] %v1521_v62  ;;  %1524 = vst [vmem:[%s10133_s8 + $0x3f8] sm:$0xff] %v1523_v63  ;;  %v1527_v1 = vld [vmem:[%s10128_s7 + $0x810] sm:$0xff] }
  0x50   : > { %1526 = vst [vmem:[%s10133_s8 + $0x400] sm:$0xff] %v1525_v0  ;;  %v1529_v2 = vld [vmem:[%s10128_s7 + $0x820] sm:$0xff]  ;;  %v1531_v3 = vld [vmem:[%s10128_s7 + $0x830] sm:$0xff]  ;;  %1528 = vst [vmem:[%s10133_s8 + $0x408] sm:$0xff] %v1527_v1 }
  0x51   : > { %1530 = vst [vmem:[%s10133_s8 + $0x410] sm:$0xff] %v1529_v2  ;;  %1532 = vst [vmem:[%s10133_s8 + $0x418] sm:$0xff] %v1531_v3  ;;  %v1533_v4 = vld [vmem:[%s10128_s7 + $0x840] sm:$0xff]  ;;  %v1535_v5 = vld [vmem:[%s10128_s7 + $0x850] sm:$0xff] }
  0x52   : > { %v1537_v6 = vld [vmem:[%s10128_s7 + $0x860] sm:$0xff]  ;;  %1534 = vst [vmem:[%s10133_s8 + $0x420] sm:$0xff] %v1533_v4  ;;  %1536 = vst [vmem:[%s10133_s8 + $0x428] sm:$0xff] %v1535_v5  ;;  %v1539_v7 = vld [vmem:[%s10128_s7 + $0x870] sm:$0xff] }
  0x53   : > { %1538 = vst [vmem:[%s10133_s8 + $0x430] sm:$0xff] %v1537_v6  ;;  %v1541_v8 = vld [vmem:[%s10128_s7 + $0x880] sm:$0xff]  ;;  %v1543_v9 = vld [vmem:[%s10128_s7 + $0x890] sm:$0xff]  ;;  %1540 = vst [vmem:[%s10133_s8 + $0x438] sm:$0xff] %v1539_v7 }
  0x54   : > { %1542 = vst [vmem:[%s10133_s8 + $0x440] sm:$0xff] %v1541_v8  ;;  %1544 = vst [vmem:[%s10133_s8 + $0x448] sm:$0xff] %v1543_v9  ;;  %v1545_v10 = vld [vmem:[%s10128_s7 + $0x8a0] sm:$0xff]  ;;  %v1547_v11 = vld [vmem:[%s10128_s7 + $0x8b0] sm:$0xff] }
  0x55   : > { %v1549_v12 = vld [vmem:[%s10128_s7 + $0x8c0] sm:$0xff]  ;;  %1546 = vst [vmem:[%s10133_s8 + $0x450] sm:$0xff] %v1545_v10  ;;  %1548 = vst [vmem:[%s10133_s8 + $0x458] sm:$0xff] %v1547_v11  ;;  %v1551_v13 = vld [vmem:[%s10128_s7 + $0x8d0] sm:$0xff] }
  0x56   : > { %1550 = vst [vmem:[%s10133_s8 + $0x460] sm:$0xff] %v1549_v12  ;;  %v1553_v14 = vld [vmem:[%s10128_s7 + $0x8e0] sm:$0xff]  ;;  %v1555_v15 = vld [vmem:[%s10128_s7 + $0x8f0] sm:$0xff]  ;;  %1552 = vst [vmem:[%s10133_s8 + $0x468] sm:$0xff] %v1551_v13 }
  0x57   : > { %1554 = vst [vmem:[%s10133_s8 + $0x470] sm:$0xff] %v1553_v14  ;;  %1556 = vst [vmem:[%s10133_s8 + $0x478] sm:$0xff] %v1555_v15  ;;  %v1557_v16 = vld [vmem:[%s10128_s7 + $0x900] sm:$0xff]  ;;  %v1559_v17 = vld [vmem:[%s10128_s7 + $0x910] sm:$0xff] }
  0x58   : > { %v1561_v18 = vld [vmem:[%s10128_s7 + $0x920] sm:$0xff]  ;;  %1558 = vst [vmem:[%s10133_s8 + $0x480] sm:$0xff] %v1557_v16  ;;  %1560 = vst [vmem:[%s10133_s8 + $0x488] sm:$0xff] %v1559_v17  ;;  %v1563_v19 = vld [vmem:[%s10128_s7 + $0x930] sm:$0xff] }
  0x59   : > { %1562 = vst [vmem:[%s10133_s8 + $0x490] sm:$0xff] %v1561_v18  ;;  %v1565_v20 = vld [vmem:[%s10128_s7 + $0x940] sm:$0xff]  ;;  %v1567_v21 = vld [vmem:[%s10128_s7 + $0x950] sm:$0xff]  ;;  %1564 = vst [vmem:[%s10133_s8 + $0x498] sm:$0xff] %v1563_v19 }
  0x5a   : > { %1566 = vst [vmem:[%s10133_s8 + $0x4a0] sm:$0xff] %v1565_v20  ;;  %1568 = vst [vmem:[%s10133_s8 + $0x4a8] sm:$0xff] %v1567_v21  ;;  %v1569_v22 = vld [vmem:[%s10128_s7 + $0x960] sm:$0xff]  ;;  %v1571_v23 = vld [vmem:[%s10128_s7 + $0x970] sm:$0xff] }
  0x5b   : > { %v1573_v24 = vld [vmem:[%s10128_s7 + $0x980] sm:$0xff]  ;;  %1570 = vst [vmem:[%s10133_s8 + $0x4b0] sm:$0xff] %v1569_v22  ;;  %1572 = vst [vmem:[%s10133_s8 + $0x4b8] sm:$0xff] %v1571_v23  ;;  %v1575_v25 = vld [vmem:[%s10128_s7 + $0x990] sm:$0xff] }
  0x5c   : > { %1574 = vst [vmem:[%s10133_s8 + $0x4c0] sm:$0xff] %v1573_v24  ;;  %v1577_v26 = vld [vmem:[%s10128_s7 + $0x9a0] sm:$0xff]  ;;  %v1579_v27 = vld [vmem:[%s10128_s7 + $0x9b0] sm:$0xff]  ;;  %1576 = vst [vmem:[%s10133_s8 + $0x4c8] sm:$0xff] %v1575_v25 }
  0x5d   : > { %1578 = vst [vmem:[%s10133_s8 + $0x4d0] sm:$0xff] %v1577_v26  ;;  %1580 = vst [vmem:[%s10133_s8 + $0x4d8] sm:$0xff] %v1579_v27  ;;  %v1581_v28 = vld [vmem:[%s10128_s7 + $0x9c0] sm:$0xff]  ;;  %v1583_v29 = vld [vmem:[%s10128_s7 + $0x9d0] sm:$0xff] }
  0x5e   : > { %v1585_v30 = vld [vmem:[%s10128_s7 + $0x9e0] sm:$0xff]  ;;  %1582 = vst [vmem:[%s10133_s8 + $0x4e0] sm:$0xff] %v1581_v28  ;;  %1584 = vst [vmem:[%s10133_s8 + $0x4e8] sm:$0xff] %v1583_v29  ;;  %v1587_v31 = vld [vmem:[%s10128_s7 + $0x9f0] sm:$0xff] }
  0x5f   : > { %1586 = vst [vmem:[%s10133_s8 + $0x4f0] sm:$0xff] %v1585_v30  ;;  %v1589_v32 = vld [vmem:[%s10128_s7 + $0xa00] sm:$0xff]  ;;  %v1591_v33 = vld [vmem:[%s10128_s7 + $0xa10] sm:$0xff]  ;;  %1588 = vst [vmem:[%s10133_s8 + $0x4f8] sm:$0xff] %v1587_v31 }
  0x60   : > { %1590 = vst [vmem:[%s10133_s8 + $0x500] sm:$0xff] %v1589_v32  ;;  %1592 = vst [vmem:[%s10133_s8 + $0x508] sm:$0xff] %v1591_v33  ;;  %v1593_v34 = vld [vmem:[%s10128_s7 + $0xa20] sm:$0xff]  ;;  %v1595_v35 = vld [vmem:[%s10128_s7 + $0xa30] sm:$0xff] }
  0x61   : > { %v1597_v36 = vld [vmem:[%s10128_s7 + $0xa40] sm:$0xff]  ;;  %1594 = vst [vmem:[%s10133_s8 + $0x510] sm:$0xff] %v1593_v34  ;;  %1596 = vst [vmem:[%s10133_s8 + $0x518] sm:$0xff] %v1595_v35  ;;  %v1599_v37 = vld [vmem:[%s10128_s7 + $0xa50] sm:$0xff] }
  0x62   : > { %1598 = vst [vmem:[%s10133_s8 + $0x520] sm:$0xff] %v1597_v36  ;;  %v1601_v38 = vld [vmem:[%s10128_s7 + $0xa60] sm:$0xff]  ;;  %v1603_v39 = vld [vmem:[%s10128_s7 + $0xa70] sm:$0xff]  ;;  %1600 = vst [vmem:[%s10133_s8 + $0x528] sm:$0xff] %v1599_v37 }
  0x63   : > { %1602 = vst [vmem:[%s10133_s8 + $0x530] sm:$0xff] %v1601_v38  ;;  %1604 = vst [vmem:[%s10133_s8 + $0x538] sm:$0xff] %v1603_v39  ;;  %v1605_v40 = vld [vmem:[%s10128_s7 + $0xa80] sm:$0xff]  ;;  %v1607_v41 = vld [vmem:[%s10128_s7 + $0xa90] sm:$0xff] }
  0x64   : > { %v1609_v42 = vld [vmem:[%s10128_s7 + $0xaa0] sm:$0xff]  ;;  %1606 = vst [vmem:[%s10133_s8 + $0x540] sm:$0xff] %v1605_v40  ;;  %1608 = vst [vmem:[%s10133_s8 + $0x548] sm:$0xff] %v1607_v41  ;;  %v1611_v43 = vld [vmem:[%s10128_s7 + $0xab0] sm:$0xff] }
  0x65   : > { %1610 = vst [vmem:[%s10133_s8 + $0x550] sm:$0xff] %v1609_v42  ;;  %v1613_v44 = vld [vmem:[%s10128_s7 + $0xac0] sm:$0xff]  ;;  %v1615_v45 = vld [vmem:[%s10128_s7 + $0xad0] sm:$0xff]  ;;  %1612 = vst [vmem:[%s10133_s8 + $0x558] sm:$0xff] %v1611_v43 }
  0x66   : > { %1614 = vst [vmem:[%s10133_s8 + $0x560] sm:$0xff] %v1613_v44  ;;  %1616 = vst [vmem:[%s10133_s8 + $0x568] sm:$0xff] %v1615_v45  ;;  %v1617_v46 = vld [vmem:[%s10128_s7 + $0xae0] sm:$0xff]  ;;  %v1619_v47 = vld [vmem:[%s10128_s7 + $0xaf0] sm:$0xff] }
  0x67   : > { %v1621_v48 = vld [vmem:[%s10128_s7 + $0xb00] sm:$0xff]  ;;  %1618 = vst [vmem:[%s10133_s8 + $0x570] sm:$0xff] %v1617_v46  ;;  %1620 = vst [vmem:[%s10133_s8 + $0x578] sm:$0xff] %v1619_v47  ;;  %v1623_v49 = vld [vmem:[%s10128_s7 + $0xb10] sm:$0xff] }
  0x68   : > { %1622 = vst [vmem:[%s10133_s8 + $0x580] sm:$0xff] %v1621_v48  ;;  %v1625_v50 = vld [vmem:[%s10128_s7 + $0xb20] sm:$0xff]  ;;  %v1627_v51 = vld [vmem:[%s10128_s7 + $0xb30] sm:$0xff]  ;;  %1624 = vst [vmem:[%s10133_s8 + $0x588] sm:$0xff] %v1623_v49 }
  0x69   : > { %1626 = vst [vmem:[%s10133_s8 + $0x590] sm:$0xff] %v1625_v50  ;;  %1628 = vst [vmem:[%s10133_s8 + $0x598] sm:$0xff] %v1627_v51  ;;  %v1629_v52 = vld [vmem:[%s10128_s7 + $0xb40] sm:$0xff]  ;;  %v1631_v53 = vld [vmem:[%s10128_s7 + $0xb50] sm:$0xff] }
  0x6a   : > { %v1633_v54 = vld [vmem:[%s10128_s7 + $0xb60] sm:$0xff]  ;;  %1630 = vst [vmem:[%s10133_s8 + $0x5a0] sm:$0xff] %v1629_v52  ;;  %1632 = vst [vmem:[%s10133_s8 + $0x5a8] sm:$0xff] %v1631_v53  ;;  %v1635_v55 = vld [vmem:[%s10128_s7 + $0xb70] sm:$0xff] }
  0x6b   : > { %1634 = vst [vmem:[%s10133_s8 + $0x5b0] sm:$0xff] %v1633_v54  ;;  %v1637_v56 = vld [vmem:[%s10128_s7 + $0xb80] sm:$0xff]  ;;  %v1639_v57 = vld [vmem:[%s10128_s7 + $0xb90] sm:$0xff]  ;;  %1636 = vst [vmem:[%s10133_s8 + $0x5b8] sm:$0xff] %v1635_v55 }
  0x6c   : > { %1638 = vst [vmem:[%s10133_s8 + $0x5c0] sm:$0xff] %v1637_v56  ;;  %1640 = vst [vmem:[%s10133_s8 + $0x5c8] sm:$0xff] %v1639_v57  ;;  %v1641_v58 = vld [vmem:[%s10128_s7 + $0xba0] sm:$0xff]  ;;  %v1643_v59 = vld [vmem:[%s10128_s7 + $0xbb0] sm:$0xff] }
  0x6d   : > { %v1645_v60 = vld [vmem:[%s10128_s7 + $0xbc0] sm:$0xff]  ;;  %1642 = vst [vmem:[%s10133_s8 + $0x5d0] sm:$0xff] %v1641_v58  ;;  %1644 = vst [vmem:[%s10133_s8 + $0x5d8] sm:$0xff] %v1643_v59  ;;  %v1647_v61 = vld [vmem:[%s10128_s7 + $0xbd0] sm:$0xff] }
  0x6e   : > { %1646 = vst [vmem:[%s10133_s8 + $0x5e0] sm:$0xff] %v1645_v60  ;;  %v1649_v62 = vld [vmem:[%s10128_s7 + $0xbe0] sm:$0xff]  ;;  %v1651_v63 = vld [vmem:[%s10128_s7 + $0xbf0] sm:$0xff]  ;;  %1648 = vst [vmem:[%s10133_s8 + $0x5e8] sm:$0xff] %v1647_v61 }
  0x6f   : > { %1650 = vst [vmem:[%s10133_s8 + $0x5f0] sm:$0xff] %v1649_v62  ;;  %1652 = vst [vmem:[%s10133_s8 + $0x5f8] sm:$0xff] %v1651_v63  ;;  %v1653_v0 = vld [vmem:[%s10128_s7 + $0xc00] sm:$0xff]  ;;  %v1655_v1 = vld [vmem:[%s10128_s7 + $0xc10] sm:$0xff] }
  0x70   : > { %v1657_v2 = vld [vmem:[%s10128_s7 + $0xc20] sm:$0xff]  ;;  %1654 = vst [vmem:[%s10133_s8 + $0x600] sm:$0xff] %v1653_v0  ;;  %1656 = vst [vmem:[%s10133_s8 + $0x608] sm:$0xff] %v1655_v1  ;;  %v1659_v3 = vld [vmem:[%s10128_s7 + $0xc30] sm:$0xff] }
  0x71   : > { %1658 = vst [vmem:[%s10133_s8 + $0x610] sm:$0xff] %v1657_v2  ;;  %v1661_v4 = vld [vmem:[%s10128_s7 + $0xc40] sm:$0xff]  ;;  %v1663_v5 = vld [vmem:[%s10128_s7 + $0xc50] sm:$0xff]  ;;  %1660 = vst [vmem:[%s10133_s8 + $0x618] sm:$0xff] %v1659_v3 }
  0x72   : > { %1662 = vst [vmem:[%s10133_s8 + $0x620] sm:$0xff] %v1661_v4  ;;  %1664 = vst [vmem:[%s10133_s8 + $0x628] sm:$0xff] %v1663_v5  ;;  %v1665_v6 = vld [vmem:[%s10128_s7 + $0xc60] sm:$0xff]  ;;  %v1667_v7 = vld [vmem:[%s10128_s7 + $0xc70] sm:$0xff] }
  0x73   : > { %v1669_v8 = vld [vmem:[%s10128_s7 + $0xc80] sm:$0xff]  ;;  %1666 = vst [vmem:[%s10133_s8 + $0x630] sm:$0xff] %v1665_v6  ;;  %1668 = vst [vmem:[%s10133_s8 + $0x638] sm:$0xff] %v1667_v7  ;;  %v1671_v9 = vld [vmem:[%s10128_s7 + $0xc90] sm:$0xff] }
  0x74   : > { %1670 = vst [vmem:[%s10133_s8 + $0x640] sm:$0xff] %v1669_v8  ;;  %v1673_v10 = vld [vmem:[%s10128_s7 + $0xca0] sm:$0xff]  ;;  %v1675_v11 = vld [vmem:[%s10128_s7 + $0xcb0] sm:$0xff]  ;;  %1672 = vst [vmem:[%s10133_s8 + $0x648] sm:$0xff] %v1671_v9 }
  0x75   : > { %1674 = vst [vmem:[%s10133_s8 + $0x650] sm:$0xff] %v1673_v10  ;;  %1676 = vst [vmem:[%s10133_s8 + $0x658] sm:$0xff] %v1675_v11  ;;  %v1677_v12 = vld [vmem:[%s10128_s7 + $0xcc0] sm:$0xff]  ;;  %v1679_v13 = vld [vmem:[%s10128_s7 + $0xcd0] sm:$0xff] }
  0x76   : > { %v1681_v14 = vld [vmem:[%s10128_s7 + $0xce0] sm:$0xff]  ;;  %1678 = vst [vmem:[%s10133_s8 + $0x660] sm:$0xff] %v1677_v12  ;;  %1680 = vst [vmem:[%s10133_s8 + $0x668] sm:$0xff] %v1679_v13  ;;  %v1683_v15 = vld [vmem:[%s10128_s7 + $0xcf0] sm:$0xff] }
  0x77   : > { %1682 = vst [vmem:[%s10133_s8 + $0x670] sm:$0xff] %v1681_v14  ;;  %v1685_v16 = vld [vmem:[%s10128_s7 + $0xd00] sm:$0xff]  ;;  %v1687_v17 = vld [vmem:[%s10128_s7 + $0xd10] sm:$0xff]  ;;  %1684 = vst [vmem:[%s10133_s8 + $0x678] sm:$0xff] %v1683_v15 }
  0x78   : > { %1686 = vst [vmem:[%s10133_s8 + $0x680] sm:$0xff] %v1685_v16  ;;  %1688 = vst [vmem:[%s10133_s8 + $0x688] sm:$0xff] %v1687_v17  ;;  %v1689_v18 = vld [vmem:[%s10128_s7 + $0xd20] sm:$0xff]  ;;  %v1691_v19 = vld [vmem:[%s10128_s7 + $0xd30] sm:$0xff] }
  0x79   : > { %v1693_v20 = vld [vmem:[%s10128_s7 + $0xd40] sm:$0xff]  ;;  %1690 = vst [vmem:[%s10133_s8 + $0x690] sm:$0xff] %v1689_v18  ;;  %1692 = vst [vmem:[%s10133_s8 + $0x698] sm:$0xff] %v1691_v19  ;;  %v1695_v21 = vld [vmem:[%s10128_s7 + $0xd50] sm:$0xff] }
  0x7a   : > { %1694 = vst [vmem:[%s10133_s8 + $0x6a0] sm:$0xff] %v1693_v20  ;;  %v1697_v22 = vld [vmem:[%s10128_s7 + $0xd60] sm:$0xff]  ;;  %v1699_v23 = vld [vmem:[%s10128_s7 + $0xd70] sm:$0xff]  ;;  %1696 = vst [vmem:[%s10133_s8 + $0x6a8] sm:$0xff] %v1695_v21 }
  0x7b   : > { %1698 = vst [vmem:[%s10133_s8 + $0x6b0] sm:$0xff] %v1697_v22  ;;  %1700 = vst [vmem:[%s10133_s8 + $0x6b8] sm:$0xff] %v1699_v23  ;;  %v1701_v24 = vld [vmem:[%s10128_s7 + $0xd80] sm:$0xff]  ;;  %v1703_v25 = vld [vmem:[%s10128_s7 + $0xd90] sm:$0xff] }
  0x7c   : > { %v1705_v26 = vld [vmem:[%s10128_s7 + $0xda0] sm:$0xff]  ;;  %1702 = vst [vmem:[%s10133_s8 + $0x6c0] sm:$0xff] %v1701_v24  ;;  %1704 = vst [vmem:[%s10133_s8 + $0x6c8] sm:$0xff] %v1703_v25  ;;  %v1707_v27 = vld [vmem:[%s10128_s7 + $0xdb0] sm:$0xff] }
  0x7d   : > { %1706 = vst [vmem:[%s10133_s8 + $0x6d0] sm:$0xff] %v1705_v26  ;;  %v1709_v28 = vld [vmem:[%s10128_s7 + $0xdc0] sm:$0xff]  ;;  %v1711_v29 = vld [vmem:[%s10128_s7 + $0xdd0] sm:$0xff]  ;;  %1708 = vst [vmem:[%s10133_s8 + $0x6d8] sm:$0xff] %v1707_v27 }
  0x7e   : > { %1710 = vst [vmem:[%s10133_s8 + $0x6e0] sm:$0xff] %v1709_v28  ;;  %1712 = vst [vmem:[%s10133_s8 + $0x6e8] sm:$0xff] %v1711_v29  ;;  %v1713_v30 = vld [vmem:[%s10128_s7 + $0xde0] sm:$0xff]  ;;  %v1715_v31 = vld [vmem:[%s10128_s7 + $0xdf0] sm:$0xff] }
  0x7f   : > { %v1717_v32 = vld [vmem:[%s10128_s7 + $0xe00] sm:$0xff]  ;;  %1714 = vst [vmem:[%s10133_s8 + $0x6f0] sm:$0xff] %v1713_v30  ;;  %1716 = vst [vmem:[%s10133_s8 + $0x6f8] sm:$0xff] %v1715_v31  ;;  %v1719_v33 = vld [vmem:[%s10128_s7 + $0xe10] sm:$0xff] }
  0x80   : > { %1718 = vst [vmem:[%s10133_s8 + $0x700] sm:$0xff] %v1717_v32  ;;  %v1721_v34 = vld [vmem:[%s10128_s7 + $0xe20] sm:$0xff]  ;;  %v1723_v35 = vld [vmem:[%s10128_s7 + $0xe30] sm:$0xff]  ;;  %1720 = vst [vmem:[%s10133_s8 + $0x708] sm:$0xff] %v1719_v33 }
  0x81   : > { %1722 = vst [vmem:[%s10133_s8 + $0x710] sm:$0xff] %v1721_v34  ;;  %1724 = vst [vmem:[%s10133_s8 + $0x718] sm:$0xff] %v1723_v35  ;;  %v1725_v36 = vld [vmem:[%s10128_s7 + $0xe40] sm:$0xff]  ;;  %v1727_v37 = vld [vmem:[%s10128_s7 + $0xe50] sm:$0xff] }
  0x82   : > { %v1729_v38 = vld [vmem:[%s10128_s7 + $0xe60] sm:$0xff]  ;;  %1726 = vst [vmem:[%s10133_s8 + $0x720] sm:$0xff] %v1725_v36  ;;  %1728 = vst [vmem:[%s10133_s8 + $0x728] sm:$0xff] %v1727_v37  ;;  %v1731_v39 = vld [vmem:[%s10128_s7 + $0xe70] sm:$0xff] }
  0x83   : > { %1730 = vst [vmem:[%s10133_s8 + $0x730] sm:$0xff] %v1729_v38  ;;  %v1733_v40 = vld [vmem:[%s10128_s7 + $0xe80] sm:$0xff]  ;;  %v1735_v41 = vld [vmem:[%s10128_s7 + $0xe90] sm:$0xff]  ;;  %1732 = vst [vmem:[%s10133_s8 + $0x738] sm:$0xff] %v1731_v39 }
  0x84   : > { %1734 = vst [vmem:[%s10133_s8 + $0x740] sm:$0xff] %v1733_v40  ;;  %1736 = vst [vmem:[%s10133_s8 + $0x748] sm:$0xff] %v1735_v41  ;;  %v1737_v42 = vld [vmem:[%s10128_s7 + $0xea0] sm:$0xff]  ;;  %v1739_v43 = vld [vmem:[%s10128_s7 + $0xeb0] sm:$0xff] }
  0x85   : > { %v1741_v44 = vld [vmem:[%s10128_s7 + $0xec0] sm:$0xff]  ;;  %1738 = vst [vmem:[%s10133_s8 + $0x750] sm:$0xff] %v1737_v42  ;;  %1740 = vst [vmem:[%s10133_s8 + $0x758] sm:$0xff] %v1739_v43  ;;  %v1743_v45 = vld [vmem:[%s10128_s7 + $0xed0] sm:$0xff] }
  0x86   : > { %1742 = vst [vmem:[%s10133_s8 + $0x760] sm:$0xff] %v1741_v44  ;;  %v1745_v46 = vld [vmem:[%s10128_s7 + $0xee0] sm:$0xff]  ;;  %v1747_v47 = vld [vmem:[%s10128_s7 + $0xef0] sm:$0xff]  ;;  %1744 = vst [vmem:[%s10133_s8 + $0x768] sm:$0xff] %v1743_v45 }
  0x87   : > { %1746 = vst [vmem:[%s10133_s8 + $0x770] sm:$0xff] %v1745_v46  ;;  %1748 = vst [vmem:[%s10133_s8 + $0x778] sm:$0xff] %v1747_v47  ;;  %v1749_v48 = vld [vmem:[%s10128_s7 + $0xf00] sm:$0xff]  ;;  %v1751_v49 = vld [vmem:[%s10128_s7 + $0xf10] sm:$0xff] }
  0x88   : > { %v1753_v50 = vld [vmem:[%s10128_s7 + $0xf20] sm:$0xff]  ;;  %1750 = vst [vmem:[%s10133_s8 + $0x780] sm:$0xff] %v1749_v48  ;;  %1752 = vst [vmem:[%s10133_s8 + $0x788] sm:$0xff] %v1751_v49  ;;  %v1755_v51 = vld [vmem:[%s10128_s7 + $0xf30] sm:$0xff] }
  0x89   : > { %1754 = vst [vmem:[%s10133_s8 + $0x790] sm:$0xff] %v1753_v50  ;;  %v1757_v52 = vld [vmem:[%s10128_s7 + $0xf40] sm:$0xff]  ;;  %v1759_v53 = vld [vmem:[%s10128_s7 + $0xf50] sm:$0xff]  ;;  %1756 = vst [vmem:[%s10133_s8 + $0x798] sm:$0xff] %v1755_v51 }
  0x8a   : > { %1758 = vst [vmem:[%s10133_s8 + $0x7a0] sm:$0xff] %v1757_v52  ;;  %1760 = vst [vmem:[%s10133_s8 + $0x7a8] sm:$0xff] %v1759_v53  ;;  %v1761_v54 = vld [vmem:[%s10128_s7 + $0xf60] sm:$0xff]  ;;  %v1763_v55 = vld [vmem:[%s10128_s7 + $0xf70] sm:$0xff] }
  0x8b   : > { %v1765_v56 = vld [vmem:[%s10128_s7 + $0xf80] sm:$0xff]  ;;  %1762 = vst [vmem:[%s10133_s8 + $0x7b0] sm:$0xff] %v1761_v54  ;;  %1764 = vst [vmem:[%s10133_s8 + $0x7b8] sm:$0xff] %v1763_v55  ;;  %v1767_v57 = vld [vmem:[%s10128_s7 + $0xf90] sm:$0xff] }
  0x8c   : > { %1766 = vst [vmem:[%s10133_s8 + $0x7c0] sm:$0xff] %v1765_v56  ;;  %v1769_v58 = vld [vmem:[%s10128_s7 + $0xfa0] sm:$0xff]  ;;  %v1771_v59 = vld [vmem:[%s10128_s7 + $0xfb0] sm:$0xff]  ;;  %1768 = vst [vmem:[%s10133_s8 + $0x7c8] sm:$0xff] %v1767_v57 }
  0x8d   : > { %1770 = vst [vmem:[%s10133_s8 + $0x7d0] sm:$0xff] %v1769_v58  ;;  %1772 = vst [vmem:[%s10133_s8 + $0x7d8] sm:$0xff] %v1771_v59  ;;  %v1773_v60 = vld [vmem:[%s10128_s7 + $0xfc0] sm:$0xff]  ;;  %v1775_v61 = vld [vmem:[%s10128_s7 + $0xfd0] sm:$0xff] }
  0x8e   : > { %v1777_v62 = vld [vmem:[%s10128_s7 + $0xfe0] sm:$0xff]  ;;  %1774 = vst [vmem:[%s10133_s8 + $0x7e0] sm:$0xff] %v1773_v60  ;;  %1776 = vst [vmem:[%s10133_s8 + $0x7e8] sm:$0xff] %v1775_v61  ;;  %v1779_v63 = vld [vmem:[%s10128_s7 + $0xff0] sm:$0xff] }
  0x8f   : > { %1778 = vst [vmem:[%s10133_s8 + $0x7f0] sm:$0xff] %v1777_v62  ;;  %v1781_v0 = vld [vmem:[%s10128_s7 + $0x1000] sm:$0xff]  ;;  %v1783_v1 = vld [vmem:[%s10128_s7 + $0x1010] sm:$0xff]  ;;  %1780 = vst [vmem:[%s10133_s8 + $0x7f8] sm:$0xff] %v1779_v63 }
  0x90   : > { %1782 = vst [vmem:[%s10133_s8 + $0x800] sm:$0xff] %v1781_v0  ;;  %1784 = vst [vmem:[%s10133_s8 + $0x808] sm:$0xff] %v1783_v1  ;;  %v1785_v2 = vld [vmem:[%s10128_s7 + $0x1020] sm:$0xff]  ;;  %v1787_v3 = vld [vmem:[%s10128_s7 + $0x1030] sm:$0xff] }
  0x91   : > { %v1789_v4 = vld [vmem:[%s10128_s7 + $0x1040] sm:$0xff]  ;;  %1786 = vst [vmem:[%s10133_s8 + $0x810] sm:$0xff] %v1785_v2  ;;  %1788 = vst [vmem:[%s10133_s8 + $0x818] sm:$0xff] %v1787_v3  ;;  %v1791_v5 = vld [vmem:[%s10128_s7 + $0x1050] sm:$0xff] }
  0x92   : > { %1790 = vst [vmem:[%s10133_s8 + $0x820] sm:$0xff] %v1789_v4  ;;  %v1793_v6 = vld [vmem:[%s10128_s7 + $0x1060] sm:$0xff]  ;;  %v1795_v7 = vld [vmem:[%s10128_s7 + $0x1070] sm:$0xff]  ;;  %1792 = vst [vmem:[%s10133_s8 + $0x828] sm:$0xff] %v1791_v5 }
  0x93   : > { %1794 = vst [vmem:[%s10133_s8 + $0x830] sm:$0xff] %v1793_v6  ;;  %1796 = vst [vmem:[%s10133_s8 + $0x838] sm:$0xff] %v1795_v7  ;;  %v1797_v8 = vld [vmem:[%s10128_s7 + $0x1080] sm:$0xff]  ;;  %v1799_v9 = vld [vmem:[%s10128_s7 + $0x1090] sm:$0xff] }
  0x94   : > { %v1801_v10 = vld [vmem:[%s10128_s7 + $0x10a0] sm:$0xff]  ;;  %1798 = vst [vmem:[%s10133_s8 + $0x840] sm:$0xff] %v1797_v8  ;;  %1800 = vst [vmem:[%s10133_s8 + $0x848] sm:$0xff] %v1799_v9  ;;  %v1803_v11 = vld [vmem:[%s10128_s7 + $0x10b0] sm:$0xff] }
  0x95   : > { %1802 = vst [vmem:[%s10133_s8 + $0x850] sm:$0xff] %v1801_v10  ;;  %v1805_v12 = vld [vmem:[%s10128_s7 + $0x10c0] sm:$0xff]  ;;  %v1807_v13 = vld [vmem:[%s10128_s7 + $0x10d0] sm:$0xff]  ;;  %1804 = vst [vmem:[%s10133_s8 + $0x858] sm:$0xff] %v1803_v11 }
  0x96   : > { %1806 = vst [vmem:[%s10133_s8 + $0x860] sm:$0xff] %v1805_v12  ;;  %1808 = vst [vmem:[%s10133_s8 + $0x868] sm:$0xff] %v1807_v13  ;;  %v1809_v14 = vld [vmem:[%s10128_s7 + $0x10e0] sm:$0xff]  ;;  %v1811_v15 = vld [vmem:[%s10128_s7 + $0x10f0] sm:$0xff] }
  0x97   : > { %v1813_v16 = vld [vmem:[%s10128_s7 + $0x1100] sm:$0xff]  ;;  %1810 = vst [vmem:[%s10133_s8 + $0x870] sm:$0xff] %v1809_v14  ;;  %1812 = vst [vmem:[%s10133_s8 + $0x878] sm:$0xff] %v1811_v15  ;;  %v1815_v17 = vld [vmem:[%s10128_s7 + $0x1110] sm:$0xff] }
  0x98   : > { %1814 = vst [vmem:[%s10133_s8 + $0x880] sm:$0xff] %v1813_v16  ;;  %v1817_v18 = vld [vmem:[%s10128_s7 + $0x1120] sm:$0xff]  ;;  %v1819_v19 = vld [vmem:[%s10128_s7 + $0x1130] sm:$0xff]  ;;  %1816 = vst [vmem:[%s10133_s8 + $0x888] sm:$0xff] %v1815_v17 }
  0x99   : > { %1818 = vst [vmem:[%s10133_s8 + $0x890] sm:$0xff] %v1817_v18  ;;  %1820 = vst [vmem:[%s10133_s8 + $0x898] sm:$0xff] %v1819_v19  ;;  %v1821_v20 = vld [vmem:[%s10128_s7 + $0x1140] sm:$0xff]  ;;  %v1823_v21 = vld [vmem:[%s10128_s7 + $0x1150] sm:$0xff] }
  0x9a   : > { %v1825_v22 = vld [vmem:[%s10128_s7 + $0x1160] sm:$0xff]  ;;  %1822 = vst [vmem:[%s10133_s8 + $0x8a0] sm:$0xff] %v1821_v20  ;;  %1824 = vst [vmem:[%s10133_s8 + $0x8a8] sm:$0xff] %v1823_v21  ;;  %v1827_v23 = vld [vmem:[%s10128_s7 + $0x1170] sm:$0xff] }
  0x9b   : > { %1826 = vst [vmem:[%s10133_s8 + $0x8b0] sm:$0xff] %v1825_v22  ;;  %v1829_v24 = vld [vmem:[%s10128_s7 + $0x1180] sm:$0xff]  ;;  %v1831_v25 = vld [vmem:[%s10128_s7 + $0x1190] sm:$0xff]  ;;  %1828 = vst [vmem:[%s10133_s8 + $0x8b8] sm:$0xff] %v1827_v23 }
  0x9c   : > { %1830 = vst [vmem:[%s10133_s8 + $0x8c0] sm:$0xff] %v1829_v24  ;;  %1832 = vst [vmem:[%s10133_s8 + $0x8c8] sm:$0xff] %v1831_v25  ;;  %v1833_v26 = vld [vmem:[%s10128_s7 + $0x11a0] sm:$0xff]  ;;  %v1835_v27 = vld [vmem:[%s10128_s7 + $0x11b0] sm:$0xff] }
  0x9d   : > { %v1837_v28 = vld [vmem:[%s10128_s7 + $0x11c0] sm:$0xff]  ;;  %1834 = vst [vmem:[%s10133_s8 + $0x8d0] sm:$0xff] %v1833_v26  ;;  %1836 = vst [vmem:[%s10133_s8 + $0x8d8] sm:$0xff] %v1835_v27  ;;  %v1839_v29 = vld [vmem:[%s10128_s7 + $0x11d0] sm:$0xff] }
  0x9e   : > { %1838 = vst [vmem:[%s10133_s8 + $0x8e0] sm:$0xff] %v1837_v28  ;;  %v1841_v30 = vld [vmem:[%s10128_s7 + $0x11e0] sm:$0xff]  ;;  %v1843_v31 = vld [vmem:[%s10128_s7 + $0x11f0] sm:$0xff]  ;;  %1840 = vst [vmem:[%s10133_s8 + $0x8e8] sm:$0xff] %v1839_v29 }
  0x9f   : > { %1842 = vst [vmem:[%s10133_s8 + $0x8f0] sm:$0xff] %v1841_v30  ;;  %1844 = vst [vmem:[%s10133_s8 + $0x8f8] sm:$0xff] %v1843_v31  ;;  %v1845_v32 = vld [vmem:[%s10128_s7 + $0x1200] sm:$0xff]  ;;  %v1847_v33 = vld [vmem:[%s10128_s7 + $0x1210] sm:$0xff] }
  0xa0   : > { %v1849_v34 = vld [vmem:[%s10128_s7 + $0x1220] sm:$0xff]  ;;  %1846 = vst [vmem:[%s10133_s8 + $0x900] sm:$0xff] %v1845_v32  ;;  %1848 = vst [vmem:[%s10133_s8 + $0x908] sm:$0xff] %v1847_v33  ;;  %v1851_v35 = vld [vmem:[%s10128_s7 + $0x1230] sm:$0xff] }
  0xa1   : > { %1850 = vst [vmem:[%s10133_s8 + $0x910] sm:$0xff] %v1849_v34  ;;  %v1853_v36 = vld [vmem:[%s10128_s7 + $0x1240] sm:$0xff]  ;;  %v1855_v37 = vld [vmem:[%s10128_s7 + $0x1250] sm:$0xff]  ;;  %1852 = vst [vmem:[%s10133_s8 + $0x918] sm:$0xff] %v1851_v35 }
  0xa2   : > { %1854 = vst [vmem:[%s10133_s8 + $0x920] sm:$0xff] %v1853_v36  ;;  %1856 = vst [vmem:[%s10133_s8 + $0x928] sm:$0xff] %v1855_v37  ;;  %v1857_v38 = vld [vmem:[%s10128_s7 + $0x1260] sm:$0xff]  ;;  %v1859_v39 = vld [vmem:[%s10128_s7 + $0x1270] sm:$0xff] }
  0xa3   : > { %v1861_v40 = vld [vmem:[%s10128_s7 + $0x1280] sm:$0xff]  ;;  %1858 = vst [vmem:[%s10133_s8 + $0x930] sm:$0xff] %v1857_v38  ;;  %1860 = vst [vmem:[%s10133_s8 + $0x938] sm:$0xff] %v1859_v39  ;;  %v1863_v41 = vld [vmem:[%s10128_s7 + $0x1290] sm:$0xff] }
  0xa4   : > { %1862 = vst [vmem:[%s10133_s8 + $0x940] sm:$0xff] %v1861_v40  ;;  %v1865_v42 = vld [vmem:[%s10128_s7 + $0x12a0] sm:$0xff]  ;;  %v1867_v43 = vld [vmem:[%s10128_s7 + $0x12b0] sm:$0xff]  ;;  %1864 = vst [vmem:[%s10133_s8 + $0x948] sm:$0xff] %v1863_v41 }
  0xa5   : > { %1866 = vst [vmem:[%s10133_s8 + $0x950] sm:$0xff] %v1865_v42  ;;  %1868 = vst [vmem:[%s10133_s8 + $0x958] sm:$0xff] %v1867_v43  ;;  %v1869_v44 = vld [vmem:[%s10128_s7 + $0x12c0] sm:$0xff]  ;;  %v1871_v45 = vld [vmem:[%s10128_s7 + $0x12d0] sm:$0xff] }
  0xa6   : > { %v1873_v46 = vld [vmem:[%s10128_s7 + $0x12e0] sm:$0xff]  ;;  %1870 = vst [vmem:[%s10133_s8 + $0x960] sm:$0xff] %v1869_v44  ;;  %1872 = vst [vmem:[%s10133_s8 + $0x968] sm:$0xff] %v1871_v45  ;;  %v1875_v47 = vld [vmem:[%s10128_s7 + $0x12f0] sm:$0xff] }
  0xa7   : > { %1874 = vst [vmem:[%s10133_s8 + $0x970] sm:$0xff] %v1873_v46  ;;  %v1877_v48 = vld [vmem:[%s10128_s7 + $0x1300] sm:$0xff]  ;;  %v1879_v49 = vld [vmem:[%s10128_s7 + $0x1310] sm:$0xff]  ;;  %1876 = vst [vmem:[%s10133_s8 + $0x978] sm:$0xff] %v1875_v47 }
  0xa8   : > { %1878 = vst [vmem:[%s10133_s8 + $0x980] sm:$0xff] %v1877_v48  ;;  %1880 = vst [vmem:[%s10133_s8 + $0x988] sm:$0xff] %v1879_v49  ;;  %v1881_v50 = vld [vmem:[%s10128_s7 + $0x1320] sm:$0xff]  ;;  %v1883_v51 = vld [vmem:[%s10128_s7 + $0x1330] sm:$0xff] }
  0xa9   : > { %v1885_v52 = vld [vmem:[%s10128_s7 + $0x1340] sm:$0xff]  ;;  %1882 = vst [vmem:[%s10133_s8 + $0x990] sm:$0xff] %v1881_v50  ;;  %1884 = vst [vmem:[%s10133_s8 + $0x998] sm:$0xff] %v1883_v51  ;;  %v1887_v53 = vld [vmem:[%s10128_s7 + $0x1350] sm:$0xff] }
  0xaa   : > { %1886 = vst [vmem:[%s10133_s8 + $0x9a0] sm:$0xff] %v1885_v52  ;;  %v1889_v54 = vld [vmem:[%s10128_s7 + $0x1360] sm:$0xff]  ;;  %v1891_v55 = vld [vmem:[%s10128_s7 + $0x1370] sm:$0xff]  ;;  %1888 = vst [vmem:[%s10133_s8 + $0x9a8] sm:$0xff] %v1887_v53 }
  0xab   : > { %1890 = vst [vmem:[%s10133_s8 + $0x9b0] sm:$0xff] %v1889_v54  ;;  %1892 = vst [vmem:[%s10133_s8 + $0x9b8] sm:$0xff] %v1891_v55  ;;  %v1893_v56 = vld [vmem:[%s10128_s7 + $0x1380] sm:$0xff]  ;;  %v1895_v57 = vld [vmem:[%s10128_s7 + $0x1390] sm:$0xff] }
  0xac   : > { %v1897_v58 = vld [vmem:[%s10128_s7 + $0x13a0] sm:$0xff]  ;;  %1894 = vst [vmem:[%s10133_s8 + $0x9c0] sm:$0xff] %v1893_v56  ;;  %1896 = vst [vmem:[%s10133_s8 + $0x9c8] sm:$0xff] %v1895_v57  ;;  %v1899_v59 = vld [vmem:[%s10128_s7 + $0x13b0] sm:$0xff] }
  0xad   : > { %1898 = vst [vmem:[%s10133_s8 + $0x9d0] sm:$0xff] %v1897_v58  ;;  %v1901_v60 = vld [vmem:[%s10128_s7 + $0x13c0] sm:$0xff]  ;;  %v1903_v61 = vld [vmem:[%s10128_s7 + $0x13d0] sm:$0xff]  ;;  %1900 = vst [vmem:[%s10133_s8 + $0x9d8] sm:$0xff] %v1899_v59 }
  0xae   : > { %1902 = vst [vmem:[%s10133_s8 + $0x9e0] sm:$0xff] %v1901_v60  ;;  %1904 = vst [vmem:[%s10133_s8 + $0x9e8] sm:$0xff] %v1903_v61  ;;  %v1905_v62 = vld [vmem:[%s10128_s7 + $0x13e0] sm:$0xff]  ;;  %v1907_v63 = vld [vmem:[%s10128_s7 + $0x13f0] sm:$0xff] }
  0xaf   : > { %v1909_v0 = vld [vmem:[%s10128_s7 + $0x1400] sm:$0xff]  ;;  %1906 = vst [vmem:[%s10133_s8 + $0x9f0] sm:$0xff] %v1905_v62  ;;  %1908 = vst [vmem:[%s10133_s8 + $0x9f8] sm:$0xff] %v1907_v63  ;;  %v1911_v1 = vld [vmem:[%s10128_s7 + $0x1410] sm:$0xff] }
  0xb0   : > { %1910 = vst [vmem:[%s10133_s8 + $0xa00] sm:$0xff] %v1909_v0  ;;  %v1913_v2 = vld [vmem:[%s10128_s7 + $0x1420] sm:$0xff]  ;;  %v1915_v3 = vld [vmem:[%s10128_s7 + $0x1430] sm:$0xff]  ;;  %1912 = vst [vmem:[%s10133_s8 + $0xa08] sm:$0xff] %v1911_v1 }
  0xb1   : > { %1914 = vst [vmem:[%s10133_s8 + $0xa10] sm:$0xff] %v1913_v2  ;;  %1916 = vst [vmem:[%s10133_s8 + $0xa18] sm:$0xff] %v1915_v3  ;;  %v1917_v4 = vld [vmem:[%s10128_s7 + $0x1440] sm:$0xff]  ;;  %v1919_v5 = vld [vmem:[%s10128_s7 + $0x1450] sm:$0xff] }
  0xb2   : > { %v1921_v6 = vld [vmem:[%s10128_s7 + $0x1460] sm:$0xff]  ;;  %1918 = vst [vmem:[%s10133_s8 + $0xa20] sm:$0xff] %v1917_v4  ;;  %1920 = vst [vmem:[%s10133_s8 + $0xa28] sm:$0xff] %v1919_v5  ;;  %v1923_v7 = vld [vmem:[%s10128_s7 + $0x1470] sm:$0xff] }
  0xb3   : > { %1922 = vst [vmem:[%s10133_s8 + $0xa30] sm:$0xff] %v1921_v6  ;;  %v1925_v8 = vld [vmem:[%s10128_s7 + $0x1480] sm:$0xff]  ;;  %v1927_v9 = vld [vmem:[%s10128_s7 + $0x1490] sm:$0xff]  ;;  %1924 = vst [vmem:[%s10133_s8 + $0xa38] sm:$0xff] %v1923_v7 }
  0xb4   : > { %1926 = vst [vmem:[%s10133_s8 + $0xa40] sm:$0xff] %v1925_v8  ;;  %1928 = vst [vmem:[%s10133_s8 + $0xa48] sm:$0xff] %v1927_v9  ;;  %v1929_v10 = vld [vmem:[%s10128_s7 + $0x14a0] sm:$0xff]  ;;  %v1931_v11 = vld [vmem:[%s10128_s7 + $0x14b0] sm:$0xff] }
  0xb5   : > { %v1933_v12 = vld [vmem:[%s10128_s7 + $0x14c0] sm:$0xff]  ;;  %1930 = vst [vmem:[%s10133_s8 + $0xa50] sm:$0xff] %v1929_v10  ;;  %1932 = vst [vmem:[%s10133_s8 + $0xa58] sm:$0xff] %v1931_v11  ;;  %v1935_v13 = vld [vmem:[%s10128_s7 + $0x14d0] sm:$0xff] }
  0xb6   : > { %1934 = vst [vmem:[%s10133_s8 + $0xa60] sm:$0xff] %v1933_v12  ;;  %v1937_v14 = vld [vmem:[%s10128_s7 + $0x14e0] sm:$0xff]  ;;  %v1939_v15 = vld [vmem:[%s10128_s7 + $0x14f0] sm:$0xff]  ;;  %1936 = vst [vmem:[%s10133_s8 + $0xa68] sm:$0xff] %v1935_v13 }
  0xb7   : > { %1938 = vst [vmem:[%s10133_s8 + $0xa70] sm:$0xff] %v1937_v14  ;;  %1940 = vst [vmem:[%s10133_s8 + $0xa78] sm:$0xff] %v1939_v15  ;;  %v1941_v16 = vld [vmem:[%s10128_s7 + $0x1500] sm:$0xff]  ;;  %v1943_v17 = vld [vmem:[%s10128_s7 + $0x1510] sm:$0xff] }
  0xb8   : > { %v1945_v18 = vld [vmem:[%s10128_s7 + $0x1520] sm:$0xff]  ;;  %1942 = vst [vmem:[%s10133_s8 + $0xa80] sm:$0xff] %v1941_v16  ;;  %1944 = vst [vmem:[%s10133_s8 + $0xa88] sm:$0xff] %v1943_v17  ;;  %v1947_v19 = vld [vmem:[%s10128_s7 + $0x1530] sm:$0xff] }
  0xb9   : > { %1946 = vst [vmem:[%s10133_s8 + $0xa90] sm:$0xff] %v1945_v18  ;;  %v1949_v20 = vld [vmem:[%s10128_s7 + $0x1540] sm:$0xff]  ;;  %v1951_v21 = vld [vmem:[%s10128_s7 + $0x1550] sm:$0xff]  ;;  %1948 = vst [vmem:[%s10133_s8 + $0xa98] sm:$0xff] %v1947_v19 }
  0xba   : > { %1950 = vst [vmem:[%s10133_s8 + $0xaa0] sm:$0xff] %v1949_v20  ;;  %1952 = vst [vmem:[%s10133_s8 + $0xaa8] sm:$0xff] %v1951_v21  ;;  %v1953_v22 = vld [vmem:[%s10128_s7 + $0x1560] sm:$0xff]  ;;  %v1955_v23 = vld [vmem:[%s10128_s7 + $0x1570] sm:$0xff] }
  0xbb   : > { %v1957_v24 = vld [vmem:[%s10128_s7 + $0x1580] sm:$0xff]  ;;  %1954 = vst [vmem:[%s10133_s8 + $0xab0] sm:$0xff] %v1953_v22  ;;  %1956 = vst [vmem:[%s10133_s8 + $0xab8] sm:$0xff] %v1955_v23  ;;  %v1959_v25 = vld [vmem:[%s10128_s7 + $0x1590] sm:$0xff] }
  0xbc   : > { %1958 = vst [vmem:[%s10133_s8 + $0xac0] sm:$0xff] %v1957_v24  ;;  %v1961_v26 = vld [vmem:[%s10128_s7 + $0x15a0] sm:$0xff]  ;;  %v1963_v27 = vld [vmem:[%s10128_s7 + $0x15b0] sm:$0xff]  ;;  %1960 = vst [vmem:[%s10133_s8 + $0xac8] sm:$0xff] %v1959_v25 }
  0xbd   : > { %1962 = vst [vmem:[%s10133_s8 + $0xad0] sm:$0xff] %v1961_v26  ;;  %1964 = vst [vmem:[%s10133_s8 + $0xad8] sm:$0xff] %v1963_v27  ;;  %v1965_v28 = vld [vmem:[%s10128_s7 + $0x15c0] sm:$0xff]  ;;  %v1967_v29 = vld [vmem:[%s10128_s7 + $0x15d0] sm:$0xff] }
  0xbe   : > { %v1969_v30 = vld [vmem:[%s10128_s7 + $0x15e0] sm:$0xff]  ;;  %1966 = vst [vmem:[%s10133_s8 + $0xae0] sm:$0xff] %v1965_v28  ;;  %1968 = vst [vmem:[%s10133_s8 + $0xae8] sm:$0xff] %v1967_v29  ;;  %v1971_v31 = vld [vmem:[%s10128_s7 + $0x15f0] sm:$0xff] }
  0xbf   : > { %1970 = vst [vmem:[%s10133_s8 + $0xaf0] sm:$0xff] %v1969_v30  ;;  %v1973_v32 = vld [vmem:[%s10128_s7 + $0x1600] sm:$0xff]  ;;  %v1975_v33 = vld [vmem:[%s10128_s7 + $0x1610] sm:$0xff]  ;;  %1972 = vst [vmem:[%s10133_s8 + $0xaf8] sm:$0xff] %v1971_v31 }
  0xc0   : > { %1974 = vst [vmem:[%s10133_s8 + $0xb00] sm:$0xff] %v1973_v32  ;;  %1976 = vst [vmem:[%s10133_s8 + $0xb08] sm:$0xff] %v1975_v33  ;;  %v1977_v34 = vld [vmem:[%s10128_s7 + $0x1620] sm:$0xff]  ;;  %v1979_v35 = vld [vmem:[%s10128_s7 + $0x1630] sm:$0xff] }
  0xc1   : > { %v1981_v36 = vld [vmem:[%s10128_s7 + $0x1640] sm:$0xff]  ;;  %1978 = vst [vmem:[%s10133_s8 + $0xb10] sm:$0xff] %v1977_v34  ;;  %1980 = vst [vmem:[%s10133_s8 + $0xb18] sm:$0xff] %v1979_v35  ;;  %v1983_v37 = vld [vmem:[%s10128_s7 + $0x1650] sm:$0xff] }
  0xc2   : > { %1982 = vst [vmem:[%s10133_s8 + $0xb20] sm:$0xff] %v1981_v36  ;;  %v1985_v38 = vld [vmem:[%s10128_s7 + $0x1660] sm:$0xff]  ;;  %v1987_v39 = vld [vmem:[%s10128_s7 + $0x1670] sm:$0xff]  ;;  %1984 = vst [vmem:[%s10133_s8 + $0xb28] sm:$0xff] %v1983_v37 }
  0xc3   : > { %1986 = vst [vmem:[%s10133_s8 + $0xb30] sm:$0xff] %v1985_v38  ;;  %1988 = vst [vmem:[%s10133_s8 + $0xb38] sm:$0xff] %v1987_v39  ;;  %v1989_v40 = vld [vmem:[%s10128_s7 + $0x1680] sm:$0xff]  ;;  %v1991_v41 = vld [vmem:[%s10128_s7 + $0x1690] sm:$0xff] }
  0xc4   : > { %v1993_v42 = vld [vmem:[%s10128_s7 + $0x16a0] sm:$0xff]  ;;  %1990 = vst [vmem:[%s10133_s8 + $0xb40] sm:$0xff] %v1989_v40  ;;  %1992 = vst [vmem:[%s10133_s8 + $0xb48] sm:$0xff] %v1991_v41  ;;  %v1995_v43 = vld [vmem:[%s10128_s7 + $0x16b0] sm:$0xff] }
  0xc5   : > { %1994 = vst [vmem:[%s10133_s8 + $0xb50] sm:$0xff] %v1993_v42  ;;  %v1997_v44 = vld [vmem:[%s10128_s7 + $0x16c0] sm:$0xff]  ;;  %v1999_v45 = vld [vmem:[%s10128_s7 + $0x16d0] sm:$0xff]  ;;  %1996 = vst [vmem:[%s10133_s8 + $0xb58] sm:$0xff] %v1995_v43 }
  0xc6   : > { %1998 = vst [vmem:[%s10133_s8 + $0xb60] sm:$0xff] %v1997_v44  ;;  %2000 = vst [vmem:[%s10133_s8 + $0xb68] sm:$0xff] %v1999_v45  ;;  %v2001_v46 = vld [vmem:[%s10128_s7 + $0x16e0] sm:$0xff]  ;;  %v2003_v47 = vld [vmem:[%s10128_s7 + $0x16f0] sm:$0xff] }
  0xc7   : > { %v2005_v48 = vld [vmem:[%s10128_s7 + $0x1700] sm:$0xff]  ;;  %2002 = vst [vmem:[%s10133_s8 + $0xb70] sm:$0xff] %v2001_v46  ;;  %2004 = vst [vmem:[%s10133_s8 + $0xb78] sm:$0xff] %v2003_v47  ;;  %v2007_v49 = vld [vmem:[%s10128_s7 + $0x1710] sm:$0xff] }
  0xc8   : > { %2006 = vst [vmem:[%s10133_s8 + $0xb80] sm:$0xff] %v2005_v48  ;;  %v2009_v50 = vld [vmem:[%s10128_s7 + $0x1720] sm:$0xff]  ;;  %v2011_v51 = vld [vmem:[%s10128_s7 + $0x1730] sm:$0xff]  ;;  %2008 = vst [vmem:[%s10133_s8 + $0xb88] sm:$0xff] %v2007_v49 }
  0xc9   : > { %2010 = vst [vmem:[%s10133_s8 + $0xb90] sm:$0xff] %v2009_v50  ;;  %2012 = vst [vmem:[%s10133_s8 + $0xb98] sm:$0xff] %v2011_v51  ;;  %v2013_v52 = vld [vmem:[%s10128_s7 + $0x1740] sm:$0xff]  ;;  %v2015_v53 = vld [vmem:[%s10128_s7 + $0x1750] sm:$0xff] }
  0xca   : > { %v2017_v54 = vld [vmem:[%s10128_s7 + $0x1760] sm:$0xff]  ;;  %2014 = vst [vmem:[%s10133_s8 + $0xba0] sm:$0xff] %v2013_v52  ;;  %2016 = vst [vmem:[%s10133_s8 + $0xba8] sm:$0xff] %v2015_v53  ;;  %v2019_v55 = vld [vmem:[%s10128_s7 + $0x1770] sm:$0xff] }
  0xcb   : > { %2018 = vst [vmem:[%s10133_s8 + $0xbb0] sm:$0xff] %v2017_v54  ;;  %v2021_v56 = vld [vmem:[%s10128_s7 + $0x1780] sm:$0xff]  ;;  %v2023_v57 = vld [vmem:[%s10128_s7 + $0x1790] sm:$0xff]  ;;  %2020 = vst [vmem:[%s10133_s8 + $0xbb8] sm:$0xff] %v2019_v55 }
  0xcc   : > { %2022 = vst [vmem:[%s10133_s8 + $0xbc0] sm:$0xff] %v2021_v56  ;;  %2024 = vst [vmem:[%s10133_s8 + $0xbc8] sm:$0xff] %v2023_v57  ;;  %v2025_v58 = vld [vmem:[%s10128_s7 + $0x17a0] sm:$0xff]  ;;  %v2027_v59 = vld [vmem:[%s10128_s7 + $0x17b0] sm:$0xff] }
  0xcd   : > { %v2029_v60 = vld [vmem:[%s10128_s7 + $0x17c0] sm:$0xff]  ;;  %2026 = vst [vmem:[%s10133_s8 + $0xbd0] sm:$0xff] %v2025_v58  ;;  %2028 = vst [vmem:[%s10133_s8 + $0xbd8] sm:$0xff] %v2027_v59  ;;  %v2031_v61 = vld [vmem:[%s10128_s7 + $0x17d0] sm:$0xff] }
  0xce   : > { %2030 = vst [vmem:[%s10133_s8 + $0xbe0] sm:$0xff] %v2029_v60  ;;  %v2033_v62 = vld [vmem:[%s10128_s7 + $0x17e0] sm:$0xff]  ;;  %v2035_v63 = vld [vmem:[%s10128_s7 + $0x17f0] sm:$0xff]  ;;  %2032 = vst [vmem:[%s10133_s8 + $0xbe8] sm:$0xff] %v2031_v61 }
  0xcf   : > { %2034 = vst [vmem:[%s10133_s8 + $0xbf0] sm:$0xff] %v2033_v62  ;;  %2036 = vst [vmem:[%s10133_s8 + $0xbf8] sm:$0xff] %v2035_v63  ;;  %v2037_v0 = vld [vmem:[%s10128_s7 + $0x1800] sm:$0xff]  ;;  %v2039_v1 = vld [vmem:[%s10128_s7 + $0x1810] sm:$0xff] }
  0xd0   : > { %v2041_v2 = vld [vmem:[%s10128_s7 + $0x1820] sm:$0xff]  ;;  %2038 = vst [vmem:[%s10133_s8 + $0xc00] sm:$0xff] %v2037_v0  ;;  %2040 = vst [vmem:[%s10133_s8 + $0xc08] sm:$0xff] %v2039_v1  ;;  %v2043_v3 = vld [vmem:[%s10128_s7 + $0x1830] sm:$0xff] }
  0xd1   : > { %2042 = vst [vmem:[%s10133_s8 + $0xc10] sm:$0xff] %v2041_v2  ;;  %v2045_v4 = vld [vmem:[%s10128_s7 + $0x1840] sm:$0xff]  ;;  %v2047_v5 = vld [vmem:[%s10128_s7 + $0x1850] sm:$0xff]  ;;  %2044 = vst [vmem:[%s10133_s8 + $0xc18] sm:$0xff] %v2043_v3 }
  0xd2   : > { %2046 = vst [vmem:[%s10133_s8 + $0xc20] sm:$0xff] %v2045_v4  ;;  %2048 = vst [vmem:[%s10133_s8 + $0xc28] sm:$0xff] %v2047_v5  ;;  %v2049_v6 = vld [vmem:[%s10128_s7 + $0x1860] sm:$0xff]  ;;  %v2051_v7 = vld [vmem:[%s10128_s7 + $0x1870] sm:$0xff] }
  0xd3   : > { %v2053_v8 = vld [vmem:[%s10128_s7 + $0x1880] sm:$0xff]  ;;  %2050 = vst [vmem:[%s10133_s8 + $0xc30] sm:$0xff] %v2049_v6  ;;  %2052 = vst [vmem:[%s10133_s8 + $0xc38] sm:$0xff] %v2051_v7  ;;  %v2055_v9 = vld [vmem:[%s10128_s7 + $0x1890] sm:$0xff] }
  0xd4   : > { %2054 = vst [vmem:[%s10133_s8 + $0xc40] sm:$0xff] %v2053_v8  ;;  %v2057_v10 = vld [vmem:[%s10128_s7 + $0x18a0] sm:$0xff]  ;;  %v2059_v11 = vld [vmem:[%s10128_s7 + $0x18b0] sm:$0xff]  ;;  %2056 = vst [vmem:[%s10133_s8 + $0xc48] sm:$0xff] %v2055_v9 }
  0xd5   : > { %2058 = vst [vmem:[%s10133_s8 + $0xc50] sm:$0xff] %v2057_v10  ;;  %2060 = vst [vmem:[%s10133_s8 + $0xc58] sm:$0xff] %v2059_v11  ;;  %v2061_v12 = vld [vmem:[%s10128_s7 + $0x18c0] sm:$0xff]  ;;  %v2063_v13 = vld [vmem:[%s10128_s7 + $0x18d0] sm:$0xff] }
  0xd6   : > { %v2065_v14 = vld [vmem:[%s10128_s7 + $0x18e0] sm:$0xff]  ;;  %2062 = vst [vmem:[%s10133_s8 + $0xc60] sm:$0xff] %v2061_v12  ;;  %2064 = vst [vmem:[%s10133_s8 + $0xc68] sm:$0xff] %v2063_v13  ;;  %v2067_v15 = vld [vmem:[%s10128_s7 + $0x18f0] sm:$0xff] }
  0xd7   : > { %2066 = vst [vmem:[%s10133_s8 + $0xc70] sm:$0xff] %v2065_v14  ;;  %v2069_v16 = vld [vmem:[%s10128_s7 + $0x1900] sm:$0xff]  ;;  %v2071_v17 = vld [vmem:[%s10128_s7 + $0x1910] sm:$0xff]  ;;  %2068 = vst [vmem:[%s10133_s8 + $0xc78] sm:$0xff] %v2067_v15 }
  0xd8   : > { %2070 = vst [vmem:[%s10133_s8 + $0xc80] sm:$0xff] %v2069_v16  ;;  %2072 = vst [vmem:[%s10133_s8 + $0xc88] sm:$0xff] %v2071_v17  ;;  %v2073_v18 = vld [vmem:[%s10128_s7 + $0x1920] sm:$0xff]  ;;  %v2075_v19 = vld [vmem:[%s10128_s7 + $0x1930] sm:$0xff] }
  0xd9   : > { %v2077_v20 = vld [vmem:[%s10128_s7 + $0x1940] sm:$0xff]  ;;  %2074 = vst [vmem:[%s10133_s8 + $0xc90] sm:$0xff] %v2073_v18  ;;  %2076 = vst [vmem:[%s10133_s8 + $0xc98] sm:$0xff] %v2075_v19  ;;  %v2079_v21 = vld [vmem:[%s10128_s7 + $0x1950] sm:$0xff] }
  0xda   : > { %2078 = vst [vmem:[%s10133_s8 + $0xca0] sm:$0xff] %v2077_v20  ;;  %v2081_v22 = vld [vmem:[%s10128_s7 + $0x1960] sm:$0xff]  ;;  %v2083_v23 = vld [vmem:[%s10128_s7 + $0x1970] sm:$0xff]  ;;  %2080 = vst [vmem:[%s10133_s8 + $0xca8] sm:$0xff] %v2079_v21 }
  0xdb   : > { %2082 = vst [vmem:[%s10133_s8 + $0xcb0] sm:$0xff] %v2081_v22  ;;  %2084 = vst [vmem:[%s10133_s8 + $0xcb8] sm:$0xff] %v2083_v23  ;;  %v2085_v24 = vld [vmem:[%s10128_s7 + $0x1980] sm:$0xff]  ;;  %v2087_v25 = vld [vmem:[%s10128_s7 + $0x1990] sm:$0xff] }
  0xdc   : > { %v2089_v26 = vld [vmem:[%s10128_s7 + $0x19a0] sm:$0xff]  ;;  %2086 = vst [vmem:[%s10133_s8 + $0xcc0] sm:$0xff] %v2085_v24  ;;  %2088 = vst [vmem:[%s10133_s8 + $0xcc8] sm:$0xff] %v2087_v25  ;;  %v2091_v27 = vld [vmem:[%s10128_s7 + $0x19b0] sm:$0xff] }
  0xdd   : > { %2090 = vst [vmem:[%s10133_s8 + $0xcd0] sm:$0xff] %v2089_v26  ;;  %v2093_v28 = vld [vmem:[%s10128_s7 + $0x19c0] sm:$0xff]  ;;  %v2095_v29 = vld [vmem:[%s10128_s7 + $0x19d0] sm:$0xff]  ;;  %2092 = vst [vmem:[%s10133_s8 + $0xcd8] sm:$0xff] %v2091_v27 }
  0xde   : > { %2094 = vst [vmem:[%s10133_s8 + $0xce0] sm:$0xff] %v2093_v28  ;;  %2096 = vst [vmem:[%s10133_s8 + $0xce8] sm:$0xff] %v2095_v29  ;;  %v2097_v30 = vld [vmem:[%s10128_s7 + $0x19e0] sm:$0xff]  ;;  %v2099_v31 = vld [vmem:[%s10128_s7 + $0x19f0] sm:$0xff] }
  0xdf   : > { %v2101_v32 = vld [vmem:[%s10128_s7 + $0x1a00] sm:$0xff]  ;;  %2098 = vst [vmem:[%s10133_s8 + $0xcf0] sm:$0xff] %v2097_v30  ;;  %2100 = vst [vmem:[%s10133_s8 + $0xcf8] sm:$0xff] %v2099_v31  ;;  %v2103_v33 = vld [vmem:[%s10128_s7 + $0x1a10] sm:$0xff] }
  0xe0   : > { %2102 = vst [vmem:[%s10133_s8 + $0xd00] sm:$0xff] %v2101_v32  ;;  %v2105_v34 = vld [vmem:[%s10128_s7 + $0x1a20] sm:$0xff]  ;;  %v2107_v35 = vld [vmem:[%s10128_s7 + $0x1a30] sm:$0xff]  ;;  %2104 = vst [vmem:[%s10133_s8 + $0xd08] sm:$0xff] %v2103_v33 }
  0xe1   : > { %2106 = vst [vmem:[%s10133_s8 + $0xd10] sm:$0xff] %v2105_v34  ;;  %2108 = vst [vmem:[%s10133_s8 + $0xd18] sm:$0xff] %v2107_v35  ;;  %v2109_v36 = vld [vmem:[%s10128_s7 + $0x1a40] sm:$0xff]  ;;  %v2111_v37 = vld [vmem:[%s10128_s7 + $0x1a50] sm:$0xff] }
  0xe2   : > { %v2113_v38 = vld [vmem:[%s10128_s7 + $0x1a60] sm:$0xff]  ;;  %2110 = vst [vmem:[%s10133_s8 + $0xd20] sm:$0xff] %v2109_v36  ;;  %2112 = vst [vmem:[%s10133_s8 + $0xd28] sm:$0xff] %v2111_v37  ;;  %v2115_v39 = vld [vmem:[%s10128_s7 + $0x1a70] sm:$0xff] }
  0xe3   : > { %2114 = vst [vmem:[%s10133_s8 + $0xd30] sm:$0xff] %v2113_v38  ;;  %v2117_v40 = vld [vmem:[%s10128_s7 + $0x1a80] sm:$0xff]  ;;  %v2119_v41 = vld [vmem:[%s10128_s7 + $0x1a90] sm:$0xff]  ;;  %2116 = vst [vmem:[%s10133_s8 + $0xd38] sm:$0xff] %v2115_v39 }
  0xe4   : > { %2118 = vst [vmem:[%s10133_s8 + $0xd40] sm:$0xff] %v2117_v40  ;;  %2120 = vst [vmem:[%s10133_s8 + $0xd48] sm:$0xff] %v2119_v41  ;;  %v2121_v42 = vld [vmem:[%s10128_s7 + $0x1aa0] sm:$0xff]  ;;  %v2123_v43 = vld [vmem:[%s10128_s7 + $0x1ab0] sm:$0xff] }
  0xe5   : > { %v2125_v44 = vld [vmem:[%s10128_s7 + $0x1ac0] sm:$0xff]  ;;  %2122 = vst [vmem:[%s10133_s8 + $0xd50] sm:$0xff] %v2121_v42  ;;  %2124 = vst [vmem:[%s10133_s8 + $0xd58] sm:$0xff] %v2123_v43  ;;  %v2127_v45 = vld [vmem:[%s10128_s7 + $0x1ad0] sm:$0xff] }
  0xe6   : > { %2126 = vst [vmem:[%s10133_s8 + $0xd60] sm:$0xff] %v2125_v44  ;;  %v2129_v46 = vld [vmem:[%s10128_s7 + $0x1ae0] sm:$0xff]  ;;  %v2131_v47 = vld [vmem:[%s10128_s7 + $0x1af0] sm:$0xff]  ;;  %2128 = vst [vmem:[%s10133_s8 + $0xd68] sm:$0xff] %v2127_v45 }
  0xe7   : > { %2130 = vst [vmem:[%s10133_s8 + $0xd70] sm:$0xff] %v2129_v46  ;;  %2132 = vst [vmem:[%s10133_s8 + $0xd78] sm:$0xff] %v2131_v47  ;;  %v2133_v48 = vld [vmem:[%s10128_s7 + $0x1b00] sm:$0xff]  ;;  %v2135_v49 = vld [vmem:[%s10128_s7 + $0x1b10] sm:$0xff] }
  0xe8   : > { %v2137_v50 = vld [vmem:[%s10128_s7 + $0x1b20] sm:$0xff]  ;;  %2134 = vst [vmem:[%s10133_s8 + $0xd80] sm:$0xff] %v2133_v48  ;;  %2136 = vst [vmem:[%s10133_s8 + $0xd88] sm:$0xff] %v2135_v49  ;;  %v2139_v51 = vld [vmem:[%s10128_s7 + $0x1b30] sm:$0xff] }
  0xe9   : > { %2138 = vst [vmem:[%s10133_s8 + $0xd90] sm:$0xff] %v2137_v50  ;;  %v2141_v52 = vld [vmem:[%s10128_s7 + $0x1b40] sm:$0xff]  ;;  %v2143_v53 = vld [vmem:[%s10128_s7 + $0x1b50] sm:$0xff]  ;;  %2140 = vst [vmem:[%s10133_s8 + $0xd98] sm:$0xff] %v2139_v51 }
  0xea   : > { %2142 = vst [vmem:[%s10133_s8 + $0xda0] sm:$0xff] %v2141_v52  ;;  %2144 = vst [vmem:[%s10133_s8 + $0xda8] sm:$0xff] %v2143_v53  ;;  %v2145_v54 = vld [vmem:[%s10128_s7 + $0x1b60] sm:$0xff]  ;;  %v2147_v55 = vld [vmem:[%s10128_s7 + $0x1b70] sm:$0xff] }
  0xeb   : > { %v2149_v56 = vld [vmem:[%s10128_s7 + $0x1b80] sm:$0xff]  ;;  %2146 = vst [vmem:[%s10133_s8 + $0xdb0] sm:$0xff] %v2145_v54  ;;  %2148 = vst [vmem:[%s10133_s8 + $0xdb8] sm:$0xff] %v2147_v55  ;;  %v2151_v57 = vld [vmem:[%s10128_s7 + $0x1b90] sm:$0xff] }
  0xec   : > { %2150 = vst [vmem:[%s10133_s8 + $0xdc0] sm:$0xff] %v2149_v56  ;;  %v2153_v58 = vld [vmem:[%s10128_s7 + $0x1ba0] sm:$0xff]  ;;  %v2155_v59 = vld [vmem:[%s10128_s7 + $0x1bb0] sm:$0xff]  ;;  %2152 = vst [vmem:[%s10133_s8 + $0xdc8] sm:$0xff] %v2151_v57 }
  0xed   : > { %2154 = vst [vmem:[%s10133_s8 + $0xdd0] sm:$0xff] %v2153_v58  ;;  %2156 = vst [vmem:[%s10133_s8 + $0xdd8] sm:$0xff] %v2155_v59  ;;  %v2157_v60 = vld [vmem:[%s10128_s7 + $0x1bc0] sm:$0xff]  ;;  %v2159_v61 = vld [vmem:[%s10128_s7 + $0x1bd0] sm:$0xff] }
  0xee   : > { %v2161_v62 = vld [vmem:[%s10128_s7 + $0x1be0] sm:$0xff]  ;;  %2158 = vst [vmem:[%s10133_s8 + $0xde0] sm:$0xff] %v2157_v60  ;;  %2160 = vst [vmem:[%s10133_s8 + $0xde8] sm:$0xff] %v2159_v61  ;;  %v2163_v63 = vld [vmem:[%s10128_s7 + $0x1bf0] sm:$0xff] }
  0xef   : > { %2162 = vst [vmem:[%s10133_s8 + $0xdf0] sm:$0xff] %v2161_v62  ;;  %v2165_v0 = vld [vmem:[%s10128_s7 + $0x1c00] sm:$0xff]  ;;  %v2167_v1 = vld [vmem:[%s10128_s7 + $0x1c10] sm:$0xff]  ;;  %2164 = vst [vmem:[%s10133_s8 + $0xdf8] sm:$0xff] %v2163_v63 }
  0xf0   : > { %2166 = vst [vmem:[%s10133_s8 + $0xe00] sm:$0xff] %v2165_v0  ;;  %2168 = vst [vmem:[%s10133_s8 + $0xe08] sm:$0xff] %v2167_v1  ;;  %v2169_v2 = vld [vmem:[%s10128_s7 + $0x1c20] sm:$0xff]  ;;  %v2171_v3 = vld [vmem:[%s10128_s7 + $0x1c30] sm:$0xff] }
  0xf1   : > { %v2173_v4 = vld [vmem:[%s10128_s7 + $0x1c40] sm:$0xff]  ;;  %2170 = vst [vmem:[%s10133_s8 + $0xe10] sm:$0xff] %v2169_v2  ;;  %2172 = vst [vmem:[%s10133_s8 + $0xe18] sm:$0xff] %v2171_v3  ;;  %v2175_v5 = vld [vmem:[%s10128_s7 + $0x1c50] sm:$0xff] }
  0xf2   : > { %2174 = vst [vmem:[%s10133_s8 + $0xe20] sm:$0xff] %v2173_v4  ;;  %v2177_v6 = vld [vmem:[%s10128_s7 + $0x1c60] sm:$0xff]  ;;  %v2179_v7 = vld [vmem:[%s10128_s7 + $0x1c70] sm:$0xff]  ;;  %2176 = vst [vmem:[%s10133_s8 + $0xe28] sm:$0xff] %v2175_v5 }
  0xf3   : > { %2178 = vst [vmem:[%s10133_s8 + $0xe30] sm:$0xff] %v2177_v6  ;;  %2180 = vst [vmem:[%s10133_s8 + $0xe38] sm:$0xff] %v2179_v7  ;;  %v2181_v8 = vld [vmem:[%s10128_s7 + $0x1c80] sm:$0xff]  ;;  %v2183_v9 = vld [vmem:[%s10128_s7 + $0x1c90] sm:$0xff] }
  0xf4   : > { %v2185_v10 = vld [vmem:[%s10128_s7 + $0x1ca0] sm:$0xff]  ;;  %2182 = vst [vmem:[%s10133_s8 + $0xe40] sm:$0xff] %v2181_v8  ;;  %2184 = vst [vmem:[%s10133_s8 + $0xe48] sm:$0xff] %v2183_v9  ;;  %v2187_v11 = vld [vmem:[%s10128_s7 + $0x1cb0] sm:$0xff] }
  0xf5   : > { %2186 = vst [vmem:[%s10133_s8 + $0xe50] sm:$0xff] %v2185_v10  ;;  %v2189_v12 = vld [vmem:[%s10128_s7 + $0x1cc0] sm:$0xff]  ;;  %v2191_v13 = vld [vmem:[%s10128_s7 + $0x1cd0] sm:$0xff]  ;;  %2188 = vst [vmem:[%s10133_s8 + $0xe58] sm:$0xff] %v2187_v11 }
  0xf6   : > { %2190 = vst [vmem:[%s10133_s8 + $0xe60] sm:$0xff] %v2189_v12  ;;  %2192 = vst [vmem:[%s10133_s8 + $0xe68] sm:$0xff] %v2191_v13  ;;  %v2193_v14 = vld [vmem:[%s10128_s7 + $0x1ce0] sm:$0xff]  ;;  %v2195_v15 = vld [vmem:[%s10128_s7 + $0x1cf0] sm:$0xff] }
  0xf7   : > { %v2197_v16 = vld [vmem:[%s10128_s7 + $0x1d00] sm:$0xff]  ;;  %2194 = vst [vmem:[%s10133_s8 + $0xe70] sm:$0xff] %v2193_v14  ;;  %2196 = vst [vmem:[%s10133_s8 + $0xe78] sm:$0xff] %v2195_v15  ;;  %v2199_v17 = vld [vmem:[%s10128_s7 + $0x1d10] sm:$0xff] }
  0xf8   : > { %2198 = vst [vmem:[%s10133_s8 + $0xe80] sm:$0xff] %v2197_v16  ;;  %v2201_v18 = vld [vmem:[%s10128_s7 + $0x1d20] sm:$0xff]  ;;  %v2203_v19 = vld [vmem:[%s10128_s7 + $0x1d30] sm:$0xff]  ;;  %2200 = vst [vmem:[%s10133_s8 + $0xe88] sm:$0xff] %v2199_v17 }
  0xf9   : > { %2202 = vst [vmem:[%s10133_s8 + $0xe90] sm:$0xff] %v2201_v18  ;;  %2204 = vst [vmem:[%s10133_s8 + $0xe98] sm:$0xff] %v2203_v19  ;;  %v2205_v20 = vld [vmem:[%s10128_s7 + $0x1d40] sm:$0xff]  ;;  %v2207_v21 = vld [vmem:[%s10128_s7 + $0x1d50] sm:$0xff] }
  0xfa   : > { %v2209_v22 = vld [vmem:[%s10128_s7 + $0x1d60] sm:$0xff]  ;;  %2206 = vst [vmem:[%s10133_s8 + $0xea0] sm:$0xff] %v2205_v20  ;;  %2208 = vst [vmem:[%s10133_s8 + $0xea8] sm:$0xff] %v2207_v21  ;;  %v2211_v23 = vld [vmem:[%s10128_s7 + $0x1d70] sm:$0xff] }
  0xfb   : > { %2210 = vst [vmem:[%s10133_s8 + $0xeb0] sm:$0xff] %v2209_v22  ;;  %v2213_v24 = vld [vmem:[%s10128_s7 + $0x1d80] sm:$0xff]  ;;  %v2215_v25 = vld [vmem:[%s10128_s7 + $0x1d90] sm:$0xff]  ;;  %2212 = vst [vmem:[%s10133_s8 + $0xeb8] sm:$0xff] %v2211_v23 }
  0xfc   : > { %2214 = vst [vmem:[%s10133_s8 + $0xec0] sm:$0xff] %v2213_v24  ;;  %2216 = vst [vmem:[%s10133_s8 + $0xec8] sm:$0xff] %v2215_v25  ;;  %v2217_v26 = vld [vmem:[%s10128_s7 + $0x1da0] sm:$0xff]  ;;  %v2219_v27 = vld [vmem:[%s10128_s7 + $0x1db0] sm:$0xff] }
  0xfd   : > { %v2221_v28 = vld [vmem:[%s10128_s7 + $0x1dc0] sm:$0xff]  ;;  %2218 = vst [vmem:[%s10133_s8 + $0xed0] sm:$0xff] %v2217_v26  ;;  %2220 = vst [vmem:[%s10133_s8 + $0xed8] sm:$0xff] %v2219_v27  ;;  %v2223_v29 = vld [vmem:[%s10128_s7 + $0x1dd0] sm:$0xff] }
  0xfe   : > { %2222 = vst [vmem:[%s10133_s8 + $0xee0] sm:$0xff] %v2221_v28  ;;  %v2225_v30 = vld [vmem:[%s10128_s7 + $0x1de0] sm:$0xff]  ;;  %v2227_v31 = vld [vmem:[%s10128_s7 + $0x1df0] sm:$0xff]  ;;  %2224 = vst [vmem:[%s10133_s8 + $0xee8] sm:$0xff] %v2223_v29 }
  0xff   : > { %2226 = vst [vmem:[%s10133_s8 + $0xef0] sm:$0xff] %v2225_v30  ;;  %2228 = vst [vmem:[%s10133_s8 + $0xef8] sm:$0xff] %v2227_v31  ;;  %v2229_v32 = vld [vmem:[%s10128_s7 + $0x1e00] sm:$0xff]  ;;  %v2231_v33 = vld [vmem:[%s10128_s7 + $0x1e10] sm:$0xff] }
 0x100   : > { %v2233_v34 = vld [vmem:[%s10128_s7 + $0x1e20] sm:$0xff]  ;;  %2230 = vst [vmem:[%s10133_s8 + $0xf00] sm:$0xff] %v2229_v32  ;;  %2232 = vst [vmem:[%s10133_s8 + $0xf08] sm:$0xff] %v2231_v33  ;;  %v2235_v35 = vld [vmem:[%s10128_s7 + $0x1e30] sm:$0xff] }
 0x101   : > { %2234 = vst [vmem:[%s10133_s8 + $0xf10] sm:$0xff] %v2233_v34  ;;  %v2237_v36 = vld [vmem:[%s10128_s7 + $0x1e40] sm:$0xff]  ;;  %v2239_v37 = vld [vmem:[%s10128_s7 + $0x1e50] sm:$0xff]  ;;  %2236 = vst [vmem:[%s10133_s8 + $0xf18] sm:$0xff] %v2235_v35 }
 0x102   : > { %2238 = vst [vmem:[%s10133_s8 + $0xf20] sm:$0xff] %v2237_v36  ;;  %2240 = vst [vmem:[%s10133_s8 + $0xf28] sm:$0xff] %v2239_v37  ;;  %v2241_v38 = vld [vmem:[%s10128_s7 + $0x1e60] sm:$0xff]  ;;  %v2243_v39 = vld [vmem:[%s10128_s7 + $0x1e70] sm:$0xff] }
 0x103   : > { %v2245_v40 = vld [vmem:[%s10128_s7 + $0x1e80] sm:$0xff]  ;;  %2242 = vst [vmem:[%s10133_s8 + $0xf30] sm:$0xff] %v2241_v38  ;;  %2244 = vst [vmem:[%s10133_s8 + $0xf38] sm:$0xff] %v2243_v39  ;;  %v2247_v41 = vld [vmem:[%s10128_s7 + $0x1e90] sm:$0xff] }
 0x104   : > { %2246 = vst [vmem:[%s10133_s8 + $0xf40] sm:$0xff] %v2245_v40  ;;  %v2249_v42 = vld [vmem:[%s10128_s7 + $0x1ea0] sm:$0xff]  ;;  %v2251_v43 = vld [vmem:[%s10128_s7 + $0x1eb0] sm:$0xff]  ;;  %2248 = vst [vmem:[%s10133_s8 + $0xf48] sm:$0xff] %v2247_v41 }
 0x105   : > { %2250 = vst [vmem:[%s10133_s8 + $0xf50] sm:$0xff] %v2249_v42  ;;  %2252 = vst [vmem:[%s10133_s8 + $0xf58] sm:$0xff] %v2251_v43  ;;  %v2253_v44 = vld [vmem:[%s10128_s7 + $0x1ec0] sm:$0xff]  ;;  %v2255_v45 = vld [vmem:[%s10128_s7 + $0x1ed0] sm:$0xff] }
 0x106   : > { %v2257_v46 = vld [vmem:[%s10128_s7 + $0x1ee0] sm:$0xff]  ;;  %2254 = vst [vmem:[%s10133_s8 + $0xf60] sm:$0xff] %v2253_v44  ;;  %2256 = vst [vmem:[%s10133_s8 + $0xf68] sm:$0xff] %v2255_v45  ;;  %v2259_v47 = vld [vmem:[%s10128_s7 + $0x1ef0] sm:$0xff] }
 0x107   : > { %2258 = vst [vmem:[%s10133_s8 + $0xf70] sm:$0xff] %v2257_v46  ;;  %v2261_v48 = vld [vmem:[%s10128_s7 + $0x1f00] sm:$0xff]  ;;  %v2263_v49 = vld [vmem:[%s10128_s7 + $0x1f10] sm:$0xff]  ;;  %2260 = vst [vmem:[%s10133_s8 + $0xf78] sm:$0xff] %v2259_v47 }
 0x108   : > { %2262 = vst [vmem:[%s10133_s8 + $0xf80] sm:$0xff] %v2261_v48  ;;  %2264 = vst [vmem:[%s10133_s8 + $0xf88] sm:$0xff] %v2263_v49  ;;  %v2265_v50 = vld [vmem:[%s10128_s7 + $0x1f20] sm:$0xff]  ;;  %v2267_v51 = vld [vmem:[%s10128_s7 + $0x1f30] sm:$0xff] }
 0x109   : > { %v2269_v52 = vld [vmem:[%s10128_s7 + $0x1f40] sm:$0xff]  ;;  %2266 = vst [vmem:[%s10133_s8 + $0xf90] sm:$0xff] %v2265_v50  ;;  %2268 = vst [vmem:[%s10133_s8 + $0xf98] sm:$0xff] %v2267_v51  ;;  %v2271_v53 = vld [vmem:[%s10128_s7 + $0x1f50] sm:$0xff] }
 0x10a   : > { %2270 = vst [vmem:[%s10133_s8 + $0xfa0] sm:$0xff] %v2269_v52  ;;  %v2273_v54 = vld [vmem:[%s10128_s7 + $0x1f60] sm:$0xff]  ;;  %v2275_v55 = vld [vmem:[%s10128_s7 + $0x1f70] sm:$0xff]  ;;  %2272 = vst [vmem:[%s10133_s8 + $0xfa8] sm:$0xff] %v2271_v53 }
 0x10b   : > { %2274 = vst [vmem:[%s10133_s8 + $0xfb0] sm:$0xff] %v2273_v54  ;;  %2276 = vst [vmem:[%s10133_s8 + $0xfb8] sm:$0xff] %v2275_v55  ;;  %v2277_v56 = vld [vmem:[%s10128_s7 + $0x1f80] sm:$0xff]  ;;  %v2279_v57 = vld [vmem:[%s10128_s7 + $0x1f90] sm:$0xff] }
 0x10c   : > { %v2281_v58 = vld [vmem:[%s10128_s7 + $0x1fa0] sm:$0xff]  ;;  %2278 = vst [vmem:[%s10133_s8 + $0xfc0] sm:$0xff] %v2277_v56  ;;  %2280 = vst [vmem:[%s10133_s8 + $0xfc8] sm:$0xff] %v2279_v57  ;;  %v2283_v59 = vld [vmem:[%s10128_s7 + $0x1fb0] sm:$0xff] }
 0x10d   : > { %2282 = vst [vmem:[%s10133_s8 + $0xfd0] sm:$0xff] %v2281_v58  ;;  %v2285_v60 = vld [vmem:[%s10128_s7 + $0x1fc0] sm:$0xff]  ;;  %v2287_v61 = vld [vmem:[%s10128_s7 + $0x1fd0] sm:$0xff]  ;;  %2284 = vst [vmem:[%s10133_s8 + $0xfd8] sm:$0xff] %v2283_v59 }
 0x10e   : > { %2286 = vst [vmem:[%s10133_s8 + $0xfe0] sm:$0xff] %v2285_v60  ;;  %2288 = vst [vmem:[%s10133_s8 + $0xfe8] sm:$0xff] %v2287_v61  ;;  %v2289_v62 = vld [vmem:[%s10128_s7 + $0x1fe0] sm:$0xff]  ;;  %v2291_v63 = vld [vmem:[%s10128_s7 + $0x1ff0] sm:$0xff] }
 0x10f   : > { %2290 = vst [vmem:[%s10133_s8 + $0xff0] sm:$0xff] %v2289_v62  ;;  %2292 = vst [vmem:[%s10133_s8 + $0xff8] sm:$0xff] %v2291_v63 }
 0x110 PF: > { %p8615_p6 = scmp.ge.s32.totalorder %s10052_s22, 1  ;;  %p4406_p7 = scmp.lt.s32.totalorder %s10052_s22, 3 }
 0x112   : > { %p4407_p8 = pnand %p8615_p6, %p4406_p7 }
 0x113   : > { %s4413_s9 = sand.u32 (!%p4407_p8), 1, %s10036_s18  }
 0x114   : > { %4410 = sbr.rel (%p4407_p8) target bundleno = 1076 (0x434), region = 88  ;;  %s8616_s14 = sshll.u32 (!%p4407_p8), %s4413_s9, 12 }
 0x115   : > { %s11173_s15 = scalar_lea.vmem (!%p4407_p8), [#allocation2], %s8616_s14  ;;  %s8617_s9 = sshll.u32 (!%p4407_p8), %s10044_s20, 1 }
 0x116   : > { %p4464_p9 = scmp.lt.s32.totalorder (!%p4407_p8), %s8617_s9, 3 }
 0x119   : > { %v11162_v0 = vld [vmem:[%s11904_s0] sm:$0xff]  ;;  %v11167_v1 = vld [vmem:[%s11904_s0 + $0x8] sm:$0xff]  ;;  %v9210_v4 = vld [vmem:[%s11173_s15 + $0x74] ss:$8 sps:$4 sm:$0xff]   ;;  %s11917_s9 = smov (!%p4464_p9, %s8617_s9), 3 }
 0x11a   : > { %v8623_v2 = vcombine.high %v11162_v0, %v11162_v0  ;;  %v8625_v3 = vcombine.high %v11167_v1, %v11167_v1  ;;  %v9212_v5 = vld [vmem:[%s11173_s15 + $0x174] ss:$8 sps:$4 sm:$0xff]   ;;  %7697 = vmatprep.subr.bf16.mxu0 %v9210_v4  ;;  %v9214_v6 = vld [vmem:[%s11173_s15 + $0x70] ss:$8 sps:$4 sm:$0xff]   ;;  %v9216_v8 = vld [vmem:[%s11173_s15 + $0x64] ss:$8 sps:$4 sm:$0xff]   ;;  %s4466_s11 = scalar_lea.vmem %s11906_s2, %s11917_s9  ;;  %s4471_s16 = scalar_lea.vmem %s11907_s3, %s11917_s9 }
 0x11b   : > { %v9215_v7 = vld [vmem:[%s11173_s15 + $0x170] ss:$8 sps:$4 sm:$0xff]   ;;  %7738 = vmatprep.subr.bf16.mxu1 %v9212_v5  ;;  %7698 = vmatpush1.bf16.msra.mxu0 %v9214_v6  ;;  %v9218_v9 = vld [vmem:[%s11173_s15 + $0x164] ss:$8 sps:$4 sm:$0xff]   ;;  %v9220_v10 = vld [vmem:[%s11173_s15 + $0x60] ss:$8 sps:$4 sm:$0xff]   ;;  %s4476_s24 = scalar_lea.vmem %s11908_s4, %s11917_s9 }
 0x11c   : > { %7729 = vmatprep.mubr.bf16.mxu0 %v8623_v2  ;;  %7770 = vmatprep.mubr.bf16.mxu1 %v8625_v3  ;;  %v9221_v11 = vld [vmem:[%s11173_s15 + $0x160] ss:$8 sps:$4 sm:$0xff]   ;;  %v9222_v12 = vld [vmem:[%s11173_s15 + $0x54] ss:$8 sps:$4 sm:$0xff]   ;;  %v9226_v14 = vld [vmem:[%s11173_s15 + $0x50] ss:$8 sps:$4 sm:$0xff]  }
 0x11d   : > { %7739 = vmatpush1.bf16.msra.mxu1 %v9215_v7  ;;  %7699 = vmatprep.subr.bf16.mxu0 %v9216_v8  ;;  %v9224_v13 = vld [vmem:[%s11173_s15 + $0x154] ss:$8 sps:$4 sm:$0xff]   ;;  %v9227_v15 = vld [vmem:[%s11173_s15 + $0x150] ss:$8 sps:$4 sm:$0xff]   ;;  %v9228_v16 = vld [vmem:[%s11173_s15 + $0x44] ss:$8 sps:$4 sm:$0xff]  }
 0x11e   : > { %7740 = vmatprep.subr.bf16.mxu1 %v9218_v9  ;;  %v9230_v17 = vld [vmem:[%s11173_s15 + $0x144] ss:$8 sps:$4 sm:$0xff]   ;;  %v9232_v18 = vld [vmem:[%s11173_s15 + $0x40] ss:$8 sps:$4 sm:$0xff]   ;;  %v9234_v20 = vld [vmem:[%s11173_s15 + $0x34] ss:$8 sps:$4 sm:$0xff]  }
 0x11f   : > { %7700 = vmatpush1.bf16.msra.mxu0 %v9220_v10  ;;  %v9233_v19 = vld [vmem:[%s11173_s15 + $0x140] ss:$8 sps:$4 sm:$0xff]   ;;  %v9236_v21 = vld [vmem:[%s11173_s15 + $0x134] ss:$8 sps:$4 sm:$0xff]   ;;  %v9238_v22 = vld [vmem:[%s11173_s15 + $0x30] ss:$8 sps:$4 sm:$0xff]   ;;  %v8622_v10 = vcombine.low %v11162_v0, %v11162_v0 }
 0x120   : > { %7701 = vmatprep.subr.bf16.mxu0 %v9222_v12  ;;  %v9239_v23 = vld [vmem:[%s11173_s15 + $0x130] ss:$8 sps:$4 sm:$0xff]   ;;  %v9240_v24 = vld [vmem:[%s11173_s15 + $0x24] ss:$8 sps:$4 sm:$0xff]   ;;  %v9244_v26 = vld [vmem:[%s11173_s15 + $0x20] ss:$8 sps:$4 sm:$0xff]  }
 0x121   : > { %7741 = vmatpush1.bf16.msra.mxu1 %v9221_v11  ;;  %v9242_v25 = vld [vmem:[%s11173_s15 + $0x124] ss:$8 sps:$4 sm:$0xff]   ;;  %v9245_v27 = vld [vmem:[%s11173_s15 + $0x120] ss:$8 sps:$4 sm:$0xff]   ;;  %v9246_v28 = vld [vmem:[%s11173_s15 + $0x14] ss:$8 sps:$4 sm:$0xff]   ;;  %v8624_v11 = vcombine.low %v11167_v1, %v11167_v1 }
 0x122   : > { %7742 = vmatprep.subr.bf16.mxu1 %v9224_v13  ;;  %v9248_v29 = vld [vmem:[%s11173_s15 + $0x114] ss:$8 sps:$4 sm:$0xff]   ;;  %v9250_v30 = vld [vmem:[%s11173_s15 + $0x10] ss:$8 sps:$4 sm:$0xff]   ;;  %v9252_v32 = vld [vmem:[%s11173_s15 + $0x4] ss:$8 sps:$4 sm:$0xff]  }
 0x123   : > { %7702 = vmatpush1.bf16.msra.mxu0 %v9226_v14  ;;  %v9251_v31 = vld [vmem:[%s11173_s15 + $0x110] ss:$8 sps:$4 sm:$0xff]   ;;  %v9254_v33 = vld [vmem:[%s11173_s15 + $0x104] ss:$8 sps:$4 sm:$0xff]   ;;  %v9256_v34 = vld [vmem:[%s11173_s15] ss:$8 sps:$4 sm:$0xff]  }
 0x124   : > { %7703 = vmatprep.subr.bf16.mxu0 %v9228_v16  ;;  %v9257_v35 = vld [vmem:[%s11173_s15 + $0x100] ss:$8 sps:$4 sm:$0xff]   ;;  %v9258_v36 = vld [vmem:[%s11173_s15 + $0xf4] ss:$8 sps:$4 sm:$0xff]   ;;  %v9262_v38 = vld [vmem:[%s11173_s15 + $0xf0] ss:$8 sps:$4 sm:$0xff]  }
 0x125   : > { %7743 = vmatpush1.bf16.msra.mxu1 %v9227_v15  ;;  %v9260_v37 = vld [vmem:[%s11173_s15 + $0x1f4] ss:$8 sps:$4 sm:$0xff]   ;;  %v9263_v39 = vld [vmem:[%s11173_s15 + $0x1f0] ss:$8 sps:$4 sm:$0xff]   ;;  %v9264_v40 = vld [vmem:[%s11173_s15 + $0xe4] ss:$8 sps:$4 sm:$0xff]  }
 0x126   : > { %7744 = vmatprep.subr.bf16.mxu1 %v9230_v17  ;;  %v9266_v41 = vld [vmem:[%s11173_s15 + $0x1e4] ss:$8 sps:$4 sm:$0xff]   ;;  %v9268_v42 = vld [vmem:[%s11173_s15 + $0xe0] ss:$8 sps:$4 sm:$0xff]   ;;  %v9270_v44 = vld [vmem:[%s11173_s15 + $0xd4] ss:$8 sps:$4 sm:$0xff]  }
 0x127   : > { %7704 = vmatpush1.bf16.msra.mxu0 %v9232_v18  ;;  %v9269_v43 = vld [vmem:[%s11173_s15 + $0x1e0] ss:$8 sps:$4 sm:$0xff]   ;;  %v9272_v45 = vld [vmem:[%s11173_s15 + $0x1d4] ss:$8 sps:$4 sm:$0xff]   ;;  %v9274_v46 = vld [vmem:[%s11173_s15 + $0xd0] ss:$8 sps:$4 sm:$0xff]  }
 0x128   : > { %7705 = vmatprep.subr.bf16.mxu0 %v9234_v20  ;;  %v9275_v47 = vld [vmem:[%s11173_s15 + $0x1d0] ss:$8 sps:$4 sm:$0xff]   ;;  %v9276_v48 = vld [vmem:[%s11173_s15 + $0xc4] ss:$8 sps:$4 sm:$0xff]   ;;  %v9280_v50 = vld [vmem:[%s11173_s15 + $0xc0] ss:$8 sps:$4 sm:$0xff]  }
 0x129   : > { %7745 = vmatpush1.bf16.msra.mxu1 %v9233_v19  ;;  %v9278_v49 = vld [vmem:[%s11173_s15 + $0x1c4] ss:$8 sps:$4 sm:$0xff]   ;;  %v9281_v51 = vld [vmem:[%s11173_s15 + $0x1c0] ss:$8 sps:$4 sm:$0xff]   ;;  %v9282_v52 = vld [vmem:[%s11173_s15 + $0xb4] ss:$8 sps:$4 sm:$0xff]  }
 0x12a   : > { %7746 = vmatprep.subr.bf16.mxu1 %v9236_v21  ;;  %v9284_v53 = vld [vmem:[%s11173_s15 + $0x1b4] ss:$8 sps:$4 sm:$0xff]   ;;  %v9286_v54 = vld [vmem:[%s11173_s15 + $0xb0] ss:$8 sps:$4 sm:$0xff]   ;;  %v9288_v56 = vld [vmem:[%s11173_s15 + $0xa4] ss:$8 sps:$4 sm:$0xff]  }
 0x12b   : > { %7706 = vmatpush1.bf16.msra.mxu0 %v9238_v22  ;;  %v9287_v55 = vld [vmem:[%s11173_s15 + $0x1b0] ss:$8 sps:$4 sm:$0xff]   ;;  %v9290_v57 = vld [vmem:[%s11173_s15 + $0x1a4] ss:$8 sps:$4 sm:$0xff]   ;;  %v9292_v58 = vld [vmem:[%s11173_s15 + $0xa0] ss:$8 sps:$4 sm:$0xff]  }
 0x12c   : > { %7707 = vmatprep.subr.bf16.mxu0 %v9240_v24  ;;  %v9293_v59 = vld [vmem:[%s11173_s15 + $0x1a0] ss:$8 sps:$4 sm:$0xff]   ;;  %v9294_v60 = vld [vmem:[%s11173_s15 + $0x94] ss:$8 sps:$4 sm:$0xff]   ;;  %v9298_v62 = vld [vmem:[%s11173_s15 + $0x90] ss:$8 sps:$4 sm:$0xff]  }
 0x12d   : > { %7747 = vmatpush1.bf16.msra.mxu1 %v9239_v23  ;;  %v9296_v61 = vld [vmem:[%s11173_s15 + $0x194] ss:$8 sps:$4 sm:$0xff]   ;;  %v9299_v63 = vld [vmem:[%s11173_s15 + $0x190] ss:$8 sps:$4 sm:$0xff]   ;;  %v9300_v2 = vld [vmem:[%s11173_s15 + $0x84] ss:$8 sps:$4 sm:$0xff]  }
 0x12e   : > { %7748 = vmatprep.subr.bf16.mxu1 %v9242_v25  ;;  %v9302_v3 = vld [vmem:[%s11173_s15 + $0x184] ss:$8 sps:$4 sm:$0xff]   ;;  %v9304_v4 = vld [vmem:[%s11173_s15 + $0x80] ss:$8 sps:$4 sm:$0xff]   ;;  %v9312_v6 = vld [vmem:[%s11173_s15 + $0x274] ss:$8 sps:$4 sm:$0xff]  }
 0x12f   : > { %7708 = vmatpush1.bf16.msra.mxu0 %v9244_v26  ;;  %v9305_v5 = vld [vmem:[%s11173_s15 + $0x180] ss:$8 sps:$4 sm:$0xff]   ;;  %v9315_v7 = vld [vmem:[%s11173_s15 + $0x374] ss:$8 sps:$4 sm:$0xff]   ;;  %v9310_v12 = vld [vmem:[%s11173_s15 + $0x270] ss:$8 sps:$4 sm:$0xff]  }
 0x130   : > { %7709 = vmatprep.subr.bf16.mxu0 %v9246_v28  ;;  %v11244_v8 = vld [vmem:[%s11904_s0 + $0x10] sm:$0xff]  ;;  %v11249_v9 = vld [vmem:[%s11904_s0 + $0x18] sm:$0xff]  ;;  %v9318_v14 = vld [vmem:[%s11173_s15 + $0x264] ss:$8 sps:$4 sm:$0xff]  }
 0x131   : > { %7749 = vmatpush1.bf16.msra.mxu1 %v9245_v27  ;;  %v9313_v13 = vld [vmem:[%s11173_s15 + $0x370] ss:$8 sps:$4 sm:$0xff]   ;;  %v9321_v15 = vld [vmem:[%s11173_s15 + $0x364] ss:$8 sps:$4 sm:$0xff]   ;;  %v8627_v16 = vcombine.high %v11244_v8, %v11244_v8  ;;  %v8629_v0 = vcombine.high %v11249_v9, %v11249_v9  ;;  %v9316_v1 = vld [vmem:[%s11173_s15 + $0x260] ss:$8 sps:$4 sm:$0xff]  }
 0x132   : > { %7750 = vmatprep.subr.bf16.mxu1 %v9248_v29  ;;  %v9319_v17 = vld [vmem:[%s11173_s15 + $0x360] ss:$8 sps:$4 sm:$0xff]   ;;  %v9324_v18 = vld [vmem:[%s11173_s15 + $0x254] ss:$8 sps:$4 sm:$0xff]   ;;  %v9322_v20 = vld [vmem:[%s11173_s15 + $0x250] ss:$8 sps:$4 sm:$0xff]  }
 0x133   : > { %7710 = vmatpush1.bf16.msra.mxu0 %v9250_v30  ;;  %v9327_v19 = vld [vmem:[%s11173_s15 + $0x354] ss:$8 sps:$4 sm:$0xff]   ;;  %v9325_v21 = vld [vmem:[%s11173_s15 + $0x350] ss:$8 sps:$4 sm:$0xff]   ;;  %v9330_v22 = vld [vmem:[%s11173_s15 + $0x244] ss:$8 sps:$4 sm:$0xff]  }
 0x134   : > { %7711 = vmatprep.subr.bf16.mxu0 %v9252_v32  ;;  %v9333_v23 = vld [vmem:[%s11173_s15 + $0x344] ss:$8 sps:$4 sm:$0xff]   ;;  %v9328_v24 = vld [vmem:[%s11173_s15 + $0x240] ss:$8 sps:$4 sm:$0xff]   ;;  %v9336_v26 = vld [vmem:[%s11173_s15 + $0x234] ss:$8 sps:$4 sm:$0xff]  }
 0x135   : > { %7751 = vmatpush1.bf16.msra.mxu1 %v9251_v31  ;;  %v9331_v25 = vld [vmem:[%s11173_s15 + $0x340] ss:$8 sps:$4 sm:$0xff]   ;;  %v9339_v27 = vld [vmem:[%s11173_s15 + $0x334] ss:$8 sps:$4 sm:$0xff]   ;;  %v9334_v28 = vld [vmem:[%s11173_s15 + $0x230] ss:$8 sps:$4 sm:$0xff]  }
 0x136   : > { %7752 = vmatprep.subr.bf16.mxu1 %v9254_v33  ;;  %v9337_v29 = vld [vmem:[%s11173_s15 + $0x330] ss:$8 sps:$4 sm:$0xff]   ;;  %v9342_v30 = vld [vmem:[%s11173_s15 + $0x224] ss:$8 sps:$4 sm:$0xff]   ;;  %v9340_v32 = vld [vmem:[%s11173_s15 + $0x220] ss:$8 sps:$4 sm:$0xff]  }
 0x137   : > { %7712 = vmatpush1.bf16.msra.mxu0 %v9256_v34  ;;  %v9345_v31 = vld [vmem:[%s11173_s15 + $0x324] ss:$8 sps:$4 sm:$0xff]   ;;  %v9343_v33 = vld [vmem:[%s11173_s15 + $0x320] ss:$8 sps:$4 sm:$0xff]   ;;  %v9348_v34 = vld [vmem:[%s11173_s15 + $0x214] ss:$8 sps:$4 sm:$0xff]  }
 0x138   : > { %7713 = vmatprep.subr.bf16.mxu0 %v9258_v36  ;;  %v9346_v36 = vld [vmem:[%s11173_s15 + $0x210] ss:$8 sps:$4 sm:$0xff]  }
 0x139   : > { %7753 = vmatpush1.bf16.msra.mxu1 %v9257_v35  ;;  %v9351_v35 = vld [vmem:[%s11173_s15 + $0x314] ss:$8 sps:$4 sm:$0xff]  }
 0x13a   : > { %7754 = vmatprep.subr.bf16.mxu1 %v9260_v37  ;;  %v9349_v37 = vld [vmem:[%s11173_s15 + $0x310] ss:$8 sps:$4 sm:$0xff]  }
 0x13b   : > { %7714 = vmatpush2.bf16.msra.mxu0 %v9262_v38  ;;  %v9354_v38 = vld [vmem:[%s11173_s15 + $0x204] ss:$8 sps:$4 sm:$0xff]  }
 0x13c   : > { %7715 = vmatprep.subr.bf16.mxu0 %v9264_v40  ;;  %v9352_v40 = vld [vmem:[%s11173_s15 + $0x200] ss:$8 sps:$4 sm:$0xff]  }
 0x13d   : > { %7755 = vmatpush2.bf16.msra.mxu1 %v9263_v39  ;;  %v9357_v39 = vld [vmem:[%s11173_s15 + $0x304] ss:$8 sps:$4 sm:$0xff]  }
 0x13e   : > { %7756 = vmatprep.subr.bf16.mxu1 %v9266_v41  ;;  %v9355_v41 = vld [vmem:[%s11173_s15 + $0x300] ss:$8 sps:$4 sm:$0xff]  }
 0x13f   : > { %7716 = vmatpush2.bf16.msra.mxu0 %v9268_v42  ;;  %v9360_v42 = vld [vmem:[%s11173_s15 + $0x2f4] ss:$8 sps:$4 sm:$0xff]  }
 0x140   : > { %7717 = vmatprep.subr.bf16.mxu0 %v9270_v44  ;;  %v9358_v44 = vld [vmem:[%s11173_s15 + $0x2f0] ss:$8 sps:$4 sm:$0xff]  }
 0x141   : > { %7757 = vmatpush2.bf16.msra.mxu1 %v9269_v43  ;;  %v9363_v43 = vld [vmem:[%s11173_s15 + $0x3f4] ss:$8 sps:$4 sm:$0xff]  }
 0x142   : > { %7758 = vmatprep.subr.bf16.mxu1 %v9272_v45  ;;  %v9361_v45 = vld [vmem:[%s11173_s15 + $0x3f0] ss:$8 sps:$4 sm:$0xff]  }
 0x143   : > { %7718 = vmatpush2.bf16.msra.mxu0 %v9274_v46  ;;  %v9366_v46 = vld [vmem:[%s11173_s15 + $0x2e4] ss:$8 sps:$4 sm:$0xff]  }
 0x144   : > { %7719 = vmatprep.subr.bf16.mxu0 %v9276_v48  ;;  %v9364_v48 = vld [vmem:[%s11173_s15 + $0x2e0] ss:$8 sps:$4 sm:$0xff]  }
 0x145   : > { %7759 = vmatpush2.bf16.msra.mxu1 %v9275_v47  ;;  %v9369_v47 = vld [vmem:[%s11173_s15 + $0x3e4] ss:$8 sps:$4 sm:$0xff]  }
 0x146   : > { %7760 = vmatprep.subr.bf16.mxu1 %v9278_v49  ;;  %v9367_v49 = vld [vmem:[%s11173_s15 + $0x3e0] ss:$8 sps:$4 sm:$0xff]  }
 0x147   : > { %7720 = vmatpush2.bf16.msra.mxu0 %v9280_v50  ;;  %v9372_v50 = vld [vmem:[%s11173_s15 + $0x2d4] ss:$8 sps:$4 sm:$0xff]  }
 0x148   : > { %7721 = vmatprep.subr.bf16.mxu0 %v9282_v52  ;;  %v9370_v52 = vld [vmem:[%s11173_s15 + $0x2d0] ss:$8 sps:$4 sm:$0xff]  }
 0x149   : > { %7761 = vmatpush2.bf16.msra.mxu1 %v9281_v51  ;;  %v9375_v51 = vld [vmem:[%s11173_s15 + $0x3d4] ss:$8 sps:$4 sm:$0xff]  }
 0x14a   : > { %7762 = vmatprep.subr.bf16.mxu1 %v9284_v53  ;;  %v9373_v53 = vld [vmem:[%s11173_s15 + $0x3d0] ss:$8 sps:$4 sm:$0xff]  }
 0x14b   : > { %7722 = vmatpush2.bf16.msra.mxu0 %v9286_v54  ;;  %v9378_v54 = vld [vmem:[%s11173_s15 + $0x2c4] ss:$8 sps:$4 sm:$0xff]  }
 0x14c   : > { %7723 = vmatprep.subr.bf16.mxu0 %v9288_v56  ;;  %v9376_v56 = vld [vmem:[%s11173_s15 + $0x2c0] ss:$8 sps:$4 sm:$0xff]  }
 0x14d   : > { %7763 = vmatpush2.bf16.msra.mxu1 %v9287_v55  ;;  %v9381_v55 = vld [vmem:[%s11173_s15 + $0x3c4] ss:$8 sps:$4 sm:$0xff]  }
 0x14e   : > { %7764 = vmatprep.subr.bf16.mxu1 %v9290_v57  ;;  %v9379_v57 = vld [vmem:[%s11173_s15 + $0x3c0] ss:$8 sps:$4 sm:$0xff]  }
 0x14f   : > { %7724 = vmatpush2.bf16.msra.mxu0 %v9292_v58  ;;  %v9384_v58 = vld [vmem:[%s11173_s15 + $0x2b4] ss:$8 sps:$4 sm:$0xff]  }
 0x150   : > { %7725 = vmatprep.subr.bf16.mxu0 %v9294_v60  ;;  %v9382_v60 = vld [vmem:[%s11173_s15 + $0x2b0] ss:$8 sps:$4 sm:$0xff]  }
 0x151   : > { %7765 = vmatpush2.bf16.msra.mxu1 %v9293_v59  ;;  %v9387_v59 = vld [vmem:[%s11173_s15 + $0x3b4] ss:$8 sps:$4 sm:$0xff]  }
 0x152   : > { %7766 = vmatprep.subr.bf16.mxu1 %v9296_v61  ;;  %v9385_v61 = vld [vmem:[%s11173_s15 + $0x3b0] ss:$8 sps:$4 sm:$0xff]  }
 0x153   : > { %7726 = vmatpush2.bf16.msra.mxu0 %v9298_v62  ;;  %v9390_v62 = vld [vmem:[%s11173_s15 + $0x2a4] ss:$8 sps:$4 sm:$0xff]  }
 0x154   : > { %7727 = vmatprep.subr.bf16.mxu0 %v9300_v2  ;;  %v9388_v2 = vld [vmem:[%s11173_s15 + $0x2a0] ss:$8 sps:$4 sm:$0xff]  }
 0x155   : > { %7767 = vmatpush2.bf16.msra.mxu1 %v9299_v63  ;;  %v9393_v63 = vld [vmem:[%s11173_s15 + $0x3a4] ss:$8 sps:$4 sm:$0xff]  }
 0x156   : > { %7768 = vmatprep.subr.bf16.mxu1 %v9302_v3  ;;  %v9391_v3 = vld [vmem:[%s11173_s15 + $0x3a0] ss:$8 sps:$4 sm:$0xff]  }
 0x157   : > { %7728 = vmatpush2.bf16.msra.mxu0 %v9304_v4  ;;  %v9396_v4 = vld [vmem:[%s11173_s15 + $0x294] ss:$8 sps:$4 sm:$0xff]  }
 0x158   : > { %7779 = vmatprep.subr.bf16.mxu0 %v9312_v6  ;;  %v9394_v6 = vld [vmem:[%s11173_s15 + $0x290] ss:$8 sps:$4 sm:$0xff]  }
 0x159   : > { %7769 = vmatpush2.bf16.msra.mxu1 %v9305_v5  ;;  %v9399_v5 = vld [vmem:[%s11173_s15 + $0x394] ss:$8 sps:$4 sm:$0xff]  }
 0x15a   : > { %7820 = vmatprep.subr.bf16.mxu1 %v9315_v7  ;;  %7730 = vmatmul.mubr.bf16.vlgmr.msra.gmra.mxu0 %v8622_v10  ;;  %v9397_v7 = vld [vmem:[%s11173_s15 + $0x390] ss:$8 sps:$4 sm:$0xff]   ;;  %v9402_v10 = vld [vmem:[%s11173_s15 + $0x284] ss:$8 sps:$4 sm:$0xff]  }
 0x15b   : > { %7780 = vmatpush1.bf16.msra.mxu0 %v9310_v12  ;;  %7811 = vmatprep.mubr.bf16.mxu0 %v8627_v16  ;;  %v9400_v12 = vld [vmem:[%s11173_s15 + $0x280] ss:$8 sps:$4 sm:$0xff]   ;;  %v8626_v16 = vcombine.low %v11244_v8, %v11244_v8  ;;  %v9418_v8 = vld [vmem:[%s11173_s15 + $0x464] ss:$8 sps:$4 sm:$0xff]  }
 0x15c   : > { %7771 = vmatmul.mubr.bf16.vlgmr.msra.gmra.mxu1 %v8624_v11  ;;  %7781 = vmatprep.subr.bf16.mxu0 %v9318_v14  ;;  %v9405_v11 = vld [vmem:[%s11173_s15 + $0x384] ss:$8 sps:$4 sm:$0xff]   ;;  %v9412_v14 = vld [vmem:[%s11173_s15 + $0x474] ss:$8 sps:$4 sm:$0xff]  }
 0x15d   : > { %7821 = vmatpush1.bf16.msra.mxu1 %v9313_v13  ;;  %7852 = vmatprep.mubr.bf16.mxu1 %v8629_v0  ;;  %v9403_v13 = vld [vmem:[%s11173_s15 + $0x380] ss:$8 sps:$4 sm:$0xff]   ;;  %v8628_v0 = vcombine.low %v11249_v9, %v11249_v9  ;;  %v9421_v9 = vld [vmem:[%s11173_s15 + $0x564] ss:$8 sps:$4 sm:$0xff]  }
 0x15e   : > { %7822 = vmatprep.subr.bf16.mxu1 %v9321_v15  ;;  %v9415_v15 = vld [vmem:[%s11173_s15 + $0x574] ss:$8 sps:$4 sm:$0xff]  }
 0x15f   : > { %7782 = vmatpush1.bf16.msra.mxu0 %v9316_v1  ;;  %v9410_v1 = vld [vmem:[%s11173_s15 + $0x470] ss:$8 sps:$4 sm:$0xff]  }
 0x160   : > { %7783 = vmatprep.subr.bf16.mxu0 %v9324_v18  ;;  %v11332_v18 = vld [vmem:[%s11904_s0 + $0x20] sm:$0xff] }
 0x161   : > { %7823 = vmatpush1.bf16.msra.mxu1 %v9319_v17  ;;  %v9413_v17 = vld [vmem:[%s11173_s15 + $0x570] ss:$8 sps:$4 sm:$0xff]  }
 0x162   : > { %7824 = vmatprep.subr.bf16.mxu1 %v9327_v19  ;;  %v11337_v19 = vld [vmem:[%s11904_s0 + $0x28] sm:$0xff] }
 0x163   : > { %7784 = vmatpush1.bf16.msra.mxu0 %v9322_v20  ;;  %v8631_v20 = vcombine.high %v11332_v18, %v11332_v18 }
 0x164   : > { %7785 = vmatprep.subr.bf16.mxu0 %v9330_v22  ;;  %v9416_v22 = vld [vmem:[%s11173_s15 + $0x460] ss:$8 sps:$4 sm:$0xff]  }
 0x165   : > { %7825 = vmatpush1.bf16.msra.mxu1 %v9325_v21  ;;  %v8633_v21 = vcombine.high %v11337_v19, %v11337_v19 }
 0x166   : > { %7826 = vmatprep.subr.bf16.mxu1 %v9333_v23  ;;  %v9419_v23 = vld [vmem:[%s11173_s15 + $0x560] ss:$8 sps:$4 sm:$0xff]  }
 0x167   : > { %7786 = vmatpush1.bf16.msra.mxu0 %v9328_v24  ;;  %v9424_v24 = vld [vmem:[%s11173_s15 + $0x454] ss:$8 sps:$4 sm:$0xff]  }
 0x168   : > { %7787 = vmatprep.subr.bf16.mxu0 %v9336_v26  ;;  %v9422_v26 = vld [vmem:[%s11173_s15 + $0x450] ss:$8 sps:$4 sm:$0xff]  }
 0x169   : > { %7827 = vmatpush1.bf16.msra.mxu1 %v9331_v25  ;;  %v9427_v25 = vld [vmem:[%s11173_s15 + $0x554] ss:$8 sps:$4 sm:$0xff]  }
 0x16a   : > { %7828 = vmatprep.subr.bf16.mxu1 %v9339_v27  ;;  %v9425_v27 = vld [vmem:[%s11173_s15 + $0x550] ss:$8 sps:$4 sm:$0xff]  }
 0x16b   : > { %7788 = vmatpush1.bf16.msra.mxu0 %v9334_v28  ;;  %v9430_v28 = vld [vmem:[%s11173_s15 + $0x444] ss:$8 sps:$4 sm:$0xff]  }
 0x16c   : > { %7789 = vmatprep.subr.bf16.mxu0 %v9342_v30  ;;  %v9428_v30 = vld [vmem:[%s11173_s15 + $0x440] ss:$8 sps:$4 sm:$0xff]  }
 0x16d   : > { %7829 = vmatpush1.bf16.msra.mxu1 %v9337_v29  ;;  %v9433_v29 = vld [vmem:[%s11173_s15 + $0x544] ss:$8 sps:$4 sm:$0xff]  }
 0x16e   : > { %7830 = vmatprep.subr.bf16.mxu1 %v9345_v31  ;;  %v9431_v31 = vld [vmem:[%s11173_s15 + $0x540] ss:$8 sps:$4 sm:$0xff]  }
 0x16f   : > { %7790 = vmatpush1.bf16.msra.mxu0 %v9340_v32  ;;  %v9436_v32 = vld [vmem:[%s11173_s15 + $0x434] ss:$8 sps:$4 sm:$0xff]  }
 0x170   : > { %7791 = vmatprep.subr.bf16.mxu0 %v9348_v34  ;;  %v9434_v34 = vld [vmem:[%s11173_s15 + $0x430] ss:$8 sps:$4 sm:$0xff]  }
 0x171   : > { %7831 = vmatpush1.bf16.msra.mxu1 %v9343_v33  ;;  %v9439_v33 = vld [vmem:[%s11173_s15 + $0x534] ss:$8 sps:$4 sm:$0xff]  }
 0x172   : > { %7832 = vmatprep.subr.bf16.mxu1 %v9351_v35  ;;  %v9437_v35 = vld [vmem:[%s11173_s15 + $0x530] ss:$8 sps:$4 sm:$0xff]  }
 0x173   : > { %7792 = vmatpush1.bf16.msra.mxu0 %v9346_v36  ;;  %v9442_v36 = vld [vmem:[%s11173_s15 + $0x424] ss:$8 sps:$4 sm:$0xff]  }
 0x174   : > { %7793 = vmatprep.subr.bf16.mxu0 %v9354_v38  ;;  %v9440_v38 = vld [vmem:[%s11173_s15 + $0x420] ss:$8 sps:$4 sm:$0xff]  }
 0x175   : > { %7833 = vmatpush1.bf16.msra.mxu1 %v9349_v37  ;;  %v9445_v37 = vld [vmem:[%s11173_s15 + $0x524] ss:$8 sps:$4 sm:$0xff]  }
 0x176   : > { %7834 = vmatprep.subr.bf16.mxu1 %v9357_v39  ;;  %v9443_v39 = vld [vmem:[%s11173_s15 + $0x520] ss:$8 sps:$4 sm:$0xff]  }
 0x177   : > { %7794 = vmatpush1.bf16.msra.mxu0 %v9352_v40  ;;  %v9448_v40 = vld [vmem:[%s11173_s15 + $0x414] ss:$8 sps:$4 sm:$0xff]  }
 0x178   : > { %7795 = vmatprep.subr.bf16.mxu0 %v9360_v42  ;;  %v9446_v42 = vld [vmem:[%s11173_s15 + $0x410] ss:$8 sps:$4 sm:$0xff]  }
 0x179   : > { %7835 = vmatpush1.bf16.msra.mxu1 %v9355_v41  ;;  %v9451_v41 = vld [vmem:[%s11173_s15 + $0x514] ss:$8 sps:$4 sm:$0xff]  }
 0x17a   : > { %7836 = vmatprep.subr.bf16.mxu1 %v9363_v43  ;;  %v9449_v43 = vld [vmem:[%s11173_s15 + $0x510] ss:$8 sps:$4 sm:$0xff]  }
 0x17b   : > { %7796 = vmatpush2.bf16.msra.mxu0 %v9358_v44  ;;  %v9454_v44 = vld [vmem:[%s11173_s15 + $0x404] ss:$8 sps:$4 sm:$0xff]  }
 0x17c   : > { %7797 = vmatprep.subr.bf16.mxu0 %v9366_v46  ;;  %v9452_v46 = vld [vmem:[%s11173_s15 + $0x400] ss:$8 sps:$4 sm:$0xff]  }
 0x17d   : > { %7837 = vmatpush2.bf16.msra.mxu1 %v9361_v45  ;;  %v9457_v45 = vld [vmem:[%s11173_s15 + $0x504] ss:$8 sps:$4 sm:$0xff]  }
 0x17e   : > { %7838 = vmatprep.subr.bf16.mxu1 %v9369_v47  ;;  %v9455_v47 = vld [vmem:[%s11173_s15 + $0x500] ss:$8 sps:$4 sm:$0xff]  }
 0x17f   : > { %7798 = vmatpush2.bf16.msra.mxu0 %v9364_v48  ;;  %v9460_v48 = vld [vmem:[%s11173_s15 + $0x4f4] ss:$8 sps:$4 sm:$0xff]  }
 0x180   : > { %7799 = vmatprep.subr.bf16.mxu0 %v9372_v50  ;;  %v9458_v50 = vld [vmem:[%s11173_s15 + $0x4f0] ss:$8 sps:$4 sm:$0xff]  }
 0x181   : > { %7839 = vmatpush2.bf16.msra.mxu1 %v9367_v49  ;;  %v9463_v49 = vld [vmem:[%s11173_s15 + $0x5f4] ss:$8 sps:$4 sm:$0xff]  }
 0x182   : > { %7840 = vmatprep.subr.bf16.mxu1 %v9375_v51  ;;  %v9461_v51 = vld [vmem:[%s11173_s15 + $0x5f0] ss:$8 sps:$4 sm:$0xff]  }
 0x183   : > { %7800 = vmatpush2.bf16.msra.mxu0 %v9370_v52  ;;  %v9466_v52 = vld [vmem:[%s11173_s15 + $0x4e4] ss:$8 sps:$4 sm:$0xff]  }
 0x184   : > { %7801 = vmatprep.subr.bf16.mxu0 %v9378_v54  ;;  %v9464_v54 = vld [vmem:[%s11173_s15 + $0x4e0] ss:$8 sps:$4 sm:$0xff]  }
 0x185   : > { %7841 = vmatpush2.bf16.msra.mxu1 %v9373_v53  ;;  %v9469_v53 = vld [vmem:[%s11173_s15 + $0x5e4] ss:$8 sps:$4 sm:$0xff]  }
 0x186   : > { %7842 = vmatprep.subr.bf16.mxu1 %v9381_v55  ;;  %v9467_v55 = vld [vmem:[%s11173_s15 + $0x5e0] ss:$8 sps:$4 sm:$0xff]  }
 0x187   : > { %7802 = vmatpush2.bf16.msra.mxu0 %v9376_v56  ;;  %v9472_v56 = vld [vmem:[%s11173_s15 + $0x4d4] ss:$8 sps:$4 sm:$0xff]  }
 0x188   : > { %7803 = vmatprep.subr.bf16.mxu0 %v9384_v58  ;;  %v9470_v58 = vld [vmem:[%s11173_s15 + $0x4d0] ss:$8 sps:$4 sm:$0xff]  }
 0x189   : > { %7843 = vmatpush2.bf16.msra.mxu1 %v9379_v57  ;;  %v9475_v57 = vld [vmem:[%s11173_s15 + $0x5d4] ss:$8 sps:$4 sm:$0xff]  }
 0x18a   : > { %7844 = vmatprep.subr.bf16.mxu1 %v9387_v59  ;;  %v9473_v59 = vld [vmem:[%s11173_s15 + $0x5d0] ss:$8 sps:$4 sm:$0xff]  }
 0x18b   : > { %7804 = vmatpush2.bf16.msra.mxu0 %v9382_v60  ;;  %v9478_v60 = vld [vmem:[%s11173_s15 + $0x4c4] ss:$8 sps:$4 sm:$0xff]  }
 0x18c   : > { %7805 = vmatprep.subr.bf16.mxu0 %v9390_v62  ;;  %v9476_v62 = vld [vmem:[%s11173_s15 + $0x4c0] ss:$8 sps:$4 sm:$0xff]  }
 0x18d   : > { %7845 = vmatpush2.bf16.msra.mxu1 %v9385_v61  ;;  %v9481_v61 = vld [vmem:[%s11173_s15 + $0x5c4] ss:$8 sps:$4 sm:$0xff]  }
 0x18e   : > { %7846 = vmatprep.subr.bf16.mxu1 %v9393_v63  ;;  %v9479_v63 = vld [vmem:[%s11173_s15 + $0x5c0] ss:$8 sps:$4 sm:$0xff]  }
 0x18f   : > { %7806 = vmatpush2.bf16.msra.mxu0 %v9388_v2  ;;  %v9484_v2 = vld [vmem:[%s11173_s15 + $0x4b4] ss:$8 sps:$4 sm:$0xff]  }
 0x190   : > { %7807 = vmatprep.subr.bf16.mxu0 %v9396_v4  ;;  %v9482_v4 = vld [vmem:[%s11173_s15 + $0x4b0] ss:$8 sps:$4 sm:$0xff]  }
 0x191   : > { %7847 = vmatpush2.bf16.msra.mxu1 %v9391_v3  ;;  %v9487_v3 = vld [vmem:[%s11173_s15 + $0x5b4] ss:$8 sps:$4 sm:$0xff]  }
 0x192   : > { %7848 = vmatprep.subr.bf16.mxu1 %v9399_v5  ;;  %v9485_v5 = vld [vmem:[%s11173_s15 + $0x5b0] ss:$8 sps:$4 sm:$0xff]  }
 0x193   : > { %7808 = vmatpush2.bf16.msra.mxu0 %v9394_v6  ;;  %v9490_v6 = vld [vmem:[%s11173_s15 + $0x4a4] ss:$8 sps:$4 sm:$0xff]  }
 0x194   : > { %7809 = vmatprep.subr.bf16.mxu0 %v9402_v10  ;;  %v9488_v10 = vld [vmem:[%s11173_s15 + $0x4a0] ss:$8 sps:$4 sm:$0xff]  }
 0x195   : > { %7849 = vmatpush2.bf16.msra.mxu1 %v9397_v7  ;;  %v9493_v7 = vld [vmem:[%s11173_s15 + $0x5a4] ss:$8 sps:$4 sm:$0xff]  }
 0x196   : > { %7850 = vmatprep.subr.bf16.mxu1 %v9405_v11  ;;  %v9491_v11 = vld [vmem:[%s11173_s15 + $0x5a0] ss:$8 sps:$4 sm:$0xff]  }
 0x197   : > { %7810 = vmatpush2.bf16.msra.mxu0 %v9400_v12  ;;  %v9496_v12 = vld [vmem:[%s11173_s15 + $0x494] ss:$8 sps:$4 sm:$0xff]  }
 0x198   : > { %7861 = vmatprep.subr.bf16.mxu0 %v9412_v14  ;;  %v9494_v14 = vld [vmem:[%s11173_s15 + $0x490] ss:$8 sps:$4 sm:$0xff]  }
 0x199   : > { %7851 = vmatpush2.bf16.msra.mxu1 %v9403_v13  ;;  %v9499_v13 = vld [vmem:[%s11173_s15 + $0x594] ss:$8 sps:$4 sm:$0xff]  }
 0x19a   : > { %7902 = vmatprep.subr.bf16.mxu1 %v9415_v15  ;;  %7812 = vmatmul.mubr.bf16.vlgmr.msra.gmra.mxu0 %v8626_v16  ;;  %v9497_v15 = vld [vmem:[%s11173_s15 + $0x590] ss:$8 sps:$4 sm:$0xff]   ;;  %v9502_v16 = vld [vmem:[%s11173_s15 + $0x484] ss:$8 sps:$4 sm:$0xff]  }
 0x19b   : > { %7862 = vmatpush1.bf16.msra.mxu0 %v9410_v1  ;;  %7893 = vmatprep.mubr.bf16.mxu0 %v8631_v20  ;;  %v9500_v1 = vld [vmem:[%s11173_s15 + $0x480] ss:$8 sps:$4 sm:$0xff]   ;;  %v9510_v20 = vld [vmem:[%s11173_s15 + $0x670] ss:$8 sps:$4 sm:$0xff]  }
 0x19c   : > { %7853 = vmatmul.mubr.bf16.vlgmr.msra.gmra.mxu1 %v8628_v0  ;;  %7863 = vmatprep.subr.bf16.mxu0 %v9418_v8  ;;  %v9505_v0 = vld [vmem:[%s11173_s15 + $0x584] ss:$8 sps:$4 sm:$0xff]   ;;  %v9512_v8 = vld [vmem:[%s11173_s15 + $0x674] ss:$8 sps:$4 sm:$0xff]  }
 0x19d   : > { %7903 = vmatpush1.bf16.msra.mxu1 %v9413_v17  ;;  %7934 = vmatprep.mubr.bf16.mxu1 %v8633_v21  ;;  %v9503_v17 = vld [vmem:[%s11173_s15 + $0x580] ss:$8 sps:$4 sm:$0xff]   ;;  %v8630_v21 = vcombine.low %v11332_v18, %v11332_v18  ;;  %v9518_v18 = vld [vmem:[%s11173_s15 + $0x664] ss:$8 sps:$4 sm:$0xff]  }
 0x19e   : > { %7904 = vmatprep.subr.bf16.mxu1 %v9421_v9  ;;  %v9515_v9 = vld [vmem:[%s11173_s15 + $0x774] ss:$8 sps:$4 sm:$0xff]  }
 0x19f   : > { %7864 = vmatpush1.bf16.msra.mxu0 %v9416_v22  ;;  %v8632_v22 = vcombine.low %v11337_v19, %v11337_v19  ;;  %v9521_v19 = vld [vmem:[%s11173_s15 + $0x764] ss:$8 sps:$4 sm:$0xff]  }
 0x1a0   : > { %7865 = vmatprep.subr.bf16.mxu0 %v9424_v24  ;;  %v11418_v24 = vld [vmem:[%s11904_s0 + $0x38] sm:$0xff] }
 0x1a1   : > { %7905 = vmatpush1.bf16.msra.mxu1 %v9419_v23  ;;  %v11413_v23 = vld [vmem:[%s11904_s0 + $0x30] sm:$0xff] }
 0x1a2   : > { %7906 = vmatprep.subr.bf16.mxu1 %v9427_v25  ;;  %v9513_v25 = vld [vmem:[%s11173_s15 + $0x770] ss:$8 sps:$4 sm:$0xff]  }
 0x1a3   : > { %7866 = vmatpush1.bf16.msra.mxu0 %v9422_v26  ;;  %v8635_v26 = vcombine.high %v11413_v23, %v11413_v23 }
 0x1a4   : > { %7867 = vmatprep.subr.bf16.mxu0 %v9430_v28  ;;  %v9516_v28 = vld [vmem:[%s11173_s15 + $0x660] ss:$8 sps:$4 sm:$0xff]  }
 0x1a5   : > { %7907 = vmatpush1.bf16.msra.mxu1 %v9425_v27  ;;  %v8637_v27 = vcombine.high %v11418_v24, %v11418_v24 }
 0x1a6   : > { %7908 = vmatprep.subr.bf16.mxu1 %v9433_v29  ;;  %v9519_v29 = vld [vmem:[%s11173_s15 + $0x760] ss:$8 sps:$4 sm:$0xff]  }
 0x1a7   : > { %7868 = vmatpush1.bf16.msra.mxu0 %v9428_v30  ;;  %v9524_v30 = vld [vmem:[%s11173_s15 + $0x654] ss:$8 sps:$4 sm:$0xff]  }
 0x1a8   : > { %7869 = vmatprep.subr.bf16.mxu0 %v9436_v32  ;;  %v9522_v32 = vld [vmem:[%s11173_s15 + $0x650] ss:$8 sps:$4 sm:$0xff]  }
 0x1a9   : > { %7909 = vmatpush1.bf16.msra.mxu1 %v9431_v31  ;;  %v9527_v31 = vld [vmem:[%s11173_s15 + $0x754] ss:$8 sps:$4 sm:$0xff]  }
 0x1aa   : > { %7910 = vmatprep.subr.bf16.mxu1 %v9439_v33  ;;  %v9525_v33 = vld [vmem:[%s11173_s15 + $0x750] ss:$8 sps:$4 sm:$0xff]  }
 0x1ab   : > { %7870 = vmatpush1.bf16.msra.mxu0 %v9434_v34  ;;  %v9530_v34 = vld [vmem:[%s11173_s15 + $0x644] ss:$8 sps:$4 sm:$0xff]  }
 0x1ac   : > { %7871 = vmatprep.subr.bf16.mxu0 %v9442_v36  ;;  %v9528_v36 = vld [vmem:[%s11173_s15 + $0x640] ss:$8 sps:$4 sm:$0xff]  }
 0x1ad   : > { %7911 = vmatpush1.bf16.msra.mxu1 %v9437_v35  ;;  %v9533_v35 = vld [vmem:[%s11173_s15 + $0x744] ss:$8 sps:$4 sm:$0xff]  }
 0x1ae   : > { %7912 = vmatprep.subr.bf16.mxu1 %v9445_v37  ;;  %v9531_v37 = vld [vmem:[%s11173_s15 + $0x740] ss:$8 sps:$4 sm:$0xff]  }
 0x1af   : > { %7872 = vmatpush1.bf16.msra.mxu0 %v9440_v38  ;;  %v9536_v38 = vld [vmem:[%s11173_s15 + $0x634] ss:$8 sps:$4 sm:$0xff]  }
 0x1b0   : > { %7873 = vmatprep.subr.bf16.mxu0 %v9448_v40  ;;  %v9534_v40 = vld [vmem:[%s11173_s15 + $0x630] ss:$8 sps:$4 sm:$0xff]  }
 0x1b1   : > { %7913 = vmatpush1.bf16.msra.mxu1 %v9443_v39  ;;  %v9539_v39 = vld [vmem:[%s11173_s15 + $0x734] ss:$8 sps:$4 sm:$0xff]  }
 0x1b2   : > { %7914 = vmatprep.subr.bf16.mxu1 %v9451_v41  ;;  %v9537_v41 = vld [vmem:[%s11173_s15 + $0x730] ss:$8 sps:$4 sm:$0xff]  }
 0x1b3   : > { %7874 = vmatpush1.bf16.msra.mxu0 %v9446_v42  ;;  %v9542_v42 = vld [vmem:[%s11173_s15 + $0x624] ss:$8 sps:$4 sm:$0xff]  }
 0x1b4   : > { %7875 = vmatprep.subr.bf16.mxu0 %v9454_v44  ;;  %v9540_v44 = vld [vmem:[%s11173_s15 + $0x620] ss:$8 sps:$4 sm:$0xff]  }
 0x1b5   : > { %7915 = vmatpush1.bf16.msra.mxu1 %v9449_v43  ;;  %v9545_v43 = vld [vmem:[%s11173_s15 + $0x724] ss:$8 sps:$4 sm:$0xff]  }
 0x1b6   : > { %7916 = vmatprep.subr.bf16.mxu1 %v9457_v45  ;;  %v9543_v45 = vld [vmem:[%s11173_s15 + $0x720] ss:$8 sps:$4 sm:$0xff]  }
 0x1b7   : > { %7876 = vmatpush1.bf16.msra.mxu0 %v9452_v46  ;;  %v9548_v46 = vld [vmem:[%s11173_s15 + $0x614] ss:$8 sps:$4 sm:$0xff]  }
 0x1b8   : > { %7877 = vmatprep.subr.bf16.mxu0 %v9460_v48  ;;  %v9546_v48 = vld [vmem:[%s11173_s15 + $0x610] ss:$8 sps:$4 sm:$0xff]  }
 0x1b9   : > { %7917 = vmatpush1.bf16.msra.mxu1 %v9455_v47  ;;  %v9551_v47 = vld [vmem:[%s11173_s15 + $0x714] ss:$8 sps:$4 sm:$0xff]  }
 0x1ba   : > { %7918 = vmatprep.subr.bf16.mxu1 %v9463_v49  ;;  %v9549_v49 = vld [vmem:[%s11173_s15 + $0x710] ss:$8 sps:$4 sm:$0xff]  }
 0x1bb   : > { %7878 = vmatpush2.bf16.msra.mxu0 %v9458_v50  ;;  %v9554_v50 = vld [vmem:[%s11173_s15 + $0x604] ss:$8 sps:$4 sm:$0xff]  }
 0x1bc   : > { %7879 = vmatprep.subr.bf16.mxu0 %v9466_v52  ;;  %v9552_v52 = vld [vmem:[%s11173_s15 + $0x600] ss:$8 sps:$4 sm:$0xff]  }
 0x1bd   : > { %7919 = vmatpush2.bf16.msra.mxu1 %v9461_v51  ;;  %v9557_v51 = vld [vmem:[%s11173_s15 + $0x704] ss:$8 sps:$4 sm:$0xff]  }
 0x1be   : > { %7920 = vmatprep.subr.bf16.mxu1 %v9469_v53  ;;  %v9555_v53 = vld [vmem:[%s11173_s15 + $0x700] ss:$8 sps:$4 sm:$0xff]  }
 0x1bf   : > { %7880 = vmatpush2.bf16.msra.mxu0 %v9464_v54  ;;  %v9560_v54 = vld [vmem:[%s11173_s15 + $0x6f4] ss:$8 sps:$4 sm:$0xff]  }
 0x1c0   : > { %7881 = vmatprep.subr.bf16.mxu0 %v9472_v56  ;;  %v9558_v56 = vld [vmem:[%s11173_s15 + $0x6f0] ss:$8 sps:$4 sm:$0xff]  }
 0x1c1   : > { %7921 = vmatpush2.bf16.msra.mxu1 %v9467_v55  ;;  %v9563_v55 = vld [vmem:[%s11173_s15 + $0x7f4] ss:$8 sps:$4 sm:$0xff]  }
 0x1c2   : > { %7922 = vmatprep.subr.bf16.mxu1 %v9475_v57  ;;  %v9561_v57 = vld [vmem:[%s11173_s15 + $0x7f0] ss:$8 sps:$4 sm:$0xff]  }
 0x1c3   : > { %7882 = vmatpush2.bf16.msra.mxu0 %v9470_v58  ;;  %v9566_v58 = vld [vmem:[%s11173_s15 + $0x6e4] ss:$8 sps:$4 sm:$0xff]  }
 0x1c4   : > { %7883 = vmatprep.subr.bf16.mxu0 %v9478_v60  ;;  %v9564_v60 = vld [vmem:[%s11173_s15 + $0x6e0] ss:$8 sps:$4 sm:$0xff]  }
 0x1c5   : > { %7923 = vmatpush2.bf16.msra.mxu1 %v9473_v59  ;;  %v9569_v59 = vld [vmem:[%s11173_s15 + $0x7e4] ss:$8 sps:$4 sm:$0xff]  }
 0x1c6   : > { %7924 = vmatprep.subr.bf16.mxu1 %v9481_v61  ;;  %v9567_v61 = vld [vmem:[%s11173_s15 + $0x7e0] ss:$8 sps:$4 sm:$0xff]  }
 0x1c7   : > { %7884 = vmatpush2.bf16.msra.mxu0 %v9476_v62  ;;  %v9572_v62 = vld [vmem:[%s11173_s15 + $0x6d4] ss:$8 sps:$4 sm:$0xff]  }
 0x1c8   : > { %7885 = vmatprep.subr.bf16.mxu0 %v9484_v2  ;;  %v9570_v2 = vld [vmem:[%s11173_s15 + $0x6d0] ss:$8 sps:$4 sm:$0xff]  }
 0x1c9   : > { %7925 = vmatpush2.bf16.msra.mxu1 %v9479_v63  ;;  %v9575_v63 = vld [vmem:[%s11173_s15 + $0x7d4] ss:$8 sps:$4 sm:$0xff]  }
 0x1ca   : > { %7926 = vmatprep.subr.bf16.mxu1 %v9487_v3  ;;  %v9573_v3 = vld [vmem:[%s11173_s15 + $0x7d0] ss:$8 sps:$4 sm:$0xff]  }
 0x1cb   : > { %7886 = vmatpush2.bf16.msra.mxu0 %v9482_v4  ;;  %v9578_v4 = vld [vmem:[%s11173_s15 + $0x6c4] ss:$8 sps:$4 sm:$0xff]  }
 0x1cc   : > { %7887 = vmatprep.subr.bf16.mxu0 %v9490_v6  ;;  %v9576_v6 = vld [vmem:[%s11173_s15 + $0x6c0] ss:$8 sps:$4 sm:$0xff]  }
 0x1cd   : > { %7927 = vmatpush2.bf16.msra.mxu1 %v9485_v5  ;;  %v9581_v5 = vld [vmem:[%s11173_s15 + $0x7c4] ss:$8 sps:$4 sm:$0xff]  }
 0x1ce   : > { %7928 = vmatprep.subr.bf16.mxu1 %v9493_v7  ;;  %v9579_v7 = vld [vmem:[%s11173_s15 + $0x7c0] ss:$8 sps:$4 sm:$0xff]  }
 0x1cf   : > { %7888 = vmatpush2.bf16.msra.mxu0 %v9488_v10  ;;  %v9584_v10 = vld [vmem:[%s11173_s15 + $0x6b4] ss:$8 sps:$4 sm:$0xff]  }
 0x1d0   : > { %7889 = vmatprep.subr.bf16.mxu0 %v9496_v12  ;;  %v9582_v12 = vld [vmem:[%s11173_s15 + $0x6b0] ss:$8 sps:$4 sm:$0xff]  }
 0x1d1   : > { %7929 = vmatpush2.bf16.msra.mxu1 %v9491_v11  ;;  %v9587_v11 = vld [vmem:[%s11173_s15 + $0x7b4] ss:$8 sps:$4 sm:$0xff]  }
 0x1d2   : > { %7930 = vmatprep.subr.bf16.mxu1 %v9499_v13  ;;  %v9585_v13 = vld [vmem:[%s11173_s15 + $0x7b0] ss:$8 sps:$4 sm:$0xff]  }
 0x1d3   : > { %7890 = vmatpush2.bf16.msra.mxu0 %v9494_v14  ;;  %v9590_v14 = vld [vmem:[%s11173_s15 + $0x6a4] ss:$8 sps:$4 sm:$0xff]  }
 0x1d4   : > { %7891 = vmatprep.subr.bf16.mxu0 %v9502_v16  ;;  %v9588_v16 = vld [vmem:[%s11173_s15 + $0x6a0] ss:$8 sps:$4 sm:$0xff]  }
 0x1d5   : > { %7931 = vmatpush2.bf16.msra.mxu1 %v9497_v15  ;;  %v9593_v15 = vld [vmem:[%s11173_s15 + $0x7a4] ss:$8 sps:$4 sm:$0xff]  }
 0x1d6   : > { %7932 = vmatprep.subr.bf16.mxu1 %v9505_v0  ;;  %v9591_v0 = vld [vmem:[%s11173_s15 + $0x7a0] ss:$8 sps:$4 sm:$0xff]  }
 0x1d7   : > { %7892 = vmatpush2.bf16.msra.mxu0 %v9500_v1  ;;  %v5015_v1 = vlaneseq }
 0x1d8   : > { %7943 = vmatprep.subr.bf16.mxu0 %v9512_v8  ;;  %v9599_v8 = vld [vmem:[%s11173_s15 + $0x794] ss:$8 sps:$4 sm:$0xff]  }
 0x1d9   : > { %7933 = vmatpush2.bf16.msra.mxu1 %v9503_v17  ;;  %v9596_v17 = vld [vmem:[%s11173_s15 + $0x694] ss:$8 sps:$4 sm:$0xff]  }
 0x1da   : > { %7984 = vmatprep.subr.bf16.mxu1 %v9515_v9  ;;  %7894 = vmatmul.mubr.bf16.vlgmr.msra.gmra.mxu0 %v8630_v21  ;;  %v9594_v9 = vld [vmem:[%s11173_s15 + $0x690] ss:$8 sps:$4 sm:$0xff]   ;;  %v11484_v21 = vshrl.u32 %v5015_v1, 7  ;;  %v9655_v1 = vld [vmem:[%s11173_s15 + $0x900] ss:$8 sps:$4 sm:$0xff]  }
 0x1db   : > { %7944 = vmatpush1.bf16.msra.mxu0 %v9510_v20  ;;  %7975 = vmatprep.mubr.bf16.mxu0 %v8635_v26  ;;  %v9597_v20 = vld [vmem:[%s11173_s15 + $0x790] ss:$8 sps:$4 sm:$0xff]   ;;  %v5013_v26 = vld [vmem:[%s4466_s11] sm:$0x3] }
 0x1dc   : > { %7935 = vmatmul.mubr.bf16.vlgmr.msra.gmra.mxu1 %v8632_v22  ;;  %7945 = vmatprep.subr.bf16.mxu0 %v9518_v18  ;;  %v9602_v22 = vld [vmem:[%s11173_s15 + $0x684] ss:$8 sps:$4 sm:$0xff]   ;;  %v9600_v18 = vld [vmem:[%s11173_s15 + $0x680] ss:$8 sps:$4 sm:$0xff]  }
 0x1dd   : > { %7985 = vmatpush1.bf16.msra.mxu1 %v9513_v25  ;;  %8016 = vmatprep.mubr.bf16.mxu1 %v8637_v27  ;;  %v9605_v25 = vld [vmem:[%s11173_s15 + $0x784] ss:$8 sps:$4 sm:$0xff]   ;;  %v11495_v27 = vsub.s32 0, %v11484_v21 }
 0x1de   : > { %7986 = vmatprep.subr.bf16.mxu1 %v9521_v19  ;;  %v9603_v19 = vld [vmem:[%s11173_s15 + $0x780] ss:$8 sps:$4 sm:$0xff]  }
 0x1df   : > { %7946 = vmatpush1.bf16.msra.mxu0 %v9516_v28  ;;  %v9612_v28 = vld [vmem:[%s11173_s15 + $0x874] ss:$8 sps:$4 sm:$0xff]  }
 0x1e0   : > { %7947 = vmatprep.subr.bf16.mxu0 %v9524_v30  ;;  %v9610_v30 = vld [vmem:[%s11173_s15 + $0x870] ss:$8 sps:$4 sm:$0xff]  }
 0x1e1   : > { %7987 = vmatpush1.bf16.msra.mxu1 %v9519_v29  ;;  %v9615_v29 = vld [vmem:[%s11173_s15 + $0x974] ss:$8 sps:$4 sm:$0xff]  }
 0x1e2   : > { %7988 = vmatprep.subr.bf16.mxu1 %v9527_v31  ;;  %v11501_v31 = vsub.s32 1, %v11484_v21 }
 0x1e3   : > { %7948 = vmatpush1.bf16.msra.mxu0 %v9522_v32  ;;  %v11506_v32 = vld [vmem:[%s11904_s0 + $0x40] sm:$0xff] }
 0x1e4   : > { %7949 = vmatprep.subr.bf16.mxu0 %v9530_v34  ;;  %v8636_v34 = vcombine.low %v11418_v24, %v11418_v24  ;;  %v8639_v24 = vcombine.high %v11506_v32, %v11506_v32 }
 0x1e5   : > { %7989 = vmatpush1.bf16.msra.mxu1 %v9525_v33  ;;  %v8634_v33 = vcombine.low %v11413_v23, %v11413_v23  ;;  %v9621_v23 = vld [vmem:[%s11173_s15 + $0x964] ss:$8 sps:$4 sm:$0xff]  }
 0x1e6   : > { %7990 = vmatprep.subr.bf16.mxu1 %v9533_v35  ;;  %v11515_v35 = vld [vmem:[%s11904_s0 + $0x48] sm:$0xff] }
 0x1e7   : > { %7950 = vmatpush1.bf16.msra.mxu0 %v9528_v36  ;;  %v5018_v36 = vrot.slane %v5013_v26, %v11495_v27 }
 0x1e8   : > { %7951 = vmatprep.subr.bf16.mxu0 %v9536_v38  ;;  %v9618_v38 = vld [vmem:[%s11173_s15 + $0x864] ss:$8 sps:$4 sm:$0xff]  }
 0x1e9   : > { %7991 = vmatpush1.bf16.msra.mxu1 %v9531_v37  ;;  %v9613_v37 = vld [vmem:[%s11173_s15 + $0x970] ss:$8 sps:$4 sm:$0xff]  }
 0x1ea   : > { %7992 = vmatprep.subr.bf16.mxu1 %v9539_v39  ;;  %v5022_v39 = vrot.slane %v5013_v26, %v11501_v31  ;;  %v9672_v26 = vld [vmem:[%s11173_s15 + $0x8d4] ss:$8 sps:$4 sm:$0xff]  }
 0x1eb   : > { %7952 = vmatpush1.bf16.msra.mxu0 %v9534_v40  ;;  %v8641_v40 = vcombine.high %v11515_v35, %v11515_v35 }
 0x1ec   : > { %7953 = vmatprep.subr.bf16.mxu0 %v9542_v42 }
 0x1ed   : > { %7993 = vmatpush1.bf16.msra.mxu1 %v9537_v41 }
 0x1ee   : > { %7994 = vmatprep.subr.bf16.mxu1 %v9545_v43  ;;  %v9616_v43 = vld [vmem:[%s11173_s15 + $0x860] ss:$8 sps:$4 sm:$0xff]  }
 0x1ef   : > { %7954 = vmatpush1.bf16.msra.mxu0 %v9540_v44 }
 0x1f0   : > { %7955 = vmatprep.subr.bf16.mxu0 %v9548_v46  ;;  %v9624_v46 = vld [vmem:[%s11173_s15 + $0x854] ss:$8 sps:$4 sm:$0xff]  }
 0x1f1   : > { %7995 = vmatpush1.bf16.msra.mxu1 %v9543_v45  ;;  %v9619_v45 = vld [vmem:[%s11173_s15 + $0x960] ss:$8 sps:$4 sm:$0xff]  }
 0x1f2   : > { %7996 = vmatprep.subr.bf16.mxu1 %v9551_v47 }
 0x1f3   : > { %7956 = vmatpush1.bf16.msra.mxu0 %v9546_v48 }
 0x1f4   : > { %7957 = vmatprep.subr.bf16.mxu0 %v9554_v50 }
 0x1f5   : > { %7997 = vmatpush1.bf16.msra.mxu1 %v9549_v49  ;;  %v9627_v49 = vld [vmem:[%s11173_s15 + $0x954] ss:$8 sps:$4 sm:$0xff]  }
 0x1f6   : > { %7998 = vmatprep.subr.bf16.mxu1 %v9557_v51 }
 0x1f7   : > { %7958 = vmatpush1.bf16.msra.mxu0 %v9552_v52 }
 0x1f8   : > { %7959 = vmatprep.subr.bf16.mxu0 %v9560_v54  ;;  %v9622_v54 = vld [vmem:[%s11173_s15 + $0x850] ss:$8 sps:$4 sm:$0xff]  }
 0x1f9   : > { %7999 = vmatpush1.bf16.msra.mxu1 %v9555_v53 }
 0x1fa   : > { %8000 = vmatprep.subr.bf16.mxu1 %v9563_v55 }
 0x1fb   : > { %7960 = vmatpush2.bf16.msra.mxu0 %v9558_v56  ;;  %v9625_v56 = vld [vmem:[%s11173_s15 + $0x950] ss:$8 sps:$4 sm:$0xff]  }
 0x1fc   : > { %7961 = vmatprep.subr.bf16.mxu0 %v9566_v58 }
 0x1fd   : > { %8001 = vmatpush2.bf16.msra.mxu1 %v9561_v57  ;;  %v9630_v57 = vld [vmem:[%s11173_s15 + $0x844] ss:$8 sps:$4 sm:$0xff]  }
 0x1fe   : > { %8002 = vmatprep.subr.bf16.mxu1 %v9569_v59 }
 0x1ff   : > { %7962 = vmatpush2.bf16.msra.mxu0 %v9564_v60  ;;  %v9633_v60 = vld [vmem:[%s11173_s15 + $0x944] ss:$8 sps:$4 sm:$0xff]  }
 0x200   : > { %7963 = vmatprep.subr.bf16.mxu0 %v9572_v62  ;;  %v9631_v62 = vld [vmem:[%s11173_s15 + $0x940] ss:$8 sps:$4 sm:$0xff]  }
 0x201   : > { %8003 = vmatpush2.bf16.msra.mxu1 %v9567_v61  ;;  %v9628_v61 = vld [vmem:[%s11173_s15 + $0x840] ss:$8 sps:$4 sm:$0xff]  }
 0x202   : > { %8004 = vmatprep.subr.bf16.mxu1 %v9575_v63  ;;  %v9636_v63 = vld [vmem:[%s11173_s15 + $0x834] ss:$8 sps:$4 sm:$0xff]  }
 0x203   : > { %7964 = vmatpush2.bf16.msra.mxu0 %v9570_v2  ;;  %v9639_v2 = vld [vmem:[%s11173_s15 + $0x934] ss:$8 sps:$4 sm:$0xff]  }
 0x204   : > { %7965 = vmatprep.subr.bf16.mxu0 %v9578_v4  ;;  %v9637_v4 = vld [vmem:[%s11173_s15 + $0x930] ss:$8 sps:$4 sm:$0xff]  }
 0x205   : > { %8005 = vmatpush2.bf16.msra.mxu1 %v9573_v3  ;;  %v9634_v3 = vld [vmem:[%s11173_s15 + $0x830] ss:$8 sps:$4 sm:$0xff]  }
 0x206   : > { %8006 = vmatprep.subr.bf16.mxu1 %v9581_v5  ;;  %v9642_v5 = vld [vmem:[%s11173_s15 + $0x824] ss:$8 sps:$4 sm:$0xff]  }
 0x207   : > { %7966 = vmatpush2.bf16.msra.mxu0 %v9576_v6  ;;  %v9645_v6 = vld [vmem:[%s11173_s15 + $0x924] ss:$8 sps:$4 sm:$0xff]  }
 0x208   : > { %7967 = vmatprep.subr.bf16.mxu0 %v9584_v10  ;;  %v9643_v10 = vld [vmem:[%s11173_s15 + $0x920] ss:$8 sps:$4 sm:$0xff]  }
 0x209   : > { %8007 = vmatpush2.bf16.msra.mxu1 %v9579_v7  ;;  %v9640_v7 = vld [vmem:[%s11173_s15 + $0x820] ss:$8 sps:$4 sm:$0xff]  }
 0x20a   : > { %8008 = vmatprep.subr.bf16.mxu1 %v9587_v11  ;;  %v9648_v11 = vld [vmem:[%s11173_s15 + $0x814] ss:$8 sps:$4 sm:$0xff]  }
 0x20b   : > { %7968 = vmatpush2.bf16.msra.mxu0 %v9582_v12  ;;  %v9651_v12 = vld [vmem:[%s11173_s15 + $0x914] ss:$8 sps:$4 sm:$0xff]  }
 0x20c   : > { %7969 = vmatprep.subr.bf16.mxu0 %v9590_v14  ;;  %v9649_v14 = vld [vmem:[%s11173_s15 + $0x910] ss:$8 sps:$4 sm:$0xff]  }
 0x20d   : > { %8009 = vmatpush2.bf16.msra.mxu1 %v9585_v13  ;;  %v9646_v13 = vld [vmem:[%s11173_s15 + $0x810] ss:$8 sps:$4 sm:$0xff]  }
 0x20e   : > { %8010 = vmatprep.subr.bf16.mxu1 %v9593_v15  ;;  %v9654_v15 = vld [vmem:[%s11173_s15 + $0x804] ss:$8 sps:$4 sm:$0xff]  }
 0x20f   : > { %7970 = vmatpush2.bf16.msra.mxu0 %v9588_v16  ;;  %v9657_v16 = vld [vmem:[%s11173_s15 + $0x904] ss:$8 sps:$4 sm:$0xff]  }
 0x210   : > { %7971 = vmatprep.subr.bf16.mxu0 %v9596_v17  ;;  %v9660_v17 = vld [vmem:[%s11173_s15 + $0x8f4] ss:$8 sps:$4 sm:$0xff]  }
 0x211   : > { %8011 = vmatpush2.bf16.msra.mxu1 %v9591_v0  ;;  %v9652_v0 = vld [vmem:[%s11173_s15 + $0x800] ss:$8 sps:$4 sm:$0xff]  }
 0x212   : > { %8012 = vmatprep.subr.bf16.mxu1 %v9599_v8  ;;  %v9663_v8 = vld [vmem:[%s11173_s15 + $0x9f4] ss:$8 sps:$4 sm:$0xff]  }
 0x213   : > { %7972 = vmatpush2.bf16.msra.mxu0 %v9594_v9  ;;  %v9658_v9 = vld [vmem:[%s11173_s15 + $0x8f0] ss:$8 sps:$4 sm:$0xff]  }
 0x214   : > { %7973 = vmatprep.subr.bf16.mxu0 %v9602_v22  ;;  %v9666_v22 = vld [vmem:[%s11173_s15 + $0x8e4] ss:$8 sps:$4 sm:$0xff]  }
 0x215   : > { %8013 = vmatpush2.bf16.msra.mxu1 %v9597_v20  ;;  %v9661_v20 = vld [vmem:[%s11173_s15 + $0x9f0] ss:$8 sps:$4 sm:$0xff]  }
 0x216   : > { %8014 = vmatprep.subr.bf16.mxu1 %v9605_v25  ;;  %v9669_v25 = vld [vmem:[%s11173_s15 + $0x9e4] ss:$8 sps:$4 sm:$0xff]  }
 0x217   : > { %7974 = vmatpush2.bf16.msra.mxu0 %v9600_v18  ;;  %v9664_v18 = vld [vmem:[%s11173_s15 + $0x8e0] ss:$8 sps:$4 sm:$0xff]  }
 0x218   : > { %8025 = vmatprep.subr.bf16.mxu0 %v9612_v28  ;;  %v9675_v28 = vld [vmem:[%s11173_s15 + $0x9d4] ss:$8 sps:$4 sm:$0xff]  }
 0x219   : > { %8015 = vmatpush2.bf16.msra.mxu1 %v9603_v19  ;;  %v9667_v19 = vld [vmem:[%s11173_s15 + $0x9e0] ss:$8 sps:$4 sm:$0xff]  }
 0x21a   : > { %8066 = vmatprep.subr.bf16.mxu1 %v9615_v29  ;;  %v7731_v41 = vpop.f32.mrf.mxu0  ;;  %7976 = vmatmul.mubr.bf16.vlgmr.msra.gmra.mxu0 %v8634_v33  ;;  %v9670_v29 = vld [vmem:[%s11173_s15 + $0x8d0] ss:$8 sps:$4 sm:$0xff]   ;;  %v9678_v33 = vld [vmem:[%s11173_s15 + $0x8c4] ss:$8 sps:$4 sm:$0xff]  }
 0x21b   : > { %v7732_v44 = vadd.f32 %v7731_v41, %v5018_v36  ;;  %8026 = vmatpush1.bf16.msra.mxu0 %v9610_v30  ;;  %8057 = vmatprep.mubr.bf16.mxu0 %v8639_v24  ;;  %v9673_v30 = vld [vmem:[%s11173_s15 + $0x9d0] ss:$8 sps:$4 sm:$0xff]   ;;  %v9676_v36 = vld [vmem:[%s11173_s15 + $0x8c0] ss:$8 sps:$4 sm:$0xff]   ;;  %v9693_v41 = vld [vmem:[%s11173_s15 + $0x9a4] ss:$8 sps:$4 sm:$0xff]  }
 0x21c   : > { %v7772_v42 = vpop.f32.mrf.mxu1  ;;  %8017 = vmatmul.mubr.bf16.vlgmr.msra.gmra.mxu1 %v8636_v34  ;;  %v7733_v47 = vpop.f32.mrf.mxu0  ;;  %8027 = vmatprep.subr.bf16.mxu0 %v9618_v38  ;;  %v9681_v34 = vld [vmem:[%s11173_s15 + $0x9c4] ss:$8 sps:$4 sm:$0xff]   ;;  %v9684_v38 = vld [vmem:[%s11173_s15 + $0x8b4] ss:$8 sps:$4 sm:$0xff]   ;;  %v9685_v24 = vld [vmem:[%s11173_s15 + $0x9b0] ss:$8 sps:$4 sm:$0xff]  }
 0x21d   : > { %8067 = vmatpush1.bf16.msra.mxu1 %v9613_v37  ;;  %v11530_v50 = vadd.f32 %v7772_v42, %v7732_v44  ;;  %v7734_v51 = vadd.f32 %v7733_v47, %v5022_v39  ;;  %8098 = vmatprep.mubr.bf16.mxu1 %v8641_v40  ;;  %v9679_v37 = vld [vmem:[%s11173_s15 + $0x9c0] ss:$8 sps:$4 sm:$0xff]   ;;  %v9682_v39 = vld [vmem:[%s11173_s15 + $0x8b0] ss:$8 sps:$4 sm:$0xff]   ;;  %v9690_v40 = vld [vmem:[%s11173_s15 + $0x8a4] ss:$8 sps:$4 sm:$0xff]  }
 0x21e   : > { %v7774_v48 = vpop.f32.mrf.mxu1  ;;  %8068 = vmatprep.subr.bf16.mxu1 %v9621_v23  ;;  %v7735_v52 = vpop.f32.mrf.mxu0  ;;  %v9687_v23 = vld [vmem:[%s11173_s15 + $0x9b4] ss:$8 sps:$4 sm:$0xff]   ;;  %v9688_v42 = vld [vmem:[%s11173_s15 + $0x8a0] ss:$8 sps:$4 sm:$0xff]   ;;  %v9697_v47 = vld [vmem:[%s11173_s15 + $0x990] ss:$8 sps:$4 sm:$0xff]  }
 0x21f   : > { %v11533_v55 = vadd.f32 %v7774_v48, %v7734_v51  ;;  %8028 = vmatpush1.bf16.msra.mxu0 %v9616_v43  ;;  %v9691_v43 = vld [vmem:[%s11173_s15 + $0x9a0] ss:$8 sps:$4 sm:$0xff]   ;;  %v9696_v44 = vld [vmem:[%s11173_s15 + $0x894] ss:$8 sps:$4 sm:$0xff]   ;;  %v9702_v48 = vld [vmem:[%s11173_s15 + $0x884] ss:$8 sps:$4 sm:$0xff]  }
 0x220   : > { %v7776_v53 = vpop.f32.mrf.mxu1  ;;  %v7736_v58 = vpop.f32.mrf.mxu0  ;;  %8029 = vmatprep.subr.bf16.mxu0 %v9624_v46  ;;  %v9694_v46 = vld [vmem:[%s11173_s15 + $0x890] ss:$8 sps:$4 sm:$0xff]   ;;  %v9700_v51 = vld [vmem:[%s11173_s15 + $0x880] ss:$8 sps:$4 sm:$0xff]  }
 0x221   : > { %8069 = vmatpush1.bf16.msra.mxu1 %v9619_v45  ;;  %v9699_v45 = vld [vmem:[%s11173_s15 + $0x994] ss:$8 sps:$4 sm:$0xff]   ;;  %v9703_v52 = vld [vmem:[%s11173_s15 + $0x980] ss:$8 sps:$4 sm:$0xff]   ;;  %v8638_v58 = vcombine.low %v11506_v32, %v11506_v32 }
 0x222   : > { %v7777_v59 = vpop.f32.mrf.mxu1  ;;  %8070 = vmatprep.subr.bf16.mxu1 %v9627_v49  ;;  %v9705_v49 = vld [vmem:[%s11173_s15 + $0x984] ss:$8 sps:$4 sm:$0xff]   ;;  %v9712_v53 = vld [vmem:[%s11173_s15 + $0xa74] ss:$8 sps:$4 sm:$0xff]   ;;  %v9716_v32 = vld [vmem:[%s11173_s15 + $0xa60] ss:$8 sps:$4 sm:$0xff]  }
 0x223   : > { %8030 = vmatpush1.bf16.msra.mxu0 %v9622_v54  ;;  %v9715_v54 = vld [vmem:[%s11173_s15 + $0xb74] ss:$8 sps:$4 sm:$0xff]   ;;  %v8640_v59 = vcombine.low %v11515_v35, %v11515_v35  ;;  %v9719_v35 = vld [vmem:[%s11173_s15 + $0xb60] ss:$8 sps:$4 sm:$0xff]  }
 0x224   : > { %8031 = vmatprep.subr.bf16.mxu0 %v9630_v57  ;;  %v9713_v57 = vld [vmem:[%s11173_s15 + $0xb70] ss:$8 sps:$4 sm:$0xff]  }
 0x225   : > { %8071 = vmatpush1.bf16.msra.mxu1 %v9625_v56  ;;  %v9710_v56 = vld [vmem:[%s11173_s15 + $0xa70] ss:$8 sps:$4 sm:$0xff]  }
 0x226   : > { %8072 = vmatprep.subr.bf16.mxu1 %v9633_v60  ;;  %v11599_v60 = vld [vmem:[%s11904_s0 + $0x50] sm:$0xff] }
 0x227   : > { %8032 = vmatpush1.bf16.msra.mxu0 %v9628_v61  ;;  %v11604_v61 = vld [vmem:[%s11904_s0 + $0x58] sm:$0xff] }
 0x228   : > { %8033 = vmatprep.subr.bf16.mxu0 %v9636_v63  ;;  %v9721_v63 = vld [vmem:[%s11173_s15 + $0xb64] ss:$8 sps:$4 sm:$0xff]  }
 0x229   : > { %8073 = vmatpush1.bf16.msra.mxu1 %v9631_v62  ;;  %v9718_v62 = vld [vmem:[%s11173_s15 + $0xa64] ss:$8 sps:$4 sm:$0xff]  }
 0x22a   : > { %8074 = vmatprep.subr.bf16.mxu1 %v9639_v2  ;;  %v8643_v2 = vcombine.high %v11599_v60, %v11599_v60 }
 0x22b   : > { %8034 = vmatpush1.bf16.msra.mxu0 %v9634_v3  ;;  %v8645_v3 = vcombine.high %v11604_v61, %v11604_v61 }
 0x22c   : > { %8035 = vmatprep.subr.bf16.mxu0 %v9642_v5 }
 0x22d   : > { %8075 = vmatpush1.bf16.msra.mxu1 %v9637_v4 }
 0x22e   : > { %8076 = vmatprep.subr.bf16.mxu1 %v9645_v6 }
 0x22f   : > { %8036 = vmatpush1.bf16.msra.mxu0 %v9640_v7 }
 0x230   : > { %8037 = vmatprep.subr.bf16.mxu0 %v9648_v11  ;;  %v9724_v11 = vld [vmem:[%s11173_s15 + $0xa54] ss:$8 sps:$4 sm:$0xff]  }
 0x231   : > { %8077 = vmatpush1.bf16.msra.mxu1 %v9643_v10 }
 0x232   : > { %8078 = vmatprep.subr.bf16.mxu1 %v9651_v12  ;;  %v9727_v12 = vld [vmem:[%s11173_s15 + $0xb54] ss:$8 sps:$4 sm:$0xff]  }
 0x233   : > { %8038 = vmatpush1.bf16.msra.mxu0 %v9646_v13 }
 0x234   : > { %8039 = vmatprep.subr.bf16.mxu0 %v9654_v15 }
 0x235   : > { %8079 = vmatpush1.bf16.msra.mxu1 %v9649_v14 }
 0x236   : > { %8080 = vmatprep.subr.bf16.mxu1 %v9657_v16 }
 0x237   : > { %8040 = vmatpush1.bf16.msra.mxu0 %v9652_v0  ;;  %v9722_v0 = vld [vmem:[%s11173_s15 + $0xa50] ss:$8 sps:$4 sm:$0xff]  }
 0x238   : > { %8041 = vmatprep.subr.bf16.mxu0 %v9660_v17 }
 0x239   : > { %8081 = vmatpush1.bf16.msra.mxu1 %v9655_v1  ;;  %v9725_v1 = vld [vmem:[%s11173_s15 + $0xb50] ss:$8 sps:$4 sm:$0xff]  }
 0x23a   : > { %8082 = vmatprep.subr.bf16.mxu1 %v9663_v8 }
 0x23b   : > { %8042 = vmatpush2.bf16.msra.mxu0 %v9658_v9  ;;  %v9733_v9 = vld [vmem:[%s11173_s15 + $0xb44] ss:$8 sps:$4 sm:$0xff]  }
 0x23c   : > { %8043 = vmatprep.subr.bf16.mxu0 %v9666_v22  ;;  %v9731_v22 = vld [vmem:[%s11173_s15 + $0xb40] ss:$8 sps:$4 sm:$0xff]  }
 0x23d   : > { %8083 = vmatpush2.bf16.msra.mxu1 %v9661_v20  ;;  %v9728_v20 = vld [vmem:[%s11173_s15 + $0xa40] ss:$8 sps:$4 sm:$0xff]  }
 0x23e   : > { %8084 = vmatprep.subr.bf16.mxu1 %v9669_v25  ;;  %v9736_v25 = vld [vmem:[%s11173_s15 + $0xa34] ss:$8 sps:$4 sm:$0xff]  }
 0x23f   : > { %8044 = vmatpush2.bf16.msra.mxu0 %v9664_v18  ;;  %v9739_v18 = vld [vmem:[%s11173_s15 + $0xb34] ss:$8 sps:$4 sm:$0xff]  }
 0x240   : > { %8045 = vmatprep.subr.bf16.mxu0 %v9672_v26  ;;  %v9737_v26 = vld [vmem:[%s11173_s15 + $0xb30] ss:$8 sps:$4 sm:$0xff]  }
 0x241   : > { %8085 = vmatpush2.bf16.msra.mxu1 %v9667_v19  ;;  %v9734_v19 = vld [vmem:[%s11173_s15 + $0xa30] ss:$8 sps:$4 sm:$0xff]  }
 0x242   : > { %8086 = vmatprep.subr.bf16.mxu1 %v9675_v28  ;;  %v9742_v28 = vld [vmem:[%s11173_s15 + $0xa24] ss:$8 sps:$4 sm:$0xff]  }
 0x243   : > { %8046 = vmatpush2.bf16.msra.mxu0 %v9670_v29  ;;  %v9745_v29 = vld [vmem:[%s11173_s15 + $0xb24] ss:$8 sps:$4 sm:$0xff]  }
 0x244   : > { %8047 = vmatprep.subr.bf16.mxu0 %v9678_v33  ;;  %v9743_v33 = vld [vmem:[%s11173_s15 + $0xb20] ss:$8 sps:$4 sm:$0xff]  }
 0x245   : > { %8087 = vmatpush2.bf16.msra.mxu1 %v9673_v30  ;;  %v9740_v30 = vld [vmem:[%s11173_s15 + $0xa20] ss:$8 sps:$4 sm:$0xff]  }
 0x246   : > { %8088 = vmatprep.subr.bf16.mxu1 %v9681_v34  ;;  %v9748_v34 = vld [vmem:[%s11173_s15 + $0xa14] ss:$8 sps:$4 sm:$0xff]  }
 0x247   : > { %8048 = vmatpush2.bf16.msra.mxu0 %v9676_v36  ;;  %v9751_v36 = vld [vmem:[%s11173_s15 + $0xb14] ss:$8 sps:$4 sm:$0xff]  }
 0x248   : > { %8049 = vmatprep.subr.bf16.mxu0 %v9684_v38  ;;  %v9749_v38 = vld [vmem:[%s11173_s15 + $0xb10] ss:$8 sps:$4 sm:$0xff]  }
 0x249   : > { %8089 = vmatpush2.bf16.msra.mxu1 %v9679_v37  ;;  %v9746_v37 = vld [vmem:[%s11173_s15 + $0xa10] ss:$8 sps:$4 sm:$0xff]  }
 0x24a   : > { %8090 = vmatprep.subr.bf16.mxu1 %v9687_v23  ;;  %v9754_v23 = vld [vmem:[%s11173_s15 + $0xa04] ss:$8 sps:$4 sm:$0xff]  }
 0x24b   : > { %8050 = vmatpush2.bf16.msra.mxu0 %v9682_v39  ;;  %v9757_v39 = vld [vmem:[%s11173_s15 + $0xb04] ss:$8 sps:$4 sm:$0xff]  }
 0x24c   : > { %8051 = vmatprep.subr.bf16.mxu0 %v9690_v40  ;;  %v9755_v40 = vld [vmem:[%s11173_s15 + $0xb00] ss:$8 sps:$4 sm:$0xff]  }
 0x24d   : > { %8091 = vmatpush2.bf16.msra.mxu1 %v9685_v24  ;;  %v9752_v24 = vld [vmem:[%s11173_s15 + $0xa00] ss:$8 sps:$4 sm:$0xff]  }
 0x24e   : > { %8092 = vmatprep.subr.bf16.mxu1 %v9693_v41  ;;  %v9760_v41 = vld [vmem:[%s11173_s15 + $0xaf4] ss:$8 sps:$4 sm:$0xff]  }
 0x24f   : > { %8052 = vmatpush2.bf16.msra.mxu0 %v9688_v42  ;;  %v9763_v42 = vld [vmem:[%s11173_s15 + $0xbf4] ss:$8 sps:$4 sm:$0xff]  }
 0x250   : > { %8053 = vmatprep.subr.bf16.mxu0 %v9696_v44  ;;  %v9761_v44 = vld [vmem:[%s11173_s15 + $0xbf0] ss:$8 sps:$4 sm:$0xff]  }
 0x251   : > { %8093 = vmatpush2.bf16.msra.mxu1 %v9691_v43  ;;  %v9758_v43 = vld [vmem:[%s11173_s15 + $0xaf0] ss:$8 sps:$4 sm:$0xff]  }
 0x252   : > { %8094 = vmatprep.subr.bf16.mxu1 %v9699_v45  ;;  %v9766_v45 = vld [vmem:[%s11173_s15 + $0xae4] ss:$8 sps:$4 sm:$0xff]  }
 0x253   : > { %8054 = vmatpush2.bf16.msra.mxu0 %v9694_v46  ;;  %v9769_v46 = vld [vmem:[%s11173_s15 + $0xbe4] ss:$8 sps:$4 sm:$0xff]  }
 0x254   : > { %8055 = vmatprep.subr.bf16.mxu0 %v9702_v48  ;;  %v9767_v48 = vld [vmem:[%s11173_s15 + $0xbe0] ss:$8 sps:$4 sm:$0xff]  }
 0x255   : > { %8095 = vmatpush2.bf16.msra.mxu1 %v9697_v47  ;;  %v9764_v47 = vld [vmem:[%s11173_s15 + $0xae0] ss:$8 sps:$4 sm:$0xff]  }
 0x256   : > { %8096 = vmatprep.subr.bf16.mxu1 %v9705_v49  ;;  %v9772_v49 = vld [vmem:[%s11173_s15 + $0xad4] ss:$8 sps:$4 sm:$0xff]  }
 0x257   : > { %8056 = vmatpush2.bf16.msra.mxu0 %v9700_v51  ;;  %v9775_v51 = vld [vmem:[%s11173_s15 + $0xbd4] ss:$8 sps:$4 sm:$0xff]  }
 0x258   : > { %8107 = vmatprep.subr.bf16.mxu0 %v9712_v53  ;;  %v9773_v53 = vld [vmem:[%s11173_s15 + $0xbd0] ss:$8 sps:$4 sm:$0xff]  }
 0x259   : > { %8097 = vmatpush2.bf16.msra.mxu1 %v9703_v52  ;;  %v9770_v52 = vld [vmem:[%s11173_s15 + $0xad0] ss:$8 sps:$4 sm:$0xff]  }
 0x25a   : > { %8148 = vmatprep.subr.bf16.mxu1 %v9715_v54  ;;  %v7813_v4 = vpop.f32.mrf.mxu0  ;;  %8058 = vmatmul.mubr.bf16.vlgmr.msra.gmra.mxu0 %v8638_v58  ;;  %v9778_v54 = vld [vmem:[%s11173_s15 + $0xac4] ss:$8 sps:$4 sm:$0xff]   ;;  %v9779_v58 = vld [vmem:[%s11173_s15 + $0xbc0] ss:$8 sps:$4 sm:$0xff]  }
 0x25b   : > { %v7814_v6 = vadd.f32 %v7813_v4, %v11530_v50  ;;  %8108 = vmatpush1.bf16.msra.mxu0 %v9710_v56  ;;  %8139 = vmatprep.mubr.bf16.mxu0 %v8643_v2  ;;  %v9781_v56 = vld [vmem:[%s11173_s15 + $0xbc4] ss:$8 sps:$4 sm:$0xff]   ;;  %v9791_v4 = vld [vmem:[%s11173_s15 + $0xba0] ss:$8 sps:$4 sm:$0xff]  }
 0x25c   : > { %v7854_v5 = vpop.f32.mrf.mxu1  ;;  %8099 = vmatmul.mubr.bf16.vlgmr.msra.gmra.mxu1 %v8640_v59  ;;  %v7815_v7 = vpop.f32.mrf.mxu0  ;;  %8109 = vmatprep.subr.bf16.mxu0 %v9718_v62  ;;  %v9784_v59 = vld [vmem:[%s11173_s15 + $0xab4] ss:$8 sps:$4 sm:$0xff]   ;;  %v9793_v2 = vld [vmem:[%s11173_s15 + $0xba4] ss:$8 sps:$4 sm:$0xff]  }
 0x25d   : > { %8149 = vmatpush1.bf16.msra.mxu1 %v9713_v57  ;;  %v11617_v13 = vadd.f32 %v7854_v5, %v7814_v6  ;;  %v7816_v14 = vadd.f32 %v7815_v7, %v11533_v55  ;;  %8180 = vmatprep.mubr.bf16.mxu1 %v8645_v3  ;;  %v9730_v55 = vld [vmem:[%s11173_s15 + $0xa44] ss:$8 sps:$4 sm:$0xff]   ;;  %v9776_v57 = vld [vmem:[%s11173_s15 + $0xac0] ss:$8 sps:$4 sm:$0xff]   ;;  %v9787_v62 = vld [vmem:[%s11173_s15 + $0xbb4] ss:$8 sps:$4 sm:$0xff]  }
 0x25e   : > { %v7856_v10 = vpop.f32.mrf.mxu1  ;;  %8150 = vmatprep.subr.bf16.mxu1 %v9721_v63  ;;  %v7817_v50 = vpop.f32.mrf.mxu0  ;;  %v9782_v63 = vld [vmem:[%s11173_s15 + $0xab0] ss:$8 sps:$4 sm:$0xff]   ;;  %v9788_v3 = vld [vmem:[%s11173_s15 + $0xaa0] ss:$8 sps:$4 sm:$0xff]   ;;  %v9796_v5 = vld [vmem:[%s11173_s15 + $0xa94] ss:$8 sps:$4 sm:$0xff]  }
 0x25f   : > { %v11620_v16 = vadd.f32 %v7856_v10, %v7816_v14  ;;  %8110 = vmatpush1.bf16.msra.mxu0 %v9716_v32  ;;  %v9785_v32 = vld [vmem:[%s11173_s15 + $0xbb0] ss:$8 sps:$4 sm:$0xff]   ;;  %v9799_v6 = vld [vmem:[%s11173_s15 + $0xb94] ss:$8 sps:$4 sm:$0xff]   ;;  %v9800_v14 = vld [vmem:[%s11173_s15 + $0xa80] ss:$8 sps:$4 sm:$0xff]  }
 0x260   : > { %v7858_v15 = vpop.f32.mrf.mxu1  ;;  %v7818_v17 = vpop.f32.mrf.mxu0  ;;  %8111 = vmatprep.subr.bf16.mxu0 %v9724_v11  ;;  %v9794_v7 = vld [vmem:[%s11173_s15 + $0xa90] ss:$8 sps:$4 sm:$0xff]   ;;  %v9802_v11 = vld [vmem:[%s11173_s15 + $0xa84] ss:$8 sps:$4 sm:$0xff]   ;;  %v9803_v50 = vld [vmem:[%s11173_s15 + $0xb80] ss:$8 sps:$4 sm:$0xff]  }
 0x261   : > { %8151 = vmatpush1.bf16.msra.mxu1 %v9719_v35  ;;  %v9790_v35 = vld [vmem:[%s11173_s15 + $0xaa4] ss:$8 sps:$4 sm:$0xff]   ;;  %v9797_v10 = vld [vmem:[%s11173_s15 + $0xb90] ss:$8 sps:$4 sm:$0xff]   ;;  %v9812_v15 = vld [vmem:[%s11173_s15 + $0xc74] ss:$8 sps:$4 sm:$0xff]   ;;  %v8644_v17 = vcombine.low %v11604_v61, %v11604_v61 }
 0x262   : > { %v7859_v8 = vpop.f32.mrf.mxu1  ;;  %8152 = vmatprep.subr.bf16.mxu1 %v9727_v12  ;;  %v9805_v12 = vld [vmem:[%s11173_s15 + $0xb84] ss:$8 sps:$4 sm:$0xff]  }
 0x263   : > { %8112 = vmatpush1.bf16.msra.mxu0 %v9722_v0  ;;  %v9815_v0 = vld [vmem:[%s11173_s15 + $0xd74] ss:$8 sps:$4 sm:$0xff]   ;;  %v11685_v8 = vld [vmem:[%s11904_s0 + $0x60] sm:$0xff] }
 0x264   : > { %8113 = vmatprep.subr.bf16.mxu0 %v9730_v55  ;;  %v11690_v55 = vld [vmem:[%s11904_s0 + $0x68] sm:$0xff] }
 0x265   : > { %8153 = vmatpush1.bf16.msra.mxu1 %v9725_v1  ;;  %v8642_v1 = vcombine.low %v11599_v60, %v11599_v60  ;;  %v9818_v60 = vld [vmem:[%s11173_s15 + $0xc64] ss:$8 sps:$4 sm:$0xff]  }
 0x266   : > { %8154 = vmatprep.subr.bf16.mxu1 %v9733_v9  ;;  %v9810_v9 = vld [vmem:[%s11173_s15 + $0xc70] ss:$8 sps:$4 sm:$0xff]   ;;  %v9821_v61 = vld [vmem:[%s11173_s15 + $0xd64] ss:$8 sps:$4 sm:$0xff]  }
 0x267   : > { %8114 = vmatpush1.bf16.msra.mxu0 %v9728_v20  ;;  %v9813_v20 = vld [vmem:[%s11173_s15 + $0xd70] ss:$8 sps:$4 sm:$0xff]  }
 0x268   : > { %8115 = vmatprep.subr.bf16.mxu0 %v9736_v25  ;;  %v8649_v25 = vcombine.high %v11690_v55, %v11690_v55 }
 0x269   : > { %8155 = vmatpush1.bf16.msra.mxu1 %v9731_v22  ;;  %v8647_v22 = vcombine.high %v11685_v8, %v11685_v8 }
 0x26a   : > { %8156 = vmatprep.subr.bf16.mxu1 %v9739_v18 }
 0x26b   : > { %8116 = vmatpush1.bf16.msra.mxu0 %v9734_v19 }
 0x26c   : > { %8117 = vmatprep.subr.bf16.mxu0 %v9742_v28  ;;  %v9816_v28 = vld [vmem:[%s11173_s15 + $0xc60] ss:$8 sps:$4 sm:$0xff]  }
 0x26d   : > { %8157 = vmatpush1.bf16.msra.mxu1 %v9737_v26 }
 0x26e   : > { %8158 = vmatprep.subr.bf16.mxu1 %v9745_v29  ;;  %v9819_v29 = vld [vmem:[%s11173_s15 + $0xd60] ss:$8 sps:$4 sm:$0xff]  }
 0x26f   : > { %8118 = vmatpush1.bf16.msra.mxu0 %v9740_v30 }
 0x270   : > { %8119 = vmatprep.subr.bf16.mxu0 %v9748_v34  ;;  %v9824_v34 = vld [vmem:[%s11173_s15 + $0xc54] ss:$8 sps:$4 sm:$0xff]  }
 0x271   : > { %8159 = vmatpush1.bf16.msra.mxu1 %v9743_v33 }
 0x272   : > { %8160 = vmatprep.subr.bf16.mxu1 %v9751_v36  ;;  %v9827_v36 = vld [vmem:[%s11173_s15 + $0xd54] ss:$8 sps:$4 sm:$0xff]  }
 0x273   : > { %8120 = vmatpush1.bf16.msra.mxu0 %v9746_v37 }
 0x274   : > { %8121 = vmatprep.subr.bf16.mxu0 %v9754_v23 }
 0x275   : > { %8161 = vmatpush1.bf16.msra.mxu1 %v9749_v38 }
 0x276   : > { %8162 = vmatprep.subr.bf16.mxu1 %v9757_v39 }
 0x277   : > { %8122 = vmatpush1.bf16.msra.mxu0 %v9752_v24  ;;  %v9822_v24 = vld [vmem:[%s11173_s15 + $0xc50] ss:$8 sps:$4 sm:$0xff]  }
 0x278   : > { %8123 = vmatprep.subr.bf16.mxu0 %v9760_v41 }
 0x279   : > { %8163 = vmatpush1.bf16.msra.mxu1 %v9755_v40  ;;  %v9825_v40 = vld [vmem:[%s11173_s15 + $0xd50] ss:$8 sps:$4 sm:$0xff]  }
 0x27a   : > { %8164 = vmatprep.subr.bf16.mxu1 %v9763_v42 }
 0x27b   : > { %8124 = vmatpush2.bf16.msra.mxu0 %v9758_v43  ;;  %v9833_v43 = vld [vmem:[%s11173_s15 + $0xd44] ss:$8 sps:$4 sm:$0xff]  }
 0x27c   : > { %8125 = vmatprep.subr.bf16.mxu0 %v9766_v45  ;;  %v9831_v45 = vld [vmem:[%s11173_s15 + $0xd40] ss:$8 sps:$4 sm:$0xff]  }
 0x27d   : > { %8165 = vmatpush2.bf16.msra.mxu1 %v9761_v44  ;;  %v9828_v44 = vld [vmem:[%s11173_s15 + $0xc40] ss:$8 sps:$4 sm:$0xff]  }
 0x27e   : > { %8166 = vmatprep.subr.bf16.mxu1 %v9769_v46  ;;  %v9836_v46 = vld [vmem:[%s11173_s15 + $0xc34] ss:$8 sps:$4 sm:$0xff]  }
 0x27f   : > { %8126 = vmatpush2.bf16.msra.mxu0 %v9764_v47  ;;  %v9839_v47 = vld [vmem:[%s11173_s15 + $0xd34] ss:$8 sps:$4 sm:$0xff]  }
 0x280   : > { %8127 = vmatprep.subr.bf16.mxu0 %v9772_v49  ;;  %v9837_v49 = vld [vmem:[%s11173_s15 + $0xd30] ss:$8 sps:$4 sm:$0xff]  }
 0x281   : > { %8167 = vmatpush2.bf16.msra.mxu1 %v9767_v48  ;;  %v9834_v48 = vld [vmem:[%s11173_s15 + $0xc30] ss:$8 sps:$4 sm:$0xff]  }
 0x282   : > { %8168 = vmatprep.subr.bf16.mxu1 %v9775_v51  ;;  %v9842_v51 = vld [vmem:[%s11173_s15 + $0xc24] ss:$8 sps:$4 sm:$0xff]  }
 0x283   : > { %8128 = vmatpush2.bf16.msra.mxu0 %v9770_v52  ;;  %v9845_v52 = vld [vmem:[%s11173_s15 + $0xd24] ss:$8 sps:$4 sm:$0xff]  }
 0x284   : > { %8129 = vmatprep.subr.bf16.mxu0 %v9778_v54  ;;  %v9843_v54 = vld [vmem:[%s11173_s15 + $0xd20] ss:$8 sps:$4 sm:$0xff]  }
 0x285   : > { %8169 = vmatpush2.bf16.msra.mxu1 %v9773_v53  ;;  %v9840_v53 = vld [vmem:[%s11173_s15 + $0xc20] ss:$8 sps:$4 sm:$0xff]  }
 0x286   : > { %8170 = vmatprep.subr.bf16.mxu1 %v9781_v56  ;;  %v9848_v56 = vld [vmem:[%s11173_s15 + $0xc14] ss:$8 sps:$4 sm:$0xff]  }
 0x287   : > { %8130 = vmatpush2.bf16.msra.mxu0 %v9776_v57  ;;  %v9851_v57 = vld [vmem:[%s11173_s15 + $0xd14] ss:$8 sps:$4 sm:$0xff]  }
 0x288   : > { %8131 = vmatprep.subr.bf16.mxu0 %v9784_v59  ;;  %v9849_v59 = vld [vmem:[%s11173_s15 + $0xd10] ss:$8 sps:$4 sm:$0xff]  }
 0x289   : > { %8171 = vmatpush2.bf16.msra.mxu1 %v9779_v58  ;;  %v9846_v58 = vld [vmem:[%s11173_s15 + $0xc10] ss:$8 sps:$4 sm:$0xff]  }
 0x28a   : > { %8172 = vmatprep.subr.bf16.mxu1 %v9787_v62  ;;  %v9854_v62 = vld [vmem:[%s11173_s15 + $0xc04] ss:$8 sps:$4 sm:$0xff]  }
 0x28b   : > { %8132 = vmatpush2.bf16.msra.mxu0 %v9782_v63  ;;  %v9857_v63 = vld [vmem:[%s11173_s15 + $0xd04] ss:$8 sps:$4 sm:$0xff]  }
 0x28c   : > { %8133 = vmatprep.subr.bf16.mxu0 %v9790_v35  ;;  %v9855_v35 = vld [vmem:[%s11173_s15 + $0xd00] ss:$8 sps:$4 sm:$0xff]  }
 0x28d   : > { %8173 = vmatpush2.bf16.msra.mxu1 %v9785_v32  ;;  %v9852_v32 = vld [vmem:[%s11173_s15 + $0xc00] ss:$8 sps:$4 sm:$0xff]  }
 0x28e   : > { %8174 = vmatprep.subr.bf16.mxu1 %v9793_v2  ;;  %v9860_v2 = vld [vmem:[%s11173_s15 + $0xcf4] ss:$8 sps:$4 sm:$0xff]  }
 0x28f   : > { %8134 = vmatpush2.bf16.msra.mxu0 %v9788_v3  ;;  %v9863_v3 = vld [vmem:[%s11173_s15 + $0xdf4] ss:$8 sps:$4 sm:$0xff]  }
 0x290   : > { %8135 = vmatprep.subr.bf16.mxu0 %v9796_v5  ;;  %v9861_v5 = vld [vmem:[%s11173_s15 + $0xdf0] ss:$8 sps:$4 sm:$0xff]  }
 0x291   : > { %8175 = vmatpush2.bf16.msra.mxu1 %v9791_v4  ;;  %v9858_v4 = vld [vmem:[%s11173_s15 + $0xcf0] ss:$8 sps:$4 sm:$0xff]  }
 0x292   : > { %8176 = vmatprep.subr.bf16.mxu1 %v9799_v6  ;;  %v9866_v6 = vld [vmem:[%s11173_s15 + $0xce4] ss:$8 sps:$4 sm:$0xff]  }
 0x293   : > { %8136 = vmatpush2.bf16.msra.mxu0 %v9794_v7  ;;  %v9869_v7 = vld [vmem:[%s11173_s15 + $0xde4] ss:$8 sps:$4 sm:$0xff]  }
 0x294   : > { %8137 = vmatprep.subr.bf16.mxu0 %v9802_v11  ;;  %v9867_v11 = vld [vmem:[%s11173_s15 + $0xde0] ss:$8 sps:$4 sm:$0xff]  }
 0x295   : > { %8177 = vmatpush2.bf16.msra.mxu1 %v9797_v10  ;;  %v9864_v10 = vld [vmem:[%s11173_s15 + $0xce0] ss:$8 sps:$4 sm:$0xff]  }
 0x296   : > { %8178 = vmatprep.subr.bf16.mxu1 %v9805_v12  ;;  %v9872_v12 = vld [vmem:[%s11173_s15 + $0xcd4] ss:$8 sps:$4 sm:$0xff]  }
 0x297   : > { %8138 = vmatpush2.bf16.msra.mxu0 %v9800_v14  ;;  %v9875_v14 = vld [vmem:[%s11173_s15 + $0xdd4] ss:$8 sps:$4 sm:$0xff]  }
 0x298   : > { %8189 = vmatprep.subr.bf16.mxu0 %v9812_v15  ;;  %v9873_v15 = vld [vmem:[%s11173_s15 + $0xdd0] ss:$8 sps:$4 sm:$0xff]  }
 0x299   : > { %8179 = vmatpush2.bf16.msra.mxu1 %v9803_v50  ;;  %v9870_v50 = vld [vmem:[%s11173_s15 + $0xcd0] ss:$8 sps:$4 sm:$0xff]  }
 0x29a   : > { %8230 = vmatprep.subr.bf16.mxu1 %v9815_v0  ;;  %v7895_v18 = vpop.f32.mrf.mxu0  ;;  %8140 = vmatmul.mubr.bf16.vlgmr.msra.gmra.mxu0 %v8642_v1  ;;  %v9878_v0 = vld [vmem:[%s11173_s15 + $0xcc4] ss:$8 sps:$4 sm:$0xff]  }
 0x29b   : > { %v7896_v26 = vadd.f32 %v7895_v18, %v11617_v13  ;;  %8190 = vmatpush1.bf16.msra.mxu0 %v9810_v9  ;;  %8221 = vmatprep.mubr.bf16.mxu0 %v8647_v22  ;;  %v9881_v1 = vld [vmem:[%s11173_s15 + $0xdc4] ss:$8 sps:$4 sm:$0xff]   ;;  %v9879_v9 = vld [vmem:[%s11173_s15 + $0xdc0] ss:$8 sps:$4 sm:$0xff]   ;;  %v9885_v22 = vld [vmem:[%s11173_s15 + $0xdb0] ss:$8 sps:$4 sm:$0xff]  }
 0x29c   : > { %v7936_v19 = vpop.f32.mrf.mxu1  ;;  %8181 = vmatmul.mubr.bf16.vlgmr.msra.gmra.mxu1 %v8644_v17  ;;  %v7897_v30 = vpop.f32.mrf.mxu0  ;;  %8191 = vmatprep.subr.bf16.mxu0 %v9818_v60  ;;  %v9876_v17 = vld [vmem:[%s11173_s15 + $0xcc0] ss:$8 sps:$4 sm:$0xff]   ;;  %v9887_v60 = vld [vmem:[%s11173_s15 + $0xdb4] ss:$8 sps:$4 sm:$0xff]   ;;  %v9893_v18 = vld [vmem:[%s11173_s15 + $0xda4] ss:$8 sps:$4 sm:$0xff]  }
 0x29d   : > { %8231 = vmatpush1.bf16.msra.mxu1 %v9813_v20  ;;  %v11705_v37 = vadd.f32 %v7936_v19, %v7896_v26  ;;  %v7898_v38 = vadd.f32 %v7897_v30, %v11620_v16  ;;  %8262 = vmatprep.mubr.bf16.mxu1 %v8649_v25  ;;  %v9830_v16 = vld [vmem:[%s11173_s15 + $0xc44] ss:$8 sps:$4 sm:$0xff]   ;;  %v9884_v20 = vld [vmem:[%s11173_s15 + $0xcb4] ss:$8 sps:$4 sm:$0xff]   ;;  %v9888_v19 = vld [vmem:[%s11173_s15 + $0xca0] ss:$8 sps:$4 sm:$0xff]  }
 0x29e   : > { %v7938_v33 = vpop.f32.mrf.mxu1  ;;  %8232 = vmatprep.subr.bf16.mxu1 %v9821_v61  ;;  %v7899_v13 = vpop.f32.mrf.mxu0  ;;  %v9882_v61 = vld [vmem:[%s11173_s15 + $0xcb0] ss:$8 sps:$4 sm:$0xff]   ;;  %v9890_v25 = vld [vmem:[%s11173_s15 + $0xca4] ss:$8 sps:$4 sm:$0xff]   ;;  %v9891_v26 = vld [vmem:[%s11173_s15 + $0xda0] ss:$8 sps:$4 sm:$0xff]  }
 0x29f   : > { %v11708_v39 = vadd.f32 %v7938_v33, %v7898_v38  ;;  %8192 = vmatpush1.bf16.msra.mxu0 %v9816_v28  ;;  %v9896_v28 = vld [vmem:[%s11173_s15 + $0xc94] ss:$8 sps:$4 sm:$0xff]   ;;  %v9894_v30 = vld [vmem:[%s11173_s15 + $0xc90] ss:$8 sps:$4 sm:$0xff]   ;;  %v9900_v38 = vld [vmem:[%s11173_s15 + $0xc80] ss:$8 sps:$4 sm:$0xff]  }
 0x2a0   : > { %v7940_v23 = vpop.f32.mrf.mxu1  ;;  %v7900_v41 = vpop.f32.mrf.mxu0  ;;  %8193 = vmatprep.subr.bf16.mxu0 %v9824_v34  ;;  %v9897_v33 = vld [vmem:[%s11173_s15 + $0xd90] ss:$8 sps:$4 sm:$0xff]   ;;  %v9902_v34 = vld [vmem:[%s11173_s15 + $0xc84] ss:$8 sps:$4 sm:$0xff]   ;;  %v9903_v13 = vld [vmem:[%s11173_s15 + $0xd80] ss:$8 sps:$4 sm:$0xff]  }
 0x2a1   : > { %8233 = vmatpush1.bf16.msra.mxu1 %v9819_v29  ;;  %v9899_v29 = vld [vmem:[%s11173_s15 + $0xd94] ss:$8 sps:$4 sm:$0xff]   ;;  %v8648_v41 = vcombine.low %v11690_v55, %v11690_v55  ;;  %v9921_v55 = vld [vmem:[%s11173_s15 + $0xf64] ss:$8 sps:$4 sm:$0xff]  }
 0x2a2   : > { %v7941_v42 = vpop.f32.mrf.mxu1  ;;  %8234 = vmatprep.subr.bf16.mxu1 %v9827_v36  ;;  %v9905_v36 = vld [vmem:[%s11173_s15 + $0xd84] ss:$8 sps:$4 sm:$0xff]   ;;  %v9912_v23 = vld [vmem:[%s11173_s15 + $0xe74] ss:$8 sps:$4 sm:$0xff]  }
 0x2a3   : > { %8194 = vmatpush1.bf16.msra.mxu0 %v9822_v24  ;;  %v9915_v24 = vld [vmem:[%s11173_s15 + $0xf74] ss:$8 sps:$4 sm:$0xff]  }
 0x2a4   : > { %8195 = vmatprep.subr.bf16.mxu0 %v9830_v16  ;;  %v11773_v42 = vld [vmem:[%s11904_s0 + $0x70] sm:$0xff]  ;;  %v11778_v16 = vld [vmem:[%s11904_s0 + $0x78] sm:$0xff] }
 0x2a5   : > { %8235 = vmatpush1.bf16.msra.mxu1 %v9825_v40  ;;  %v8646_v40 = vcombine.low %v11685_v8, %v11685_v8  ;;  %v9918_v8 = vld [vmem:[%s11173_s15 + $0xe64] ss:$8 sps:$4 sm:$0xff]  }
 0x2a6   : > { %8236 = vmatprep.subr.bf16.mxu1 %v9833_v43  ;;  %v9910_v43 = vld [vmem:[%s11173_s15 + $0xe70] ss:$8 sps:$4 sm:$0xff]  }
 0x2a7   : > { %8196 = vmatpush1.bf16.msra.mxu0 %v9828_v44  ;;  %v9913_v44 = vld [vmem:[%s11173_s15 + $0xf70] ss:$8 sps:$4 sm:$0xff]  }
 0x2a8   : > { %8197 = vmatprep.subr.bf16.mxu0 %v9836_v46  ;;  %v8653_v46 = vcombine.high %v11778_v16, %v11778_v16 }
 0x2a9   : > { %8237 = vmatpush1.bf16.msra.mxu1 %v9831_v45  ;;  %v8651_v45 = vcombine.high %v11773_v42, %v11773_v42 }
 0x2aa   : > { %8238 = vmatprep.subr.bf16.mxu1 %v9839_v47 }
 0x2ab   : > { %8198 = vmatpush1.bf16.msra.mxu0 %v9834_v48 }
 0x2ac   : > { %8199 = vmatprep.subr.bf16.mxu0 %v9842_v51  ;;  %v9916_v51 = vld [vmem:[%s11173_s15 + $0xe60] ss:$8 sps:$4 sm:$0xff]  }
 0x2ad   : > { %8239 = vmatpush1.bf16.msra.mxu1 %v9837_v49 }
 0x2ae   : > { %8240 = vmatprep.subr.bf16.mxu1 %v9845_v52  ;;  %v9919_v52 = vld [vmem:[%s11173_s15 + $0xf60] ss:$8 sps:$4 sm:$0xff]  }
 0x2af   : > { %8200 = vmatpush1.bf16.msra.mxu0 %v9840_v53 }
 0x2b0   : > { %8201 = vmatprep.subr.bf16.mxu0 %v9848_v56  ;;  %v9924_v56 = vld [vmem:[%s11173_s15 + $0xe54] ss:$8 sps:$4 sm:$0xff]  }
 0x2b1   : > { %8241 = vmatpush1.bf16.msra.mxu1 %v9843_v54 }
 0x2b2   : > { %8242 = vmatprep.subr.bf16.mxu1 %v9851_v57  ;;  %v9927_v57 = vld [vmem:[%s11173_s15 + $0xf54] ss:$8 sps:$4 sm:$0xff]  }
 0x2b3   : > { %8202 = vmatpush1.bf16.msra.mxu0 %v9846_v58 }
 0x2b4   : > { %8203 = vmatprep.subr.bf16.mxu0 %v9854_v62 }
 0x2b5   : > { %8243 = vmatpush1.bf16.msra.mxu1 %v9849_v59 }
 0x2b6   : > { %8244 = vmatprep.subr.bf16.mxu1 %v9857_v63 }
 0x2b7   : > { %8204 = vmatpush1.bf16.msra.mxu0 %v9852_v32  ;;  %v9922_v32 = vld [vmem:[%s11173_s15 + $0xe50] ss:$8 sps:$4 sm:$0xff]  }
 0x2b8   : > { %8205 = vmatprep.subr.bf16.mxu0 %v9860_v2 }
 0x2b9   : > { %8245 = vmatpush1.bf16.msra.mxu1 %v9855_v35  ;;  %v9925_v35 = vld [vmem:[%s11173_s15 + $0xf50] ss:$8 sps:$4 sm:$0xff]  }
 0x2ba   : > { %8246 = vmatprep.subr.bf16.mxu1 %v9863_v3 }
 0x2bb   : > { %8206 = vmatpush2.bf16.msra.mxu0 %v9858_v4  ;;  %v9933_v4 = vld [vmem:[%s11173_s15 + $0xf44] ss:$8 sps:$4 sm:$0xff]  }
 0x2bc   : > { %8207 = vmatprep.subr.bf16.mxu0 %v9866_v6  ;;  %v9931_v6 = vld [vmem:[%s11173_s15 + $0xf40] ss:$8 sps:$4 sm:$0xff]  }
 0x2bd   : > { %8247 = vmatpush2.bf16.msra.mxu1 %v9861_v5  ;;  %v9928_v5 = vld [vmem:[%s11173_s15 + $0xe40] ss:$8 sps:$4 sm:$0xff]  }
 0x2be   : > { %8248 = vmatprep.subr.bf16.mxu1 %v9869_v7  ;;  %v9936_v7 = vld [vmem:[%s11173_s15 + $0xe34] ss:$8 sps:$4 sm:$0xff]  }
 0x2bf   : > { %8208 = vmatpush2.bf16.msra.mxu0 %v9864_v10  ;;  %v9939_v10 = vld [vmem:[%s11173_s15 + $0xf34] ss:$8 sps:$4 sm:$0xff]  }
 0x2c0   : > { %8209 = vmatprep.subr.bf16.mxu0 %v9872_v12  ;;  %v9937_v12 = vld [vmem:[%s11173_s15 + $0xf30] ss:$8 sps:$4 sm:$0xff]  }
 0x2c1   : > { %8249 = vmatpush2.bf16.msra.mxu1 %v9867_v11  ;;  %v9934_v11 = vld [vmem:[%s11173_s15 + $0xe30] ss:$8 sps:$4 sm:$0xff]  }
 0x2c2   : > { %8250 = vmatprep.subr.bf16.mxu1 %v9875_v14  ;;  %v9942_v14 = vld [vmem:[%s11173_s15 + $0xe24] ss:$8 sps:$4 sm:$0xff]  }
 0x2c3   : > { %8210 = vmatpush2.bf16.msra.mxu0 %v9870_v50  ;;  %v9945_v50 = vld [vmem:[%s11173_s15 + $0xf24] ss:$8 sps:$4 sm:$0xff]  }
 0x2c4   : > { %8211 = vmatprep.subr.bf16.mxu0 %v9878_v0  ;;  %v9943_v0 = vld [vmem:[%s11173_s15 + $0xf20] ss:$8 sps:$4 sm:$0xff]  }
 0x2c5   : > { %8251 = vmatpush2.bf16.msra.mxu1 %v9873_v15  ;;  %v9940_v15 = vld [vmem:[%s11173_s15 + $0xe20] ss:$8 sps:$4 sm:$0xff]  }
 0x2c6   : > { %8252 = vmatprep.subr.bf16.mxu1 %v9881_v1  ;;  %v9948_v1 = vld [vmem:[%s11173_s15 + $0xe14] ss:$8 sps:$4 sm:$0xff]  }
 0x2c7   : > { %8212 = vmatpush2.bf16.msra.mxu0 %v9876_v17  ;;  %v9951_v17 = vld [vmem:[%s11173_s15 + $0xf14] ss:$8 sps:$4 sm:$0xff]  }
 0x2c8   : > { %8213 = vmatprep.subr.bf16.mxu0 %v9884_v20  ;;  %v9949_v20 = vld [vmem:[%s11173_s15 + $0xf10] ss:$8 sps:$4 sm:$0xff]  }
 0x2c9   : > { %8253 = vmatpush2.bf16.msra.mxu1 %v9879_v9  ;;  %v9946_v9 = vld [vmem:[%s11173_s15 + $0xe10] ss:$8 sps:$4 sm:$0xff]  }
 0x2ca   : > { %8254 = vmatprep.subr.bf16.mxu1 %v9887_v60  ;;  %v9954_v60 = vld [vmem:[%s11173_s15 + $0xe04] ss:$8 sps:$4 sm:$0xff]  }
 0x2cb   : > { %8214 = vmatpush2.bf16.msra.mxu0 %v9882_v61  ;;  %v9957_v61 = vld [vmem:[%s11173_s15 + $0xf04] ss:$8 sps:$4 sm:$0xff]  }
 0x2cc   : > { %8215 = vmatprep.subr.bf16.mxu0 %v9890_v25  ;;  %v9955_v25 = vld [vmem:[%s11173_s15 + $0xf00] ss:$8 sps:$4 sm:$0xff]  }
 0x2cd   : > { %8255 = vmatpush2.bf16.msra.mxu1 %v9885_v22  ;;  %v9952_v22 = vld [vmem:[%s11173_s15 + $0xe00] ss:$8 sps:$4 sm:$0xff]  }
 0x2ce   : > { %8256 = vmatprep.subr.bf16.mxu1 %v9893_v18  ;;  %v9960_v18 = vld [vmem:[%s11173_s15 + $0xef4] ss:$8 sps:$4 sm:$0xff]  }
 0x2cf   : > { %8216 = vmatpush2.bf16.msra.mxu0 %v9888_v19  ;;  %v9963_v19 = vld [vmem:[%s11173_s15 + $0xff4] ss:$8 sps:$4 sm:$0xff]  }
 0x2d0   : > { %8217 = vmatprep.subr.bf16.mxu0 %v9896_v28  ;;  %v9961_v28 = vld [vmem:[%s11173_s15 + $0xff0] ss:$8 sps:$4 sm:$0xff]  }
 0x2d1   : > { %8257 = vmatpush2.bf16.msra.mxu1 %v9891_v26  ;;  %v9958_v26 = vld [vmem:[%s11173_s15 + $0xef0] ss:$8 sps:$4 sm:$0xff]  }
 0x2d2   : > { %8258 = vmatprep.subr.bf16.mxu1 %v9899_v29  ;;  %v9966_v29 = vld [vmem:[%s11173_s15 + $0xee4] ss:$8 sps:$4 sm:$0xff]  }
 0x2d3   : > { %8218 = vmatpush2.bf16.msra.mxu0 %v9894_v30  ;;  %v9969_v30 = vld [vmem:[%s11173_s15 + $0xfe4] ss:$8 sps:$4 sm:$0xff]  }
 0x2d4   : > { %8219 = vmatprep.subr.bf16.mxu0 %v9902_v34  ;;  %v9967_v34 = vld [vmem:[%s11173_s15 + $0xfe0] ss:$8 sps:$4 sm:$0xff]  }
 0x2d5   : > { %8259 = vmatpush2.bf16.msra.mxu1 %v9897_v33  ;;  %v9964_v33 = vld [vmem:[%s11173_s15 + $0xee0] ss:$8 sps:$4 sm:$0xff]  }
 0x2d6   : > { %8260 = vmatprep.subr.bf16.mxu1 %v9905_v36  ;;  %v9972_v36 = vld [vmem:[%s11173_s15 + $0xed4] ss:$8 sps:$4 sm:$0xff]  }
 0x2d7   : > { %8220 = vmatpush2.bf16.msra.mxu0 %v9900_v38  ;;  %v9975_v38 = vld [vmem:[%s11173_s15 + $0xfd4] ss:$8 sps:$4 sm:$0xff]  }
 0x2d8   : > { %8271 = vmatprep.subr.bf16.mxu0 %v9912_v23  ;;  %v9973_v23 = vld [vmem:[%s11173_s15 + $0xfd0] ss:$8 sps:$4 sm:$0xff]  }
 0x2d9   : > { %8261 = vmatpush2.bf16.msra.mxu1 %v9903_v13  ;;  %v9970_v13 = vld [vmem:[%s11173_s15 + $0xed0] ss:$8 sps:$4 sm:$0xff]  }
 0x2da   : > { %8312 = vmatprep.subr.bf16.mxu1 %v9915_v24  ;;  %v7977_v47 = vpop.f32.mrf.mxu0  ;;  %8222 = vmatmul.mubr.bf16.vlgmr.msra.gmra.mxu0 %v8646_v40  ;;  %v9978_v24 = vld [vmem:[%s11173_s15 + $0xec4] ss:$8 sps:$4 sm:$0xff]  }
 0x2db   : > { %v7978_v49 = vadd.f32 %v7977_v47, %v11705_v37  ;;  %8272 = vmatpush1.bf16.msra.mxu0 %v9910_v43  ;;  %8303 = vmatprep.mubr.bf16.mxu0 %v8651_v45  ;;  %v9981_v40 = vld [vmem:[%s11173_s15 + $0xfc4] ss:$8 sps:$4 sm:$0xff]   ;;  %v9979_v43 = vld [vmem:[%s11173_s15 + $0xfc0] ss:$8 sps:$4 sm:$0xff]   ;;  %v9985_v45 = vld [vmem:[%s11173_s15 + $0xfb0] ss:$8 sps:$4 sm:$0xff]  }
 0x2dc   : > { %v8018_v48 = vpop.f32.mrf.mxu1  ;;  %8263 = vmatmul.mubr.bf16.vlgmr.msra.gmra.mxu1 %v8648_v41  ;;  %v7979_v53 = vpop.f32.mrf.mxu0  ;;  %8273 = vmatprep.subr.bf16.mxu0 %v9918_v8  ;;  %v9976_v41 = vld [vmem:[%s11173_s15 + $0xec0] ss:$8 sps:$4 sm:$0xff]   ;;  %v9987_v8 = vld [vmem:[%s11173_s15 + $0xfb4] ss:$8 sps:$4 sm:$0xff]   ;;  %v9993_v47 = vld [vmem:[%s11173_s15 + $0xfa4] ss:$8 sps:$4 sm:$0xff]  }
 0x2dd   : > { %8313 = vmatpush1.bf16.msra.mxu1 %v9913_v44  ;;  %v11793_v58 = vadd.f32 %v8018_v48, %v7978_v49  ;;  %v7980_v59 = vadd.f32 %v7979_v53, %v11708_v39  ;;  %8344 = vmatprep.mubr.bf16.mxu1 %v8653_v46  ;;  %v9930_v39 = vld [vmem:[%s11173_s15 + $0xe44] ss:$8 sps:$4 sm:$0xff]   ;;  %v9984_v44 = vld [vmem:[%s11173_s15 + $0xeb4] ss:$8 sps:$4 sm:$0xff]   ;;  %v9988_v48 = vld [vmem:[%s11173_s15 + $0xea0] ss:$8 sps:$4 sm:$0xff]  }
 0x2de   : > { %v8020_v54 = vpop.f32.mrf.mxu1  ;;  %8314 = vmatprep.subr.bf16.mxu1 %v9921_v55  ;;  %v7981_v37 = vpop.f32.mrf.mxu0  ;;  %v9982_v55 = vld [vmem:[%s11173_s15 + $0xeb0] ss:$8 sps:$4 sm:$0xff]   ;;  %v9990_v46 = vld [vmem:[%s11173_s15 + $0xea4] ss:$8 sps:$4 sm:$0xff]   ;;  %v9991_v49 = vld [vmem:[%s11173_s15 + $0xfa0] ss:$8 sps:$4 sm:$0xff]  }
 0x2df   : > { %v11796_v63 = vadd.f32 %v8020_v54, %v7980_v59  ;;  %8274 = vmatpush1.bf16.msra.mxu0 %v9916_v51  ;;  %v9996_v51 = vld [vmem:[%s11173_s15 + $0xe94] ss:$8 sps:$4 sm:$0xff]   ;;  %v9994_v53 = vld [vmem:[%s11173_s15 + $0xe90] ss:$8 sps:$4 sm:$0xff]   ;;  %v10000_v59 = vld [vmem:[%s11173_s15 + $0xe80] ss:$8 sps:$4 sm:$0xff]  }
 0x2e0   : > { %v8022_v62 = vpop.f32.mrf.mxu1  ;;  %v7982_v2 = vpop.f32.mrf.mxu0  ;;  %8275 = vmatprep.subr.bf16.mxu0 %v9924_v56  ;;  %v9997_v54 = vld [vmem:[%s11173_s15 + $0xf90] ss:$8 sps:$4 sm:$0xff]   ;;  %v10002_v56 = vld [vmem:[%s11173_s15 + $0xe84] ss:$8 sps:$4 sm:$0xff]   ;;  %v10003_v37 = vld [vmem:[%s11173_s15 + $0xf80] ss:$8 sps:$4 sm:$0xff]  }
 0x2e1   : > { %8315 = vmatpush1.bf16.msra.mxu1 %v9919_v52  ;;  %v9999_v52 = vld [vmem:[%s11173_s15 + $0xf94] ss:$8 sps:$4 sm:$0xff]   ;;  %v8650_v62 = vcombine.low %v11773_v42, %v11773_v42 }
 0x2e2   : > { %v8023_v3 = vpop.f32.mrf.mxu1  ;;  %8316 = vmatprep.subr.bf16.mxu1 %v9927_v57  ;;  %v10005_v57 = vld [vmem:[%s11173_s15 + $0xf84] ss:$8 sps:$4 sm:$0xff]   ;;  %s8621_s15 = sshll.u32 %s11917_s9, 3 }
 0x2e3   : > { %8276 = vmatpush1.bf16.msra.mxu0 %v9922_v32  ;;  %v8652_v32 = vcombine.low %v11778_v16, %v11778_v16  ;;  %s11862_s12 = scalar_lea.vmem %s11909_s5, %s8621_s15 }
 0x2e4   : > { %8277 = vmatprep.subr.bf16.mxu0 %v9930_v39 }
 0x2e5   : > { %8317 = vmatpush1.bf16.msra.mxu1 %v9925_v35 }
 0x2e6   : > { %8318 = vmatprep.subr.bf16.mxu1 %v9933_v4 }
 0x2e7   : > { %8278 = vmatpush1.bf16.msra.mxu0 %v9928_v5 }
 0x2e8   : > { %8279 = vmatprep.subr.bf16.mxu0 %v9936_v7 }
 0x2e9   : > { %8319 = vmatpush1.bf16.msra.mxu1 %v9931_v6 }
 0x2ea   : > { %8320 = vmatprep.subr.bf16.mxu1 %v9939_v10 }
 0x2eb   : > { %8280 = vmatpush1.bf16.msra.mxu0 %v9934_v11 }
 0x2ec   : > { %8281 = vmatprep.subr.bf16.mxu0 %v9942_v14 }
 0x2ed   : > { %8321 = vmatpush1.bf16.msra.mxu1 %v9937_v12 }
 0x2ee   : > { %8322 = vmatprep.subr.bf16.mxu1 %v9945_v50 }
 0x2ef   : > { %8282 = vmatpush1.bf16.msra.mxu0 %v9940_v15 }
 0x2f0   : > { %8283 = vmatprep.subr.bf16.mxu0 %v9948_v1 }
 0x2f1   : > { %8323 = vmatpush1.bf16.msra.mxu1 %v9943_v0 }
 0x2f2   : > { %8324 = vmatprep.subr.bf16.mxu1 %v9951_v17 }
 0x2f3   : > { %8284 = vmatpush1.bf16.msra.mxu0 %v9946_v9 }
 0x2f4   : > { %8285 = vmatprep.subr.bf16.mxu0 %v9954_v60 }
 0x2f5   : > { %8325 = vmatpush1.bf16.msra.mxu1 %v9949_v20 }
 0x2f6   : > { %8326 = vmatprep.subr.bf16.mxu1 %v9957_v61 }
 0x2f7   : > { %8286 = vmatpush1.bf16.msra.mxu0 %v9952_v22 }
 0x2f8   : > { %8287 = vmatprep.subr.bf16.mxu0 %v9960_v18 }
 0x2f9   : > { %8327 = vmatpush1.bf16.msra.mxu1 %v9955_v25 }
 0x2fa   : > { %8328 = vmatprep.subr.bf16.mxu1 %v9963_v19 }
 0x2fb   : > { %8288 = vmatpush2.bf16.msra.mxu0 %v9958_v26 }
 0x2fc   : > { %8289 = vmatprep.subr.bf16.mxu0 %v9966_v29 }
 0x2fd   : > { %8329 = vmatpush2.bf16.msra.mxu1 %v9961_v28 }
 0x2fe   : > { %8330 = vmatprep.subr.bf16.mxu1 %v9969_v30 }
 0x2ff   : > { %8290 = vmatpush2.bf16.msra.mxu0 %v9964_v33 }
 0x300   : > { %8291 = vmatprep.subr.bf16.mxu0 %v9972_v36 }
 0x301   : > { %8331 = vmatpush2.bf16.msra.mxu1 %v9967_v34 }
 0x302   : > { %8332 = vmatprep.subr.bf16.mxu1 %v9975_v38 }
 0x303   : > { %8292 = vmatpush2.bf16.msra.mxu0 %v9970_v13 }
 0x304   : > { %8293 = vmatprep.subr.bf16.mxu0 %v9978_v24 }
 0x305   : > { %8333 = vmatpush2.bf16.msra.mxu1 %v9973_v23 }
 0x306   : > { %8334 = vmatprep.subr.bf16.mxu1 %v9981_v40 }
 0x307   : > { %8294 = vmatpush2.bf16.msra.mxu0 %v9976_v41 }
 0x308   : > { %8295 = vmatprep.subr.bf16.mxu0 %v9984_v44 }
 0x309   : > { %8335 = vmatpush2.bf16.msra.mxu1 %v9979_v43 }
 0x30a   : > { %8336 = vmatprep.subr.bf16.mxu1 %v9987_v8 }
 0x30b   : > { %8296 = vmatpush2.bf16.msra.mxu0 %v9982_v55 }
 0x30c   : > { %8297 = vmatprep.subr.bf16.mxu0 %v9990_v46 }
 0x30d   : > { %8337 = vmatpush2.bf16.msra.mxu1 %v9985_v45 }
 0x30e   : > { %8338 = vmatprep.subr.bf16.mxu1 %v9993_v47 }
 0x30f   : > { %8298 = vmatpush2.bf16.msra.mxu0 %v9988_v48 }
 0x310   : > { %8299 = vmatprep.subr.bf16.mxu0 %v9996_v51 }
 0x311   : > { %8339 = vmatpush2.bf16.msra.mxu1 %v9991_v49 }
 0x312   : > { %8340 = vmatprep.subr.bf16.mxu1 %v9999_v52 }
 0x313   : > { %8300 = vmatpush2.bf16.msra.mxu0 %v9994_v53 }
 0x314   : > { %8301 = vmatprep.subr.bf16.mxu0 %v10002_v56 }
 0x315   : > { %8341 = vmatpush2.bf16.msra.mxu1 %v9997_v54 }
 0x316   : > { %8342 = vmatprep.subr.bf16.mxu1 %v10005_v57 }
 0x317   : > { %8302 = vmatpush2.bf16.msra.mxu0 %v10000_v59 }
 0x319   : > { %8343 = vmatpush2.bf16.msra.mxu1 %v10003_v37 }
 0x31a   : > { %v8059_v35 = vpop.f32.mrf.mxu0  ;;  %8304 = vmatmul.mubr.bf16.vlgmr.msra.gmra.mxu0 %v8650_v62 }
 0x31b   : > { %v8060_v3 = vadd.f32 %v8059_v35, %v11793_v58 }
 0x31c   : > { %v8100_v2 = vpop.f32.mrf.mxu1  ;;  %8345 = vmatmul.mubr.bf16.vlgmr.msra.gmra.mxu1 %v8652_v32  ;;  %v8061_v39 = vpop.f32.mrf.mxu0 }
 0x31d   : > { %v8101_v5 = vadd.f32 %v8100_v2, %v8060_v3  ;;  %v8062_v6 = vadd.f32 %v8061_v39, %v11796_v63 }
 0x31e   : > { %v8102_v4 = vpop.f32.mrf.mxu1  ;;  %v8063_v7 = vpop.f32.mrf.mxu0 }
 0x31f   : > { %v8103_v11 = vadd.f32 %v8102_v4, %v8062_v6 }
 0x320   : > { %v8104_v10 = vpop.f32.mrf.mxu1  ;;  %v8064_v42 = vpop.f32.mrf.mxu0 }
 0x322   : > { %v8105_v12 = vpop.f32.mrf.mxu1 }
 0x35a   : > { %v8141_v14 = vpop.f32.mrf.mxu0 }
 0x35b   : > { %v8142_v50 = vadd.f32 %v8141_v14, %v8101_v5 }
 0x35c   : > { %v8182_v16 = vpop.f32.mrf.mxu1  ;;  %v8143_v15 = vpop.f32.mrf.mxu0 }
 0x35d   : > { %v8183_v1 = vadd.f32 %v8182_v16, %v8142_v50  ;;  %v8144_v17 = vadd.f32 %v8143_v15, %v8103_v11 }
 0x35e   : > { %v8184_v0 = vpop.f32.mrf.mxu1  ;;  %v8145_v9 = vpop.f32.mrf.mxu0 }
 0x35f   : > { %v8185_v20 = vadd.f32 %v8184_v0, %v8144_v17 }
 0x360   : > { %v8186_v58 = vpop.f32.mrf.mxu1  ;;  %v8146_v60 = vpop.f32.mrf.mxu0 }
 0x361   : > { %v10054_v60 = vmov 1966171168  }
 0x362   : > { %v8187_v61 = vpop.f32.mrf.mxu1 }
 0x363   : > { %v8414_v61 = vunpack.c.l.s4 %v10054_v60 }
 0x39a   : > { %v8223_v22 = vpop.f32.mrf.mxu0 }
 0x39b   : > { %v8224_v30 = vadd.f32 %v8223_v22, %v8183_v1  ;;  %v8415_v22 = vunpack.c.0.s8 %v8414_v61 }
 0x39c   : > { %v8264_v63 = vpop.f32.mrf.mxu1  ;;  %v8225_v25 = vpop.f32.mrf.mxu0 }
 0x39d   : > { %v8226_v33 = vadd.f32 %v8225_v25, %v8185_v20  ;;  %v8265_v34 = vadd.f32 %v8264_v63, %v8224_v30  ;;  %v8418_v25 = vsub.s32 %v8415_v22, %v11484_v21 }
 0x39e   : > { %v8266_v18 = vpop.f32.mrf.mxu1  ;;  %v8227_v19 = vpop.f32.mrf.mxu0 }
 0x39f   : > { %v8267_v13 = vadd.f32 %v8266_v18, %v8226_v33 }
 0x3a0   : > { %v8268_v26 = vpop.f32.mrf.mxu1  ;;  %v8228_v28 = vpop.f32.mrf.mxu0 }
 0x3a1   : > { %v8405_v28 = vld [vmem:[%s4471_s16] sm:$0x3] }
 0x3a2   : > { %v8269_v29 = vpop.f32.mrf.mxu1 }
 0x3da   : > { %v8305_v36 = vpop.f32.mrf.mxu0 }
 0x3db   : > { %v8306_v23 = vadd.f32 %v8305_v36, %v8265_v34 }
 0x3dc   : > { %v8346_v38 = vpop.f32.mrf.mxu1  ;;  %v8307_v24 = vpop.f32.mrf.mxu0 }
 0x3dd   : > { %v8347_v41 = vadd.f32 %v8346_v38, %v8306_v23  ;;  %v8308_v43 = vadd.f32 %v8307_v24, %v8267_v13  ;;  %v8429_v23 = vld [vmem:[%s4476_s24] sm:$0x3] }
 0x3de   : > { %v8348_v40 = vpop.f32.mrf.mxu1  ;;  %v8309_v44 = vpop.f32.mrf.mxu0 }
 0x3df   : > { %8358 = vst [vmem:[%s11862_s12] sm:$0xff] %v8347_v41  ;;  %v11865_v55 = vadd.f32 %v8348_v40, %v8308_v43 }
 0x3e0   : > { %v8350_v8 = vpop.f32.mrf.mxu1  ;;  %v8310_v45 = vpop.f32.mrf.mxu0 }
 0x3e1   : > { %8359 = vst [vmem:[%s11862_s12 + $0x8] sm:$0xff] %v11865_v55  ;;  %v8377_v47 = vrot.slane %v11865_v55, 4 }
 0x3e2   : > { %v8351_v46 = vpop.f32.mrf.mxu1 }
 0x3e3   : > { %v8378_v48 = vadd.f32 %v8377_v47, %v11865_v55 }
 0x3e5   : > { %v8379_v49 = vrot.slane %v8378_v48, 2 }
 0x3e6   : > { %v8364_v52 = vld [vmem:[%s11862_s12] sm:$0xff] }
 0x3e7   : > { %v8380_v51 = vadd.f32 %v8379_v49, %v8378_v48  ;;  %v8371_v53 = vrot.slane %v8364_v52, 4 }
 0x3e9   : > { %v8381_v54 = vrot.slane %v8380_v51, 1  ;;  %v8372_v56 = vadd.f32 %v8371_v53, %v8364_v52 }
 0x3eb   : > { %v8382_v57 = vadd.f32 %v8381_v54, %v8380_v51  ;;  %v8373_v59 = vrot.slane %v8372_v56, 2 }
 0x3ed   : > { %v8384_v37 = vmul.f32 0.125, %v8382_v57  ;;  %v8374_v62 = vadd.f32 %v8373_v59, %v8372_v56 }
 0x3ef   : > { %v8386_v32 = vsub.f32 %v11865_v55, %v8384_v37  ;;  %v8375_v35 = vrot.slane %v8374_v62, 1 }
 0x3f1   : > { %v8390_v2 = vmul.f32 %v8386_v32, %v8386_v32  ;;  %v8376_v3 = vadd.f32 %v8375_v35, %v8374_v62 }
 0x3f3   : > { %v8397_v39 = vrot.slane %v8390_v2, 4  ;;  %v8383_v4 = vmul.f32 0.125, %v8376_v3 }
 0x3f5   : > { %v8398_v5 = vadd.f32 %v8397_v39, %v8390_v2  ;;  %v8385_v6 = vsub.f32 %v8364_v52, %v8383_v4 }
 0x3f7   : > { %v8399_v7 = vrot.slane %v8398_v5, 2  ;;  %v8389_v10 = vmul.f32 %v8385_v6, %v8385_v6 }
 0x3f9   : > { %v8400_v11 = vadd.f32 %v8399_v7, %v8398_v5  ;;  %v8391_v42 = vrot.slane %v8389_v10, 4 }
 0x3fb   : > { %v8401_v12 = vrot.slane %v8400_v11, 1  ;;  %v8392_v14 = vadd.f32 %v8391_v42, %v8389_v10 }
 0x3fd   : > { %v8402_v16 = vadd.f32 %v8401_v12, %v8400_v11  ;;  %v8393_v50 = vrot.slane %v8392_v14, 2 }
 0x3ff   : > { %v8394_v15 = vadd.f32 %v8393_v50, %v8392_v14  ;;  %v8404_v0 = vmul.f32 0.125, %v8402_v16 }
 0x401   : > { %v8395_v1 = vrot.slane %v8394_v15, 1  ;;  %v8407_v9 = vadd.f32 1e-05, %v8404_v0 }
 0x403   : > { %v8396_v17 = vadd.f32 %v8395_v1, %v8394_v15  ;;  %10010 = vrsqrt.f32 %v8407_v9 }
 0x405   : > { %v8403_v58 = vmul.f32 0.125, %v8396_v17 }
 0x407   : > { %v8406_v20 = vadd.f32 1e-05, %v8403_v58 }
 0x409   : > { %10012 = vrsqrt.f32 %v8406_v20 }
 0x410   : > { %v10011_v63 = vpop.eup %10010 }
 0x416   : > { %v10013_v18 = vpop.eup %10012 }
 0x417   : > { %v8412_v19 = vcombine.low %v10013_v18, %v10011_v63 }
 0x419   : > { %v8419_v26 = vrot.slane %v8412_v19, %v8418_v25 }
 0x41b   : > { %v8426_v29 = vrot.slane %v8419_v26, %v8418_v25 }
 0x41d   : > { %v8428_v30 = vmul.f32 %v8426_v29, %v8405_v28 }
 0x41f   : > { %v8434_v33 = vrot.slane %v8428_v30, %v11495_v27  ;;  %v8438_v34 = vrot.slane %v8428_v30, %v11501_v31 }
 0x421   : > { %v8441_v36 = vmul.f32 %v8434_v33, %v8383_v4  ;;  %v8442_v38 = vmul.f32 %v8438_v34, %v8384_v37  ;;  %v8462_v41 = vmul.f32 %v8434_v33, %v8364_v52  ;;  %v8463_v43 = vmul.f32 %v8438_v34, %v11865_v55 }
 0x423   : > { %v8445_v21 = vcombine.low %v8441_v36, %v8442_v38 }
 0x425   : > { %v8452_v13 = vrot.slane %v8445_v21, %v8418_v25 }
 0x427   : > { %v8459_v24 = vrot.slane %v8452_v13, %v8418_v25 }
 0x429   : > { %v8461_v40 = vsub.f32 %v8429_v23, %v8459_v24 }
 0x42b   : > { %v8468_v44 = vrot.slane %v8461_v40, %v11495_v27  ;;  %v8472_v8 = vrot.slane %v8461_v40, %v11501_v31 }
 0x42d   : > { %v8475_v45 = vadd.f32 %v8468_v44, %v8462_v41  ;;  %v8476_v46 = vadd.f32 %v8472_v8, %v8463_v43 }
 0x42f   : > { %v8477_v47 = vmul.f32 0.2, %v8475_v45  ;;  %v8478_v48 = vmul.f32 0.2, %v8476_v46 }
 0x431   : > { %v8479_v49 = vmax.f32 %v8475_v45, %v8477_v47  ;;  %v8480_v51 = vmax.f32 %v8476_v46, %v8478_v48 }
 0x433   : > { %8481 = vst [vmem:[%s11862_s12] sm:$0xff] %v8479_v49  ;;  %8482 = vst [vmem:[%s11862_s12 + $0x8] sm:$0xff] %v8480_v51 }
 0x434 PF: > { %s15_s22 = sadd.s32 1, %s10052_s22   ;;  %s11910_s18 = smov %s10040_s19 }
 0x435   : > { %p12_p10 = scmp.ge.s32.totalorder %s15_s22, 4   ;;  %s11911_s19 = smov %s10120_s26 }
 0x436   : > { %s11912_s20 = smov %s10048_s21  ;;  %s11913_s21 = smov %s11915_s23 }
 0x437   :  { %14 = sbr.rel (!%p12_p10) target bundleno = 3 (0x3), region = 150 }

// kernel: discriminator_forward.11
= control target key start
LH: loop header
LB: loop body
LE: loop exit
PB: predicated region body
PF: predicated region fallthrough
CT: control target
= control target key end

     0   :  { %s5192_s1 = inlined_call_operand.vmem [shape: bf16[4608,128], index: 1, kind: input, shape index: {}]   ;;  %s5193_s0 = inlined_call_operand.vmem [shape: bf16[8,4608], index: 0, kind: input, shape index: {}]   ;;  %s5194_s2 = inlined_call_operand.vmem [shape: f32[1,128], index: 2, kind: input, shape index: {}]   ;;  %s5195_s3 = inlined_call_operand.vmem [shape: f32[8,128], index: 3, kind: output, shape index: {}]  }
   0x1   :  { %v3918_v0 = vld [vmem:[%s5192_s1 + $0x78] sm:$0xff]   ;;  %v3922_v4 = vld [vmem:[%s5192_s1 + $0x70] sm:$0xff]   ;;  %v3926_v8 = vld [vmem:[%s5192_s1 + $0x68] sm:$0xff]  }
   0x2   :  { %v3919_v1 = vld [vmem:[%s5192_s1 + $0xf8] sm:$0xff]   ;;  %3522 = vmatprep.subr.bf16.mxu0 %v3918_v0  ;;  %v3923_v5 = vld [vmem:[%s5192_s1 + $0xf0] sm:$0xff]   ;;  %v3927_v9 = vld [vmem:[%s5192_s1 + $0xe8] sm:$0xff]  }
   0x3   :  { %v3920_v2 = vld [vmem:[%s5192_s1 + $0x38] sm:$0xff]   ;;  %3544 = vmatprep.subr.bf16.mxu1 %v3919_v1  ;;  %v3924_v6 = vld [vmem:[%s5192_s1 + $0x30] sm:$0xff]   ;;  %v3928_v10 = vld [vmem:[%s5192_s1 + $0x28] sm:$0xff]  }
   0x4   :  { %v3921_v3 = vld [vmem:[%s5192_s1 + $0xb8] sm:$0xff]   ;;  %3523 = vmatpush3.bf16.msra.mxu0 %v3920_v2  ;;  %v3925_v7 = vld [vmem:[%s5192_s1 + $0xb0] sm:$0xff]   ;;  %v3929_v11 = vld [vmem:[%s5192_s1 + $0xa8] sm:$0xff]  }
   0x5   :  { %3545 = vmatpush3.bf16.msra.mxu1 %v3921_v3  ;;  %3524 = vmatprep.subr.bf16.mxu0 %v3922_v4  ;;  %v3930_v12 = vld [vmem:[%s5192_s1 + $0x60] sm:$0xff]   ;;  %v3934_v16 = vld [vmem:[%s5192_s1 + $0x58] sm:$0xff]   ;;  %v3938_v20 = vld [vmem:[%s5192_s1 + $0x50] sm:$0xff]  }
   0x6   :  { %3546 = vmatprep.subr.bf16.mxu1 %v3923_v5  ;;  %v3931_v13 = vld [vmem:[%s5192_s1 + $0xe0] sm:$0xff]   ;;  %v3935_v17 = vld [vmem:[%s5192_s1 + $0xd8] sm:$0xff]   ;;  %v3939_v21 = vld [vmem:[%s5192_s1 + $0xd0] sm:$0xff]  }
   0x7   :  { %v3932_v14 = vld [vmem:[%s5192_s1 + $0x20] sm:$0xff]   ;;  %v3936_v18 = vld [vmem:[%s5192_s1 + $0x18] sm:$0xff]   ;;  %v3940_v22 = vld [vmem:[%s5192_s1 + $0x10] sm:$0xff]  }
   0x8   :  { %3525 = vmatpush3.bf16.msra.mxu0 %v3924_v6  ;;  %v3933_v15 = vld [vmem:[%s5192_s1 + $0xa0] sm:$0xff]   ;;  %v3937_v19 = vld [vmem:[%s5192_s1 + $0x98] sm:$0xff]   ;;  %v3941_v23 = vld [vmem:[%s5192_s1 + $0x90] sm:$0xff]  }
   0x9   :  { %3547 = vmatpush3.bf16.msra.mxu1 %v3925_v7  ;;  %3526 = vmatprep.subr.bf16.mxu0 %v3926_v8  ;;  %v3942_v24 = vld [vmem:[%s5192_s1 + $0x48] sm:$0xff]   ;;  %v3946_v28 = vld [vmem:[%s5192_s1 + $0x40] sm:$0xff]   ;;  %v3954_v38 = vld [vmem:[%s5192_s1 + $0x178] sm:$0xff]  }
   0xa   :  { %3548 = vmatprep.subr.bf16.mxu1 %v3927_v9  ;;  %v3943_v25 = vld [vmem:[%s5192_s1 + $0xc8] sm:$0xff]   ;;  %v3947_v29 = vld [vmem:[%s5192_s1 + $0xc0] sm:$0xff]   ;;  %v3955_v39 = vld [vmem:[%s5192_s1 + $0x1f8] sm:$0xff]  }
   0xb   :  { %v3944_v26 = vld [vmem:[%s5192_s1 + $0x8] sm:$0xff]   ;;  %v3948_v30 = vld [vmem:[%s5192_s1] sm:$0xff]   ;;  %v3956_v40 = vld [vmem:[%s5192_s1 + $0x138] sm:$0xff]  }
   0xc   :  { %3527 = vmatpush3.bf16.msra.mxu0 %v3928_v10  ;;  %v3945_v27 = vld [vmem:[%s5192_s1 + $0x88] sm:$0xff]   ;;  %v3949_v31 = vld [vmem:[%s5192_s1 + $0x80] sm:$0xff]   ;;  %v3957_v41 = vld [vmem:[%s5192_s1 + $0x1b8] sm:$0xff]  }
   0xd   :  { %3549 = vmatpush3.bf16.msra.mxu1 %v3929_v11  ;;  %3528 = vmatprep.subr.bf16.mxu0 %v3930_v12  ;;  %v16_v32 = vld [vmem:[%s5193_s0] sm:$0xff]  ;;  %v17_v33 = vld [vmem:[%s5193_s0 + $0x8] sm:$0xff]  ;;  %v3958_v42 = vld [vmem:[%s5192_s1 + $0x170] sm:$0xff]  }
   0xe   :  { %3550 = vmatprep.subr.bf16.mxu1 %v3931_v13  ;;  %v3198_v34 = vcombine.low %v16_v32, %v16_v32  ;;  %v3199_v35 = vcombine.high %v16_v32, %v16_v32  ;;  %v3200_v36 = vcombine.low %v17_v33, %v17_v33  ;;  %v3201_v37 = vcombine.high %v17_v33, %v17_v33  ;;  %v3959_v43 = vld [vmem:[%s5192_s1 + $0x1f0] sm:$0xff]   ;;  %v3962_v46 = vld [vmem:[%s5192_s1 + $0x168] sm:$0xff]   ;;  %v3966_v50 = vld [vmem:[%s5192_s1 + $0x160] sm:$0xff]  }
   0xf   :  { %v3960_v44 = vld [vmem:[%s5192_s1 + $0x130] sm:$0xff]   ;;  %v3963_v47 = vld [vmem:[%s5192_s1 + $0x1e8] sm:$0xff]   ;;  %v3967_v51 = vld [vmem:[%s5192_s1 + $0x1e0] sm:$0xff]  }
  0x10   :  { %3529 = vmatpush3.bf16.msra.mxu0 %v3932_v14  ;;  %2503 = vmatprep.mubr.bf16.mxu0 %v3199_v35  ;;  %v3961_v45 = vld [vmem:[%s5192_s1 + $0x1b0] sm:$0xff]   ;;  %v3964_v48 = vld [vmem:[%s5192_s1 + $0x128] sm:$0xff]   ;;  %v3968_v52 = vld [vmem:[%s5192_s1 + $0x120] sm:$0xff]  }
  0x11   :  { %3551 = vmatpush3.bf16.msra.mxu1 %v3933_v15  ;;  %3530 = vmatprep.subr.bf16.mxu0 %v3934_v16  ;;  %v3965_v49 = vld [vmem:[%s5192_s1 + $0x1a8] sm:$0xff]   ;;  %v3969_v53 = vld [vmem:[%s5192_s1 + $0x1a0] sm:$0xff]   ;;  %v3970_v54 = vld [vmem:[%s5192_s1 + $0x158] sm:$0xff]  }
  0x12   :  { %3552 = vmatprep.subr.bf16.mxu1 %v3935_v17  ;;  %2543 = vmatprep.mubr.bf16.mxu1 %v3201_v37  ;;  %v3971_v55 = vld [vmem:[%s5192_s1 + $0x1d8] sm:$0xff]   ;;  %v3974_v58 = vld [vmem:[%s5192_s1 + $0x150] sm:$0xff]   ;;  %v3978_v62 = vld [vmem:[%s5192_s1 + $0x148] sm:$0xff]  }
  0x13   :  { %v3972_v56 = vld [vmem:[%s5192_s1 + $0x118] sm:$0xff]   ;;  %v3975_v59 = vld [vmem:[%s5192_s1 + $0x1d0] sm:$0xff]   ;;  %v3979_v63 = vld [vmem:[%s5192_s1 + $0x1c8] sm:$0xff]  }
  0x14   :  { %3531 = vmatpush3.bf16.msra.mxu0 %v3936_v18  ;;  %v3973_v57 = vld [vmem:[%s5192_s1 + $0x198] sm:$0xff]   ;;  %v3976_v60 = vld [vmem:[%s5192_s1 + $0x110] sm:$0xff]   ;;  %v3980_v0 = vld [vmem:[%s5192_s1 + $0x108] sm:$0xff]  }
  0x15   :  { %3553 = vmatpush3.bf16.msra.mxu1 %v3937_v19  ;;  %3532 = vmatprep.subr.bf16.mxu0 %v3938_v20  ;;  %v3977_v61 = vld [vmem:[%s5192_s1 + $0x190] sm:$0xff]   ;;  %v3981_v1 = vld [vmem:[%s5192_s1 + $0x188] sm:$0xff]   ;;  %v3982_v2 = vld [vmem:[%s5192_s1 + $0x140] sm:$0xff]  }
  0x16   :  { %3554 = vmatprep.subr.bf16.mxu1 %v3939_v21  ;;  %v3983_v3 = vld [vmem:[%s5192_s1 + $0x1c0] sm:$0xff]   ;;  %v18_v6 = vld [vmem:[%s5193_s0 + $0x10] sm:$0xff]  ;;  %v19_v9 = vld [vmem:[%s5193_s0 + $0x18] sm:$0xff] }
  0x17   :  { %v3984_v4 = vld [vmem:[%s5192_s1 + $0x100] sm:$0xff]   ;;  %v3202_v7 = vcombine.low %v18_v6, %v18_v6  ;;  %v3203_v8 = vcombine.high %v18_v6, %v18_v6  ;;  %v3204_v10 = vcombine.low %v19_v9, %v19_v9  ;;  %v3205_v11 = vcombine.high %v19_v9, %v19_v9  ;;  %v3990_v12 = vld [vmem:[%s5192_s1 + $0x278] sm:$0xff]   ;;  %v3994_v16 = vld [vmem:[%s5192_s1 + $0x270] sm:$0xff]  }
  0x18   :  { %3533 = vmatpush3.bf16.msra.mxu0 %v3940_v22  ;;  %v3985_v5 = vld [vmem:[%s5192_s1 + $0x180] sm:$0xff]   ;;  %v3991_v13 = vld [vmem:[%s5192_s1 + $0x2f8] sm:$0xff]   ;;  %v3995_v17 = vld [vmem:[%s5192_s1 + $0x2f0] sm:$0xff]  }
  0x19   :  { %3555 = vmatpush3.bf16.msra.mxu1 %v3941_v23  ;;  %3534 = vmatprep.subr.bf16.mxu0 %v3942_v24  ;;  %v3992_v14 = vld [vmem:[%s5192_s1 + $0x238] sm:$0xff]   ;;  %v3996_v18 = vld [vmem:[%s5192_s1 + $0x230] sm:$0xff]   ;;  %v3998_v20 = vld [vmem:[%s5192_s1 + $0x268] sm:$0xff]  }
  0x1a   :  { %3556 = vmatprep.subr.bf16.mxu1 %v3943_v25  ;;  %v3993_v15 = vld [vmem:[%s5192_s1 + $0x2b8] sm:$0xff]   ;;  %v3997_v19 = vld [vmem:[%s5192_s1 + $0x2b0] sm:$0xff]   ;;  %v3999_v21 = vld [vmem:[%s5192_s1 + $0x2e8] sm:$0xff]  }
  0x1b   :  { %v4000_v22 = vld [vmem:[%s5192_s1 + $0x228] sm:$0xff]   ;;  %v4002_v24 = vld [vmem:[%s5192_s1 + $0x260] sm:$0xff]   ;;  %v4010_v32 = vld [vmem:[%s5192_s1 + $0x250] sm:$0xff]  }
  0x1c   :  { %3535 = vmatpush3.bf16.msra.mxu0 %v3944_v26  ;;  %v4001_v23 = vld [vmem:[%s5192_s1 + $0x2a8] sm:$0xff]   ;;  %v4003_v25 = vld [vmem:[%s5192_s1 + $0x2e0] sm:$0xff]   ;;  %v4011_v33 = vld [vmem:[%s5192_s1 + $0x2d0] sm:$0xff]  }
  0x1d   :  { %3557 = vmatpush3.bf16.msra.mxu1 %v3945_v27  ;;  %3536 = vmatprep.subr.bf16.mxu0 %v3946_v28  ;;  %v4004_v26 = vld [vmem:[%s5192_s1 + $0x220] sm:$0xff]   ;;  %v4006_v28 = vld [vmem:[%s5192_s1 + $0x258] sm:$0xff]   ;;  %v4013_v35 = vld [vmem:[%s5192_s1 + $0x290] sm:$0xff]  }
  0x1e   :  { %3558 = vmatprep.subr.bf16.mxu1 %v3947_v29  ;;  %v4005_v27 = vld [vmem:[%s5192_s1 + $0x2a0] sm:$0xff]   ;;  %v4007_v29 = vld [vmem:[%s5192_s1 + $0x2d8] sm:$0xff]   ;;  %v4015_v37 = vld [vmem:[%s5192_s1 + $0x2c8] sm:$0xff]  }
  0x1f   :  { %v4046_v6 = vld [vmem:[%s5192_s1 + $0x350] sm:$0xff]  }
  0x20   :  { %3537 = vmatpush3.bf16.msra.mxu0 %v3948_v30  ;;  %v4008_v30 = vld [vmem:[%s5192_s1 + $0x218] sm:$0xff]   ;;  %v4049_v9 = vld [vmem:[%s5192_s1 + $0x390] sm:$0xff]  }
  0x21   :  { %3559 = vmatpush3.bf16.msra.mxu1 %v3949_v31  ;;  %3566 = vmatprep.subr.bf16.mxu0 %v3954_v38  ;;  %v4009_v31 = vld [vmem:[%s5192_s1 + $0x298] sm:$0xff]   ;;  %v4016_v38 = vld [vmem:[%s5192_s1 + $0x208] sm:$0xff]  }
  0x22   :  { %3588 = vmatprep.subr.bf16.mxu1 %v3955_v39  ;;  %v4017_v39 = vld [vmem:[%s5192_s1 + $0x288] sm:$0xff]  }
  0x23   :  { %2504 = vmatmul.mubr.bf16.vlgmr.msra.gmra.mxu0 %v3198_v34  ;;  %v4012_v34 = vld [vmem:[%s5192_s1 + $0x210] sm:$0xff]  }
  0x24   :  { %2544 = vmatmul.mubr.bf16.vlgmr.msra.gmra.mxu1 %v3200_v36  ;;  %3567 = vmatpush3.bf16.msra.mxu0 %v3956_v40  ;;  %v4014_v36 = vld [vmem:[%s5192_s1 + $0x248] sm:$0xff]   ;;  %v4018_v40 = vld [vmem:[%s5192_s1 + $0x240] sm:$0xff]  }
  0x25   :  { %3589 = vmatpush3.bf16.msra.mxu1 %v3957_v41  ;;  %3568 = vmatprep.subr.bf16.mxu0 %v3958_v42  ;;  %v4019_v41 = vld [vmem:[%s5192_s1 + $0x2c0] sm:$0xff]  }
  0x26   :  { %3590 = vmatprep.subr.bf16.mxu1 %v3959_v43  ;;  %2583 = vmatprep.mubr.bf16.mxu0 %v3203_v8  ;;  %v4020_v42 = vld [vmem:[%s5192_s1 + $0x200] sm:$0xff]   ;;  %v4048_v8 = vld [vmem:[%s5192_s1 + $0x310] sm:$0xff]  }
  0x27   :  { %2623 = vmatprep.mubr.bf16.mxu1 %v3205_v11  ;;  %v4021_v43 = vld [vmem:[%s5192_s1 + $0x280] sm:$0xff]   ;;  %v4051_v11 = vld [vmem:[%s5192_s1 + $0x3c8] sm:$0xff]  }
  0x28   :  { %3569 = vmatpush3.bf16.msra.mxu0 %v3960_v44  ;;  %v20_v44 = vld [vmem:[%s5193_s0 + $0x20] sm:$0xff] }
  0x29   :  { %3591 = vmatpush3.bf16.msra.mxu1 %v3961_v45  ;;  %3570 = vmatprep.subr.bf16.mxu0 %v3962_v46  ;;  %v21_v45 = vld [vmem:[%s5193_s0 + $0x28] sm:$0xff]  ;;  %v3206_v46 = vcombine.low %v20_v44, %v20_v44 }
  0x2a   :  { %3592 = vmatprep.subr.bf16.mxu1 %v3963_v47  ;;  %v3207_v47 = vcombine.high %v20_v44, %v20_v44  ;;  %v4082_v44 = vld [vmem:[%s5192_s1 + $0x450] sm:$0xff]  }
  0x2c   :  { %3571 = vmatpush3.bf16.msra.mxu0 %v3964_v48  ;;  %v3208_v48 = vcombine.low %v21_v45, %v21_v45 }
  0x2d   :  { %3593 = vmatpush3.bf16.msra.mxu1 %v3965_v49  ;;  %3572 = vmatprep.subr.bf16.mxu0 %v3966_v50  ;;  %v3209_v49 = vcombine.high %v21_v45, %v21_v45  ;;  %v4026_v50 = vld [vmem:[%s5192_s1 + $0x378] sm:$0xff]   ;;  %v4083_v45 = vld [vmem:[%s5192_s1 + $0x4d0] sm:$0xff]  }
  0x2e   :  { %3594 = vmatprep.subr.bf16.mxu1 %v3967_v51  ;;  %v4027_v51 = vld [vmem:[%s5192_s1 + $0x3f8] sm:$0xff]  }
  0x30   :  { %3573 = vmatpush3.bf16.msra.mxu0 %v3968_v52  ;;  %v4028_v52 = vld [vmem:[%s5192_s1 + $0x338] sm:$0xff]  }
  0x31   :  { %3595 = vmatpush3.bf16.msra.mxu1 %v3969_v53  ;;  %3574 = vmatprep.subr.bf16.mxu0 %v3970_v54  ;;  %v4029_v53 = vld [vmem:[%s5192_s1 + $0x3b8] sm:$0xff]   ;;  %v4030_v54 = vld [vmem:[%s5192_s1 + $0x370] sm:$0xff]  }
  0x32   :  { %3596 = vmatprep.subr.bf16.mxu1 %v3971_v55  ;;  %v4031_v55 = vld [vmem:[%s5192_s1 + $0x3f0] sm:$0xff]  }
  0x34   :  { %3575 = vmatpush3.bf16.msra.mxu0 %v3972_v56  ;;  %v4032_v56 = vld [vmem:[%s5192_s1 + $0x330] sm:$0xff]  }
  0x35   :  { %3597 = vmatpush3.bf16.msra.mxu1 %v3973_v57  ;;  %3576 = vmatprep.subr.bf16.mxu0 %v3974_v58  ;;  %v4033_v57 = vld [vmem:[%s5192_s1 + $0x3b0] sm:$0xff]   ;;  %v4034_v58 = vld [vmem:[%s5192_s1 + $0x368] sm:$0xff]  }
  0x36   :  { %3598 = vmatprep.subr.bf16.mxu1 %v3975_v59  ;;  %v4035_v59 = vld [vmem:[%s5192_s1 + $0x3e8] sm:$0xff]  }
  0x38   :  { %3577 = vmatpush3.bf16.msra.mxu0 %v3976_v60  ;;  %v4036_v60 = vld [vmem:[%s5192_s1 + $0x328] sm:$0xff]  }
  0x39   :  { %3599 = vmatpush3.bf16.msra.mxu1 %v3977_v61  ;;  %3578 = vmatprep.subr.bf16.mxu0 %v3978_v62  ;;  %v4037_v61 = vld [vmem:[%s5192_s1 + $0x3a8] sm:$0xff]   ;;  %v4038_v62 = vld [vmem:[%s5192_s1 + $0x360] sm:$0xff]  }
  0x3a   :  { %3600 = vmatprep.subr.bf16.mxu1 %v3979_v63  ;;  %v4039_v63 = vld [vmem:[%s5192_s1 + $0x3e0] sm:$0xff]  }
  0x3c   :  { %3579 = vmatpush3.bf16.msra.mxu0 %v3980_v0  ;;  %v4040_v0 = vld [vmem:[%s5192_s1 + $0x320] sm:$0xff]  }
  0x3d   :  { %3601 = vmatpush3.bf16.msra.mxu1 %v3981_v1  ;;  %3580 = vmatprep.subr.bf16.mxu0 %v3982_v2  ;;  %v4041_v1 = vld [vmem:[%s5192_s1 + $0x3a0] sm:$0xff]   ;;  %v4042_v2 = vld [vmem:[%s5192_s1 + $0x358] sm:$0xff]  }
  0x3e   :  { %3602 = vmatprep.subr.bf16.mxu1 %v3983_v3  ;;  %v4043_v3 = vld [vmem:[%s5192_s1 + $0x3d8] sm:$0xff]  }
  0x40   :  { %3581 = vmatpush3.bf16.msra.mxu0 %v3984_v4  ;;  %v4044_v4 = vld [vmem:[%s5192_s1 + $0x318] sm:$0xff]  }
  0x41   :  { %3603 = vmatpush3.bf16.msra.mxu1 %v3985_v5  ;;  %3610 = vmatprep.subr.bf16.mxu0 %v3990_v12  ;;  %v4045_v5 = vld [vmem:[%s5192_s1 + $0x398] sm:$0xff]   ;;  %v4052_v12 = vld [vmem:[%s5192_s1 + $0x308] sm:$0xff]  }
  0x42   :  { %3632 = vmatprep.subr.bf16.mxu1 %v3991_v13  ;;  %v4053_v13 = vld [vmem:[%s5192_s1 + $0x388] sm:$0xff]  }
  0x43   :  { %2584 = vmatmul.mubr.bf16.vlgmr.msra.gmra.mxu0 %v3202_v7  ;;  %v4047_v7 = vld [vmem:[%s5192_s1 + $0x3d0] sm:$0xff]  }
  0x44   :  { %2624 = vmatmul.mubr.bf16.vlgmr.msra.gmra.mxu1 %v3204_v10  ;;  %3611 = vmatpush3.bf16.msra.mxu0 %v3992_v14  ;;  %v4050_v10 = vld [vmem:[%s5192_s1 + $0x348] sm:$0xff]   ;;  %v4054_v14 = vld [vmem:[%s5192_s1 + $0x340] sm:$0xff]  }
  0x45   :  { %3633 = vmatpush3.bf16.msra.mxu1 %v3993_v15  ;;  %3612 = vmatprep.subr.bf16.mxu0 %v3994_v16  ;;  %v4055_v15 = vld [vmem:[%s5192_s1 + $0x3c0] sm:$0xff]  }
  0x46   :  { %3634 = vmatprep.subr.bf16.mxu1 %v3995_v17  ;;  %2663 = vmatprep.mubr.bf16.mxu0 %v3207_v47  ;;  %v4056_v16 = vld [vmem:[%s5192_s1 + $0x300] sm:$0xff]   ;;  %v4085_v47 = vld [vmem:[%s5192_s1 + $0x490] sm:$0xff]  }
  0x47   :  { %2703 = vmatprep.mubr.bf16.mxu1 %v3209_v49  ;;  %v4057_v17 = vld [vmem:[%s5192_s1 + $0x380] sm:$0xff]   ;;  %v4087_v49 = vld [vmem:[%s5192_s1 + $0x4c8] sm:$0xff]  }
  0x48   :  { %3613 = vmatpush3.bf16.msra.mxu0 %v3996_v18  ;;  %v22_v18 = vld [vmem:[%s5193_s0 + $0x30] sm:$0xff] }
  0x49   :  { %3635 = vmatpush3.bf16.msra.mxu1 %v3997_v19  ;;  %3614 = vmatprep.subr.bf16.mxu0 %v3998_v20  ;;  %v23_v19 = vld [vmem:[%s5193_s0 + $0x38] sm:$0xff]  ;;  %v3210_v20 = vcombine.low %v22_v18, %v22_v18 }
  0x4a   :  { %3636 = vmatprep.subr.bf16.mxu1 %v3999_v21  ;;  %v3211_v21 = vcombine.high %v22_v18, %v22_v18  ;;  %v4118_v18 = vld [vmem:[%s5192_s1 + $0x550] sm:$0xff]  }
  0x4c   :  { %3615 = vmatpush3.bf16.msra.mxu0 %v4000_v22  ;;  %v3212_v22 = vcombine.low %v23_v19, %v23_v19 }
  0x4d   :  { %3637 = vmatpush3.bf16.msra.mxu1 %v4001_v23  ;;  %3616 = vmatprep.subr.bf16.mxu0 %v4002_v24  ;;  %v4062_v23 = vld [vmem:[%s5192_s1 + $0x478] sm:$0xff]   ;;  %v3213_v24 = vcombine.high %v23_v19, %v23_v19  ;;  %v4119_v19 = vld [vmem:[%s5192_s1 + $0x5d0] sm:$0xff]  }
  0x4e   :  { %3638 = vmatprep.subr.bf16.mxu1 %v4003_v25  ;;  %v4063_v25 = vld [vmem:[%s5192_s1 + $0x4f8] sm:$0xff]  }
  0x50   :  { %3617 = vmatpush3.bf16.msra.mxu0 %v4004_v26  ;;  %v4064_v26 = vld [vmem:[%s5192_s1 + $0x438] sm:$0xff]  }
  0x51   :  { %3639 = vmatpush3.bf16.msra.mxu1 %v4005_v27  ;;  %3618 = vmatprep.subr.bf16.mxu0 %v4006_v28  ;;  %v4065_v27 = vld [vmem:[%s5192_s1 + $0x4b8] sm:$0xff]   ;;  %v4066_v28 = vld [vmem:[%s5192_s1 + $0x470] sm:$0xff]  }
  0x52   :  { %3640 = vmatprep.subr.bf16.mxu1 %v4007_v29  ;;  %v4067_v29 = vld [vmem:[%s5192_s1 + $0x4f0] sm:$0xff]  }
  0x54   :  { %3619 = vmatpush3.bf16.msra.mxu0 %v4008_v30  ;;  %v4068_v30 = vld [vmem:[%s5192_s1 + $0x430] sm:$0xff]  }
  0x55   :  { %3641 = vmatpush3.bf16.msra.mxu1 %v4009_v31  ;;  %3620 = vmatprep.subr.bf16.mxu0 %v4010_v32  ;;  %v4069_v31 = vld [vmem:[%s5192_s1 + $0x4b0] sm:$0xff]   ;;  %v4070_v32 = vld [vmem:[%s5192_s1 + $0x468] sm:$0xff]  }
  0x56   :  { %3642 = vmatprep.subr.bf16.mxu1 %v4011_v33  ;;  %v4071_v33 = vld [vmem:[%s5192_s1 + $0x4e8] sm:$0xff]  }
  0x58   :  { %3621 = vmatpush3.bf16.msra.mxu0 %v4012_v34  ;;  %v4072_v34 = vld [vmem:[%s5192_s1 + $0x428] sm:$0xff]  }
  0x59   :  { %3643 = vmatpush3.bf16.msra.mxu1 %v4013_v35  ;;  %3622 = vmatprep.subr.bf16.mxu0 %v4014_v36  ;;  %v4073_v35 = vld [vmem:[%s5192_s1 + $0x4a8] sm:$0xff]   ;;  %v4074_v36 = vld [vmem:[%s5192_s1 + $0x460] sm:$0xff]  }
  0x5a   :  { %3644 = vmatprep.subr.bf16.mxu1 %v4015_v37  ;;  %v4075_v37 = vld [vmem:[%s5192_s1 + $0x4e0] sm:$0xff]  }
  0x5c   :  { %3623 = vmatpush3.bf16.msra.mxu0 %v4016_v38  ;;  %v4076_v38 = vld [vmem:[%s5192_s1 + $0x420] sm:$0xff]  }
  0x5d   :  { %3645 = vmatpush3.bf16.msra.mxu1 %v4017_v39  ;;  %3624 = vmatprep.subr.bf16.mxu0 %v4018_v40  ;;  %v4077_v39 = vld [vmem:[%s5192_s1 + $0x4a0] sm:$0xff]   ;;  %v4078_v40 = vld [vmem:[%s5192_s1 + $0x458] sm:$0xff]  }
  0x5e   :  { %3646 = vmatprep.subr.bf16.mxu1 %v4019_v41  ;;  %v4079_v41 = vld [vmem:[%s5192_s1 + $0x4d8] sm:$0xff]  }
  0x60   :  { %3625 = vmatpush3.bf16.msra.mxu0 %v4020_v42  ;;  %v4080_v42 = vld [vmem:[%s5192_s1 + $0x418] sm:$0xff]  }
  0x61   :  { %3647 = vmatpush3.bf16.msra.mxu1 %v4021_v43  ;;  %3654 = vmatprep.subr.bf16.mxu0 %v4026_v50  ;;  %v4081_v43 = vld [vmem:[%s5192_s1 + $0x498] sm:$0xff]   ;;  %v4088_v50 = vld [vmem:[%s5192_s1 + $0x408] sm:$0xff]  }
  0x62   :  { %3676 = vmatprep.subr.bf16.mxu1 %v4027_v51  ;;  %v4089_v51 = vld [vmem:[%s5192_s1 + $0x488] sm:$0xff]  }
  0x63   :  { %2664 = vmatmul.mubr.bf16.vlgmr.msra.gmra.mxu0 %v3206_v46  ;;  %v4084_v46 = vld [vmem:[%s5192_s1 + $0x410] sm:$0xff]  }
  0x64   :  { %2704 = vmatmul.mubr.bf16.vlgmr.msra.gmra.mxu1 %v3208_v48  ;;  %3655 = vmatpush3.bf16.msra.mxu0 %v4028_v52  ;;  %v4086_v48 = vld [vmem:[%s5192_s1 + $0x448] sm:$0xff]   ;;  %v4090_v52 = vld [vmem:[%s5192_s1 + $0x440] sm:$0xff]  }
  0x65   :  { %3677 = vmatpush3.bf16.msra.mxu1 %v4029_v53  ;;  %3656 = vmatprep.subr.bf16.mxu0 %v4030_v54  ;;  %v4091_v53 = vld [vmem:[%s5192_s1 + $0x4c0] sm:$0xff]  }
  0x66   :  { %3678 = vmatprep.subr.bf16.mxu1 %v4031_v55  ;;  %2743 = vmatprep.mubr.bf16.mxu0 %v3211_v21  ;;  %v4092_v54 = vld [vmem:[%s5192_s1 + $0x400] sm:$0xff]   ;;  %v4121_v21 = vld [vmem:[%s5192_s1 + $0x590] sm:$0xff]  }
  0x67   :  { %2783 = vmatprep.mubr.bf16.mxu1 %v3213_v24  ;;  %v4093_v55 = vld [vmem:[%s5192_s1 + $0x480] sm:$0xff]   ;;  %v4124_v24 = vld [vmem:[%s5192_s1 + $0x508] sm:$0xff]  }
  0x68   :  { %3657 = vmatpush3.bf16.msra.mxu0 %v4032_v56  ;;  %v24_v56 = vld [vmem:[%s5193_s0 + $0x40] sm:$0xff] }
  0x69   :  { %3679 = vmatpush3.bf16.msra.mxu1 %v4033_v57  ;;  %3658 = vmatprep.subr.bf16.mxu0 %v4034_v58  ;;  %v3214_v57 = vcombine.low %v24_v56, %v24_v56  ;;  %v3215_v58 = vcombine.high %v24_v56, %v24_v56  ;;  %v4154_v56 = vld [vmem:[%s5192_s1 + $0x650] sm:$0xff]  }
  0x6a   :  { %3680 = vmatprep.subr.bf16.mxu1 %v4035_v59  ;;  %v25_v59 = vld [vmem:[%s5193_s0 + $0x48] sm:$0xff] }
  0x6c   :  { %3659 = vmatpush3.bf16.msra.mxu0 %v4036_v60  ;;  %v3216_v60 = vcombine.low %v25_v59, %v25_v59 }
  0x6d   :  { %3681 = vmatpush3.bf16.msra.mxu1 %v4037_v61  ;;  %3660 = vmatprep.subr.bf16.mxu0 %v4038_v62  ;;  %v3217_v61 = vcombine.high %v25_v59, %v25_v59  ;;  %v4098_v62 = vld [vmem:[%s5192_s1 + $0x578] sm:$0xff]   ;;  %v4157_v59 = vld [vmem:[%s5192_s1 + $0x690] sm:$0xff]  }
  0x6e   :  { %3682 = vmatprep.subr.bf16.mxu1 %v4039_v63  ;;  %v4099_v63 = vld [vmem:[%s5192_s1 + $0x5f8] sm:$0xff]  }
  0x70   :  { %3661 = vmatpush3.bf16.msra.mxu0 %v4040_v0  ;;  %v4100_v0 = vld [vmem:[%s5192_s1 + $0x538] sm:$0xff]  }
  0x71   :  { %3683 = vmatpush3.bf16.msra.mxu1 %v4041_v1  ;;  %3662 = vmatprep.subr.bf16.mxu0 %v4042_v2  ;;  %v4101_v1 = vld [vmem:[%s5192_s1 + $0x5b8] sm:$0xff]   ;;  %v4102_v2 = vld [vmem:[%s5192_s1 + $0x570] sm:$0xff]  }
  0x72   :  { %3684 = vmatprep.subr.bf16.mxu1 %v4043_v3  ;;  %v4103_v3 = vld [vmem:[%s5192_s1 + $0x5f0] sm:$0xff]  }
  0x74   :  { %3663 = vmatpush3.bf16.msra.mxu0 %v4044_v4  ;;  %v4104_v4 = vld [vmem:[%s5192_s1 + $0x530] sm:$0xff]  }
  0x75   :  { %3685 = vmatpush3.bf16.msra.mxu1 %v4045_v5  ;;  %3664 = vmatprep.subr.bf16.mxu0 %v4046_v6  ;;  %v4105_v5 = vld [vmem:[%s5192_s1 + $0x5b0] sm:$0xff]   ;;  %v4106_v6 = vld [vmem:[%s5192_s1 + $0x568] sm:$0xff]  }
  0x76   :  { %3686 = vmatprep.subr.bf16.mxu1 %v4047_v7  ;;  %v4107_v7 = vld [vmem:[%s5192_s1 + $0x5e8] sm:$0xff]  }
  0x78   :  { %3665 = vmatpush3.bf16.msra.mxu0 %v4048_v8  ;;  %v4108_v8 = vld [vmem:[%s5192_s1 + $0x528] sm:$0xff]  }
  0x79   :  { %3687 = vmatpush3.bf16.msra.mxu1 %v4049_v9  ;;  %3666 = vmatprep.subr.bf16.mxu0 %v4050_v10  ;;  %v4109_v9 = vld [vmem:[%s5192_s1 + $0x5a8] sm:$0xff]   ;;  %v4110_v10 = vld [vmem:[%s5192_s1 + $0x560] sm:$0xff]  }
  0x7a   :  { %3688 = vmatprep.subr.bf16.mxu1 %v4051_v11  ;;  %v4111_v11 = vld [vmem:[%s5192_s1 + $0x5e0] sm:$0xff]  }
  0x7c   :  { %3667 = vmatpush3.bf16.msra.mxu0 %v4052_v12  ;;  %v4112_v12 = vld [vmem:[%s5192_s1 + $0x520] sm:$0xff]  }
  0x7d   :  { %3689 = vmatpush3.bf16.msra.mxu1 %v4053_v13  ;;  %3668 = vmatprep.subr.bf16.mxu0 %v4054_v14  ;;  %v4113_v13 = vld [vmem:[%s5192_s1 + $0x5a0] sm:$0xff]   ;;  %v4114_v14 = vld [vmem:[%s5192_s1 + $0x558] sm:$0xff]  }
  0x7e   :  { %3690 = vmatprep.subr.bf16.mxu1 %v4055_v15  ;;  %v4115_v15 = vld [vmem:[%s5192_s1 + $0x5d8] sm:$0xff]  }
  0x80   :  { %3669 = vmatpush3.bf16.msra.mxu0 %v4056_v16  ;;  %v4116_v16 = vld [vmem:[%s5192_s1 + $0x518] sm:$0xff]  }
  0x81   :  { %3691 = vmatpush3.bf16.msra.mxu1 %v4057_v17  ;;  %3698 = vmatprep.subr.bf16.mxu0 %v4062_v23  ;;  %v4117_v17 = vld [vmem:[%s5192_s1 + $0x598] sm:$0xff]   ;;  %v4123_v23 = vld [vmem:[%s5192_s1 + $0x5c8] sm:$0xff]  }
  0x82   :  { %3720 = vmatprep.subr.bf16.mxu1 %v4063_v25  ;;  %v4125_v25 = vld [vmem:[%s5192_s1 + $0x588] sm:$0xff]  }
  0x83   :  { %2744 = vmatmul.mubr.bf16.vlgmr.msra.gmra.mxu0 %v3210_v20  ;;  %v4120_v20 = vld [vmem:[%s5192_s1 + $0x510] sm:$0xff]  }
  0x84   :  { %2784 = vmatmul.mubr.bf16.vlgmr.msra.gmra.mxu1 %v3212_v22  ;;  %3699 = vmatpush3.bf16.msra.mxu0 %v4064_v26  ;;  %v4122_v22 = vld [vmem:[%s5192_s1 + $0x548] sm:$0xff]   ;;  %v4126_v26 = vld [vmem:[%s5192_s1 + $0x540] sm:$0xff]  }
  0x85   :  { %3721 = vmatpush3.bf16.msra.mxu1 %v4065_v27  ;;  %3700 = vmatprep.subr.bf16.mxu0 %v4066_v28  ;;  %v4127_v27 = vld [vmem:[%s5192_s1 + $0x5c0] sm:$0xff]  }
  0x86   :  { %3722 = vmatprep.subr.bf16.mxu1 %v4067_v29  ;;  %2823 = vmatprep.mubr.bf16.mxu0 %v3215_v58  ;;  %v4128_v28 = vld [vmem:[%s5192_s1 + $0x500] sm:$0xff]   ;;  %v4156_v58 = vld [vmem:[%s5192_s1 + $0x610] sm:$0xff]  }
  0x87   :  { %2863 = vmatprep.mubr.bf16.mxu1 %v3217_v61  ;;  %v4129_v29 = vld [vmem:[%s5192_s1 + $0x580] sm:$0xff]   ;;  %v4159_v61 = vld [vmem:[%s5192_s1 + $0x6c8] sm:$0xff]  }
  0x88   :  { %3701 = vmatpush3.bf16.msra.mxu0 %v4068_v30  ;;  %v26_v30 = vld [vmem:[%s5193_s0 + $0x50] sm:$0xff] }
  0x89   :  { %3723 = vmatpush3.bf16.msra.mxu1 %v4069_v31  ;;  %3702 = vmatprep.subr.bf16.mxu0 %v4070_v32  ;;  %v27_v31 = vld [vmem:[%s5193_s0 + $0x58] sm:$0xff]  ;;  %v3218_v32 = vcombine.low %v26_v30, %v26_v30 }
  0x8a   :  { %3724 = vmatprep.subr.bf16.mxu1 %v4071_v33  ;;  %v3219_v33 = vcombine.high %v26_v30, %v26_v30  ;;  %v4177_v30 = vld [vmem:[%s5192_s1 + $0x7b0] sm:$0xff]  }
  0x8c   :  { %3703 = vmatpush3.bf16.msra.mxu0 %v4072_v34  ;;  %v3220_v34 = vcombine.low %v27_v31, %v27_v31 }
  0x8d   :  { %3725 = vmatpush3.bf16.msra.mxu1 %v4073_v35  ;;  %3704 = vmatprep.subr.bf16.mxu0 %v4074_v36  ;;  %v3221_v35 = vcombine.high %v27_v31, %v27_v31  ;;  %v4134_v36 = vld [vmem:[%s5192_s1 + $0x678] sm:$0xff]   ;;  %v4178_v31 = vld [vmem:[%s5192_s1 + $0x768] sm:$0xff]  }
  0x8e   :  { %3726 = vmatprep.subr.bf16.mxu1 %v4075_v37  ;;  %v4135_v37 = vld [vmem:[%s5192_s1 + $0x6f8] sm:$0xff]  }
  0x90   :  { %3705 = vmatpush3.bf16.msra.mxu0 %v4076_v38  ;;  %v4136_v38 = vld [vmem:[%s5192_s1 + $0x638] sm:$0xff]  }
  0x91   :  { %3727 = vmatpush3.bf16.msra.mxu1 %v4077_v39  ;;  %3706 = vmatprep.subr.bf16.mxu0 %v4078_v40  ;;  %v4137_v39 = vld [vmem:[%s5192_s1 + $0x6b8] sm:$0xff]   ;;  %v4138_v40 = vld [vmem:[%s5192_s1 + $0x670] sm:$0xff]  }
  0x92   :  { %3728 = vmatprep.subr.bf16.mxu1 %v4079_v41  ;;  %v4139_v41 = vld [vmem:[%s5192_s1 + $0x6f0] sm:$0xff]  }
  0x94   :  { %3707 = vmatpush3.bf16.msra.mxu0 %v4080_v42  ;;  %v4140_v42 = vld [vmem:[%s5192_s1 + $0x630] sm:$0xff]  }
  0x95   :  { %3729 = vmatpush3.bf16.msra.mxu1 %v4081_v43  ;;  %3708 = vmatprep.subr.bf16.mxu0 %v4082_v44  ;;  %v4141_v43 = vld [vmem:[%s5192_s1 + $0x6b0] sm:$0xff]   ;;  %v4142_v44 = vld [vmem:[%s5192_s1 + $0x668] sm:$0xff]  }
  0x96   :  { %3730 = vmatprep.subr.bf16.mxu1 %v4083_v45  ;;  %v4143_v45 = vld [vmem:[%s5192_s1 + $0x6e8] sm:$0xff]  }
  0x98   :  { %3709 = vmatpush3.bf16.msra.mxu0 %v4084_v46  ;;  %v4144_v46 = vld [vmem:[%s5192_s1 + $0x628] sm:$0xff]  }
  0x99   :  { %3731 = vmatpush3.bf16.msra.mxu1 %v4085_v47  ;;  %3710 = vmatprep.subr.bf16.mxu0 %v4086_v48  ;;  %v4145_v47 = vld [vmem:[%s5192_s1 + $0x6a8] sm:$0xff]   ;;  %v4146_v48 = vld [vmem:[%s5192_s1 + $0x660] sm:$0xff]  }
  0x9a   :  { %3732 = vmatprep.subr.bf16.mxu1 %v4087_v49  ;;  %v4147_v49 = vld [vmem:[%s5192_s1 + $0x6e0] sm:$0xff]  }
  0x9c   :  { %3711 = vmatpush3.bf16.msra.mxu0 %v4088_v50  ;;  %v4148_v50 = vld [vmem:[%s5192_s1 + $0x620] sm:$0xff]  }
  0x9d   :  { %3733 = vmatpush3.bf16.msra.mxu1 %v4089_v51  ;;  %3712 = vmatprep.subr.bf16.mxu0 %v4090_v52  ;;  %v4149_v51 = vld [vmem:[%s5192_s1 + $0x6a0] sm:$0xff]   ;;  %v4150_v52 = vld [vmem:[%s5192_s1 + $0x658] sm:$0xff]  }
  0x9e   :  { %3734 = vmatprep.subr.bf16.mxu1 %v4091_v53  ;;  %v4151_v53 = vld [vmem:[%s5192_s1 + $0x6d8] sm:$0xff]  }
  0xa0   :  { %3713 = vmatpush3.bf16.msra.mxu0 %v4092_v54  ;;  %v4152_v54 = vld [vmem:[%s5192_s1 + $0x618] sm:$0xff]  }
  0xa1   :  { %3735 = vmatpush3.bf16.msra.mxu1 %v4093_v55  ;;  %3742 = vmatprep.subr.bf16.mxu0 %v4098_v62  ;;  %v4153_v55 = vld [vmem:[%s5192_s1 + $0x698] sm:$0xff]   ;;  %v4160_v62 = vld [vmem:[%s5192_s1 + $0x608] sm:$0xff]  }
  0xa2   :  { %3764 = vmatprep.subr.bf16.mxu1 %v4099_v63  ;;  %v4161_v63 = vld [vmem:[%s5192_s1 + $0x688] sm:$0xff]  }
  0xa3   :  { %2824 = vmatmul.mubr.bf16.vlgmr.msra.gmra.mxu0 %v3214_v57  ;;  %v4155_v57 = vld [vmem:[%s5192_s1 + $0x6d0] sm:$0xff]  }
  0xa4   :  { %2864 = vmatmul.mubr.bf16.vlgmr.msra.gmra.mxu1 %v3216_v60  ;;  %3743 = vmatpush3.bf16.msra.mxu0 %v4100_v0  ;;  %v4158_v60 = vld [vmem:[%s5192_s1 + $0x648] sm:$0xff]   ;;  %v4162_v0 = vld [vmem:[%s5192_s1 + $0x640] sm:$0xff]  }
  0xa5   :  { %3765 = vmatpush3.bf16.msra.mxu1 %v4101_v1  ;;  %3744 = vmatprep.subr.bf16.mxu0 %v4102_v2  ;;  %v4163_v1 = vld [vmem:[%s5192_s1 + $0x6c0] sm:$0xff]  }
  0xa6   :  { %3766 = vmatprep.subr.bf16.mxu1 %v4103_v3  ;;  %2903 = vmatprep.mubr.bf16.mxu0 %v3219_v33  ;;  %v4164_v2 = vld [vmem:[%s5192_s1 + $0x600] sm:$0xff]   ;;  %v4180_v33 = vld [vmem:[%s5192_s1 + $0x728] sm:$0xff]  }
  0xa7   :  { %2943 = vmatprep.mubr.bf16.mxu1 %v3221_v35  ;;  %v4165_v3 = vld [vmem:[%s5192_s1 + $0x680] sm:$0xff]  }
  0xa8   :  { %3745 = vmatpush3.bf16.msra.mxu0 %v4104_v4  ;;  %v28_v4 = vld [vmem:[%s5193_s0 + $0x60] sm:$0xff] }
  0xa9   :  { %3767 = vmatpush3.bf16.msra.mxu1 %v4105_v5  ;;  %3746 = vmatprep.subr.bf16.mxu0 %v4106_v6  ;;  %v29_v5 = vld [vmem:[%s5193_s0 + $0x68] sm:$0xff]  ;;  %v4182_v35 = vld [vmem:[%s5192_s1 + $0x760] sm:$0xff]  }
  0xaa   :  { %3768 = vmatprep.subr.bf16.mxu1 %v4107_v7 }
  0xac   :  { %3747 = vmatpush3.bf16.msra.mxu0 %v4108_v8  ;;  %v3222_v8 = vcombine.low %v28_v4, %v28_v4 }
  0xad   :  { %3769 = vmatpush3.bf16.msra.mxu1 %v4109_v9  ;;  %3748 = vmatprep.subr.bf16.mxu0 %v4110_v10  ;;  %v3223_v9 = vcombine.high %v28_v4, %v28_v4  ;;  %v3224_v10 = vcombine.low %v29_v5, %v29_v5 }
  0xae   :  { %3770 = vmatprep.subr.bf16.mxu1 %v4111_v11  ;;  %v4170_v11 = vld [vmem:[%s5192_s1 + $0x778] sm:$0xff]  }
  0xb0   :  { %3749 = vmatpush3.bf16.msra.mxu0 %v4112_v12  ;;  %v3225_v12 = vcombine.high %v29_v5, %v29_v5 }
  0xb1   :  { %3771 = vmatpush3.bf16.msra.mxu1 %v4113_v13  ;;  %3750 = vmatprep.subr.bf16.mxu0 %v4114_v14  ;;  %v4171_v13 = vld [vmem:[%s5192_s1 + $0x7f8] sm:$0xff]  }
  0xb2   :  { %3772 = vmatprep.subr.bf16.mxu1 %v4115_v15 }
  0xb4   :  { %3751 = vmatpush3.bf16.msra.mxu0 %v4116_v16  ;;  %v4172_v16 = vld [vmem:[%s5192_s1 + $0x738] sm:$0xff]  }
  0xb5   :  { %3773 = vmatpush3.bf16.msra.mxu1 %v4117_v17  ;;  %3752 = vmatprep.subr.bf16.mxu0 %v4118_v18 }
  0xb6   :  { %3774 = vmatprep.subr.bf16.mxu1 %v4119_v19  ;;  %v4173_v19 = vld [vmem:[%s5192_s1 + $0x7b8] sm:$0xff]  }
  0xb8   :  { %3753 = vmatpush3.bf16.msra.mxu0 %v4120_v20  ;;  %v3197_v20 = vld [vmem:[%s5194_s2] ss:$0 sm:$0xff] }
  0xb9   :  { %3775 = vmatpush3.bf16.msra.mxu1 %v4121_v21  ;;  %3754 = vmatprep.subr.bf16.mxu0 %v4122_v22 }
  0xba   :  { %3776 = vmatprep.subr.bf16.mxu1 %v4123_v23 }
  0xbc   :  { %3755 = vmatpush3.bf16.msra.mxu0 %v4124_v24  ;;  %v4174_v24 = vld [vmem:[%s5192_s1 + $0x770] sm:$0xff]  }
  0xbd   :  { %3777 = vmatpush3.bf16.msra.mxu1 %v4125_v25  ;;  %3756 = vmatprep.subr.bf16.mxu0 %v4126_v26  ;;  %v4175_v25 = vld [vmem:[%s5192_s1 + $0x7f0] sm:$0xff]  }
  0xbe   :  { %3778 = vmatprep.subr.bf16.mxu1 %v4127_v27 }
  0xc0   :  { %3757 = vmatpush3.bf16.msra.mxu0 %v4128_v28 }
  0xc1   :  { %3779 = vmatpush3.bf16.msra.mxu1 %v4129_v29  ;;  %3786 = vmatprep.subr.bf16.mxu0 %v4134_v36  ;;  %v4176_v29 = vld [vmem:[%s5192_s1 + $0x730] sm:$0xff]   ;;  %v4183_v36 = vld [vmem:[%s5192_s1 + $0x7e0] sm:$0xff]  }
  0xc2   :  { %3808 = vmatprep.subr.bf16.mxu1 %v4135_v37  ;;  %v4184_v37 = vld [vmem:[%s5192_s1 + $0x720] sm:$0xff]  }
  0xc3   :  { %2904 = vmatmul.mubr.bf16.vlgmr.msra.gmra.mxu0 %v3218_v32  ;;  %v4179_v32 = vld [vmem:[%s5192_s1 + $0x7e8] sm:$0xff]  }
  0xc4   :  { %2944 = vmatmul.mubr.bf16.vlgmr.msra.gmra.mxu1 %v3220_v34  ;;  %3787 = vmatpush3.bf16.msra.mxu0 %v4136_v38  ;;  %v4181_v34 = vld [vmem:[%s5192_s1 + $0x7a8] sm:$0xff]   ;;  %v4185_v38 = vld [vmem:[%s5192_s1 + $0x7a0] sm:$0xff]  }
  0xc5   :  { %3809 = vmatpush3.bf16.msra.mxu1 %v4137_v39  ;;  %3788 = vmatprep.subr.bf16.mxu0 %v4138_v40  ;;  %v4186_v39 = vld [vmem:[%s5192_s1 + $0x758] sm:$0xff]  }
  0xc6   :  { %3810 = vmatprep.subr.bf16.mxu1 %v4139_v41  ;;  %2983 = vmatprep.mubr.bf16.mxu0 %v3223_v9  ;;  %v4187_v40 = vld [vmem:[%s5192_s1 + $0x7d8] sm:$0xff]  }
  0xc7   :  { %3023 = vmatprep.mubr.bf16.mxu1 %v3225_v12  ;;  %v4188_v41 = vld [vmem:[%s5192_s1 + $0x718] sm:$0xff]  }
  0xc8   :  { %3789 = vmatpush3.bf16.msra.mxu0 %v4140_v42  ;;  %v4189_v42 = vld [vmem:[%s5192_s1 + $0x798] sm:$0xff]  }
  0xc9   :  { %3811 = vmatpush3.bf16.msra.mxu1 %v4141_v43  ;;  %3790 = vmatprep.subr.bf16.mxu0 %v4142_v44  ;;  %v4190_v43 = vld [vmem:[%s5192_s1 + $0x750] sm:$0xff]  }
  0xca   :  { %3812 = vmatprep.subr.bf16.mxu1 %v4143_v45  ;;  %v4191_v44 = vld [vmem:[%s5192_s1 + $0x7d0] sm:$0xff]  }
  0xcb   :  { %v4192_v45 = vld [vmem:[%s5192_s1 + $0x710] sm:$0xff]  }
  0xcc   :  { %3791 = vmatpush3.bf16.msra.mxu0 %v4144_v46  ;;  %v4193_v46 = vld [vmem:[%s5192_s1 + $0x790] sm:$0xff]  }
  0xcd   :  { %3813 = vmatpush3.bf16.msra.mxu1 %v4145_v47  ;;  %3792 = vmatprep.subr.bf16.mxu0 %v4146_v48  ;;  %v4194_v47 = vld [vmem:[%s5192_s1 + $0x748] sm:$0xff]  }
  0xce   :  { %3814 = vmatprep.subr.bf16.mxu1 %v4147_v49  ;;  %v4195_v48 = vld [vmem:[%s5192_s1 + $0x7c8] sm:$0xff]  }
  0xcf   :  { %v4196_v49 = vld [vmem:[%s5192_s1 + $0x708] sm:$0xff]  }
  0xd0   :  { %3793 = vmatpush3.bf16.msra.mxu0 %v4148_v50  ;;  %v4197_v50 = vld [vmem:[%s5192_s1 + $0x788] sm:$0xff]  }
  0xd1   :  { %3815 = vmatpush3.bf16.msra.mxu1 %v4149_v51  ;;  %3794 = vmatprep.subr.bf16.mxu0 %v4150_v52  ;;  %v4198_v51 = vld [vmem:[%s5192_s1 + $0x740] sm:$0xff]  }
  0xd2   :  { %3816 = vmatprep.subr.bf16.mxu1 %v4151_v53  ;;  %v4199_v52 = vld [vmem:[%s5192_s1 + $0x7c0] sm:$0xff]  }
  0xd3   :  { %v4200_v53 = vld [vmem:[%s5192_s1 + $0x700] sm:$0xff]  }
  0xd4   :  { %3795 = vmatpush3.bf16.msra.mxu0 %v4152_v54  ;;  %v4201_v54 = vld [vmem:[%s5192_s1 + $0x780] sm:$0xff]  }
  0xd5   :  { %3817 = vmatpush3.bf16.msra.mxu1 %v4153_v55  ;;  %3796 = vmatprep.subr.bf16.mxu0 %v4154_v56  ;;  %v30_v55 = vld [vmem:[%s5193_s0 + $0x70] sm:$0xff]  ;;  %v31_v56 = vld [vmem:[%s5193_s0 + $0x78] sm:$0xff] }
  0xd6   :  { %3818 = vmatprep.subr.bf16.mxu1 %v4155_v57 }
  0xd8   :  { %3797 = vmatpush3.bf16.msra.mxu0 %v4156_v58 }
  0xd9   :  { %3819 = vmatpush3.bf16.msra.mxu1 %v4157_v59  ;;  %3798 = vmatprep.subr.bf16.mxu0 %v4158_v60  ;;  %v3226_v59 = vcombine.low %v30_v55, %v30_v55  ;;  %v3227_v60 = vcombine.high %v30_v55, %v30_v55 }
  0xda   :  { %3820 = vmatprep.subr.bf16.mxu1 %v4159_v61  ;;  %v3228_v61 = vcombine.low %v31_v56, %v31_v56 }
  0xdc   :  { %3799 = vmatpush3.bf16.msra.mxu0 %v4160_v62  ;;  %v4206_v62 = vld [vmem:[%s5192_s1 + $0x878] sm:$0xff]  }
  0xdd   :  { %3821 = vmatpush3.bf16.msra.mxu1 %v4161_v63  ;;  %3800 = vmatprep.subr.bf16.mxu0 %v4162_v0  ;;  %v3229_v63 = vcombine.high %v31_v56, %v31_v56  ;;  %v4207_v0 = vld [vmem:[%s5192_s1 + $0x8f8] sm:$0xff]  }
  0xde   :  { %3822 = vmatprep.subr.bf16.mxu1 %v4163_v1 }
  0xe0   :  { %3801 = vmatpush3.bf16.msra.mxu0 %v4164_v2 }
  0xe1   :  { %3823 = vmatpush3.bf16.msra.mxu1 %v4165_v3  ;;  %3830 = vmatprep.subr.bf16.mxu0 %v4170_v11  ;;  %v4208_v3 = vld [vmem:[%s5192_s1 + $0x838] sm:$0xff]   ;;  %v4211_v11 = vld [vmem:[%s5192_s1 + $0x8f0] sm:$0xff]  }
  0xe2   :  { %3852 = vmatprep.subr.bf16.mxu1 %v4171_v13 }
  0xe3   :  { %v3538_v6 = vpop.f32.mrf.mxu0  ;;  %2984 = vmatmul.mubr.bf16.vlgmr.msra.gmra.mxu0 %v3222_v8 }
  0xe4   :  { %v3560_v7 = vpop.f32.mrf.mxu1  ;;  %3024 = vmatmul.mubr.bf16.vlgmr.msra.gmra.mxu1 %v3224_v10  ;;  %3831 = vmatpush3.bf16.msra.mxu0 %v4172_v16  ;;  %v4210_v10 = vld [vmem:[%s5192_s1 + $0x870] sm:$0xff]  }
  0xe5   :  { %v3539_v14 = vpop.f32.mrf.mxu0  ;;  %3853 = vmatpush3.bf16.msra.mxu1 %v4173_v19  ;;  %3832 = vmatprep.subr.bf16.mxu0 %v4174_v24  ;;  %v4213_v16 = vld [vmem:[%s5192_s1 + $0x8b0] sm:$0xff]   ;;  %v4216_v19 = vld [vmem:[%s5192_s1 + $0x828] sm:$0xff]   ;;  %v4221_v24 = vld [vmem:[%s5192_s1 + $0x8a0] sm:$0xff]  }
  0xe6   :  { %v3561_v15 = vpop.f32.mrf.mxu1  ;;  %v3540_v17 = vadd.f32 %v3539_v14, %v3538_v6  ;;  %3854 = vmatprep.subr.bf16.mxu1 %v4175_v25  ;;  %3063 = vmatprep.mubr.bf16.mxu0 %v3227_v60  ;;  %v4209_v6 = vld [vmem:[%s5192_s1 + $0x8b8] sm:$0xff]  }
  0xe7   :  { %v3562_v18 = vadd.f32 %v3561_v15, %v3560_v7  ;;  %v3541_v21 = vpop.f32.mrf.mxu0  ;;  %3103 = vmatprep.mubr.bf16.mxu1 %v3229_v63  ;;  %v4212_v15 = vld [vmem:[%s5192_s1 + $0x830] sm:$0xff]   ;;  %v4222_v25 = vld [vmem:[%s5192_s1 + $0x858] sm:$0xff]  }
  0xe8   :  { %v3563_v22 = vpop.f32.mrf.mxu1  ;;  %v2506_v23 = vadd.f32 %v3540_v17, %v3197_v20  ;;  %3833 = vmatpush3.bf16.msra.mxu0 %v4176_v29  ;;  %v4214_v17 = vld [vmem:[%s5192_s1 + $0x868] sm:$0xff]   ;;  %v4218_v21 = vld [vmem:[%s5192_s1 + $0x860] sm:$0xff]   ;;  %v4226_v29 = vld [vmem:[%s5192_s1 + $0x850] sm:$0xff]  }
  0xe9   :  { %v3542_v26 = vpop.f32.mrf.mxu0  ;;  %3855 = vmatpush3.bf16.msra.mxu1 %v4177_v30  ;;  %3834 = vmatprep.subr.bf16.mxu0 %v4178_v31  ;;  %v4217_v20 = vld [vmem:[%s5192_s1 + $0x8a8] sm:$0xff]   ;;  %v4219_v22 = vld [vmem:[%s5192_s1 + $0x8e0] sm:$0xff]   ;;  %v4227_v30 = vld [vmem:[%s5192_s1 + $0x8d0] sm:$0xff]  }
  0xea   :  { %v3564_v27 = vpop.f32.mrf.mxu1  ;;  %v4997_v28 = vadd.f32 %v3562_v18, %v2506_v23  ;;  %3856 = vmatprep.subr.bf16.mxu1 %v4179_v32  ;;  %v4215_v18 = vld [vmem:[%s5192_s1 + $0x8e8] sm:$0xff]   ;;  %v4220_v23 = vld [vmem:[%s5192_s1 + $0x820] sm:$0xff]   ;;  %v4223_v26 = vld [vmem:[%s5192_s1 + $0x8d8] sm:$0xff]  }
  0xeb   :  { %v4224_v27 = vld [vmem:[%s5192_s1 + $0x818] sm:$0xff]   ;;  %v4228_v31 = vld [vmem:[%s5192_s1 + $0x810] sm:$0xff]  }
  0xec   :  { %3835 = vmatpush3.bf16.msra.mxu0 %v4180_v33  ;;  %v4229_v32 = vld [vmem:[%s5192_s1 + $0x890] sm:$0xff]   ;;  %v4230_v33 = vld [vmem:[%s5192_s1 + $0x848] sm:$0xff]  }
  0xed   :  { %3857 = vmatpush3.bf16.msra.mxu1 %v4181_v34  ;;  %3836 = vmatprep.subr.bf16.mxu0 %v4182_v35  ;;  %v4231_v34 = vld [vmem:[%s5192_s1 + $0x8c8] sm:$0xff]  }
  0xee   :  { %3858 = vmatprep.subr.bf16.mxu1 %v4183_v36  ;;  %v4232_v35 = vld [vmem:[%s5192_s1 + $0x808] sm:$0xff]  }
  0xef   :  { %v4233_v36 = vld [vmem:[%s5192_s1 + $0x888] sm:$0xff]  }
  0xf0   :  { %3837 = vmatpush3.bf16.msra.mxu0 %v4184_v37  ;;  %v4234_v37 = vld [vmem:[%s5192_s1 + $0x840] sm:$0xff]  }
  0xf1   :  { %3859 = vmatpush3.bf16.msra.mxu1 %v4185_v38  ;;  %3838 = vmatprep.subr.bf16.mxu0 %v4186_v39  ;;  %v4235_v38 = vld [vmem:[%s5192_s1 + $0x8c0] sm:$0xff]  }
  0xf2   :  { %3860 = vmatprep.subr.bf16.mxu1 %v4187_v40  ;;  %v4236_v39 = vld [vmem:[%s5192_s1 + $0x800] sm:$0xff]  }
  0xf3   :  { %v4237_v40 = vld [vmem:[%s5192_s1 + $0x880] sm:$0xff]  }
  0xf4   :  { %3839 = vmatpush3.bf16.msra.mxu0 %v4188_v41  ;;  %v32_v41 = vld [vmem:[%s5193_s0 + $0x80] sm:$0xff] }
  0xf5   :  { %3861 = vmatpush3.bf16.msra.mxu1 %v4189_v42  ;;  %3840 = vmatprep.subr.bf16.mxu0 %v4190_v43  ;;  %v3230_v43 = vcombine.low %v32_v41, %v32_v41 }
  0xf6   :  { %3862 = vmatprep.subr.bf16.mxu1 %v4191_v44  ;;  %v3231_v44 = vcombine.high %v32_v41, %v32_v41 }
  0xf8   :  { %3841 = vmatpush3.bf16.msra.mxu0 %v4192_v45  ;;  %v33_v45 = vld [vmem:[%s5193_s0 + $0x88] sm:$0xff] }
  0xf9   :  { %3863 = vmatpush3.bf16.msra.mxu1 %v4193_v46  ;;  %3842 = vmatprep.subr.bf16.mxu0 %v4194_v47  ;;  %v3232_v47 = vcombine.low %v33_v45, %v33_v45 }
  0xfa   :  { %3864 = vmatprep.subr.bf16.mxu1 %v4195_v48  ;;  %v3233_v48 = vcombine.high %v33_v45, %v33_v45 }
  0xfc   :  { %3843 = vmatpush3.bf16.msra.mxu0 %v4196_v49 }
  0xfd   :  { %3865 = vmatpush3.bf16.msra.mxu1 %v4197_v50  ;;  %3844 = vmatprep.subr.bf16.mxu0 %v4198_v51 }
  0xfe   :  { %3866 = vmatprep.subr.bf16.mxu1 %v4199_v52 }
 0x100   :  { %3845 = vmatpush3.bf16.msra.mxu0 %v4200_v53 }
 0x101   :  { %3867 = vmatpush3.bf16.msra.mxu1 %v4201_v54  ;;  %3874 = vmatprep.subr.bf16.mxu0 %v4206_v62 }
 0x102   :  { %3896 = vmatprep.subr.bf16.mxu1 %v4207_v0 }
 0x103   :  { %v3582_v57 = vpop.f32.mrf.mxu0  ;;  %3064 = vmatmul.mubr.bf16.vlgmr.msra.gmra.mxu0 %v3226_v59 }
 0x104   :  { %v3604_v58 = vpop.f32.mrf.mxu1  ;;  %3104 = vmatmul.mubr.bf16.vlgmr.msra.gmra.mxu1 %v3228_v61  ;;  %3875 = vmatpush3.bf16.msra.mxu0 %v4208_v3 }
 0x105   :  { %v3583_v1 = vpop.f32.mrf.mxu0  ;;  %3897 = vmatpush3.bf16.msra.mxu1 %v4209_v6  ;;  %3876 = vmatprep.subr.bf16.mxu0 %v4210_v10 }
 0x106   :  { %v3605_v2 = vpop.f32.mrf.mxu1  ;;  %v3584_v4 = vadd.f32 %v3583_v1, %v3582_v57  ;;  %3898 = vmatprep.subr.bf16.mxu1 %v4211_v11  ;;  %3143 = vmatprep.mubr.bf16.mxu0 %v3231_v44 }
 0x107   :  { %v3606_v5 = vadd.f32 %v3605_v2, %v3604_v58  ;;  %v3585_v7 = vpop.f32.mrf.mxu0  ;;  %3183 = vmatprep.mubr.bf16.mxu1 %v3233_v48 }
 0x108   :  { %v3607_v8 = vpop.f32.mrf.mxu1  ;;  %v2586_v9 = vadd.f32 %v3584_v4, %v4997_v28  ;;  %3877 = vmatpush3.bf16.msra.mxu0 %v4212_v15  ;;  %v4225_v28 = vld [vmem:[%s5192_s1 + $0x898] sm:$0xff]  }
 0x109   :  { %v3586_v12 = vpop.f32.mrf.mxu0  ;;  %3899 = vmatpush3.bf16.msra.mxu1 %v4213_v16  ;;  %3878 = vmatprep.subr.bf16.mxu0 %v4214_v17 }
 0x10a   :  { %v3608_v13 = vpop.f32.mrf.mxu1  ;;  %v5102_v14 = vadd.f32 %v3606_v5, %v2586_v9  ;;  %3900 = vmatprep.subr.bf16.mxu1 %v4215_v18 }
 0x10c   :  { %3879 = vmatpush3.bf16.msra.mxu0 %v4216_v19 }
 0x10d   :  { %3901 = vmatpush3.bf16.msra.mxu1 %v4217_v20  ;;  %3880 = vmatprep.subr.bf16.mxu0 %v4218_v21 }
 0x10e   :  { %3902 = vmatprep.subr.bf16.mxu1 %v4219_v22 }
 0x110   :  { %3881 = vmatpush3.bf16.msra.mxu0 %v4220_v23 }
 0x111   :  { %3903 = vmatpush3.bf16.msra.mxu1 %v4221_v24  ;;  %3882 = vmatprep.subr.bf16.mxu0 %v4222_v25 }
 0x112   :  { %3904 = vmatprep.subr.bf16.mxu1 %v4223_v26 }
 0x114   :  { %3883 = vmatpush3.bf16.msra.mxu0 %v4224_v27 }
 0x115   :  { %3905 = vmatpush3.bf16.msra.mxu1 %v4225_v28  ;;  %3884 = vmatprep.subr.bf16.mxu0 %v4226_v29 }
 0x116   :  { %3906 = vmatprep.subr.bf16.mxu1 %v4227_v30 }
 0x118   :  { %3885 = vmatpush3.bf16.msra.mxu0 %v4228_v31 }
 0x119   :  { %3907 = vmatpush3.bf16.msra.mxu1 %v4229_v32  ;;  %3886 = vmatprep.subr.bf16.mxu0 %v4230_v33 }
 0x11a   :  { %3908 = vmatprep.subr.bf16.mxu1 %v4231_v34 }
 0x11c   :  { %3887 = vmatpush3.bf16.msra.mxu0 %v4232_v35 }
 0x11d   :  { %3909 = vmatpush3.bf16.msra.mxu1 %v4233_v36  ;;  %3888 = vmatprep.subr.bf16.mxu0 %v4234_v37 }
 0x11e   :  { %3910 = vmatprep.subr.bf16.mxu1 %v4235_v38 }
 0x120   :  { %3889 = vmatpush3.bf16.msra.mxu0 %v4236_v39 }
 0x121   :  { %3911 = vmatpush3.bf16.msra.mxu1 %v4237_v40 }
 0x123   :  { %v3626_v42 = vpop.f32.mrf.mxu0  ;;  %3144 = vmatmul.mubr.bf16.vlgmr.msra.gmra.mxu0 %v3230_v43 }
 0x124   :  { %v3648_v46 = vpop.f32.mrf.mxu1  ;;  %3184 = vmatmul.mubr.bf16.vlgmr.msra.gmra.mxu1 %v3232_v47 }
 0x125   :  { %v3627_v49 = vpop.f32.mrf.mxu0 }
 0x126   :  { %v3628_v50 = vadd.f32 %v3627_v49, %v3626_v42  ;;  %v3649_v51 = vpop.f32.mrf.mxu1 }
 0x127   :  { %v3650_v52 = vadd.f32 %v3649_v51, %v3648_v46  ;;  %v3629_v53 = vpop.f32.mrf.mxu0 }
 0x128   :  { %v2666_v54 = vadd.f32 %v3628_v50, %v5102_v14  ;;  %v3651_v55 = vpop.f32.mrf.mxu1 }
 0x129   :  { %v3630_v56 = vpop.f32.mrf.mxu0 }
 0x12a   :  { %v2706_v57 = vadd.f32 %v3650_v52, %v2666_v54  ;;  %v3652_v58 = vpop.f32.mrf.mxu1 }
 0x143   :  { %v3670_v59 = vpop.f32.mrf.mxu0 }
 0x144   :  { %v3692_v60 = vpop.f32.mrf.mxu1 }
 0x145   :  { %v3671_v61 = vpop.f32.mrf.mxu0 }
 0x146   :  { %v3672_v62 = vadd.f32 %v3671_v61, %v3670_v59  ;;  %v3693_v63 = vpop.f32.mrf.mxu1 }
 0x147   :  { %v3694_v0 = vadd.f32 %v3693_v63, %v3692_v60  ;;  %v3673_v1 = vpop.f32.mrf.mxu0 }
 0x148   :  { %v2746_v2 = vadd.f32 %v3672_v62, %v2706_v57  ;;  %v3695_v3 = vpop.f32.mrf.mxu1 }
 0x149   :  { %v3674_v4 = vpop.f32.mrf.mxu0 }
 0x14a   :  { %v2786_v5 = vadd.f32 %v3694_v0, %v2746_v2  ;;  %v3696_v6 = vpop.f32.mrf.mxu1 }
 0x163   :  { %v3714_v7 = vpop.f32.mrf.mxu0 }
 0x164   :  { %v3736_v8 = vpop.f32.mrf.mxu1 }
 0x165   :  { %v3715_v9 = vpop.f32.mrf.mxu0 }
 0x166   :  { %v3737_v10 = vpop.f32.mrf.mxu1  ;;  %v3716_v11 = vadd.f32 %v3715_v9, %v3714_v7 }
 0x167   :  { %v3738_v12 = vadd.f32 %v3737_v10, %v3736_v8  ;;  %v3717_v13 = vpop.f32.mrf.mxu0 }
 0x168   :  { %v3739_v14 = vpop.f32.mrf.mxu1  ;;  %v2826_v15 = vadd.f32 %v3716_v11, %v2786_v5 }
 0x169   :  { %v3718_v16 = vpop.f32.mrf.mxu0 }
 0x16a   :  { %v3740_v17 = vpop.f32.mrf.mxu1  ;;  %v2866_v18 = vadd.f32 %v3738_v12, %v2826_v15 }
 0x183   :  { %v3758_v19 = vpop.f32.mrf.mxu0 }
 0x184   :  { %v3780_v20 = vpop.f32.mrf.mxu1 }
 0x185   :  { %v3759_v21 = vpop.f32.mrf.mxu0 }
 0x186   :  { %v3760_v22 = vadd.f32 %v3759_v21, %v3758_v19  ;;  %v3781_v23 = vpop.f32.mrf.mxu1 }
 0x187   :  { %v3782_v24 = vadd.f32 %v3781_v23, %v3780_v20  ;;  %v3761_v25 = vpop.f32.mrf.mxu0 }
 0x188   :  { %v2906_v26 = vadd.f32 %v3760_v22, %v2866_v18  ;;  %v3783_v27 = vpop.f32.mrf.mxu1 }
 0x189   :  { %v3762_v28 = vpop.f32.mrf.mxu0 }
 0x18a   :  { %v2946_v29 = vadd.f32 %v3782_v24, %v2906_v26  ;;  %v3784_v30 = vpop.f32.mrf.mxu1 }
 0x1a3   :  { %v3802_v31 = vpop.f32.mrf.mxu0 }
 0x1a4   :  { %v3824_v32 = vpop.f32.mrf.mxu1 }
 0x1a5   :  { %v3803_v33 = vpop.f32.mrf.mxu0 }
 0x1a6   :  { %v3825_v34 = vpop.f32.mrf.mxu1  ;;  %v3804_v47 = vadd.f32 %v3803_v33, %v3802_v31 }
 0x1a7   :  { %v3805_v35 = vpop.f32.mrf.mxu0  ;;  %v3826_v49 = vadd.f32 %v3825_v34, %v3824_v32 }
 0x1a8   :  { %v3827_v36 = vpop.f32.mrf.mxu1  ;;  %v2986_v48 = vadd.f32 %v3804_v47, %v2946_v29 }
 0x1a9   :  { %v3806_v37 = vpop.f32.mrf.mxu0 }
 0x1aa   :  { %v3828_v38 = vpop.f32.mrf.mxu1  ;;  %v3026_v51 = vadd.f32 %v3826_v49, %v2986_v48 }
 0x1c3   :  { %v3846_v39 = vpop.f32.mrf.mxu0 }
 0x1c4   :  { %v3868_v40 = vpop.f32.mrf.mxu1 }
 0x1c5   :  { %v3847_v41 = vpop.f32.mrf.mxu0 }
 0x1c6   :  { %v3869_v42 = vpop.f32.mrf.mxu1  ;;  %v3848_v50 = vadd.f32 %v3847_v41, %v3846_v39 }
 0x1c7   :  { %v3849_v43 = vpop.f32.mrf.mxu0  ;;  %v3870_v53 = vadd.f32 %v3869_v42, %v3868_v40 }
 0x1c8   :  { %v3871_v44 = vpop.f32.mrf.mxu1  ;;  %v3066_v52 = vadd.f32 %v3848_v50, %v3026_v51 }
 0x1c9   :  { %v3850_v45 = vpop.f32.mrf.mxu0 }
 0x1ca   :  { %v3872_v46 = vpop.f32.mrf.mxu1  ;;  %v3106_v58 = vadd.f32 %v3870_v53, %v3066_v52 }
 0x1e3   :  { %v3890_v54 = vpop.f32.mrf.mxu0 }
 0x1e4   :  { %v3912_v55 = vpop.f32.mrf.mxu1 }
 0x1e5   :  { %v3891_v56 = vpop.f32.mrf.mxu0 }
 0x1e6   :  { %v3913_v57 = vpop.f32.mrf.mxu1  ;;  %v3892_v59 = vadd.f32 %v3891_v56, %v3890_v54 }
 0x1e7   :  { %v3893_v60 = vpop.f32.mrf.mxu0  ;;  %v3914_v63 = vadd.f32 %v3913_v57, %v3912_v55 }
 0x1e8   :  { %v3915_v61 = vpop.f32.mrf.mxu1  ;;  %v3146_v62 = vadd.f32 %v3892_v59, %v3106_v58 }
 0x1e9   :  { %v3894_v0 = vpop.f32.mrf.mxu0 }
 0x1ea   :  { %v3916_v1 = vpop.f32.mrf.mxu1  ;;  %v3186_v2 = vadd.f32 %v3914_v63, %v3146_v62 }
 0x1ec   :  { %3192 = vst [vmem:[%s5195_s3] sm:$0xff] %v3186_v2 }

</bundles_post_ra>
